<compile_context>
chip_gen: v7x
topology: tpu7x:2x2x1
jax: 0.10.0
libtpu: 0.0.40
codegen_flags: <defaults>
</compile_context>

<pallas_src>
import jax
import jax.numpy as jnp
from jax.experimental import pallas as pl
from jax.experimental.pallas import tpu as pltpu


# ----------------------------------------------------------------------------
# In-kernel math helpers (f32 elementwise; divides/exp routed to the EUP)
# ----------------------------------------------------------------------------
def _erf(x):
    # Abramowitz & Stegun 7.1.26 rational approximation (|err| < 1.5e-7).
    a1, a2, a3, a4, a5 = 0.254829592, -0.284496736, 1.421413741, -1.453152027, 1.061405429
    p = 0.3275911
    s = jnp.where(x >= 0.0, 1.0, -1.0)
    ax = jnp.abs(x)
    t = pl.reciprocal(1.0 + p * ax, approx=True)          # divide -> EUP slot
    poly = ((((a5 * t + a4) * t + a3) * t + a2) * t + a1) * t
    return s * (1.0 - poly * jnp.exp(-ax * ax))


def _gelu(x):
    # nn.GELU() default = exact (erf-based) GELU
    return 0.5 * x * (1.0 + _erf(x * 0.7071067811865476))


# ----------------------------------------------------------------------------
# Fused kernel: VSS(LayerNorm+residual) -> ConvFFN -> 7x7 spatial gate
# ----------------------------------------------------------------------------
def _fused_kernel(x_ref, y_ref, gamma_ref, beta_ref, w3_ref, bns_ref, bnb_ref,
                  w1_ref, w2_ref, wy_ref, o_ref, xp_scr, pm_scr):
    bb, H, W, cin = x_ref.shape
    cpad = o_ref.shape[-1]
    M = bb * H * W

    # ---- VSSBlock: LayerNorm over channels + residual (f32, one-pass variance) ----
    # TODO(synk): VSSBlock's SS2D selective-scan core is not defined in the provided
    # reference source; only the LayerNorm + residual branch is implemented.
    x = x_ref[...].astype(jnp.float32)                                # (bb,H,W,Cin)
    mean = jnp.mean(x, axis=-1, keepdims=True)
    var = jnp.mean(x * x, axis=-1, keepdims=True) - mean * mean
    vss = x + (x - mean) * jax.lax.rsqrt(var + 1e-5) * gamma_ref[...] + beta_ref[...]

    # ---- 3x3 conv (padding=1, no bias) as 9 accumulating MXU matmuls over taps ----
    # Zero only the 1-wide halo each step (the interior is fully overwritten below).
    zrow = jnp.zeros((bb, 1, W + 2, cin), xp_scr.dtype)
    zcol = jnp.zeros((bb, H + 2, 1, cin), xp_scr.dtype)
    xp_scr[:, 0:1, :, :] = zrow
    xp_scr[:, H + 1:H + 2, :, :] = zrow
    xp_scr[:, :, 0:1, :] = zcol
    xp_scr[:, :, W + 1:W + 2, :] = zcol
    xp_scr[:, 1:H + 1, 1:W + 1, :] = vss

    h = jnp.zeros((M, cin), jnp.float32)
    for k in range(9):
        dy, dx = divmod(k, 3)
        tap = xp_scr[:, dy:dy + H, dx:dx + W, :].reshape(M, cin)
        h = h + jnp.dot(tap.astype(jnp.bfloat16), w3_ref[k],
                        preferred_element_type=jnp.float32)           # (M, Cin) f32

    # ---- BatchNorm (eval, folded) + ReLU6 (f32) ----
    h = jnp.clip(h * bns_ref[...] + bnb_ref[...], 0.0, 6.0)

    # ---- fc1 (1x1) -> GELU -> fc2 (1x1); Dropout(0.1) = identity at eval ----
    h = jnp.dot(h.astype(jnp.bfloat16), w1_ref[...],
                preferred_element_type=jnp.float32)                   # (M, Chid)
    h = _gelu(h)
    xm = jnp.dot(h.astype(jnp.bfloat16), w2_ref[...],
                 preferred_element_type=jnp.float32)                  # (M, Cpad)
    xm = xm.reshape(bb, H, W, cpad)            # split leading dim only (layout kept)

    # ---- spatial gate: sigmoid(conv7x7([max_c(y), mean_c(y)], padding=3)) ----
    yv = y_ref[...].astype(jnp.float32)
    mx = jnp.max(yv, axis=-1, keepdims=True)                          # (bb,H,W,1)
    av = jnp.mean(yv, axis=-1, keepdims=True)                         # (bb,H,W,1)
    zrow = jnp.zeros((bb, 3, W + 6, 2), jnp.float32)
    zcol = jnp.zeros((bb, H + 6, 3, 2), jnp.float32)
    pm_scr[:, 0:3, :, :] = zrow
    pm_scr[:, H + 3:H + 6, :, :] = zrow
    pm_scr[:, :, 0:3, :] = zcol
    pm_scr[:, :, W + 3:W + 6, :] = zcol
    pm_scr[:, 3:H + 3, 3:W + 3, 0:1] = mx
    pm_scr[:, 3:H + 3, 3:W + 3, 1:2] = av

    # 49-tap shift-and-accumulate on the padded maps (VPU); {max,avg} share the lane
    # dim so each tap is one slice load + one fused multiply-add, and the gate stays
    # in (..., 1) layout -> no relayout before the final broadcast multiply.
    acc = jnp.zeros((bb, H, W, 2), jnp.float32)
    for t in range(49):
        ky, kx = divmod(t, 7)
        acc = acc + pm_scr[:, ky:ky + H, kx:kx + W, :] * wy_ref[t:t + 1, :]
    logit = jnp.sum(acc, axis=-1, keepdims=True)                      # (bb,H,W,1)
    gate = pl.reciprocal(1.0 + jnp.exp(-logit), approx=True)          # sigmoid via EUP

    # Lane-dense, unmasked store: cpad is a multiple of 128 (zero-padded fc2 columns).
    o_ref[...] = (gate * xm).astype(o_ref.dtype)


# ----------------------------------------------------------------------------
# Helpers
# ----------------------------------------------------------------------------
def _vmem_limit_bytes():
    # ~capacity/2: 64 MiB on v5e/v6e (128 MiB physical), 32 MiB on v7x (64 MiB).
    cap = 128 * 1024 * 1024
    try:
        cap = int(getattr(pltpu.get_tpu_info(), "vmem_capacity_bytes", cap))
    except Exception:
        pass
    return int(min(cap // 2, 100 * 1024 * 1024))


def _pick_batch_block(batch, h, w):
    # Largest divisor of `batch` keeping M = bb*H*W near the MXU sweet spot (<=1024),
    # stopping once M >= 256 rows.
    hw = h * w
    bb = 1
    for cand in range(1, batch + 1):
        if batch % cand:
            continue
        if cand * hw <= 1024:
            bb = cand
        if cand * hw >= 256:
            break
    return bb


# ----------------------------------------------------------------------------
# Wrapper (layout conversion only; everything else happens inside the kernel)
# ----------------------------------------------------------------------------
def block_cfl_spatial_forward(x_nchw, y_nchw, params):
    # TODO(synk): if the surrounding model can stay NHWC end-to-end, drop these two
    # boundary transposes (they are full HBM round trips of x and the output).
    x = jnp.transpose(x_nchw, (0, 2, 3, 1))                 # (B,H,W,Cin)
    y = jnp.transpose(y_nchw, (0, 2, 3, 1))                 # (B,H,W,Cy)
    B, H, W, cin = x.shape
    cy = y.shape[-1]
    chid = params["w_fc1"].shape[-1]
    w2 = params["w_fc2"]
    cout = w2.shape[-1]
    cpad = ((cout + 127) // 128) * 128                      # lane-dense output channels
    w2p = w2 if cpad == cout else jnp.pad(w2, ((0, 0), (0, cpad - cout)))

    bb = _pick_batch_block(B, H, W)
    grid = (B // bb,)

    grid_spec = pltpu.PrefetchScalarGridSpec(
        num_scalar_prefetch=0,
        grid=grid,
        in_specs=[
            pl.BlockSpec((bb, H, W, cin), lambda b: (b, 0, 0, 0)),    # x
            pl.BlockSpec((bb, H, W, cy), lambda b: (b, 0, 0, 0)),     # y
            pl.BlockSpec((1, cin), lambda b: (0, 0)),                 # ln_gamma
            pl.BlockSpec((1, cin), lambda b: (0, 0)),                 # ln_beta
            pl.BlockSpec((9, cin, cin), lambda b: (0, 0, 0)),         # 3x3 conv taps
            pl.BlockSpec((1, cin), lambda b: (0, 0)),                 # bn_scale
            pl.BlockSpec((1, cin), lambda b: (0, 0)),                 # bn_shift
            pl.BlockSpec((cin, chid), lambda b: (0, 0)),              # fc1
            pl.BlockSpec((chid, cpad), lambda b: (0, 0)),             # fc2 (lane-padded)
            pl.BlockSpec((49, 2), lambda b: (0, 0)),                  # 7x7 gate taps
        ],
        out_specs=pl.BlockSpec((bb, H, W, cpad), lambda b: (b, 0, 0, 0)),
        scratch_shapes=[
            pltpu.VMEM((bb, H + 2, W + 2, cin), jnp.float32),   # zero-halo VSS buffer
            pltpu.VMEM((bb, H + 6, W + 6, 2), jnp.float32),     # padded {max,avg} maps
        ],
    )
    out = pl.pallas_call(
        _fused_kernel,
        out_shape=jax.ShapeDtypeStruct((B, H, W, cpad), jnp.float32),
        grid_spec=grid_spec,
        compiler_params=pltpu.CompilerParams(
            dimension_semantics=("parallel",),              # v7x: 2 TCs split the batch
            vmem_limit_bytes=_vmem_limit_bytes(),
        ),
    )(x, y,
      params["ln_gamma"], params["ln_beta"], params["w_conv3_taps"],
      params["bn_scale"], params["bn_shift"],
      params["w_fc1"], w2p, params["w_convy_taps"])
    out = out[..., :cout]                                   # drop zero-padded lanes
    return jnp.transpose(out, (0, 3, 1, 2))                 # back to NCHW


# ----------------------------------------------------------------------------
# Deterministic parameter init (shapes follow the PyTorch __init__)
# ----------------------------------------------------------------------------
def init_params(key, in_chs, out_ch):
    ks = jax.random.split(key, 8)
    # PyTorch-layout (OIHW) weights
    w_conv3_oihw = 0.1 * jax.random.normal(ks[0], (in_chs, in_chs, 3, 3), jnp.float32)
    w_fc1_oihw = 0.1 * jax.random.normal(ks[1], (in_chs, in_chs, 1, 1), jnp.float32)
    w_fc2_oihw = 0.1 * jax.random.normal(ks[2], (out_ch, in_chs, 1, 1), jnp.float32)
    w_convy_oihw = 0.1 * jax.random.normal(ks[3], (1, 2, 7, 7), jnp.float32)
    # VSSBlock LayerNorm params
    ln_gamma = 1.0 + 0.1 * jax.random.normal(ks[4], (in_chs,), jnp.float32)
    ln_beta = 0.1 * jax.random.normal(ks[5], (in_chs,), jnp.float32)
    # BatchNorm (eval mode) params -> fold running stats into scale/shift
    bn_weight = 1.0 + 0.1 * jax.random.normal(ks[6], (in_chs,), jnp.float32)
    bn_bias = 0.1 * jax.random.normal(ks[7], (in_chs,), jnp.float32)
    bn_mean = jnp.zeros((in_chs,), jnp.float32)
    bn_var = jnp.ones((in_chs,), jnp.float32)
    eps = 1e-5
    bn_scale = bn_weight / jnp.sqrt(bn_var + eps)
    bn_shift = bn_bias - bn_mean * bn_scale

    # OIHW -> per-tap (dy,dx) matrices (Cin_in, Cin_out): w3[dy*3+dx][i,o] = W[o,i,dy,dx]
    w_conv3_taps = jnp.transpose(w_conv3_oihw, (2, 3, 1, 0)).reshape(9, in_chs, in_chs)
    # (1,2,7,7) -> (49, 2) tap table: [:,0]=max-channel weight, [:,1]=avg-channel weight
    w_convy_taps = jnp.transpose(w_convy_oihw[0], (1, 2, 0)).reshape(49, 2)

    return {
        "ln_gamma": ln_gamma.reshape(1, in_chs),
        "ln_beta": ln_beta.reshape(1, in_chs),
        "w_conv3_taps": w_conv3_taps.astype(jnp.bfloat16),            # (9, Cin, Cin)
        "bn_scale": bn_scale.reshape(1, in_chs),
        "bn_shift": bn_shift.reshape(1, in_chs),
        "w_fc1": jnp.transpose(w_fc1_oihw[:, :, 0, 0], (1, 0)).astype(jnp.bfloat16),
        "w_fc2": jnp.transpose(w_fc2_oihw[:, :, 0, 0], (1, 0)).astype(jnp.bfloat16),
        "w_convy_taps": w_convy_taps,                                 # (49, 2) f32
    }


if __name__ == "__main__":
    key = jax.random.PRNGKey(0)
    kx, ky_, kp = jax.random.split(key, 3)

    # small shapes: B=2, in_chs=32 (hidden_ch==in_chs in the module), out_ch=16,
    # H=W=8 spatial, y has 4 channels
    B, in_chs, out_ch, H, W, cy = 2, 32, 16, 8, 8, 4
    x = jax.random.normal(kx, (B, in_chs, H, W), jnp.float32)   # NCHW like PyTorch
    y = jax.random.normal(ky_, (B, cy, H, W), jnp.float32)      # NCHW like PyTorch

    params = init_params(kp, in_chs, out_ch)
    out = jax.jit(block_cfl_spatial_forward)(x, y, params)
    jax.block_until_ready(out)
    assert out.shape == (B, out_ch, H, W), out.shape
    assert bool(jnp.all(jnp.isfinite(out)))
    print("KERNEL_OK")
</pallas_src>

<mosaic_0001>
module attributes {stable_mosaic.version = 11 : i64} {
  func.func @_fused_kernel(%arg0: i32, %arg1: memref<2x8x8x32xf32, #tpu.memory_space<vmem>>, %arg2: memref<2x8x8x4xf32, #tpu.memory_space<vmem>>, %arg3: memref<1x32xf32, #tpu.memory_space<vmem>>, %arg4: memref<1x32xf32, #tpu.memory_space<vmem>>, %arg5: memref<9x32x32xbf16, #tpu.memory_space<vmem>>, %arg6: memref<1x32xf32, #tpu.memory_space<vmem>>, %arg7: memref<1x32xf32, #tpu.memory_space<vmem>>, %arg8: memref<32x32xbf16, #tpu.memory_space<vmem>>, %arg9: memref<32x128xbf16, #tpu.memory_space<vmem>>, %arg10: memref<49x2xf32, #tpu.memory_space<vmem>>, %arg11: memref<2x8x8x128xf32, #tpu.memory_space<vmem>>, %arg12: memref<2x10x10x32xf32, #tpu.memory_space<vmem>>, %arg13: memref<2x14x14x2xf32, #tpu.memory_space<vmem>>) attributes {dimension_semantics = [#tpu.dimension_semantics<parallel>], iteration_bounds = array<i64: 1>, scalar_prefetch = 0 : i64, scratch_operands = 2 : i64, tpu.core_type = #tpu.core_type<tc>, window_params = [{transform_indices = @transform_0, window_bounds = array<i64: 2, 8, 8, 32>}, {transform_indices = @transform_1, window_bounds = array<i64: 2, 8, 8, 4>}, {pipeline_mode = #tpu.pipeline_mode<synchronous>, transform_indices = @transform_2, window_bounds = array<i64: 1, 32>}, {pipeline_mode = #tpu.pipeline_mode<synchronous>, transform_indices = @transform_3, window_bounds = array<i64: 1, 32>}, {pipeline_mode = #tpu.pipeline_mode<synchronous>, transform_indices = @transform_4, window_bounds = array<i64: 9, 32, 32>}, {pipeline_mode = #tpu.pipeline_mode<synchronous>, transform_indices = @transform_5, window_bounds = array<i64: 1, 32>}, {pipeline_mode = #tpu.pipeline_mode<synchronous>, transform_indices = @transform_6, window_bounds = array<i64: 1, 32>}, {pipeline_mode = #tpu.pipeline_mode<synchronous>, transform_indices = @transform_7, window_bounds = array<i64: 32, 32>}, {pipeline_mode = #tpu.pipeline_mode<synchronous>, transform_indices = @transform_8, window_bounds = array<i64: 32, 128>}, {pipeline_mode = #tpu.pipeline_mode<synchronous>, transform_indices = @transform_9, window_bounds = array<i64: 49, 2>}, {transform_indices = @transform_10, window_bounds = array<i64: 2, 8, 8, 128>}]} {
    %c0 = arith.constant 0 : index
    %c0_0 = arith.constant 0 : index
    %c0_1 = arith.constant 0 : index
    %c0_2 = arith.constant 0 : index
    %0 = vector.load %arg1[%c0, %c0_0, %c0_1, %c0_2] : memref<2x8x8x32xf32, #tpu.memory_space<vmem>>, vector<2x8x8x32xf32>
    %cst = arith.constant dense<0.000000e+00> : vector<2x8x8xf32>
    %1 = vector.multi_reduction <add>, %0, %cst [3] : vector<2x8x8x32xf32> to vector<2x8x8xf32>
    %2 = vector.shape_cast %1 : vector<2x8x8xf32> to vector<2x8x8x1xf32>
    %cst_3 = arith.constant 3.200000e+01 : f32
    %3 = vector.broadcast %cst_3 : f32 to vector<2x8x8x1xf32>
    %4 = arith.divf %2, %3 : vector<2x8x8x1xf32>
    %5 = arith.mulf %0, %0 : vector<2x8x8x32xf32>
    %cst_4 = arith.constant dense<0.000000e+00> : vector<2x8x8xf32>
    %6 = vector.multi_reduction <add>, %5, %cst_4 [3] : vector<2x8x8x32xf32> to vector<2x8x8xf32>
    %7 = vector.shape_cast %6 : vector<2x8x8xf32> to vector<2x8x8x1xf32>
    %cst_5 = arith.constant 3.200000e+01 : f32
    %8 = vector.broadcast %cst_5 : f32 to vector<2x8x8x1xf32>
    %9 = arith.divf %7, %8 : vector<2x8x8x1xf32>
    %10 = arith.mulf %4, %4 : vector<2x8x8x1xf32>
    %11 = arith.subf %9, %10 : vector<2x8x8x1xf32>
    %12 = vector.broadcast %4 : vector<2x8x8x1xf32> to vector<2x8x8x32xf32>
    %13 = arith.subf %0, %12 : vector<2x8x8x32xf32>
    %cst_6 = arith.constant 9.99999974E-6 : f32
    %14 = vector.broadcast %cst_6 : f32 to vector<2x8x8x1xf32>
    %15 = arith.addf %11, %14 : vector<2x8x8x1xf32>
    %16 = math.rsqrt %15 : vector<2x8x8x1xf32>
    %17 = vector.broadcast %16 : vector<2x8x8x1xf32> to vector<2x8x8x32xf32>
    %18 = arith.mulf %13, %17 : vector<2x8x8x32xf32>
    %c0_7 = arith.constant 0 : index
    %c0_8 = arith.constant 0 : index
    %19 = vector.load %arg3[%c0_7, %c0_8] : memref<1x32xf32, #tpu.memory_space<vmem>>, vector<1x32xf32>
    %20 = vector.shape_cast %19 : vector<1x32xf32> to vector<1x1x1x32xf32>
    %21 = vector.broadcast %20 : vector<1x1x1x32xf32> to vector<2x8x8x32xf32>
    %22 = arith.mulf %18, %21 : vector<2x8x8x32xf32>
    %23 = arith.addf %0, %22 : vector<2x8x8x32xf32>
    %c0_9 = arith.constant 0 : index
    %c0_10 = arith.constant 0 : index
    %24 = vector.load %arg4[%c0_9, %c0_10] : memref<1x32xf32, #tpu.memory_space<vmem>>, vector<1x32xf32>
    %25 = vector.shape_cast %24 : vector<1x32xf32> to vector<1x1x1x32xf32>
    %26 = vector.broadcast %25 : vector<1x1x1x32xf32> to vector<2x8x8x32xf32>
    %27 = arith.addf %23, %26 : vector<2x8x8x32xf32>
    %cst_11 = arith.constant 0.000000e+00 : f32
    %28 = vector.broadcast %cst_11 : f32 to vector<2x1x10x32xf32>
    %cst_12 = arith.constant 0.000000e+00 : f32
    %29 = vector.broadcast %cst_12 : f32 to vector<2x10x1x32xf32>
    %c0_13 = arith.constant 0 : index
    %c0_14 = arith.constant 0 : index
    %c0_15 = arith.constant 0 : index
    %c0_16 = arith.constant 0 : index
    %30 = vector.load %arg12[%c0_13, %c0_14, %c0_15, %c0_16] : memref<2x10x10x32xf32, #tpu.memory_space<vmem>>, vector<2x1x10x32xf32>
    tpu.vector_store %arg12[%c0_13, %c0_14, %c0_15, %c0_16], %28 {strides = array<i32>} : memref<2x10x10x32xf32, #tpu.memory_space<vmem>>, vector<2x1x10x32xf32>,
    %c0_17 = arith.constant 0 : index
    %c9 = arith.constant 9 : index
    %c0_18 = arith.constant 0 : index
    %c0_19 = arith.constant 0 : index
    %31 = vector.load %arg12[%c0_17, %c9, %c0_18, %c0_19] : memref<2x10x10x32xf32, #tpu.memory_space<vmem>>, vector<2x1x10x32xf32>
    tpu.vector_store %arg12[%c0_17, %c9, %c0_18, %c0_19], %28 {strides = array<i32>} : memref<2x10x10x32xf32, #tpu.memory_space<vmem>>, vector<2x1x10x32xf32>,
    %c0_20 = arith.constant 0 : index
    %c0_21 = arith.constant 0 : index
    %c0_22 = arith.constant 0 : index
    %c0_23 = arith.constant 0 : index
    %32 = vector.load %arg12[%c0_20, %c0_21, %c0_22, %c0_23] : memref<2x10x10x32xf32, #tpu.memory_space<vmem>>, vector<2x10x1x32xf32>
    tpu.vector_store %arg12[%c0_20, %c0_21, %c0_22, %c0_23], %29 {strides = array<i32>} : memref<2x10x10x32xf32, #tpu.memory_space<vmem>>, vector<2x10x1x32xf32>,
    %c0_24 = arith.constant 0 : index
    %c0_25 = arith.constant 0 : index
    %c9_26 = arith.constant 9 : index
    %c0_27 = arith.constant 0 : index
    %33 = vector.load %arg12[%c0_24, %c0_25, %c9_26, %c0_27] : memref<2x10x10x32xf32, #tpu.memory_space<vmem>>, vector<2x10x1x32xf32>
    tpu.vector_store %arg12[%c0_24, %c0_25, %c9_26, %c0_27], %29 {strides = array<i32>} : memref<2x10x10x32xf32, #tpu.memory_space<vmem>>, vector<2x10x1x32xf32>,
    %c0_28 = arith.constant 0 : index
    %c1 = arith.constant 1 : index
    %c1_29 = arith.constant 1 : index
    %c0_30 = arith.constant 0 : index
    %34 = vector.load %arg12[%c0_28, %c1, %c1_29, %c0_30] : memref<2x10x10x32xf32, #tpu.memory_space<vmem>>, vector<2x8x8x32xf32>
    tpu.vector_store %arg12[%c0_28, %c1, %c1_29, %c0_30], %27 {strides = array<i32>} : memref<2x10x10x32xf32, #tpu.memory_space<vmem>>, vector<2x8x8x32xf32>,
    %cst_31 = arith.constant 0.000000e+00 : f32
    %35 = vector.broadcast %cst_31 : f32 to vector<128x32xf32>
    %c0_32 = arith.constant 0 : index
    %c0_33 = arith.constant 0 : index
    %c0_34 = arith.constant 0 : index
    %c0_35 = arith.constant 0 : index
    %36 = vector.load %arg12[%c0_32, %c0_33, %c0_34, %c0_35] : memref<2x10x10x32xf32, #tpu.memory_space<vmem>>, vector<2x8x8x32xf32>
    %37 = vector.shape_cast %36 : vector<2x8x8x32xf32> to vector<128x32xf32>
    %38 = arith.truncf %37 : vector<128x32xf32> to vector<128x32xbf16>
    %c0_36 = arith.constant 0 : index
    %c0_37 = arith.constant 0 : index
    %c0_38 = arith.constant 0 : index
    %39 = vector.load %arg5[%c0_36, %c0_37, %c0_38] : memref<9x32x32xbf16, #tpu.memory_space<vmem>>, vector<1x32x32xbf16>
    %40 = vector.shape_cast %39 : vector<1x32x32xbf16> to vector<32x32xbf16>
    %cst_39 = arith.constant dense<0.000000e+00> : vector<128x32xf32>
    %41 = tpu.matmul %38, %40, %cst_39 {dimension_numbers = #tpu.dot_dimension_numbers<[1], [0], [0], [1], [0, 0, 1, 1], [], []>} : vector<128x32xbf16>, vector<32x32xbf16>, vector<128x32xf32> -> vector<128x32xf32>
    %42 = arith.addf %35, %41 : vector<128x32xf32>
    %c0_40 = arith.constant 0 : index
    %c0_41 = arith.constant 0 : index
    %c1_42 = arith.constant 1 : index
    %c0_43 = arith.constant 0 : index
    %43 = vector.load %arg12[%c0_40, %c0_41, %c1_42, %c0_43] : memref<2x10x10x32xf32, #tpu.memory_space<vmem>>, vector<2x8x8x32xf32>
    %44 = vector.shape_cast %43 : vector<2x8x8x32xf32> to vector<128x32xf32>
    %45 = arith.truncf %44 : vector<128x32xf32> to vector<128x32xbf16>
    %c1_44 = arith.constant 1 : index
    %c0_45 = arith.constant 0 : index
    %c0_46 = arith.constant 0 : index
    %46 = vector.load %arg5[%c1_44, %c0_45, %c0_46] : memref<9x32x32xbf16, #tpu.memory_space<vmem>>, vector<1x32x32xbf16>
    %47 = vector.shape_cast %46 : vector<1x32x32xbf16> to vector<32x32xbf16>
    %cst_47 = arith.constant dense<0.000000e+00> : vector<128x32xf32>
    %48 = tpu.matmul %45, %47, %cst_47 {dimension_numbers = #tpu.dot_dimension_numbers<[1], [0], [0], [1], [0, 0, 1, 1], [], []>} : vector<128x32xbf16>, vector<32x32xbf16>, vector<128x32xf32> -> vector<128x32xf32>
    %49 = arith.addf %42, %48 : vector<128x32xf32>
    %c0_48 = arith.constant 0 : index
    %c0_49 = arith.constant 0 : index
    %c2 = arith.constant 2 : index
    %c0_50 = arith.constant 0 : index
    %50 = vector.load %arg12[%c0_48, %c0_49, %c2, %c0_50] : memref<2x10x10x32xf32, #tpu.memory_space<vmem>>, vector<2x8x8x32xf32>
    %51 = vector.shape_cast %50 : vector<2x8x8x32xf32> to vector<128x32xf32>
    %52 = arith.truncf %51 : vector<128x32xf32> to vector<128x32xbf16>
    %c2_51 = arith.constant 2 : index
    %c0_52 = arith.constant 0 : index
    %c0_53 = arith.constant 0 : index
    %53 = vector.load %arg5[%c2_51, %c0_52, %c0_53] : memref<9x32x32xbf16, #tpu.memory_space<vmem>>, vector<1x32x32xbf16>
    %54 = vector.shape_cast %53 : vector<1x32x32xbf16> to vector<32x32xbf16>
    %cst_54 = arith.constant dense<0.000000e+00> : vector<128x32xf32>
    %55 = tpu.matmul %52, %54, %cst_54 {dimension_numbers = #tpu.dot_dimension_numbers<[1], [0], [0], [1], [0, 0, 1, 1], [], []>} : vector<128x32xbf16>, vector<32x32xbf16>, vector<128x32xf32> -> vector<128x32xf32>
    %56 = arith.addf %49, %55 : vector<128x32xf32>
    %c0_55 = arith.constant 0 : index
    %c1_56 = arith.constant 1 : index
    %c0_57 = arith.constant 0 : index
    %c0_58 = arith.constant 0 : index
    %57 = vector.load %arg12[%c0_55, %c1_56, %c0_57, %c0_58] : memref<2x10x10x32xf32, #tpu.memory_space<vmem>>, vector<2x8x8x32xf32>
    %58 = vector.shape_cast %57 : vector<2x8x8x32xf32> to vector<128x32xf32>
    %59 = arith.truncf %58 : vector<128x32xf32> to vector<128x32xbf16>
    %c3 = arith.constant 3 : index
    %c0_59 = arith.constant 0 : index
    %c0_60 = arith.constant 0 : index
    %60 = vector.load %arg5[%c3, %c0_59, %c0_60] : memref<9x32x32xbf16, #tpu.memory_space<vmem>>, vector<1x32x32xbf16>
    %61 = vector.shape_cast %60 : vector<1x32x32xbf16> to vector<32x32xbf16>
    %cst_61 = arith.constant dense<0.000000e+00> : vector<128x32xf32>
    %62 = tpu.matmul %59, %61, %cst_61 {dimension_numbers = #tpu.dot_dimension_numbers<[1], [0], [0], [1], [0, 0, 1, 1], [], []>} : vector<128x32xbf16>, vector<32x32xbf16>, vector<128x32xf32> -> vector<128x32xf32>
    %63 = arith.addf %56, %62 : vector<128x32xf32>
    %c0_62 = arith.constant 0 : index
    %c1_63 = arith.constant 1 : index
    %c1_64 = arith.constant 1 : index
    %c0_65 = arith.constant 0 : index
    %64 = vector.load %arg12[%c0_62, %c1_63, %c1_64, %c0_65] : memref<2x10x10x32xf32, #tpu.memory_space<vmem>>, vector<2x8x8x32xf32>
    %65 = vector.shape_cast %64 : vector<2x8x8x32xf32> to vector<128x32xf32>
    %66 = arith.truncf %65 : vector<128x32xf32> to vector<128x32xbf16>
    %c4 = arith.constant 4 : index
    %c0_66 = arith.constant 0 : index
    %c0_67 = arith.constant 0 : index
    %67 = vector.load %arg5[%c4, %c0_66, %c0_67] : memref<9x32x32xbf16, #tpu.memory_space<vmem>>, vector<1x32x32xbf16>
    %68 = vector.shape_cast %67 : vector<1x32x32xbf16> to vector<32x32xbf16>
    %cst_68 = arith.constant dense<0.000000e+00> : vector<128x32xf32>
    %69 = tpu.matmul %66, %68, %cst_68 {dimension_numbers = #tpu.dot_dimension_numbers<[1], [0], [0], [1], [0, 0, 1, 1], [], []>} : vector<128x32xbf16>, vector<32x32xbf16>, vector<128x32xf32> -> vector<128x32xf32>
    %70 = arith.addf %63, %69 : vector<128x32xf32>
    %c0_69 = arith.constant 0 : index
    %c1_70 = arith.constant 1 : index
    %c2_71 = arith.constant 2 : index
    %c0_72 = arith.constant 0 : index
    %71 = vector.load %arg12[%c0_69, %c1_70, %c2_71, %c0_72] : memref<2x10x10x32xf32, #tpu.memory_space<vmem>>, vector<2x8x8x32xf32>
    %72 = vector.shape_cast %71 : vector<2x8x8x32xf32> to vector<128x32xf32>
    %73 = arith.truncf %72 : vector<128x32xf32> to vector<128x32xbf16>
    %c5 = arith.constant 5 : index
    %c0_73 = arith.constant 0 : index
    %c0_74 = arith.constant 0 : index
    %74 = vector.load %arg5[%c5, %c0_73, %c0_74] : memref<9x32x32xbf16, #tpu.memory_space<vmem>>, vector<1x32x32xbf16>
    %75 = vector.shape_cast %74 : vector<1x32x32xbf16> to vector<32x32xbf16>
    %cst_75 = arith.constant dense<0.000000e+00> : vector<128x32xf32>
    %76 = tpu.matmul %73, %75, %cst_75 {dimension_numbers = #tpu.dot_dimension_numbers<[1], [0], [0], [1], [0, 0, 1, 1], [], []>} : vector<128x32xbf16>, vector<32x32xbf16>, vector<128x32xf32> -> vector<128x32xf32>
    %77 = arith.addf %70, %76 : vector<128x32xf32>
    %c0_76 = arith.constant 0 : index
    %c2_77 = arith.constant 2 : index
    %c0_78 = arith.constant 0 : index
    %c0_79 = arith.constant 0 : index
    %78 = vector.load %arg12[%c0_76, %c2_77, %c0_78, %c0_79] : memref<2x10x10x32xf32, #tpu.memory_space<vmem>>, vector<2x8x8x32xf32>
    %79 = vector.shape_cast %78 : vector<2x8x8x32xf32> to vector<128x32xf32>
    %80 = arith.truncf %79 : vector<128x32xf32> to vector<128x32xbf16>
    %c6 = arith.constant 6 : index
    %c0_80 = arith.constant 0 : index
    %c0_81 = arith.constant 0 : index
    %81 = vector.load %arg5[%c6, %c0_80, %c0_81] : memref<9x32x32xbf16, #tpu.memory_space<vmem>>, vector<1x32x32xbf16>
    %82 = vector.shape_cast %81 : vector<1x32x32xbf16> to vector<32x32xbf16>
    %cst_82 = arith.constant dense<0.000000e+00> : vector<128x32xf32>
    %83 = tpu.matmul %80, %82, %cst_82 {dimension_numbers = #tpu.dot_dimension_numbers<[1], [0], [0], [1], [0, 0, 1, 1], [], []>} : vector<128x32xbf16>, vector<32x32xbf16>, vector<128x32xf32> -> vector<128x32xf32>
    %84 = arith.addf %77, %83 : vector<128x32xf32>
    %c0_83 = arith.constant 0 : index
    %c2_84 = arith.constant 2 : index
    %c1_85 = arith.constant 1 : index
    %c0_86 = arith.constant 0 : index
    %85 = vector.load %arg12[%c0_83, %c2_84, %c1_85, %c0_86] : memref<2x10x10x32xf32, #tpu.memory_space<vmem>>, vector<2x8x8x32xf32>
    %86 = vector.shape_cast %85 : vector<2x8x8x32xf32> to vector<128x32xf32>
    %87 = arith.truncf %86 : vector<128x32xf32> to vector<128x32xbf16>
    %c7 = arith.constant 7 : index
    %c0_87 = arith.constant 0 : index
    %c0_88 = arith.constant 0 : index
    %88 = vector.load %arg5[%c7, %c0_87, %c0_88] : memref<9x32x32xbf16, #tpu.memory_space<vmem>>, vector<1x32x32xbf16>
    %89 = vector.shape_cast %88 : vector<1x32x32xbf16> to vector<32x32xbf16>
    %cst_89 = arith.constant dense<0.000000e+00> : vector<128x32xf32>
    %90 = tpu.matmul %87, %89, %cst_89 {dimension_numbers = #tpu.dot_dimension_numbers<[1], [0], [0], [1], [0, 0, 1, 1], [], []>} : vector<128x32xbf16>, vector<32x32xbf16>, vector<128x32xf32> -> vector<128x32xf32>
    %91 = arith.addf %84, %90 : vector<128x32xf32>
    %c0_90 = arith.constant 0 : index
    %c2_91 = arith.constant 2 : index
    %c2_92 = arith.constant 2 : index
    %c0_93 = arith.constant 0 : index
    %92 = vector.load %arg12[%c0_90, %c2_91, %c2_92, %c0_93] : memref<2x10x10x32xf32, #tpu.memory_space<vmem>>, vector<2x8x8x32xf32>
    %93 = vector.shape_cast %92 : vector<2x8x8x32xf32> to vector<128x32xf32>
    %94 = arith.truncf %93 : vector<128x32xf32> to vector<128x32xbf16>
    %c8 = arith.constant 8 : index
    %c0_94 = arith.constant 0 : index
    %c0_95 = arith.constant 0 : index
    %95 = vector.load %arg5[%c8, %c0_94, %c0_95] : memref<9x32x32xbf16, #tpu.memory_space<vmem>>, vector<1x32x32xbf16>
    %96 = vector.shape_cast %95 : vector<1x32x32xbf16> to vector<32x32xbf16>
    %cst_96 = arith.constant dense<0.000000e+00> : vector<128x32xf32>
    %97 = tpu.matmul %94, %96, %cst_96 {dimension_numbers = #tpu.dot_dimension_numbers<[1], [0], [0], [1], [0, 0, 1, 1], [], []>} : vector<128x32xbf16>, vector<32x32xbf16>, vector<128x32xf32> -> vector<128x32xf32>
    %98 = arith.addf %91, %97 : vector<128x32xf32>
    %c0_97 = arith.constant 0 : index
    %c0_98 = arith.constant 0 : index
    %99 = vector.load %arg6[%c0_97, %c0_98] : memref<1x32xf32, #tpu.memory_space<vmem>>, vector<1x32xf32>
    %100 = vector.broadcast %99 : vector<1x32xf32> to vector<128x32xf32>
    %101 = arith.mulf %98, %100 : vector<128x32xf32>
    %c0_99 = arith.constant 0 : index
    %c0_100 = arith.constant 0 : index
    %102 = vector.load %arg7[%c0_99, %c0_100] : memref<1x32xf32, #tpu.memory_space<vmem>>, vector<1x32xf32>
    %103 = vector.broadcast %102 : vector<1x32xf32> to vector<128x32xf32>
    %104 = arith.addf %101, %103 : vector<128x32xf32>
    %cst_101 = arith.constant 0.000000e+00 : f32
    %cst_102 = arith.constant 6.000000e+00 : f32
    %105 = vector.broadcast %cst_101 : f32 to vector<128x32xf32>
    %106 = arith.maximumf %105, %104 : vector<128x32xf32>
    %107 = vector.broadcast %cst_102 : f32 to vector<128x32xf32>
    %108 = arith.minimumf %107, %106 : vector<128x32xf32>
    %109 = arith.truncf %108 : vector<128x32xf32> to vector<128x32xbf16>
    %c0_103 = arith.constant 0 : index
    %c0_104 = arith.constant 0 : index
    %110 = vector.load %arg8[%c0_103, %c0_104] : memref<32x32xbf16, #tpu.memory_space<vmem>>, vector<32x32xbf16>
    %cst_105 = arith.constant dense<0.000000e+00> : vector<128x32xf32>
    %111 = tpu.matmul %109, %110, %cst_105 {dimension_numbers = #tpu.dot_dimension_numbers<[1], [0], [0], [1], [0, 0, 1, 1], [], []>} : vector<128x32xbf16>, vector<32x32xbf16>, vector<128x32xf32> -> vector<128x32xf32>
    %cst_106 = arith.constant 5.000000e-01 : f32
    %112 = vector.broadcast %cst_106 : f32 to vector<128x32xf32>
    %113 = arith.mulf %112, %111 : vector<128x32xf32>
    %cst_107 = arith.constant 0.707106769 : f32
    %114 = vector.broadcast %cst_107 : f32 to vector<128x32xf32>
    %115 = arith.mulf %111, %114 : vector<128x32xf32>
    %cst_108 = arith.constant 0.000000e+00 : f32
    %116 = vector.broadcast %cst_108 : f32 to vector<128x32xf32>
    %117 = arith.cmpf oge, %115, %116 : vector<128x32xf32>
    %cst_109 = arith.constant 1.000000e+00 : f32
    %cst_110 = arith.constant -1.000000e+00 : f32
    %118 = vector.broadcast %cst_109 : f32 to vector<128x32xf32>
    %119 = vector.broadcast %cst_110 : f32 to vector<128x32xf32>
    %120 = arith.select %117, %118, %119 : vector<128x32xi1>, vector<128x32xf32>
    %121 = math.absf %115 : vector<128x32xf32>
    %cst_111 = arith.constant 0.327591091 : f32
    %122 = vector.broadcast %cst_111 : f32 to vector<128x32xf32>
    %123 = arith.mulf %122, %121 : vector<128x32xf32>
    %cst_112 = arith.constant 1.000000e+00 : f32
    %124 = vector.broadcast %cst_112 : f32 to vector<128x32xf32>
    %125 = arith.addf %124, %123 : vector<128x32xf32>
    %126 = tpu.reciprocal %125 {approx = true} : vector<128x32xf32> -> vector<128x32xf32>
    %cst_113 = arith.constant 1.06140542 : f32
    %127 = vector.broadcast %cst_113 : f32 to vector<128x32xf32>
    %128 = arith.mulf %127, %126 : vector<128x32xf32>
    %cst_114 = arith.constant -1.45315206 : f32
    %129 = vector.broadcast %cst_114 : f32 to vector<128x32xf32>
    %130 = arith.addf %128, %129 : vector<128x32xf32>
    %131 = arith.mulf %130, %126 : vector<128x32xf32>
    %cst_115 = arith.constant 1.42141378 : f32
    %132 = vector.broadcast %cst_115 : f32 to vector<128x32xf32>
    %133 = arith.addf %131, %132 : vector<128x32xf32>
    %134 = arith.mulf %133, %126 : vector<128x32xf32>
    %cst_116 = arith.constant -0.284496725 : f32
    %135 = vector.broadcast %cst_116 : f32 to vector<128x32xf32>
    %136 = arith.addf %134, %135 : vector<128x32xf32>
    %137 = arith.mulf %136, %126 : vector<128x32xf32>
    %cst_117 = arith.constant 0.254829586 : f32
    %138 = vector.broadcast %cst_117 : f32 to vector<128x32xf32>
    %139 = arith.addf %137, %138 : vector<128x32xf32>
    %140 = arith.mulf %139, %126 : vector<128x32xf32>
    %cst_118 = arith.constant 0.000000e+00 : f32
    %141 = vector.broadcast %cst_118 : f32 to vector<128x32xf32>
    %142 = arith.subf %141, %121 : vector<128x32xf32>
    %143 = arith.mulf %142, %121 : vector<128x32xf32>
    %144 = math.exp %143 : vector<128x32xf32>
    %145 = arith.mulf %140, %144 : vector<128x32xf32>
    %cst_119 = arith.constant 1.000000e+00 : f32
    %146 = vector.broadcast %cst_119 : f32 to vector<128x32xf32>
    %147 = arith.subf %146, %145 : vector<128x32xf32>
    %148 = arith.mulf %120, %147 : vector<128x32xf32>
    %cst_120 = arith.constant 1.000000e+00 : f32
    %149 = vector.broadcast %cst_120 : f32 to vector<128x32xf32>
    %150 = arith.addf %149, %148 : vector<128x32xf32>
    %151 = arith.mulf %113, %150 : vector<128x32xf32>
    %152 = arith.truncf %151 : vector<128x32xf32> to vector<128x32xbf16>
    %c0_121 = arith.constant 0 : index
    %c0_122 = arith.constant 0 : index
    %153 = vector.load %arg9[%c0_121, %c0_122] : memref<32x128xbf16, #tpu.memory_space<vmem>>, vector<32x128xbf16>
    %cst_123 = arith.constant dense<0.000000e+00> : vector<128x128xf32>
    %154 = tpu.matmul %152, %153, %cst_123 {dimension_numbers = #tpu.dot_dimension_numbers<[1], [0], [0], [1], [0, 0, 1, 1], [], []>} : vector<128x32xbf16>, vector<32x128xbf16>, vector<128x128xf32> -> vector<128x128xf32>
    %155 = vector.shape_cast %154 : vector<128x128xf32> to vector<2x8x8x128xf32>
    %c0_124 = arith.constant 0 : index
    %c0_125 = arith.constant 0 : index
    %c0_126 = arith.constant 0 : index
    %c0_127 = arith.constant 0 : index
    %156 = vector.load %arg2[%c0_124, %c0_125, %c0_126, %c0_127] : memref<2x8x8x4xf32, #tpu.memory_space<vmem>>, vector<2x8x8x4xf32>
    %cst_128 = arith.constant dense<0xFF800000> : vector<2x8x8xf32>
    %157 = vector.multi_reduction <maximumf>, %156, %cst_128 [3] : vector<2x8x8x4xf32> to vector<2x8x8xf32>
    %158 = vector.shape_cast %157 : vector<2x8x8xf32> to vector<2x8x8x1xf32>
    %cst_129 = arith.constant dense<0.000000e+00> : vector<2x8x8xf32>
    %159 = vector.multi_reduction <add>, %156, %cst_129 [3] : vector<2x8x8x4xf32> to vector<2x8x8xf32>
    %160 = vector.shape_cast %159 : vector<2x8x8xf32> to vector<2x8x8x1xf32>
    %cst_130 = arith.constant 4.000000e+00 : f32
    %161 = vector.broadcast %cst_130 : f32 to vector<2x8x8x1xf32>
    %162 = arith.divf %160, %161 : vector<2x8x8x1xf32>
    %cst_131 = arith.constant 0.000000e+00 : f32
    %163 = vector.broadcast %cst_131 : f32 to vector<2x3x14x2xf32>
    %cst_132 = arith.constant 0.000000e+00 : f32
    %164 = vector.broadcast %cst_132 : f32 to vector<2x14x3x2xf32>
    %c0_133 = arith.constant 0 : index
    %c0_134 = arith.constant 0 : index
    %c0_135 = arith.constant 0 : index
    %c0_136 = arith.constant 0 : index
    %165 = vector.load %arg13[%c0_133, %c0_134, %c0_135, %c0_136] : memref<2x14x14x2xf32, #tpu.memory_space<vmem>>, vector<2x3x14x2xf32>
    tpu.vector_store %arg13[%c0_133, %c0_134, %c0_135, %c0_136], %163 {strides = array<i32>} : memref<2x14x14x2xf32, #tpu.memory_space<vmem>>, vector<2x3x14x2xf32>,
    %c0_137 = arith.constant 0 : index
    %c11 = arith.constant 11 : index
    %c0_138 = arith.constant 0 : index
    %c0_139 = arith.constant 0 : index
    %166 = vector.load %arg13[%c0_137, %c11, %c0_138, %c0_139] : memref<2x14x14x2xf32, #tpu.memory_space<vmem>>, vector<2x3x14x2xf32>
    tpu.vector_store %arg13[%c0_137, %c11, %c0_138, %c0_139], %163 {strides = array<i32>} : memref<2x14x14x2xf32, #tpu.memory_space<vmem>>, vector<2x3x14x2xf32>,
    %c0_140 = arith.constant 0 : index
    %c0_141 = arith.constant 0 : index
    %c0_142 = arith.constant 0 : index
    %c0_143 = arith.constant 0 : index
    %167 = vector.load %arg13[%c0_140, %c0_141, %c0_142, %c0_143] : memref<2x14x14x2xf32, #tpu.memory_space<vmem>>, vector<2x14x3x2xf32>
    tpu.vector_store %arg13[%c0_140, %c0_141, %c0_142, %c0_143], %164 {strides = array<i32>} : memref<2x14x14x2xf32, #tpu.memory_space<vmem>>, vector<2x14x3x2xf32>,
    %c0_144 = arith.constant 0 : index
    %c0_145 = arith.constant 0 : index
    %c11_146 = arith.constant 11 : index
    %c0_147 = arith.constant 0 : index
    %168 = vector.load %arg13[%c0_144, %c0_145, %c11_146, %c0_147] : memref<2x14x14x2xf32, #tpu.memory_space<vmem>>, vector<2x14x3x2xf32>
    tpu.vector_store %arg13[%c0_144, %c0_145, %c11_146, %c0_147], %164 {strides = array<i32>} : memref<2x14x14x2xf32, #tpu.memory_space<vmem>>, vector<2x14x3x2xf32>,
    %c0_148 = arith.constant 0 : index
    %c3_149 = arith.constant 3 : index
    %c3_150 = arith.constant 3 : index
    %c0_151 = arith.constant 0 : index
    %169 = vector.load %arg13[%c0_148, %c3_149, %c3_150, %c0_151] : memref<2x14x14x2xf32, #tpu.memory_space<vmem>>, vector<2x8x8x1xf32>
    tpu.vector_store %arg13[%c0_148, %c3_149, %c3_150, %c0_151], %158 {strides = array<i32>} : memref<2x14x14x2xf32, #tpu.memory_space<vmem>>, vector<2x8x8x1xf32>,
    %c0_152 = arith.constant 0 : index
    %c3_153 = arith.constant 3 : index
    %c3_154 = arith.constant 3 : index
    %c1_155 = arith.constant 1 : index
    %170 = vector.load %arg13[%c0_152, %c3_153, %c3_154, %c1_155] : memref<2x14x14x2xf32, #tpu.memory_space<vmem>>, vector<2x8x8x1xf32>
    tpu.vector_store %arg13[%c0_152, %c3_153, %c3_154, %c1_155], %162 {strides = array<i32>} : memref<2x14x14x2xf32, #tpu.memory_space<vmem>>, vector<2x8x8x1xf32>,
    %cst_156 = arith.constant 0.000000e+00 : f32
    %171 = vector.broadcast %cst_156 : f32 to vector<2x8x8x2xf32>
    %c0_157 = arith.constant 0 : index
    %c0_158 = arith.constant 0 : index
    %c0_159 = arith.constant 0 : index
    %c0_160 = arith.constant 0 : index
    %172 = vector.load %arg13[%c0_157, %c0_158, %c0_159, %c0_160] : memref<2x14x14x2xf32, #tpu.memory_space<vmem>>, vector<2x8x8x2xf32>
    %c0_161 = arith.constant 0 : index
    %c0_162 = arith.constant 0 : index
    %173 = vector.load %arg10[%c0_161, %c0_162] : memref<49x2xf32, #tpu.memory_space<vmem>>, vector<1x2xf32>
    %174 = vector.shape_cast %173 : vector<1x2xf32> to vector<1x1x1x2xf32>
    %175 = vector.broadcast %174 : vector<1x1x1x2xf32> to vector<2x8x8x2xf32>
    %176 = arith.mulf %172, %175 : vector<2x8x8x2xf32>
    %177 = arith.addf %171, %176 : vector<2x8x8x2xf32>
    %c0_163 = arith.constant 0 : index
    %c0_164 = arith.constant 0 : index
    %c1_165 = arith.constant 1 : index
    %c0_166 = arith.constant 0 : index
    %178 = vector.load %arg13[%c0_163, %c0_164, %c1_165, %c0_166] : memref<2x14x14x2xf32, #tpu.memory_space<vmem>>, vector<2x8x8x2xf32>
    %c1_167 = arith.constant 1 : index
    %c0_168 = arith.constant 0 : index
    %179 = vector.load %arg10[%c1_167, %c0_168] : memref<49x2xf32, #tpu.memory_space<vmem>>, vector<1x2xf32>
    %180 = vector.shape_cast %179 : vector<1x2xf32> to vector<1x1x1x2xf32>
    %181 = vector.broadcast %180 : vector<1x1x1x2xf32> to vector<2x8x8x2xf32>
    %182 = arith.mulf %178, %181 : vector<2x8x8x2xf32>
    %183 = arith.addf %177, %182 : vector<2x8x8x2xf32>
    %c0_169 = arith.constant 0 : index
    %c0_170 = arith.constant 0 : index
    %c2_171 = arith.constant 2 : index
    %c0_172 = arith.constant 0 : index
    %184 = vector.load %arg13[%c0_169, %c0_170, %c2_171, %c0_172] : memref<2x14x14x2xf32, #tpu.memory_space<vmem>>, vector<2x8x8x2xf32>
    %c2_173 = arith.constant 2 : index
    %c0_174 = arith.constant 0 : index
    %185 = vector.load %arg10[%c2_173, %c0_174] : memref<49x2xf32, #tpu.memory_space<vmem>>, vector<1x2xf32>
    %186 = vector.shape_cast %185 : vector<1x2xf32> to vector<1x1x1x2xf32>
    %187 = vector.broadcast %186 : vector<1x1x1x2xf32> to vector<2x8x8x2xf32>
    %188 = arith.mulf %184, %187 : vector<2x8x8x2xf32>
    %189 = arith.addf %183, %188 : vector<2x8x8x2xf32>
    %c0_175 = arith.constant 0 : index
    %c0_176 = arith.constant 0 : index
    %c3_177 = arith.constant 3 : index
    %c0_178 = arith.constant 0 : index
    %190 = vector.load %arg13[%c0_175, %c0_176, %c3_177, %c0_178] : memref<2x14x14x2xf32, #tpu.memory_space<vmem>>, vector<2x8x8x2xf32>
    %c3_179 = arith.constant 3 : index
    %c0_180 = arith.constant 0 : index
    %191 = vector.load %arg10[%c3_179, %c0_180] : memref<49x2xf32, #tpu.memory_space<vmem>>, vector<1x2xf32>
    %192 = vector.shape_cast %191 : vector<1x2xf32> to vector<1x1x1x2xf32>
    %193 = vector.broadcast %192 : vector<1x1x1x2xf32> to vector<2x8x8x2xf32>
    %194 = arith.mulf %190, %193 : vector<2x8x8x2xf32>
    %195 = arith.addf %189, %194 : vector<2x8x8x2xf32>
    %c0_181 = arith.constant 0 : index
    %c0_182 = arith.constant 0 : index
    %c4_183 = arith.constant 4 : index
    %c0_184 = arith.constant 0 : index
    %196 = vector.load %arg13[%c0_181, %c0_182, %c4_183, %c0_184] : memref<2x14x14x2xf32, #tpu.memory_space<vmem>>, vector<2x8x8x2xf32>
    %c4_185 = arith.constant 4 : index
    %c0_186 = arith.constant 0 : index
    %197 = vector.load %arg10[%c4_185, %c0_186] : memref<49x2xf32, #tpu.memory_space<vmem>>, vector<1x2xf32>
    %198 = vector.shape_cast %197 : vector<1x2xf32> to vector<1x1x1x2xf32>
    %199 = vector.broadcast %198 : vector<1x1x1x2xf32> to vector<2x8x8x2xf32>
    %200 = arith.mulf %196, %199 : vector<2x8x8x2xf32>
    %201 = arith.addf %195, %200 : vector<2x8x8x2xf32>
    %c0_187 = arith.constant 0 : index
    %c0_188 = arith.constant 0 : index
    %c5_189 = arith.constant 5 : index
    %c0_190 = arith.constant 0 : index
    %202 = vector.load %arg13[%c0_187, %c0_188, %c5_189, %c0_190] : memref<2x14x14x2xf32, #tpu.memory_space<vmem>>, vector<2x8x8x2xf32>
    %c5_191 = arith.constant 5 : index
    %c0_192 = arith.constant 0 : index
    %203 = vector.load %arg10[%c5_191, %c0_192] : memref<49x2xf32, #tpu.memory_space<vmem>>, vector<1x2xf32>
    %204 = vector.shape_cast %203 : vector<1x2xf32> to vector<1x1x1x2xf32>
    %205 = vector.broadcast %204 : vector<1x1x1x2xf32> to vector<2x8x8x2xf32>
    %206 = arith.mulf %202, %205 : vector<2x8x8x2xf32>
    %207 = arith.addf %201, %206 : vector<2x8x8x2xf32>
    %c0_193 = arith.constant 0 : index
    %c0_194 = arith.constant 0 : index
    %c6_195 = arith.constant 6 : index
    %c0_196 = arith.constant 0 : index
    %208 = vector.load %arg13[%c0_193, %c0_194, %c6_195, %c0_196] : memref<2x14x14x2xf32, #tpu.memory_space<vmem>>, vector<2x8x8x2xf32>
    %c6_197 = arith.constant 6 : index
    %c0_198 = arith.constant 0 : index
    %209 = vector.load %arg10[%c6_197, %c0_198] : memref<49x2xf32, #tpu.memory_space<vmem>>, vector<1x2xf32>
    %210 = vector.shape_cast %209 : vector<1x2xf32> to vector<1x1x1x2xf32>
    %211 = vector.broadcast %210 : vector<1x1x1x2xf32> to vector<2x8x8x2xf32>
    %212 = arith.mulf %208, %211 : vector<2x8x8x2xf32>
    %213 = arith.addf %207, %212 : vector<2x8x8x2xf32>
    %c0_199 = arith.constant 0 : index
    %c1_200 = arith.constant 1 : index
    %c0_201 = arith.constant 0 : index
    %c0_202 = arith.constant 0 : index
    %214 = vector.load %arg13[%c0_199, %c1_200, %c0_201, %c0_202] : memref<2x14x14x2xf32, #tpu.memory_space<vmem>>, vector<2x8x8x2xf32>
    %c7_203 = arith.constant 7 : index
    %c0_204 = arith.constant 0 : index
    %215 = vector.load %arg10[%c7_203, %c0_204] : memref<49x2xf32, #tpu.memory_space<vmem>>, vector<1x2xf32>
    %216 = vector.shape_cast %215 : vector<1x2xf32> to vector<1x1x1x2xf32>
    %217 = vector.broadcast %216 : vector<1x1x1x2xf32> to vector<2x8x8x2xf32>
    %218 = arith.mulf %214, %217 : vector<2x8x8x2xf32>
    %219 = arith.addf %213, %218 : vector<2x8x8x2xf32>
    %c0_205 = arith.constant 0 : index
    %c1_206 = arith.constant 1 : index
    %c1_207 = arith.constant 1 : index
    %c0_208 = arith.constant 0 : index
    %220 = vector.load %arg13[%c0_205, %c1_206, %c1_207, %c0_208] : memref<2x14x14x2xf32, #tpu.memory_space<vmem>>, vector<2x8x8x2xf32>
    %c8_209 = arith.constant 8 : index
    %c0_210 = arith.constant 0 : index
    %221 = vector.load %arg10[%c8_209, %c0_210] : memref<49x2xf32, #tpu.memory_space<vmem>>, vector<1x2xf32>
    %222 = vector.shape_cast %221 : vector<1x2xf32> to vector<1x1x1x2xf32>
    %223 = vector.broadcast %222 : vector<1x1x1x2xf32> to vector<2x8x8x2xf32>
    %224 = arith.mulf %220, %223 : vector<2x8x8x2xf32>
    %225 = arith.addf %219, %224 : vector<2x8x8x2xf32>
    %c0_211 = arith.constant 0 : index
    %c1_212 = arith.constant 1 : index
    %c2_213 = arith.constant 2 : index
    %c0_214 = arith.constant 0 : index
    %226 = vector.load %arg13[%c0_211, %c1_212, %c2_213, %c0_214] : memref<2x14x14x2xf32, #tpu.memory_space<vmem>>, vector<2x8x8x2xf32>
    %c9_215 = arith.constant 9 : index
    %c0_216 = arith.constant 0 : index
    %227 = vector.load %arg10[%c9_215, %c0_216] : memref<49x2xf32, #tpu.memory_space<vmem>>, vector<1x2xf32>
    %228 = vector.shape_cast %227 : vector<1x2xf32> to vector<1x1x1x2xf32>
    %229 = vector.broadcast %228 : vector<1x1x1x2xf32> to vector<2x8x8x2xf32>
    %230 = arith.mulf %226, %229 : vector<2x8x8x2xf32>
    %231 = arith.addf %225, %230 : vector<2x8x8x2xf32>
    %c0_217 = arith.constant 0 : index
    %c1_218 = arith.constant 1 : index
    %c3_219 = arith.constant 3 : index
    %c0_220 = arith.constant 0 : index
    %232 = vector.load %arg13[%c0_217, %c1_218, %c3_219, %c0_220] : memref<2x14x14x2xf32, #tpu.memory_space<vmem>>, vector<2x8x8x2xf32>
    %c10 = arith.constant 10 : index
    %c0_221 = arith.constant 0 : index
    %233 = vector.load %arg10[%c10, %c0_221] : memref<49x2xf32, #tpu.memory_space<vmem>>, vector<1x2xf32>
    %234 = vector.shape_cast %233 : vector<1x2xf32> to vector<1x1x1x2xf32>
    %235 = vector.broadcast %234 : vector<1x1x1x2xf32> to vector<2x8x8x2xf32>
    %236 = arith.mulf %232, %235 : vector<2x8x8x2xf32>
    %237 = arith.addf %231, %236 : vector<2x8x8x2xf32>
    %c0_222 = arith.constant 0 : index
    %c1_223 = arith.constant 1 : index
    %c4_224 = arith.constant 4 : index
    %c0_225 = arith.constant 0 : index
    %238 = vector.load %arg13[%c0_222, %c1_223, %c4_224, %c0_225] : memref<2x14x14x2xf32, #tpu.memory_space<vmem>>, vector<2x8x8x2xf32>
    %c11_226 = arith.constant 11 : index
    %c0_227 = arith.constant 0 : index
    %239 = vector.load %arg10[%c11_226, %c0_227] : memref<49x2xf32, #tpu.memory_space<vmem>>, vector<1x2xf32>
    %240 = vector.shape_cast %239 : vector<1x2xf32> to vector<1x1x1x2xf32>
    %241 = vector.broadcast %240 : vector<1x1x1x2xf32> to vector<2x8x8x2xf32>
    %242 = arith.mulf %238, %241 : vector<2x8x8x2xf32>
    %243 = arith.addf %237, %242 : vector<2x8x8x2xf32>
    %c0_228 = arith.constant 0 : index
    %c1_229 = arith.constant 1 : index
    %c5_230 = arith.constant 5 : index
    %c0_231 = arith.constant 0 : index
    %244 = vector.load %arg13[%c0_228, %c1_229, %c5_230, %c0_231] : memref<2x14x14x2xf32, #tpu.memory_space<vmem>>, vector<2x8x8x2xf32>
    %c12 = arith.constant 12 : index
    %c0_232 = arith.constant 0 : index
    %245 = vector.load %arg10[%c12, %c0_232] : memref<49x2xf32, #tpu.memory_space<vmem>>, vector<1x2xf32>
    %246 = vector.shape_cast %245 : vector<1x2xf32> to vector<1x1x1x2xf32>
    %247 = vector.broadcast %246 : vector<1x1x1x2xf32> to vector<2x8x8x2xf32>
    %248 = arith.mulf %244, %247 : vector<2x8x8x2xf32>
    %249 = arith.addf %243, %248 : vector<2x8x8x2xf32>
    %c0_233 = arith.constant 0 : index
    %c1_234 = arith.constant 1 : index
    %c6_235 = arith.constant 6 : index
    %c0_236 = arith.constant 0 : index
    %250 = vector.load %arg13[%c0_233, %c1_234, %c6_235, %c0_236] : memref<2x14x14x2xf32, #tpu.memory_space<vmem>>, vector<2x8x8x2xf32>
    %c13 = arith.constant 13 : index
    %c0_237 = arith.constant 0 : index
    %251 = vector.load %arg10[%c13, %c0_237] : memref<49x2xf32, #tpu.memory_space<vmem>>, vector<1x2xf32>
    %252 = vector.shape_cast %251 : vector<1x2xf32> to vector<1x1x1x2xf32>
    %253 = vector.broadcast %252 : vector<1x1x1x2xf32> to vector<2x8x8x2xf32>
    %254 = arith.mulf %250, %253 : vector<2x8x8x2xf32>
    %255 = arith.addf %249, %254 : vector<2x8x8x2xf32>
    %c0_238 = arith.constant 0 : index
    %c2_239 = arith.constant 2 : index
    %c0_240 = arith.constant 0 : index
    %c0_241 = arith.constant 0 : index
    %256 = vector.load %arg13[%c0_238, %c2_239, %c0_240, %c0_241] : memref<2x14x14x2xf32, #tpu.memory_space<vmem>>, vector<2x8x8x2xf32>
    %c14 = arith.constant 14 : index
    %c0_242 = arith.constant 0 : index
    %257 = vector.load %arg10[%c14, %c0_242] : memref<49x2xf32, #tpu.memory_space<vmem>>, vector<1x2xf32>
    %258 = vector.shape_cast %257 : vector<1x2xf32> to vector<1x1x1x2xf32>
    %259 = vector.broadcast %258 : vector<1x1x1x2xf32> to vector<2x8x8x2xf32>
    %260 = arith.mulf %256, %259 : vector<2x8x8x2xf32>
    %261 = arith.addf %255, %260 : vector<2x8x8x2xf32>
    %c0_243 = arith.constant 0 : index
    %c2_244 = arith.constant 2 : index
    %c1_245 = arith.constant 1 : index
    %c0_246 = arith.constant 0 : index
    %262 = vector.load %arg13[%c0_243, %c2_244, %c1_245, %c0_246] : memref<2x14x14x2xf32, #tpu.memory_space<vmem>>, vector<2x8x8x2xf32>
    %c15 = arith.constant 15 : index
    %c0_247 = arith.constant 0 : index
    %263 = vector.load %arg10[%c15, %c0_247] : memref<49x2xf32, #tpu.memory_space<vmem>>, vector<1x2xf32>
    %264 = vector.shape_cast %263 : vector<1x2xf32> to vector<1x1x1x2xf32>
    %265 = vector.broadcast %264 : vector<1x1x1x2xf32> to vector<2x8x8x2xf32>
    %266 = arith.mulf %262, %265 : vector<2x8x8x2xf32>
    %267 = arith.addf %261, %266 : vector<2x8x8x2xf32>
    %c0_248 = arith.constant 0 : index
    %c2_249 = arith.constant 2 : index
    %c2_250 = arith.constant 2 : index
    %c0_251 = arith.constant 0 : index
    %268 = vector.load %arg13[%c0_248, %c2_249, %c2_250, %c0_251] : memref<2x14x14x2xf32, #tpu.memory_space<vmem>>, vector<2x8x8x2xf32>
    %c16 = arith.constant 16 : index
    %c0_252 = arith.constant 0 : index
    %269 = vector.load %arg10[%c16, %c0_252] : memref<49x2xf32, #tpu.memory_space<vmem>>, vector<1x2xf32>
    %270 = vector.shape_cast %269 : vector<1x2xf32> to vector<1x1x1x2xf32>
    %271 = vector.broadcast %270 : vector<1x1x1x2xf32> to vector<2x8x8x2xf32>
    %272 = arith.mulf %268, %271 : vector<2x8x8x2xf32>
    %273 = arith.addf %267, %272 : vector<2x8x8x2xf32>
    %c0_253 = arith.constant 0 : index
    %c2_254 = arith.constant 2 : index
    %c3_255 = arith.constant 3 : index
    %c0_256 = arith.constant 0 : index
    %274 = vector.load %arg13[%c0_253, %c2_254, %c3_255, %c0_256] : memref<2x14x14x2xf32, #tpu.memory_space<vmem>>, vector<2x8x8x2xf32>
    %c17 = arith.constant 17 : index
    %c0_257 = arith.constant 0 : index
    %275 = vector.load %arg10[%c17, %c0_257] : memref<49x2xf32, #tpu.memory_space<vmem>>, vector<1x2xf32>
    %276 = vector.shape_cast %275 : vector<1x2xf32> to vector<1x1x1x2xf32>
    %277 = vector.broadcast %276 : vector<1x1x1x2xf32> to vector<2x8x8x2xf32>
    %278 = arith.mulf %274, %277 : vector<2x8x8x2xf32>
    %279 = arith.addf %273, %278 : vector<2x8x8x2xf32>
    %c0_258 = arith.constant 0 : index
    %c2_259 = arith.constant 2 : index
    %c4_260 = arith.constant 4 : index
    %c0_261 = arith.constant 0 : index
    %280 = vector.load %arg13[%c0_258, %c2_259, %c4_260, %c0_261] : memref<2x14x14x2xf32, #tpu.memory_space<vmem>>, vector<2x8x8x2xf32>
    %c18 = arith.constant 18 : index
    %c0_262 = arith.constant 0 : index
    %281 = vector.load %arg10[%c18, %c0_262] : memref<49x2xf32, #tpu.memory_space<vmem>>, vector<1x2xf32>
    %282 = vector.shape_cast %281 : vector<1x2xf32> to vector<1x1x1x2xf32>
    %283 = vector.broadcast %282 : vector<1x1x1x2xf32> to vector<2x8x8x2xf32>
    %284 = arith.mulf %280, %283 : vector<2x8x8x2xf32>
    %285 = arith.addf %279, %284 : vector<2x8x8x2xf32>
    %c0_263 = arith.constant 0 : index
    %c2_264 = arith.constant 2 : index
    %c5_265 = arith.constant 5 : index
    %c0_266 = arith.constant 0 : index
    %286 = vector.load %arg13[%c0_263, %c2_264, %c5_265, %c0_266] : memref<2x14x14x2xf32, #tpu.memory_space<vmem>>, vector<2x8x8x2xf32>
    %c19 = arith.constant 19 : index
    %c0_267 = arith.constant 0 : index
    %287 = vector.load %arg10[%c19, %c0_267] : memref<49x2xf32, #tpu.memory_space<vmem>>, vector<1x2xf32>
    %288 = vector.shape_cast %287 : vector<1x2xf32> to vector<1x1x1x2xf32>
    %289 = vector.broadcast %288 : vector<1x1x1x2xf32> to vector<2x8x8x2xf32>
    %290 = arith.mulf %286, %289 : vector<2x8x8x2xf32>
    %291 = arith.addf %285, %290 : vector<2x8x8x2xf32>
    %c0_268 = arith.constant 0 : index
    %c2_269 = arith.constant 2 : index
    %c6_270 = arith.constant 6 : index
    %c0_271 = arith.constant 0 : index
    %292 = vector.load %arg13[%c0_268, %c2_269, %c6_270, %c0_271] : memref<2x14x14x2xf32, #tpu.memory_space<vmem>>, vector<2x8x8x2xf32>
    %c20 = arith.constant 20 : index
    %c0_272 = arith.constant 0 : index
    %293 = vector.load %arg10[%c20, %c0_272] : memref<49x2xf32, #tpu.memory_space<vmem>>, vector<1x2xf32>
    %294 = vector.shape_cast %293 : vector<1x2xf32> to vector<1x1x1x2xf32>
    %295 = vector.broadcast %294 : vector<1x1x1x2xf32> to vector<2x8x8x2xf32>
    %296 = arith.mulf %292, %295 : vector<2x8x8x2xf32>
    %297 = arith.addf %291, %296 : vector<2x8x8x2xf32>
    %c0_273 = arith.constant 0 : index
    %c3_274 = arith.constant 3 : index
    %c0_275 = arith.constant 0 : index
    %c0_276 = arith.constant 0 : index
    %298 = vector.load %arg13[%c0_273, %c3_274, %c0_275, %c0_276] : memref<2x14x14x2xf32, #tpu.memory_space<vmem>>, vector<2x8x8x2xf32>
    %c21 = arith.constant 21 : index
    %c0_277 = arith.constant 0 : index
    %299 = vector.load %arg10[%c21, %c0_277] : memref<49x2xf32, #tpu.memory_space<vmem>>, vector<1x2xf32>
    %300 = vector.shape_cast %299 : vector<1x2xf32> to vector<1x1x1x2xf32>
    %301 = vector.broadcast %300 : vector<1x1x1x2xf32> to vector<2x8x8x2xf32>
    %302 = arith.mulf %298, %301 : vector<2x8x8x2xf32>
    %303 = arith.addf %297, %302 : vector<2x8x8x2xf32>
    %c0_278 = arith.constant 0 : index
    %c3_279 = arith.constant 3 : index
    %c1_280 = arith.constant 1 : index
    %c0_281 = arith.constant 0 : index
    %304 = vector.load %arg13[%c0_278, %c3_279, %c1_280, %c0_281] : memref<2x14x14x2xf32, #tpu.memory_space<vmem>>, vector<2x8x8x2xf32>
    %c22 = arith.constant 22 : index
    %c0_282 = arith.constant 0 : index
    %305 = vector.load %arg10[%c22, %c0_282] : memref<49x2xf32, #tpu.memory_space<vmem>>, vector<1x2xf32>
    %306 = vector.shape_cast %305 : vector<1x2xf32> to vector<1x1x1x2xf32>
    %307 = vector.broadcast %306 : vector<1x1x1x2xf32> to vector<2x8x8x2xf32>
    %308 = arith.mulf %304, %307 : vector<2x8x8x2xf32>
    %309 = arith.addf %303, %308 : vector<2x8x8x2xf32>
    %c0_283 = arith.constant 0 : index
    %c3_284 = arith.constant 3 : index
    %c2_285 = arith.constant 2 : index
    %c0_286 = arith.constant 0 : index
    %310 = vector.load %arg13[%c0_283, %c3_284, %c2_285, %c0_286] : memref<2x14x14x2xf32, #tpu.memory_space<vmem>>, vector<2x8x8x2xf32>
    %c23 = arith.constant 23 : index
    %c0_287 = arith.constant 0 : index
    %311 = vector.load %arg10[%c23, %c0_287] : memref<49x2xf32, #tpu.memory_space<vmem>>, vector<1x2xf32>
    %312 = vector.shape_cast %311 : vector<1x2xf32> to vector<1x1x1x2xf32>
    %313 = vector.broadcast %312 : vector<1x1x1x2xf32> to vector<2x8x8x2xf32>
    %314 = arith.mulf %310, %313 : vector<2x8x8x2xf32>
    %315 = arith.addf %309, %314 : vector<2x8x8x2xf32>
    %c0_288 = arith.constant 0 : index
    %c3_289 = arith.constant 3 : index
    %c3_290 = arith.constant 3 : index
    %c0_291 = arith.constant 0 : index
    %316 = vector.load %arg13[%c0_288, %c3_289, %c3_290, %c0_291] : memref<2x14x14x2xf32, #tpu.memory_space<vmem>>, vector<2x8x8x2xf32>
    %c24 = arith.constant 24 : index
    %c0_292 = arith.constant 0 : index
    %317 = vector.load %arg10[%c24, %c0_292] : memref<49x2xf32, #tpu.memory_space<vmem>>, vector<1x2xf32>
    %318 = vector.shape_cast %317 : vector<1x2xf32> to vector<1x1x1x2xf32>
    %319 = vector.broadcast %318 : vector<1x1x1x2xf32> to vector<2x8x8x2xf32>
    %320 = arith.mulf %316, %319 : vector<2x8x8x2xf32>
    %321 = arith.addf %315, %320 : vector<2x8x8x2xf32>
    %c0_293 = arith.constant 0 : index
    %c3_294 = arith.constant 3 : index
    %c4_295 = arith.constant 4 : index
    %c0_296 = arith.constant 0 : index
    %322 = vector.load %arg13[%c0_293, %c3_294, %c4_295, %c0_296] : memref<2x14x14x2xf32, #tpu.memory_space<vmem>>, vector<2x8x8x2xf32>
    %c25 = arith.constant 25 : index
    %c0_297 = arith.constant 0 : index
    %323 = vector.load %arg10[%c25, %c0_297] : memref<49x2xf32, #tpu.memory_space<vmem>>, vector<1x2xf32>
    %324 = vector.shape_cast %323 : vector<1x2xf32> to vector<1x1x1x2xf32>
    %325 = vector.broadcast %324 : vector<1x1x1x2xf32> to vector<2x8x8x2xf32>
    %326 = arith.mulf %322, %325 : vector<2x8x8x2xf32>
    %327 = arith.addf %321, %326 : vector<2x8x8x2xf32>
    %c0_298 = arith.constant 0 : index
    %c3_299 = arith.constant 3 : index
    %c5_300 = arith.constant 5 : index
    %c0_301 = arith.constant 0 : index
    %328 = vector.load %arg13[%c0_298, %c3_299, %c5_300, %c0_301] : memref<2x14x14x2xf32, #tpu.memory_space<vmem>>, vector<2x8x8x2xf32>
    %c26 = arith.constant 26 : index
    %c0_302 = arith.constant 0 : index
    %329 = vector.load %arg10[%c26, %c0_302] : memref<49x2xf32, #tpu.memory_space<vmem>>, vector<1x2xf32>
    %330 = vector.shape_cast %329 : vector<1x2xf32> to vector<1x1x1x2xf32>
    %331 = vector.broadcast %330 : vector<1x1x1x2xf32> to vector<2x8x8x2xf32>
    %332 = arith.mulf %328, %331 : vector<2x8x8x2xf32>
    %333 = arith.addf %327, %332 : vector<2x8x8x2xf32>
    %c0_303 = arith.constant 0 : index
    %c3_304 = arith.constant 3 : index
    %c6_305 = arith.constant 6 : index
    %c0_306 = arith.constant 0 : index
    %334 = vector.load %arg13[%c0_303, %c3_304, %c6_305, %c0_306] : memref<2x14x14x2xf32, #tpu.memory_space<vmem>>, vector<2x8x8x2xf32>
    %c27 = arith.constant 27 : index
    %c0_307 = arith.constant 0 : index
    %335 = vector.load %arg10[%c27, %c0_307] : memref<49x2xf32, #tpu.memory_space<vmem>>, vector<1x2xf32>
    %336 = vector.shape_cast %335 : vector<1x2xf32> to vector<1x1x1x2xf32>
    %337 = vector.broadcast %336 : vector<1x1x1x2xf32> to vector<2x8x8x2xf32>
    %338 = arith.mulf %334, %337 : vector<2x8x8x2xf32>
    %339 = arith.addf %333, %338 : vector<2x8x8x2xf32>
    %c0_308 = arith.constant 0 : index
    %c4_309 = arith.constant 4 : index
    %c0_310 = arith.constant 0 : index
    %c0_311 = arith.constant 0 : index
    %340 = vector.load %arg13[%c0_308, %c4_309, %c0_310, %c0_311] : memref<2x14x14x2xf32, #tpu.memory_space<vmem>>, vector<2x8x8x2xf32>
    %c28 = arith.constant 28 : index
    %c0_312 = arith.constant 0 : index
    %341 = vector.load %arg10[%c28, %c0_312] : memref<49x2xf32, #tpu.memory_space<vmem>>, vector<1x2xf32>
    %342 = vector.shape_cast %341 : vector<1x2xf32> to vector<1x1x1x2xf32>
    %343 = vector.broadcast %342 : vector<1x1x1x2xf32> to vector<2x8x8x2xf32>
    %344 = arith.mulf %340, %343 : vector<2x8x8x2xf32>
    %345 = arith.addf %339, %344 : vector<2x8x8x2xf32>
    %c0_313 = arith.constant 0 : index
    %c4_314 = arith.constant 4 : index
    %c1_315 = arith.constant 1 : index
    %c0_316 = arith.constant 0 : index
    %346 = vector.load %arg13[%c0_313, %c4_314, %c1_315, %c0_316] : memref<2x14x14x2xf32, #tpu.memory_space<vmem>>, vector<2x8x8x2xf32>
    %c29 = arith.constant 29 : index
    %c0_317 = arith.constant 0 : index
    %347 = vector.load %arg10[%c29, %c0_317] : memref<49x2xf32, #tpu.memory_space<vmem>>, vector<1x2xf32>
    %348 = vector.shape_cast %347 : vector<1x2xf32> to vector<1x1x1x2xf32>
    %349 = vector.broadcast %348 : vector<1x1x1x2xf32> to vector<2x8x8x2xf32>
    %350 = arith.mulf %346, %349 : vector<2x8x8x2xf32>
    %351 = arith.addf %345, %350 : vector<2x8x8x2xf32>
    %c0_318 = arith.constant 0 : index
    %c4_319 = arith.constant 4 : index
    %c2_320 = arith.constant 2 : index
    %c0_321 = arith.constant 0 : index
    %352 = vector.load %arg13[%c0_318, %c4_319, %c2_320, %c0_321] : memref<2x14x14x2xf32, #tpu.memory_space<vmem>>, vector<2x8x8x2xf32>
    %c30 = arith.constant 30 : index
    %c0_322 = arith.constant 0 : index
    %353 = vector.load %arg10[%c30, %c0_322] : memref<49x2xf32, #tpu.memory_space<vmem>>, vector<1x2xf32>
    %354 = vector.shape_cast %353 : vector<1x2xf32> to vector<1x1x1x2xf32>
    %355 = vector.broadcast %354 : vector<1x1x1x2xf32> to vector<2x8x8x2xf32>
    %356 = arith.mulf %352, %355 : vector<2x8x8x2xf32>
    %357 = arith.addf %351, %356 : vector<2x8x8x2xf32>
    %c0_323 = arith.constant 0 : index
    %c4_324 = arith.constant 4 : index
    %c3_325 = arith.constant 3 : index
    %c0_326 = arith.constant 0 : index
    %358 = vector.load %arg13[%c0_323, %c4_324, %c3_325, %c0_326] : memref<2x14x14x2xf32, #tpu.memory_space<vmem>>, vector<2x8x8x2xf32>
    %c31 = arith.constant 31 : index
    %c0_327 = arith.constant 0 : index
    %359 = vector.load %arg10[%c31, %c0_327] : memref<49x2xf32, #tpu.memory_space<vmem>>, vector<1x2xf32>
    %360 = vector.shape_cast %359 : vector<1x2xf32> to vector<1x1x1x2xf32>
    %361 = vector.broadcast %360 : vector<1x1x1x2xf32> to vector<2x8x8x2xf32>
    %362 = arith.mulf %358, %361 : vector<2x8x8x2xf32>
    %363 = arith.addf %357, %362 : vector<2x8x8x2xf32>
    %c0_328 = arith.constant 0 : index
    %c4_329 = arith.constant 4 : index
    %c4_330 = arith.constant 4 : index
    %c0_331 = arith.constant 0 : index
    %364 = vector.load %arg13[%c0_328, %c4_329, %c4_330, %c0_331] : memref<2x14x14x2xf32, #tpu.memory_space<vmem>>, vector<2x8x8x2xf32>
    %c32 = arith.constant 32 : index
    %c0_332 = arith.constant 0 : index
    %365 = vector.load %arg10[%c32, %c0_332] : memref<49x2xf32, #tpu.memory_space<vmem>>, vector<1x2xf32>
    %366 = vector.shape_cast %365 : vector<1x2xf32> to vector<1x1x1x2xf32>
    %367 = vector.broadcast %366 : vector<1x1x1x2xf32> to vector<2x8x8x2xf32>
    %368 = arith.mulf %364, %367 : vector<2x8x8x2xf32>
    %369 = arith.addf %363, %368 : vector<2x8x8x2xf32>
    %c0_333 = arith.constant 0 : index
    %c4_334 = arith.constant 4 : index
    %c5_335 = arith.constant 5 : index
    %c0_336 = arith.constant 0 : index
    %370 = vector.load %arg13[%c0_333, %c4_334, %c5_335, %c0_336] : memref<2x14x14x2xf32, #tpu.memory_space<vmem>>, vector<2x8x8x2xf32>
    %c33 = arith.constant 33 : index
    %c0_337 = arith.constant 0 : index
    %371 = vector.load %arg10[%c33, %c0_337] : memref<49x2xf32, #tpu.memory_space<vmem>>, vector<1x2xf32>
    %372 = vector.shape_cast %371 : vector<1x2xf32> to vector<1x1x1x2xf32>
    %373 = vector.broadcast %372 : vector<1x1x1x2xf32> to vector<2x8x8x2xf32>
    %374 = arith.mulf %370, %373 : vector<2x8x8x2xf32>
    %375 = arith.addf %369, %374 : vector<2x8x8x2xf32>
    %c0_338 = arith.constant 0 : index
    %c4_339 = arith.constant 4 : index
    %c6_340 = arith.constant 6 : index
    %c0_341 = arith.constant 0 : index
    %376 = vector.load %arg13[%c0_338, %c4_339, %c6_340, %c0_341] : memref<2x14x14x2xf32, #tpu.memory_space<vmem>>, vector<2x8x8x2xf32>
    %c34 = arith.constant 34 : index
    %c0_342 = arith.constant 0 : index
    %377 = vector.load %arg10[%c34, %c0_342] : memref<49x2xf32, #tpu.memory_space<vmem>>, vector<1x2xf32>
    %378 = vector.shape_cast %377 : vector<1x2xf32> to vector<1x1x1x2xf32>
    %379 = vector.broadcast %378 : vector<1x1x1x2xf32> to vector<2x8x8x2xf32>
    %380 = arith.mulf %376, %379 : vector<2x8x8x2xf32>
    %381 = arith.addf %375, %380 : vector<2x8x8x2xf32>
    %c0_343 = arith.constant 0 : index
    %c5_344 = arith.constant 5 : index
    %c0_345 = arith.constant 0 : index
    %c0_346 = arith.constant 0 : index
    %382 = vector.load %arg13[%c0_343, %c5_344, %c0_345, %c0_346] : memref<2x14x14x2xf32, #tpu.memory_space<vmem>>, vector<2x8x8x2xf32>
    %c35 = arith.constant 35 : index
    %c0_347 = arith.constant 0 : index
    %383 = vector.load %arg10[%c35, %c0_347] : memref<49x2xf32, #tpu.memory_space<vmem>>, vector<1x2xf32>
    %384 = vector.shape_cast %383 : vector<1x2xf32> to vector<1x1x1x2xf32>
    %385 = vector.broadcast %384 : vector<1x1x1x2xf32> to vector<2x8x8x2xf32>
    %386 = arith.mulf %382, %385 : vector<2x8x8x2xf32>
    %387 = arith.addf %381, %386 : vector<2x8x8x2xf32>
    %c0_348 = arith.constant 0 : index
    %c5_349 = arith.constant 5 : index
    %c1_350 = arith.constant 1 : index
    %c0_351 = arith.constant 0 : index
    %388 = vector.load %arg13[%c0_348, %c5_349, %c1_350, %c0_351] : memref<2x14x14x2xf32, #tpu.memory_space<vmem>>, vector<2x8x8x2xf32>
    %c36 = arith.constant 36 : index
    %c0_352 = arith.constant 0 : index
    %389 = vector.load %arg10[%c36, %c0_352] : memref<49x2xf32, #tpu.memory_space<vmem>>, vector<1x2xf32>
    %390 = vector.shape_cast %389 : vector<1x2xf32> to vector<1x1x1x2xf32>
    %391 = vector.broadcast %390 : vector<1x1x1x2xf32> to vector<2x8x8x2xf32>
    %392 = arith.mulf %388, %391 : vector<2x8x8x2xf32>
    %393 = arith.addf %387, %392 : vector<2x8x8x2xf32>
    %c0_353 = arith.constant 0 : index
    %c5_354 = arith.constant 5 : index
    %c2_355 = arith.constant 2 : index
    %c0_356 = arith.constant 0 : index
    %394 = vector.load %arg13[%c0_353, %c5_354, %c2_355, %c0_356] : memref<2x14x14x2xf32, #tpu.memory_space<vmem>>, vector<2x8x8x2xf32>
    %c37 = arith.constant 37 : index
    %c0_357 = arith.constant 0 : index
    %395 = vector.load %arg10[%c37, %c0_357] : memref<49x2xf32, #tpu.memory_space<vmem>>, vector<1x2xf32>
    %396 = vector.shape_cast %395 : vector<1x2xf32> to vector<1x1x1x2xf32>
    %397 = vector.broadcast %396 : vector<1x1x1x2xf32> to vector<2x8x8x2xf32>
    %398 = arith.mulf %394, %397 : vector<2x8x8x2xf32>
    %399 = arith.addf %393, %398 : vector<2x8x8x2xf32>
    %c0_358 = arith.constant 0 : index
    %c5_359 = arith.constant 5 : index
    %c3_360 = arith.constant 3 : index
    %c0_361 = arith.constant 0 : index
    %400 = vector.load %arg13[%c0_358, %c5_359, %c3_360, %c0_361] : memref<2x14x14x2xf32, #tpu.memory_space<vmem>>, vector<2x8x8x2xf32>
    %c38 = arith.constant 38 : index
    %c0_362 = arith.constant 0 : index
    %401 = vector.load %arg10[%c38, %c0_362] : memref<49x2xf32, #tpu.memory_space<vmem>>, vector<1x2xf32>
    %402 = vector.shape_cast %401 : vector<1x2xf32> to vector<1x1x1x2xf32>
    %403 = vector.broadcast %402 : vector<1x1x1x2xf32> to vector<2x8x8x2xf32>
    %404 = arith.mulf %400, %403 : vector<2x8x8x2xf32>
    %405 = arith.addf %399, %404 : vector<2x8x8x2xf32>
    %c0_363 = arith.constant 0 : index
    %c5_364 = arith.constant 5 : index
    %c4_365 = arith.constant 4 : index
    %c0_366 = arith.constant 0 : index
    %406 = vector.load %arg13[%c0_363, %c5_364, %c4_365, %c0_366] : memref<2x14x14x2xf32, #tpu.memory_space<vmem>>, vector<2x8x8x2xf32>
    %c39 = arith.constant 39 : index
    %c0_367 = arith.constant 0 : index
    %407 = vector.load %arg10[%c39, %c0_367] : memref<49x2xf32, #tpu.memory_space<vmem>>, vector<1x2xf32>
    %408 = vector.shape_cast %407 : vector<1x2xf32> to vector<1x1x1x2xf32>
    %409 = vector.broadcast %408 : vector<1x1x1x2xf32> to vector<2x8x8x2xf32>
    %410 = arith.mulf %406, %409 : vector<2x8x8x2xf32>
    %411 = arith.addf %405, %410 : vector<2x8x8x2xf32>
    %c0_368 = arith.constant 0 : index
    %c5_369 = arith.constant 5 : index
    %c5_370 = arith.constant 5 : index
    %c0_371 = arith.constant 0 : index
    %412 = vector.load %arg13[%c0_368, %c5_369, %c5_370, %c0_371] : memref<2x14x14x2xf32, #tpu.memory_space<vmem>>, vector<2x8x8x2xf32>
    %c40 = arith.constant 40 : index
    %c0_372 = arith.constant 0 : index
    %413 = vector.load %arg10[%c40, %c0_372] : memref<49x2xf32, #tpu.memory_space<vmem>>, vector<1x2xf32>
    %414 = vector.shape_cast %413 : vector<1x2xf32> to vector<1x1x1x2xf32>
    %415 = vector.broadcast %414 : vector<1x1x1x2xf32> to vector<2x8x8x2xf32>
    %416 = arith.mulf %412, %415 : vector<2x8x8x2xf32>
    %417 = arith.addf %411, %416 : vector<2x8x8x2xf32>
    %c0_373 = arith.constant 0 : index
    %c5_374 = arith.constant 5 : index
    %c6_375 = arith.constant 6 : index
    %c0_376 = arith.constant 0 : index
    %418 = vector.load %arg13[%c0_373, %c5_374, %c6_375, %c0_376] : memref<2x14x14x2xf32, #tpu.memory_space<vmem>>, vector<2x8x8x2xf32>
    %c41 = arith.constant 41 : index
    %c0_377 = arith.constant 0 : index
    %419 = vector.load %arg10[%c41, %c0_377] : memref<49x2xf32, #tpu.memory_space<vmem>>, vector<1x2xf32>
    %420 = vector.shape_cast %419 : vector<1x2xf32> to vector<1x1x1x2xf32>
    %421 = vector.broadcast %420 : vector<1x1x1x2xf32> to vector<2x8x8x2xf32>
    %422 = arith.mulf %418, %421 : vector<2x8x8x2xf32>
    %423 = arith.addf %417, %422 : vector<2x8x8x2xf32>
    %c0_378 = arith.constant 0 : index
    %c6_379 = arith.constant 6 : index
    %c0_380 = arith.constant 0 : index
    %c0_381 = arith.constant 0 : index
    %424 = vector.load %arg13[%c0_378, %c6_379, %c0_380, %c0_381] : memref<2x14x14x2xf32, #tpu.memory_space<vmem>>, vector<2x8x8x2xf32>
    %c42 = arith.constant 42 : index
    %c0_382 = arith.constant 0 : index
    %425 = vector.load %arg10[%c42, %c0_382] : memref<49x2xf32, #tpu.memory_space<vmem>>, vector<1x2xf32>
    %426 = vector.shape_cast %425 : vector<1x2xf32> to vector<1x1x1x2xf32>
    %427 = vector.broadcast %426 : vector<1x1x1x2xf32> to vector<2x8x8x2xf32>
    %428 = arith.mulf %424, %427 : vector<2x8x8x2xf32>
    %429 = arith.addf %423, %428 : vector<2x8x8x2xf32>
    %c0_383 = arith.constant 0 : index
    %c6_384 = arith.constant 6 : index
    %c1_385 = arith.constant 1 : index
    %c0_386 = arith.constant 0 : index
    %430 = vector.load %arg13[%c0_383, %c6_384, %c1_385, %c0_386] : memref<2x14x14x2xf32, #tpu.memory_space<vmem>>, vector<2x8x8x2xf32>
    %c43 = arith.constant 43 : index
    %c0_387 = arith.constant 0 : index
    %431 = vector.load %arg10[%c43, %c0_387] : memref<49x2xf32, #tpu.memory_space<vmem>>, vector<1x2xf32>
    %432 = vector.shape_cast %431 : vector<1x2xf32> to vector<1x1x1x2xf32>
    %433 = vector.broadcast %432 : vector<1x1x1x2xf32> to vector<2x8x8x2xf32>
    %434 = arith.mulf %430, %433 : vector<2x8x8x2xf32>
    %435 = arith.addf %429, %434 : vector<2x8x8x2xf32>
    %c0_388 = arith.constant 0 : index
    %c6_389 = arith.constant 6 : index
    %c2_390 = arith.constant 2 : index
    %c0_391 = arith.constant 0 : index
    %436 = vector.load %arg13[%c0_388, %c6_389, %c2_390, %c0_391] : memref<2x14x14x2xf32, #tpu.memory_space<vmem>>, vector<2x8x8x2xf32>
    %c44 = arith.constant 44 : index
    %c0_392 = arith.constant 0 : index
    %437 = vector.load %arg10[%c44, %c0_392] : memref<49x2xf32, #tpu.memory_space<vmem>>, vector<1x2xf32>
    %438 = vector.shape_cast %437 : vector<1x2xf32> to vector<1x1x1x2xf32>
    %439 = vector.broadcast %438 : vector<1x1x1x2xf32> to vector<2x8x8x2xf32>
    %440 = arith.mulf %436, %439 : vector<2x8x8x2xf32>
    %441 = arith.addf %435, %440 : vector<2x8x8x2xf32>
    %c0_393 = arith.constant 0 : index
    %c6_394 = arith.constant 6 : index
    %c3_395 = arith.constant 3 : index
    %c0_396 = arith.constant 0 : index
    %442 = vector.load %arg13[%c0_393, %c6_394, %c3_395, %c0_396] : memref<2x14x14x2xf32, #tpu.memory_space<vmem>>, vector<2x8x8x2xf32>
    %c45 = arith.constant 45 : index
    %c0_397 = arith.constant 0 : index
    %443 = vector.load %arg10[%c45, %c0_397] : memref<49x2xf32, #tpu.memory_space<vmem>>, vector<1x2xf32>
    %444 = vector.shape_cast %443 : vector<1x2xf32> to vector<1x1x1x2xf32>
    %445 = vector.broadcast %444 : vector<1x1x1x2xf32> to vector<2x8x8x2xf32>
    %446 = arith.mulf %442, %445 : vector<2x8x8x2xf32>
    %447 = arith.addf %441, %446 : vector<2x8x8x2xf32>
    %c0_398 = arith.constant 0 : index
    %c6_399 = arith.constant 6 : index
    %c4_400 = arith.constant 4 : index
    %c0_401 = arith.constant 0 : index
    %448 = vector.load %arg13[%c0_398, %c6_399, %c4_400, %c0_401] : memref<2x14x14x2xf32, #tpu.memory_space<vmem>>, vector<2x8x8x2xf32>
    %c46 = arith.constant 46 : index
    %c0_402 = arith.constant 0 : index
    %449 = vector.load %arg10[%c46, %c0_402] : memref<49x2xf32, #tpu.memory_space<vmem>>, vector<1x2xf32>
    %450 = vector.shape_cast %449 : vector<1x2xf32> to vector<1x1x1x2xf32>
    %451 = vector.broadcast %450 : vector<1x1x1x2xf32> to vector<2x8x8x2xf32>
    %452 = arith.mulf %448, %451 : vector<2x8x8x2xf32>
    %453 = arith.addf %447, %452 : vector<2x8x8x2xf32>
    %c0_403 = arith.constant 0 : index
    %c6_404 = arith.constant 6 : index
    %c5_405 = arith.constant 5 : index
    %c0_406 = arith.constant 0 : index
    %454 = vector.load %arg13[%c0_403, %c6_404, %c5_405, %c0_406] : memref<2x14x14x2xf32, #tpu.memory_space<vmem>>, vector<2x8x8x2xf32>
    %c47 = arith.constant 47 : index
    %c0_407 = arith.constant 0 : index
    %455 = vector.load %arg10[%c47, %c0_407] : memref<49x2xf32, #tpu.memory_space<vmem>>, vector<1x2xf32>
    %456 = vector.shape_cast %455 : vector<1x2xf32> to vector<1x1x1x2xf32>
    %457 = vector.broadcast %456 : vector<1x1x1x2xf32> to vector<2x8x8x2xf32>
    %458 = arith.mulf %454, %457 : vector<2x8x8x2xf32>
    %459 = arith.addf %453, %458 : vector<2x8x8x2xf32>
    %c0_408 = arith.constant 0 : index
    %c6_409 = arith.constant 6 : index
    %c6_410 = arith.constant 6 : index
    %c0_411 = arith.constant 0 : index
    %460 = vector.load %arg13[%c0_408, %c6_409, %c6_410, %c0_411] : memref<2x14x14x2xf32, #tpu.memory_space<vmem>>, vector<2x8x8x2xf32>
    %c48 = arith.constant 48 : index
    %c0_412 = arith.constant 0 : index
    %461 = vector.load %arg10[%c48, %c0_412] : memref<49x2xf32, #tpu.memory_space<vmem>>, vector<1x2xf32>
    %462 = vector.shape_cast %461 : vector<1x2xf32> to vector<1x1x1x2xf32>
    %463 = vector.broadcast %462 : vector<1x1x1x2xf32> to vector<2x8x8x2xf32>
    %464 = arith.mulf %460, %463 : vector<2x8x8x2xf32>
    %465 = arith.addf %459, %464 : vector<2x8x8x2xf32>
    %cst_413 = arith.constant dense<0.000000e+00> : vector<2x8x8xf32>
    %466 = vector.multi_reduction <add>, %465, %cst_413 [3] : vector<2x8x8x2xf32> to vector<2x8x8xf32>
    %467 = vector.shape_cast %466 : vector<2x8x8xf32> to vector<2x8x8x1xf32>
    %cst_414 = arith.constant 0.000000e+00 : f32
    %468 = vector.broadcast %cst_414 : f32 to vector<2x8x8x1xf32>
    %469 = arith.subf %468, %467 : vector<2x8x8x1xf32>
    %470 = math.exp %469 : vector<2x8x8x1xf32>
    %cst_415 = arith.constant 1.000000e+00 : f32
    %471 = vector.broadcast %cst_415 : f32 to vector<2x8x8x1xf32>
    %472 = arith.addf %471, %470 : vector<2x8x8x1xf32>
    %473 = tpu.reciprocal %472 {approx = true} : vector<2x8x8x1xf32> -> vector<2x8x8x1xf32>
    %474 = vector.broadcast %473 : vector<2x8x8x1xf32> to vector<2x8x8x128xf32>
    %475 = arith.mulf %474, %155 : vector<2x8x8x128xf32>
    %c0_416 = arith.constant 0 : index
    %c0_417 = arith.constant 0 : index
    %c0_418 = arith.constant 0 : index
    %c0_419 = arith.constant 0 : index
    %476 = vector.load %arg11[%c0_416, %c0_417, %c0_418, %c0_419] : memref<2x8x8x128xf32, #tpu.memory_space<vmem>>, vector<2x8x8x128xf32>
    tpu.vector_store %arg11[%c0_416, %c0_417, %c0_418, %c0_419], %475 {strides = array<i32>} : memref<2x8x8x128xf32, #tpu.memory_space<vmem>>, vector<2x8x8x128xf32>,
    return
  }
  func.func @transform_0(%arg0: i32) -> (i32, i32, i32, i32) {
    %c0_i32 = arith.constant 0 : i32
    %c0_i32_0 = arith.constant 0 : i32
    %c0_i32_1 = arith.constant 0 : i32
    %c0_i32_2 = arith.constant 0 : i32
    return %arg0, %c0_i32, %c0_i32_0, %c0_i32_1 : i32, i32, i32, i32
  }
  func.func @transform_1(%arg0: i32) -> (i32, i32, i32, i32) {
    %c0_i32 = arith.constant 0 : i32
    %c0_i32_0 = arith.constant 0 : i32
    %c0_i32_1 = arith.constant 0 : i32
    %c0_i32_2 = arith.constant 0 : i32
    return %arg0, %c0_i32, %c0_i32_0, %c0_i32_1 : i32, i32, i32, i32
  }
  func.func @transform_2(%arg0: i32) -> (i32, i32) {
    %c0_i32 = arith.constant 0 : i32
    %c0_i32_0 = arith.constant 0 : i32
    %c0_i32_1 = arith.constant 0 : i32
    return %c0_i32, %c0_i32_0 : i32, i32
  }
  func.func @transform_3(%arg0: i32) -> (i32, i32) {
    %c0_i32 = arith.constant 0 : i32
    %c0_i32_0 = arith.constant 0 : i32
    %c0_i32_1 = arith.constant 0 : i32
    return %c0_i32, %c0_i32_0 : i32, i32
  }
  func.func @transform_4(%arg0: i32) -> (i32, i32, i32) {
    %c0_i32 = arith.constant 0 : i32
    %c0_i32_0 = arith.constant 0 : i32
    %c0_i32_1 = arith.constant 0 : i32
    %c0_i32_2 = arith.constant 0 : i32
    return %c0_i32, %c0_i32_0, %c0_i32_1 : i32, i32, i32
  }
  func.func @transform_5(%arg0: i32) -> (i32, i32) {
    %c0_i32 = arith.constant 0 : i32
    %c0_i32_0 = arith.constant 0 : i32
    %c0_i32_1 = arith.constant 0 : i32
    return %c0_i32, %c0_i32_0 : i32, i32
  }
  func.func @transform_6(%arg0: i32) -> (i32, i32) {
    %c0_i32 = arith.constant 0 : i32
    %c0_i32_0 = arith.constant 0 : i32
    %c0_i32_1 = arith.constant 0 : i32
    return %c0_i32, %c0_i32_0 : i32, i32
  }
  func.func @transform_7(%arg0: i32) -> (i32, i32) {
    %c0_i32 = arith.constant 0 : i32
    %c0_i32_0 = arith.constant 0 : i32
    %c0_i32_1 = arith.constant 0 : i32
    return %c0_i32, %c0_i32_0 : i32, i32
  }
  func.func @transform_8(%arg0: i32) -> (i32, i32) {
    %c0_i32 = arith.constant 0 : i32
    %c0_i32_0 = arith.constant 0 : i32
    %c0_i32_1 = arith.constant 0 : i32
    return %c0_i32, %c0_i32_0 : i32, i32
  }
  func.func @transform_9(%arg0: i32) -> (i32, i32) {
    %c0_i32 = arith.constant 0 : i32
    %c0_i32_0 = arith.constant 0 : i32
    %c0_i32_1 = arith.constant 0 : i32
    return %c0_i32, %c0_i32_0 : i32, i32
  }
  func.func @transform_10(%arg0: i32) -> (i32, i32, i32, i32) {
    %c0_i32 = arith.constant 0 : i32
    %c0_i32_0 = arith.constant 0 : i32
    %c0_i32_1 = arith.constant 0 : i32
    %c0_i32_2 = arith.constant 0 : i32
    return %arg0, %c0_i32, %c0_i32_0, %c0_i32_1 : i32, i32, i32, i32
  }
}

</mosaic_0001>

<bundles_post_ra>
// kernel: block_cfl_spatial_forward.1
= control target key start
LH: loop header
LB: loop body
LE: loop exit
PB: predicated region body
PF: predicated region fallthrough
CT: control target
= control target key end

     0   :  { %15 = vsyncpa [#allocation5], 0  ;;  %s11223_s0 = inlined_call_operand.hbm [shape: f32[2,8,8,32], index: 0, kind: input, shape index: {}]   ;;  %s11224_s1 = inlined_call_operand.hbm [shape: f32[2,8,8,4], index: 1, kind: input, shape index: {}]   ;;  %s11225_s2 = inlined_call_operand.hbm [shape: f32[1,32], index: 2, kind: input, shape index: {}]   ;;  %s11226_s3 = inlined_call_operand.hbm [shape: f32[1,32], index: 3, kind: input, shape index: {}]   ;;  %s11227_s4 = inlined_call_operand.hbm [shape: bf16[9,32,32], index: 4, kind: input, shape index: {}]   ;;  %s11228_s5 = inlined_call_operand.hbm [shape: f32[1,32], index: 5, kind: input, shape index: {}]   ;;  %s11229_s6 = inlined_call_operand.hbm [shape: f32[1,32], index: 6, kind: input, shape index: {}]   ;;  %s11230_s7 = inlined_call_operand.hbm [shape: bf16[32,32], index: 7, kind: input, shape index: {}]   ;;  %s11231_s8 = inlined_call_operand.hbm [shape: bf16[32,128], index: 8, kind: input, shape index: {}]   ;;  %s11232_s9 = inlined_call_operand.hbm [shape: f32[49,2], index: 9, kind: input, shape index: {}]   ;;  %s11233_s10 = inlined_call_operand.hbm [shape: f32[2,8,8,128], index: 10, kind: output, shape index: {}]  }
   0x1   :  { %16 = vsyncpa [#allocation8], 0 }
   0x2   :  { %17 = vsyncpa [#allocation11], 0 }
   0x3   :  { %18 = vsyncpa [#allocation14], 0 }
   0x4   :  { %19 = vsyncpa [#allocation17], 0 }
   0x5   :  { %20 = vsyncpa [#allocation20], 0 }
   0x6   :  { %21 = vsyncpa [#allocation6], 0  ;;  %s7174_s13 = smov [#allocation7]   ;;  %s7175_s15 = smov [#allocation10]  }
   0x7   :  { %s39_s14 = sshll.u32 %s7174_s13, 4  ;;  %s62_s16 = sshll.u32 %s7175_s15, 4  ;;  %s40_s14 = int_to_ptr.vmem [resolvable:$true] %s39_s14  ;;  %s7246_s16 = int_to_ptr.vmem [resolvable:$true] %s62_s16 }
   0x8   :  { %s6918_s19 = scalar_lea.hbm %s11224_s1, 2048 }
   0x9   :  { %p6919_p0 = scmp.ne.s32.totalorder %s11224_s1, %s6918_s19  ;;  %p6922_p1 = scmp.lt.u32.totalorder %s6918_s19, %s11224_s1 }
   0xb   :  { %p6924_p2 = pnand %p6922_p1, %p6919_p0 }
   0xd   :  { %6927 = shalt.err (!%p6924_p2)
}
   0xe   :  { %s6928_s24 = scalar_lea.vmem %s40_s14, 2048  ;;  %p6933_p4 = scmp.lt.s32.totalorder %s40_s14, %s40_s14 }
   0xf   :  { %p6929_p3 = scmp.ne.s32.totalorder %s40_s14, %s6928_s24  ;;  %p6934_p5 = scmp.lt.s32.totalorder %s6928_s24, %s6928_s24 }
  0x11   :  { %p6935_p6 = por %p6934_p5, %p6933_p4 }
  0x13   :  { %p6936_p7 = pnand %p6935_p6, %p6929_p3 }
  0x15   :  { %6939 = shalt.err (!%p6936_p7)
}
  0x16   :  { %s7176_s25 = smov 128   ;;  %s7177_s26 = smov 8  }
  0x17   :  { %45 = dma.hbm_to_vmem [thread:$0]  %s11224_s1, 2048, %s40_s14, [#allocation8], %s7176_s25, %s7176_s25, %s7177_s26  }
  0x18   :  { %s6940_s11 = scalar_lea.hbm %s11226_s3, 16 }
  0x19   :  { %p6941_p8 = scmp.ne.s32.totalorder %s11226_s3, %s6940_s11  ;;  %p6944_p9 = scmp.lt.u32.totalorder %s6940_s11, %s11226_s3 }
  0x1b   :  { %p6946_p10 = pnand %p6944_p9, %p6941_p8 }
  0x1d   :  { %6949 = shalt.err (!%p6946_p10)
}
  0x1e   :  { %s6950_s18 = scalar_lea.vmem %s7246_s16, 16  ;;  %s6954_s1 = scalar_lea.vmem %s7246_s16, 32 }
  0x1f   :  { %p6951_p11 = scmp.ne.s32.totalorder %s7246_s16, %s6950_s18  ;;  %p6955_p12 = scmp.lt.s32.totalorder %s7246_s16, %s7246_s16 }
  0x20   :  { %p6956_p13 = scmp.lt.s32.totalorder %s6954_s1, %s6950_s18 }
  0x22   :  { %p6957_p0 = por %p6956_p13, %p6955_p12 }
  0x24   :  { %p6958_p1 = pnand %p6957_p0, %p6951_p11 }
  0x26   :  { %6961 = shalt.err (!%p6958_p1)
}
  0x27   :  { %65 = dma.hbm_to_vmem [thread:$0]  %s11226_s3, 16, %s7246_s16, [#allocation11]  }
  0x28   :  { %s7178_s20 = smov [#allocation13]   ;;  %s6962_s24 = scalar_lea.hbm %s11228_s5, 16 }
  0x29   :  { %s84_s21 = sshll.u32 %s7178_s20, 4  ;;  %p6963_p2 = scmp.ne.s32.totalorder %s11228_s5, %s6962_s24  ;;  %s85_s21 = int_to_ptr.vmem [resolvable:$true] %s84_s21 }
  0x2a   :  { %p6966_p3 = scmp.lt.u32.totalorder %s6962_s24, %s11228_s5 }
  0x2c   :  { %p6968_p4 = pnand %p6966_p3, %p6963_p2 }
  0x2e   :  { %6971 = shalt.err (!%p6968_p4)
}
  0x2f   :  { %s6972_s11 = scalar_lea.vmem %s85_s21, 16  ;;  %s6976_s3 = scalar_lea.vmem %s85_s21, 32 }
  0x30   :  { %p6973_p5 = scmp.ne.s32.totalorder %s85_s21, %s6972_s11  ;;  %p6977_p6 = scmp.lt.s32.totalorder %s85_s21, %s85_s21 }
  0x31   :  { %p6978_p7 = scmp.lt.s32.totalorder %s6976_s3, %s6972_s11 }
  0x33   :  { %p6979_p8 = por %p6978_p7, %p6977_p6 }
  0x35   :  { %p6980_p9 = pnand %p6979_p8, %p6973_p5 }
  0x37   :  { %6983 = shalt.err (!%p6980_p9)
}
  0x38   :  { %87 = dma.hbm_to_vmem [thread:$0]  %s11228_s5, 16, %s85_s21, [#allocation14]  }
  0x39   :  { %s7179_s13 = smov [#allocation16]   ;;  %s7180_s17 = smov [#allocation4]  }
  0x3a   :  { %s103_s15 = sshll.u32 %s7179_s13, 4  ;;  %s27_s18 = sshll.u32 %s7180_s17, 4  ;;  %s104_s15 = int_to_ptr.vmem [resolvable:$true] %s103_s15  ;;  %s28_s18 = int_to_ptr.vmem [resolvable:$true] %s27_s18 }
  0x3b   :  { %s6984_s19 = scalar_lea.hbm %s11230_s7, 256 }
  0x3c   :  { %p6985_p10 = scmp.ne.s32.totalorder %s11230_s7, %s6984_s19  ;;  %p6988_p11 = scmp.lt.u32.totalorder %s6984_s19, %s11230_s7 }
  0x3e   :  { %p6990_p12 = pnand %p6988_p11, %p6985_p10 }
  0x40   :  { %6993 = shalt.err (!%p6990_p12)
}
  0x41   :  { %s6994_s5 = scalar_lea.vmem %s104_s15, 256  ;;  %p6999_p0 = scmp.lt.s32.totalorder %s104_s15, %s104_s15 }
  0x42   :  { %p6995_p13 = scmp.ne.s32.totalorder %s104_s15, %s6994_s5  ;;  %p7000_p1 = scmp.lt.s32.totalorder %s6994_s5, %s6994_s5 }
  0x44   :  { %p7001_p2 = por %p7000_p1, %p6999_p0 }
  0x46   :  { %p7002_p3 = pnand %p7001_p2, %p6995_p13 }
  0x48   :  { %7005 = shalt.err (!%p7002_p3)
}
  0x49   :  { %s7181_s21 = smov 64   ;;  %s7182_s27 = smov 4  }
  0x4a   :  { %109 = dma.hbm_to_vmem [thread:$0]  %s11230_s7, 256, %s104_s15, [#allocation17], %s7181_s21, %s7181_s21, %s7182_s27  }
  0x4b   :  { %s7006_s3 = scalar_lea.hbm %s11223_s0, 2048 }
  0x4c   :  { %p7007_p4 = scmp.ne.s32.totalorder %s11223_s0, %s7006_s3  ;;  %p7010_p5 = scmp.lt.u32.totalorder %s7006_s3, %s11223_s0 }
  0x4e   :  { %p7012_p6 = pnand %p7010_p5, %p7007_p4 }
  0x50   :  { %7015 = shalt.err (!%p7012_p6)
}
  0x51   :  { %s7016_s1 = scalar_lea.vmem %s28_s18, 2048  ;;  %p7021_p8 = scmp.lt.s32.totalorder %s28_s18, %s28_s18 }
  0x52   :  { %p7017_p7 = scmp.ne.s32.totalorder %s28_s18, %s7016_s1  ;;  %p7022_p9 = scmp.lt.s32.totalorder %s7016_s1, %s7016_s1 }
  0x54   :  { %p7023_p10 = por %p7022_p9, %p7021_p8 }
  0x56   :  { %p7024_p11 = pnand %p7023_p10, %p7017_p7 }
  0x58   :  { %7027 = shalt.err (!%p7024_p11)
}
  0x59   :  { %33 = dma.hbm_to_vmem [thread:$0]  %s11223_s0, 2048, %s28_s18, [#allocation5], %s7176_s25, %s7176_s25, %s7177_s26  }
  0x5a   :  { %s7183_s14 = smov [#allocation9]   ;;  %s7184_s20 = smov [#allocation12]  }
  0x5b   :  { %s52_s19 = sshll.u32 %s7183_s14, 4  ;;  %s71_s22 = sshll.u32 %s7184_s20, 4  ;;  %s53_s19 = int_to_ptr.vmem [resolvable:$true] %s52_s19  ;;  %s72_s22 = int_to_ptr.vmem [resolvable:$true] %s71_s22 }
  0x5c   :  { %s7028_s5 = scalar_lea.hbm %s11225_s2, 16 }
  0x5d   :  { %p7029_p12 = scmp.ne.s32.totalorder %s11225_s2, %s7028_s5  ;;  %p7032_p13 = scmp.lt.u32.totalorder %s7028_s5, %s11225_s2 }
  0x5f   :  { %p7034_p0 = pnand %p7032_p13, %p7029_p12 }
  0x61   :  { %7037 = shalt.err (!%p7034_p0)
}
  0x62   :  { %s7038_s0 = scalar_lea.vmem %s53_s19, 16  ;;  %s7042_s18 = scalar_lea.vmem %s53_s19, 32 }
  0x63   :  { %p7039_p1 = scmp.ne.s32.totalorder %s53_s19, %s7038_s0  ;;  %p7043_p2 = scmp.lt.s32.totalorder %s53_s19, %s53_s19 }
  0x64   :  { %p7044_p3 = scmp.lt.s32.totalorder %s7042_s18, %s7038_s0 }
  0x66   :  { %p7045_p4 = por %p7044_p3, %p7043_p2 }
  0x68   :  { %p7046_p5 = pnand %p7045_p4, %p7039_p1 }
  0x6a   :  { %7049 = shalt.err (!%p7046_p5)
}
  0x6b   :  { %55 = dma.hbm_to_vmem [thread:$0]  %s11225_s2, 16, %s53_s19, [#allocation8]  }
  0x6c   :  { %s7050_s17 = scalar_lea.hbm %s11227_s4, 2304 }
  0x6d   :  { %p7051_p6 = scmp.ne.s32.totalorder %s11227_s4, %s7050_s17  ;;  %p7054_p7 = scmp.lt.u32.totalorder %s7050_s17, %s11227_s4 }
  0x6f   :  { %p7056_p8 = pnand %p7054_p7, %p7051_p6 }
  0x71   :  { %7059 = shalt.err (!%p7056_p8)
}
  0x72   :  { %s7060_s20 = scalar_lea.vmem %s72_s22, 2304  ;;  %p7065_p10 = scmp.lt.s32.totalorder %s72_s22, %s72_s22 }
  0x73   :  { %p7061_p9 = scmp.ne.s32.totalorder %s72_s22, %s7060_s20  ;;  %p7066_p11 = scmp.lt.s32.totalorder %s7060_s20, %s7060_s20 }
  0x75   :  { %p7067_p12 = por %p7066_p11, %p7065_p10 }
  0x77   :  { %p7068_p13 = pnand %p7067_p12, %p7061_p9 }
  0x79   :  { %7071 = shalt.err (!%p7068_p13)
}
  0x7a   :  { %77 = dma.hbm_to_vmem [thread:$0]  %s11227_s4, 2304, %s72_s22, [#allocation11], %s7181_s21, %s7181_s21, %s7182_s27  }
  0x7b   :  { %s7185_s23 = smov [#allocation15]   ;;  %s7186_s5 = smov [#allocation18]  }
  0x7c   :  { %s94_s24 = sshll.u32 %s7185_s23, 4  ;;  %s115_s28 = sshll.u32 %s7186_s5, 4  ;;  %s95_s24 = int_to_ptr.vmem [resolvable:$true] %s94_s24  ;;  %s116_s28 = int_to_ptr.vmem [resolvable:$true] %s115_s28 }
  0x7d   :  { %s7072_s11 = scalar_lea.hbm %s11229_s6, 16 }
  0x7e   :  { %p7073_p0 = scmp.ne.s32.totalorder %s11229_s6, %s7072_s11  ;;  %p7076_p1 = scmp.lt.u32.totalorder %s7072_s11, %s11229_s6 }
  0x80   :  { %p7078_p2 = pnand %p7076_p1, %p7073_p0 }
  0x82   :  { %7081 = shalt.err (!%p7078_p2)
}
  0x83   :  { %s7082_s4 = scalar_lea.vmem %s95_s24, 16  ;;  %s7086_s22 = scalar_lea.vmem %s95_s24, 32 }
  0x84   :  { %p7083_p3 = scmp.ne.s32.totalorder %s95_s24, %s7082_s4  ;;  %p7087_p4 = scmp.lt.s32.totalorder %s95_s24, %s95_s24 }
  0x85   :  { %p7088_p5 = scmp.lt.s32.totalorder %s7086_s22, %s7082_s4 }
  0x87   :  { %p7089_p6 = por %p7088_p5, %p7087_p4 }
  0x89   :  { %p7090_p7 = pnand %p7089_p6, %p7083_p3 }
  0x8b   :  { %7093 = shalt.err (!%p7090_p7)
}
  0x8c   :  { %97 = dma.hbm_to_vmem [thread:$0]  %s11229_s6, 16, %s95_s24, [#allocation14]  }
  0x8d   :  { %s7094_s7 = scalar_lea.hbm %s11231_s8, 256 }
  0x8e   :  { %p7095_p8 = scmp.ne.s32.totalorder %s11231_s8, %s7094_s7  ;;  %p7098_p9 = scmp.lt.u32.totalorder %s7094_s7, %s11231_s8 }
  0x90   :  { %p7100_p10 = pnand %p7098_p9, %p7095_p8 }
  0x92   :  { %7103 = shalt.err (!%p7100_p10)
}
  0x93   :  { %s7104_s19 = scalar_lea.vmem %s116_s28, 256  ;;  %p7109_p12 = scmp.lt.s32.totalorder %s116_s28, %s116_s28 }
  0x94   :  { %p7105_p11 = scmp.ne.s32.totalorder %s116_s28, %s7104_s19  ;;  %p7110_p13 = scmp.lt.s32.totalorder %s7104_s19, %s7104_s19 }
  0x96   :  { %p7111_p0 = por %p7110_p13, %p7109_p12 }
  0x98   :  { %p7112_p1 = pnand %p7111_p0, %p7105_p11 }
  0x9a   :  { %7115 = shalt.err (!%p7112_p1)
}
  0x9b   :  { %121 = dma.hbm_to_vmem [thread:$0]  %s11231_s8, 256, %s116_s28, [#allocation17], %s7181_s21, %s7181_s21, %s7182_s27  }
  0x9c   :  { %s7187_s24 = smov [#allocation19]   ;;  %s7116_s11 = scalar_lea.hbm %s11232_s9, 896 }
  0x9d   :  { %s127_s5 = sshll.u32 %s7187_s24, 4  ;;  %p7117_p2 = scmp.ne.s32.totalorder %s11232_s9, %s7116_s11  ;;  %s128_s5 = int_to_ptr.vmem [resolvable:$true] %s127_s5 }
  0x9e   :  { %p7120_p3 = scmp.lt.u32.totalorder %s7116_s11, %s11232_s9 }
  0xa0   :  { %p7122_p4 = pnand %p7120_p3, %p7117_p2 }
  0xa2   :  { %7125 = shalt.err (!%p7122_p4)
}
  0xa3   :  { %s7126_s4 = scalar_lea.vmem %s128_s5, 896  ;;  %p7131_p6 = scmp.lt.s32.totalorder %s128_s5, %s128_s5 }
  0xa4   :  { %p7127_p5 = scmp.ne.s32.totalorder %s128_s5, %s7126_s4  ;;  %p7132_p7 = scmp.lt.s32.totalorder %s7126_s4, %s7126_s4 }
  0xa6   :  { %p7133_p8 = por %p7132_p7, %p7131_p6 }
  0xa8   :  { %p7134_p9 = pnand %p7133_p8, %p7127_p5 }
  0xaa   :  { %7137 = shalt.err (!%p7134_p9)
}
  0xab   :  { %133 = dma.hbm_to_vmem [thread:$0]  %s11232_s9, 896, %s128_s5, [#allocation20], %s7176_s25, %s7176_s25, %s7177_s26  }
  0xac   :  { %7160 = dma.done.wait [#allocation5], 2048  }
  0xad   :  { %7161 = vsyncadd [#allocation5], 4294965248 }
  0xae   :  { %7162 = dma.done.wait [#allocation8], 2064  }
  0xaf   :  { %7163 = vsyncadd [#allocation8], 4294965232 }
  0xb0   :  { %7164 = dma.done.wait [#allocation11], 2320  }
  0xb1   :  { %7165 = vsyncadd [#allocation11], 4294964976 }
  0xb2   :  { %7166 = dma.done.wait [#allocation14], 32  }
  0xb3   :  { %7167 = vsyncadd [#allocation14], 4294967264 }
  0xb4   :  { %7168 = dma.done.wait [#allocation17], 512  }
  0xb5   :  { %7169 = vsyncadd [#allocation17], 4294966784 }
  0xb6   :  { %7170 = dma.done.wait [#allocation20], 896  }
  0xb7   :  { %7171 = vsyncadd [#allocation20], 4294966400  ;;  %vm181_vm0 = vcmask 261120   ;;  %v7392_v0 = vld [vmem:[#allocation4 + $0x10] sm:$0xff]  ;;  %v7394_v1 = vld [vmem:[#allocation4] sm:$0xff]  ;;  %vm486_vm1 = vcmask 254976  }
  0xb8   :  { %v7396_v2 = vld [vmem:[#allocation4 + $0x18] sm:$0xff]  ;;  %v188_v3 = vsel %vm181_vm0, %v7392_v0, 0.0  ;;  %v182_v4 = vsel %vm181_vm0, %v7394_v1, 0.0  ;;  %v7402_v5 = vld [vmem:[#allocation4 + $0x8] sm:$0xff]  ;;  %v247_v9 = vmul.f32 %v7394_v1, %v7394_v1  ;;  %v249_v11 = vmul.f32 %v7392_v0, %v7392_v0  ;;  %v7420_v15 = vld [vmem:[#allocation4 + $0x20] sm:$0xff]  ;;  %s7190_s9 = smov [#allocation21]  }
  0xb9   :  { %189 = vadd.xlane.f32.xlu1 %v188_v3  ;;  %183 = vadd.xlane.f32.xlu0 %v182_v4  ;;  %v191_v6 = vsel %vm181_vm0, %v7396_v2, 0.0  ;;  %v185_v7 = vsel %vm181_vm0, %v7402_v5, 0.0  ;;  %v248_v8 = vmul.f32 %v7402_v5, %v7402_v5  ;;  %v250_v10 = vmul.f32 %v7396_v2, %v7396_v2  ;;  %v7418_v14 = vld [vmem:[#allocation4 + $0x28] sm:$0xff]  ;;  %v7424_v18 = vld [vmem:[#allocation4 + $0x38] sm:$0xff]  ;;  %v7426_v19 = vld [vmem:[#allocation4 + $0x30] sm:$0xff]  ;;  %s5923_s27 = sshll.u32 %s7190_s9, 4  ;;  %s5924_s27 = int_to_ptr.vmem [resolvable:$true] %s5923_s27 }
  0xba   :  { %v263_v13 = vsel %vm181_vm0, %v247_v9, 0.0  ;;  %v269_v17 = vsel %vm181_vm0, %v249_v11, 0.0  ;;  %v197_v20 = vsel %vm181_vm0, %v7418_v14, 0.0  ;;  %v194_v21 = vsel %vm181_vm0, %v7420_v15, 0.0  ;;  %v7448_v32 = vld [vmem:[#allocation4 + $0x48] sm:$0xff]  ;;  %v7450_v33 = vld [vmem:[#allocation4 + $0x40] sm:$0xff]  ;;  %p7143_p11 = scmp.lt.s32.totalorder %s5924_s27, %s5924_s27 }
  0xbb   :  { %v266_v12 = vsel %vm181_vm0, %v248_v8, 0.0  ;;  %v272_v16 = vsel %vm181_vm0, %v250_v10, 0.0  ;;  %v203_v22 = vsel %vm181_vm0, %v7424_v18, 0.0  ;;  %v200_v23 = vsel %vm181_vm0, %v7426_v19, 0.0  ;;  %v7456_v36 = vld [vmem:[#allocation4 + $0x58] sm:$0xff]  ;;  %v7458_v37 = vld [vmem:[#allocation4 + $0x50] sm:$0xff] }
  0xbc   :  { %v252_v24 = vmul.f32 %v7418_v14, %v7418_v14  ;;  %v251_v25 = vmul.f32 %v7420_v15, %v7420_v15  ;;  %v254_v28 = vmul.f32 %v7424_v18, %v7424_v18  ;;  %v253_v29 = vmul.f32 %v7426_v19, %v7426_v19  ;;  %v7476_v48 = vld [vmem:[#allocation4 + $0x68] sm:$0xff]  ;;  %v7478_v49 = vld [vmem:[#allocation4 + $0x60] sm:$0xff]  ;;  %v7484_v52 = vld [vmem:[#allocation4 + $0x78] sm:$0xff]  ;;  %s7138_s28 = scalar_lea.vmem %s5924_s27, 2048 }
  0xbd   :  { %192 = vadd.xlane.f32.xlu1 %v191_v6  ;;  %186 = vadd.xlane.f32.xlu0 %v185_v7  ;;  %v209_v34 = vsel %vm181_vm0, %v7448_v32, 0.0  ;;  %v206_v35 = vsel %vm181_vm0, %v7450_v33, 0.0  ;;  %v215_v38 = vsel %vm181_vm0, %v7456_v36, 0.0  ;;  %v212_v39 = vsel %vm181_vm0, %v7458_v37, 0.0  ;;  %v7486_v53 = vld [vmem:[#allocation4 + $0x70] sm:$0xff]  ;;  %v6584_v4 = vld [vmem:[#allocation12 + $0x18] sm:$0xff]   ;;  %p7139_p10 = scmp.ne.s32.totalorder %s5924_s27, %s7138_s28  ;;  %p7144_p12 = scmp.lt.s32.totalorder %s7138_s28, %s7138_s28 }
  0xbe   :  { %v278_v26 = vsel %vm181_vm0, %v252_v24, 0.0  ;;  %v275_v27 = vsel %vm181_vm0, %v251_v25, 0.0  ;;  %v284_v30 = vsel %vm181_vm0, %v254_v28, 0.0  ;;  %v281_v31 = vsel %vm181_vm0, %v253_v29, 0.0  ;;  %v6582_v59 = vld [vmem:[#allocation12 + $0x10] sm:$0xff]   ;;  %v7598_v6 = vld [vmem:[#allocation12 + $0x38] sm:$0xff]  }
  0xbf   :  { %v256_v40 = vmul.f32 %v7448_v32, %v7448_v32  ;;  %v255_v41 = vmul.f32 %v7450_v33, %v7450_v33  ;;  %v258_v44 = vmul.f32 %v7456_v36, %v7456_v36  ;;  %v257_v45 = vmul.f32 %v7458_v37, %v7458_v37  ;;  %v7588_v60 = vld [vmem:[#allocation12 + $0x30] sm:$0xff]   ;;  %6213 = vmatprep.subr.bf16.mxu1 %v6582_v59  ;;  %v7604_v9 = vld [vmem:[#allocation12 + $0x40] sm:$0xff]   ;;  %p7145_p13 = por %p7144_p12, %p7143_p11 }
  0xc0   :  { %v221_v50 = vsel %vm181_vm0, %v7476_v48, 0.0  ;;  %v218_v51 = vsel %vm181_vm0, %v7478_v49, 0.0  ;;  %v7188_v54 = vmov 0.0   ;;  %vm495_vm2 = vcmask 253952   ;;  %6273 = vmatprep.subr.bf16.mxu0 %v7588_v60  ;;  %6214 = vmatpush3.bf16.msra.mxu1 %v6582_v59  ;;  %v7607_v10 = vld [vmem:[#allocation12] sm:$0xff]  }
  0xc1   :  { %267 = vadd.xlane.f32.xlu1 %v266_v12  ;;  %264 = vadd.xlane.f32.xlu0 %v263_v13  ;;  %v290_v42 = vsel %vm181_vm0, %v256_v40, 0.0  ;;  %v287_v43 = vsel %vm181_vm0, %v255_v41, 0.0  ;;  %v296_v46 = vsel %vm181_vm0, %v258_v44, 0.0  ;;  %v293_v47 = vsel %vm181_vm0, %v257_v45, 0.0  ;;  %485 = vst.msk [vmem:[#allocation2] sm:$0xff] %vm181_vm0, %v7188_v54  ;;  %488 = vst.msk [vmem:[#allocation2 + $0xa0] sm:$0xff] %vm181_vm0, %v7188_v54  ;;  %p7146_p0 = pnand %p7145_p13, %p7139_p10 }
  0xc2   :  { %487 = vst.msk [vmem:[#allocation2 + $0x8] sm:$0x3] %vm486_vm1, %v7188_v54  ;;  %489 = vst.msk [vmem:[#allocation2 + $0xa8] sm:$0x3] %vm486_vm1, %v7188_v54  ;;  %v227_v55 = vsel %vm181_vm0, %v7484_v52, 0.0  ;;  %v224_v56 = vsel %vm181_vm0, %v7486_v53, 0.0  ;;  %v260_v57 = vmul.f32 %v7476_v48, %v7476_v48  ;;  %v259_v58 = vmul.f32 %v7478_v49, %v7478_v49  ;;  %6274 = vmatpush3.bf16.msra.mxu0 %v7588_v60 }
  0xc3   :  { %491 = vst.msk [vmem:[#allocation2 + $0x90] sm:$0xff] %vm181_vm0, %v7188_v54  ;;  %493 = vst.msk [vmem:[#allocation2 + $0x130] sm:$0xff] %vm181_vm0, %v7188_v54  ;;  %v262_v63 = vmul.f32 %v7484_v52, %v7484_v52  ;;  %v261_v3 = vmul.f32 %v7486_v53, %v7486_v53  ;;  %6215 = vmatprep.subr.bf16.mxu1 %v6584_v4  ;;  %6275 = vmatprep.subr.bf16.mxu0 %v7598_v6  ;;  %vm2923_vm3 = vcmask 31744   ;;  %vm3037_vm4 = vcmask 15360  }
  0xc4   :  { %492 = vst.msk [vmem:[#allocation2 + $0x98] sm:$0x3] %vm486_vm1, %v7188_v54  ;;  %494 = vst.msk [vmem:[#allocation2 + $0x138] sm:$0x3] %vm486_vm1, %v7188_v54  ;;  %v302_v61 = vsel %vm181_vm0, %v260_v57, 0.0  ;;  %v299_v62 = vsel %vm181_vm0, %v259_v58, 0.0  ;;  %6216 = vmatpush3.bf16.msra.mxu1 %v6584_v4 }
  0xc5   :  { %273 = vadd.xlane.f32.xlu1 %v272_v16  ;;  %270 = vadd.xlane.f32.xlu0 %v269_v17  ;;  %496 = vst.msk [vmem:[#allocation2] sm:$0x1] %vm495_vm2, %v7188_v54  ;;  %516 = vst.msk [vmem:[#allocation2 + $0x9] sm:$0x1] %vm495_vm2, %v7188_v54  ;;  %v308_v7 = vsel %vm181_vm0, %v262_v63, 0.0  ;;  %v305_v8 = vsel %vm181_vm0, %v261_v3, 0.0 }
  0xc6   :  { %497 = vst.msk [vmem:[#allocation2 + $0x10] sm:$0x1] %vm495_vm2, %v7188_v54  ;;  %498 = vst.msk [vmem:[#allocation2 + $0x20] sm:$0x1] %vm495_vm2, %v7188_v54  ;;  %6276 = vmatpush3.bf16.msra.mxu0 %v7598_v6  ;;  %6233 = vmatprep.subr.bf16.mxu1 %v7607_v10  ;;  %v7626_v4 = vld [vmem:[#allocation9] ss:$0 sm:$0xff] }
  0xc7   :  { %499 = vst.msk [vmem:[#allocation2 + $0x30] sm:$0x1] %vm495_vm2, %v7188_v54  ;;  %500 = vst.msk [vmem:[#allocation2 + $0x40] sm:$0x1] %vm495_vm2, %v7188_v54  ;;  %6293 = vmatprep.subr.bf16.mxu0 %v7604_v9  ;;  %vm3039_vm5 = vcmask 13312   ;;  %vm3064_vm6 = vcmask 10240  }
  0xc8   :  { %501 = vst.msk [vmem:[#allocation2 + $0x50] sm:$0x1] %vm495_vm2, %v7188_v54  ;;  %502 = vst.msk [vmem:[#allocation2 + $0x60] sm:$0x1] %vm495_vm2, %v7188_v54  ;;  %vm3122_vm7 = vcmask 7168   ;;  %vm3139_vm8 = vcmask 15368  }
  0xc9   :  { %198 = vadd.xlane.f32.xlu1 %v197_v20  ;;  %195 = vadd.xlane.f32.xlu0 %v194_v21  ;;  %503 = vst.msk [vmem:[#allocation2 + $0x70] sm:$0x1] %vm495_vm2, %v7188_v54  ;;  %504 = vst.msk [vmem:[#allocation2 + $0x80] sm:$0x1] %vm495_vm2, %v7188_v54 }
  0xca   :  { %507 = vst.msk [vmem:[#allocation2 + $0xb0] sm:$0x1] %vm495_vm2, %v7188_v54  ;;  %508 = vst.msk [vmem:[#allocation2 + $0xc0] sm:$0x1] %vm495_vm2, %v7188_v54 }
  0xcb   :  { %509 = vst.msk [vmem:[#allocation2 + $0xd0] sm:$0x1] %vm495_vm2, %v7188_v54  ;;  %510 = vst.msk [vmem:[#allocation2 + $0xe0] sm:$0x1] %vm495_vm2, %v7188_v54 }
  0xcc   :  { %511 = vst.msk [vmem:[#allocation2 + $0xf0] sm:$0x1] %vm495_vm2, %v7188_v54  ;;  %512 = vst.msk [vmem:[#allocation2 + $0x100] sm:$0x1] %vm495_vm2, %v7188_v54 }
  0xcd   :  { %204 = vadd.xlane.f32.xlu1 %v203_v22  ;;  %201 = vadd.xlane.f32.xlu0 %v200_v23  ;;  %513 = vst.msk [vmem:[#allocation2 + $0x110] sm:$0x1] %vm495_vm2, %v7188_v54  ;;  %514 = vst.msk [vmem:[#allocation2 + $0x120] sm:$0x1] %vm495_vm2, %v7188_v54 }
  0xce   :  { %517 = vst.msk [vmem:[#allocation2 + $0x19] sm:$0x1] %vm495_vm2, %v7188_v54  ;;  %518 = vst.msk [vmem:[#allocation2 + $0x29] sm:$0x1] %vm495_vm2, %v7188_v54 }
  0xcf   :  { %519 = vst.msk [vmem:[#allocation2 + $0x39] sm:$0x1] %vm495_vm2, %v7188_v54  ;;  %520 = vst.msk [vmem:[#allocation2 + $0x49] sm:$0x1] %vm495_vm2, %v7188_v54 }
  0xd0   :  { %521 = vst.msk [vmem:[#allocation2 + $0x59] sm:$0x1] %vm495_vm2, %v7188_v54  ;;  %522 = vst.msk [vmem:[#allocation2 + $0x69] sm:$0x1] %vm495_vm2, %v7188_v54 }
  0xd1   :  { %279 = vadd.xlane.f32.xlu1 %v278_v26  ;;  %276 = vadd.xlane.f32.xlu0 %v275_v27  ;;  %523 = vst.msk [vmem:[#allocation2 + $0x79] sm:$0x1] %vm495_vm2, %v7188_v54  ;;  %524 = vst.msk [vmem:[#allocation2 + $0x89] sm:$0x1] %vm495_vm2, %v7188_v54 }
  0xd2   :  { %527 = vst.msk [vmem:[#allocation2 + $0xb9] sm:$0x1] %vm495_vm2, %v7188_v54  ;;  %528 = vst.msk [vmem:[#allocation2 + $0xc9] sm:$0x1] %vm495_vm2, %v7188_v54 }
  0xd3   :  { %529 = vst.msk [vmem:[#allocation2 + $0xd9] sm:$0x1] %vm495_vm2, %v7188_v54  ;;  %530 = vst.msk [vmem:[#allocation2 + $0xe9] sm:$0x1] %vm495_vm2, %v7188_v54 }
  0xd4   :  { %531 = vst.msk [vmem:[#allocation2 + $0xf9] sm:$0x1] %vm495_vm2, %v7188_v54  ;;  %532 = vst.msk [vmem:[#allocation2 + $0x109] sm:$0x1] %vm495_vm2, %v7188_v54 }
  0xd5   :  { %285 = vadd.xlane.f32.xlu1 %v284_v30  ;;  %282 = vadd.xlane.f32.xlu0 %v281_v31  ;;  %533 = vst.msk [vmem:[#allocation2 + $0x119] sm:$0x1] %vm495_vm2, %v7188_v54  ;;  %534 = vst.msk [vmem:[#allocation2 + $0x129] sm:$0x1] %vm495_vm2, %v7188_v54 }
  0xd6   :  { %505 = vst.msk [vmem:[#allocation2 + $0x90] sm:$0x1] %vm495_vm2, %v7188_v54  ;;  %506 = vst.msk [vmem:[#allocation2 + $0xa0] sm:$0x1] %vm495_vm2, %v7188_v54 }
  0xd7   :  { %515 = vst.msk [vmem:[#allocation2 + $0x130] sm:$0x1] %vm495_vm2, %v7188_v54  ;;  %525 = vst.msk [vmem:[#allocation2 + $0x99] sm:$0x1] %vm495_vm2, %v7188_v54 }
  0xd8   :  { %526 = vst.msk [vmem:[#allocation2 + $0xa9] sm:$0x1] %vm495_vm2, %v7188_v54  ;;  %535 = vst.msk [vmem:[#allocation2 + $0x139] sm:$0x1] %vm495_vm2, %v7188_v54 }
  0xd9   :  { %210 = vadd.xlane.f32.xlu1 %v209_v34  ;;  %207 = vadd.xlane.f32.xlu0 %v206_v35  ;;  %3038 = vst.msk [vmem:[#allocation3] sm:$0xff] %vm3037_vm4, %v7188_v54  ;;  %3041 = vst.msk [vmem:[#allocation3 + $0x10] sm:$0xff] %vm3037_vm4, %v7188_v54 }
  0xda   :  { %3043 = vst.msk [vmem:[#allocation3 + $0x20] sm:$0xff] %vm3037_vm4, %v7188_v54  ;;  %3045 = vst.msk [vmem:[#allocation3 + $0xe0] sm:$0xff] %vm3037_vm4, %v7188_v54 }
  0xdb   :  { %3047 = vst.msk [vmem:[#allocation3 + $0xf0] sm:$0xff] %vm3037_vm4, %v7188_v54  ;;  %3049 = vst.msk [vmem:[#allocation3 + $0x100] sm:$0xff] %vm3037_vm4, %v7188_v54 }
  0xdc   :  { %3052 = vst.msk [vmem:[#allocation3 + $0xb0] sm:$0xff] %vm3037_vm4, %v7188_v54  ;;  %3054 = vst.msk [vmem:[#allocation3 + $0xc0] sm:$0xff] %vm3037_vm4, %v7188_v54 }
  0xdd   :  { %216 = vadd.xlane.f32.xlu1 %v215_v38  ;;  %213 = vadd.xlane.f32.xlu0 %v212_v39  ;;  %3056 = vst.msk [vmem:[#allocation3 + $0xd0] sm:$0xff] %vm3037_vm4, %v7188_v54  ;;  %3058 = vst.msk [vmem:[#allocation3 + $0x190] sm:$0xff] %vm3037_vm4, %v7188_v54 }
  0xde   :  { %3060 = vst.msk [vmem:[#allocation3 + $0x1a0] sm:$0xff] %vm3037_vm4, %v7188_v54  ;;  %3062 = vst.msk [vmem:[#allocation3 + $0x1b0] sm:$0xff] %vm3037_vm4, %v7188_v54 }
  0xdf   :  { %3040 = vst.msk [vmem:[#allocation3 + $0x8] sm:$0x3f] %vm3039_vm5, %v7188_v54  ;;  %3042 = vst.msk [vmem:[#allocation3 + $0x18] sm:$0x3f] %vm3039_vm5, %v7188_v54 }
  0xe0   :  { %3044 = vst.msk [vmem:[#allocation3 + $0x28] sm:$0x3f] %vm3039_vm5, %v7188_v54  ;;  %3046 = vst.msk [vmem:[#allocation3 + $0xe8] sm:$0x3f] %vm3039_vm5, %v7188_v54 }
  0xe1   :  { %291 = vadd.xlane.f32.xlu1 %v290_v42  ;;  %288 = vadd.xlane.f32.xlu0 %v287_v43  ;;  %3065 = vst.msk [vmem:[#allocation3] sm:$0x7] %vm3064_vm6, %v7188_v54  ;;  %3066 = vst.msk [vmem:[#allocation3 + $0x10] sm:$0x7] %vm3064_vm6, %v7188_v54 }
  0xe2   :  { %3067 = vst.msk [vmem:[#allocation3 + $0x20] sm:$0x7] %vm3064_vm6, %v7188_v54  ;;  %3068 = vst.msk [vmem:[#allocation3 + $0x30] sm:$0x7] %vm3064_vm6, %v7188_v54 }
  0xe3   :  { %3069 = vst.msk [vmem:[#allocation3 + $0x40] sm:$0x7] %vm3064_vm6, %v7188_v54  ;;  %3070 = vst.msk [vmem:[#allocation3 + $0x50] sm:$0x7] %vm3064_vm6, %v7188_v54 }
  0xe4   :  { %3096 = vst.msk [vmem:[#allocation3 + $0x3b] sm:$0x7] %vm3064_vm6, %v7188_v54  ;;  %3097 = vst.msk [vmem:[#allocation3 + $0x4b] sm:$0x7] %vm3064_vm6, %v7188_v54 }
  0xe5   :  { %297 = vadd.xlane.f32.xlu1 %v296_v46  ;;  %294 = vadd.xlane.f32.xlu0 %v293_v47  ;;  %3048 = vst.msk [vmem:[#allocation3 + $0xf8] sm:$0x3f] %vm3039_vm5, %v7188_v54  ;;  %3050 = vst.msk [vmem:[#allocation3 + $0x108] sm:$0x3f] %vm3039_vm5, %v7188_v54 }
  0xe6   :  { %3053 = vst.msk [vmem:[#allocation3 + $0xb8] sm:$0x3f] %vm3039_vm5, %v7188_v54  ;;  %3055 = vst.msk [vmem:[#allocation3 + $0xc8] sm:$0x3f] %vm3039_vm5, %v7188_v54 }
  0xe7   :  { %3057 = vst.msk [vmem:[#allocation3 + $0xd8] sm:$0x3f] %vm3039_vm5, %v7188_v54  ;;  %3059 = vst.msk [vmem:[#allocation3 + $0x198] sm:$0x3f] %vm3039_vm5, %v7188_v54 }
  0xe8   :  { %3061 = vst.msk [vmem:[#allocation3 + $0x1a8] sm:$0x3f] %vm3039_vm5, %v7188_v54  ;;  %3063 = vst.msk [vmem:[#allocation3 + $0x1b8] sm:$0x3f] %vm3039_vm5, %v7188_v54 }
  0xe9   :  { %222 = vadd.xlane.f32.xlu1 %v221_v50  ;;  %219 = vadd.xlane.f32.xlu0 %v218_v51  ;;  %3071 = vst.msk [vmem:[#allocation3 + $0x60] sm:$0x7] %vm3064_vm6, %v7188_v54  ;;  %3072 = vst.msk [vmem:[#allocation3 + $0x70] sm:$0x7] %vm3064_vm6, %v7188_v54 }
  0xea   :  { %3073 = vst.msk [vmem:[#allocation3 + $0x80] sm:$0x7] %vm3064_vm6, %v7188_v54  ;;  %3074 = vst.msk [vmem:[#allocation3 + $0x90] sm:$0x7] %vm3064_vm6, %v7188_v54 }
  0xeb   :  { %3075 = vst.msk [vmem:[#allocation3 + $0xa0] sm:$0x7] %vm3064_vm6, %v7188_v54  ;;  %3082 = vst.msk [vmem:[#allocation3 + $0x110] sm:$0x7] %vm3064_vm6, %v7188_v54 }
  0xec   :  { %3083 = vst.msk [vmem:[#allocation3 + $0x120] sm:$0x7] %vm3064_vm6, %v7188_v54  ;;  %3084 = vst.msk [vmem:[#allocation3 + $0x130] sm:$0x7] %vm3064_vm6, %v7188_v54 }
  0xed   :  { %228 = vadd.xlane.f32.xlu1 %v227_v55  ;;  %225 = vadd.xlane.f32.xlu0 %v224_v56  ;;  %3085 = vst.msk [vmem:[#allocation3 + $0x140] sm:$0x7] %vm3064_vm6, %v7188_v54  ;;  %3086 = vst.msk [vmem:[#allocation3 + $0x150] sm:$0x7] %vm3064_vm6, %v7188_v54 }
  0xee   :  { %3087 = vst.msk [vmem:[#allocation3 + $0x160] sm:$0x7] %vm3064_vm6, %v7188_v54  ;;  %3088 = vst.msk [vmem:[#allocation3 + $0x170] sm:$0x7] %vm3064_vm6, %v7188_v54 }
  0xef   :  { %3089 = vst.msk [vmem:[#allocation3 + $0x180] sm:$0x7] %vm3064_vm6, %v7188_v54  ;;  %3098 = vst.msk [vmem:[#allocation3 + $0x5b] sm:$0x7] %vm3064_vm6, %v7188_v54 }
  0xf0   :  { %3099 = vst.msk [vmem:[#allocation3 + $0x6b] sm:$0x7] %vm3064_vm6, %v7188_v54  ;;  %3100 = vst.msk [vmem:[#allocation3 + $0x7b] sm:$0x7] %vm3064_vm6, %v7188_v54 }
  0xf1   :  { %303 = vadd.xlane.f32.xlu1 %v302_v61  ;;  %300 = vadd.xlane.f32.xlu0 %v299_v62  ;;  %3101 = vst.msk [vmem:[#allocation3 + $0x8b] sm:$0x7] %vm3064_vm6, %v7188_v54  ;;  %3102 = vst.msk [vmem:[#allocation3 + $0x9b] sm:$0x7] %vm3064_vm6, %v7188_v54 }
  0xf2   :  { %3103 = vst.msk [vmem:[#allocation3 + $0xab] sm:$0x7] %vm3064_vm6, %v7188_v54  ;;  %3110 = vst.msk [vmem:[#allocation3 + $0x11b] sm:$0x7] %vm3064_vm6, %v7188_v54 }
  0xf3   :  { %3111 = vst.msk [vmem:[#allocation3 + $0x12b] sm:$0x7] %vm3064_vm6, %v7188_v54  ;;  %3112 = vst.msk [vmem:[#allocation3 + $0x13b] sm:$0x7] %vm3064_vm6, %v7188_v54 }
  0xf4   :  { %3113 = vst.msk [vmem:[#allocation3 + $0x14b] sm:$0x7] %vm3064_vm6, %v7188_v54  ;;  %3114 = vst.msk [vmem:[#allocation3 + $0x15b] sm:$0x7] %vm3064_vm6, %v7188_v54 }
  0xf5   :  { %309 = vadd.xlane.f32.xlu1 %v308_v7  ;;  %306 = vadd.xlane.f32.xlu0 %v305_v8  ;;  %3115 = vst.msk [vmem:[#allocation3 + $0x16b] sm:$0x7] %vm3064_vm6, %v7188_v54  ;;  %3116 = vst.msk [vmem:[#allocation3 + $0x17b] sm:$0x7] %vm3064_vm6, %v7188_v54 }
  0xf6   :  { %3117 = vst.msk [vmem:[#allocation3 + $0x18b] sm:$0x7] %vm3064_vm6, %v7188_v54  ;;  %3076 = vst.msk [vmem:[#allocation3 + $0xb0] sm:$0x7] %vm3064_vm6, %v7188_v54 }
  0xf7   :  { %3077 = vst.msk [vmem:[#allocation3 + $0xc0] sm:$0x7] %vm3064_vm6, %v7188_v54  ;;  %3078 = vst.msk [vmem:[#allocation3 + $0xd0] sm:$0x7] %vm3064_vm6, %v7188_v54 }
  0xf8   :  { %3079 = vst.msk [vmem:[#allocation3 + $0xe0] sm:$0x7] %vm3064_vm6, %v7188_v54  ;;  %3080 = vst.msk [vmem:[#allocation3 + $0xf0] sm:$0x7] %vm3064_vm6, %v7188_v54 }
  0xf9   :  { %3081 = vst.msk [vmem:[#allocation3 + $0x100] sm:$0x7] %vm3064_vm6, %v7188_v54  ;;  %3090 = vst.msk [vmem:[#allocation3 + $0x190] sm:$0x7] %vm3064_vm6, %v7188_v54 }
  0xfa   :  { %3091 = vst.msk [vmem:[#allocation3 + $0x1a0] sm:$0x7] %vm3064_vm6, %v7188_v54  ;;  %3092 = vst.msk [vmem:[#allocation3 + $0x1b0] sm:$0x7] %vm3064_vm6, %v7188_v54 }
  0xfb   :  { %3093 = vst.msk [vmem:[#allocation3 + $0xb] sm:$0x7] %vm3064_vm6, %v7188_v54  ;;  %3094 = vst.msk [vmem:[#allocation3 + $0x1b] sm:$0x7] %vm3064_vm6, %v7188_v54 }
  0xfc   :  { %3095 = vst.msk [vmem:[#allocation3 + $0x2b] sm:$0x7] %vm3064_vm6, %v7188_v54  ;;  %3104 = vst.msk [vmem:[#allocation3 + $0xbb] sm:$0x7] %vm3064_vm6, %v7188_v54 }
  0xfd   :  { %3105 = vst.msk [vmem:[#allocation3 + $0xcb] sm:$0x7] %vm3064_vm6, %v7188_v54  ;;  %3106 = vst.msk [vmem:[#allocation3 + $0xdb] sm:$0x7] %vm3064_vm6, %v7188_v54 }
  0xfe   :  { %3107 = vst.msk [vmem:[#allocation3 + $0xeb] sm:$0x7] %vm3064_vm6, %v7188_v54  ;;  %3108 = vst.msk [vmem:[#allocation3 + $0xfb] sm:$0x7] %vm3064_vm6, %v7188_v54 }
  0xff   :  { %3109 = vst.msk [vmem:[#allocation3 + $0x10b] sm:$0x7] %vm3064_vm6, %v7188_v54  ;;  %3118 = vst.msk [vmem:[#allocation3 + $0x19b] sm:$0x7] %vm3064_vm6, %v7188_v54 }
 0x100   :  { %3119 = vst.msk [vmem:[#allocation3 + $0x1ab] sm:$0x7] %vm3064_vm6, %v7188_v54  ;;  %3120 = vst.msk [vmem:[#allocation3 + $0x1bb] sm:$0x7] %vm3064_vm6, %v7188_v54 }
 0x146   :  { %v190_v11 = vpop.xlane.xlu1 %189  ;;  %v184_v12 = vpop.xlane.xlu0 %183 }
 0x147   :  { %v231_v17 = vmul.f32 0.03125, %v184_v12  ;;  %v7610_v21 = vmul.f32 0.03125, %v190_v11 }
 0x149   :  { %v327_v25 = vmul.f32 %v231_v17, %v231_v17  ;;  %v329_v31 = vmul.f32 %v7610_v21, %v7610_v21  ;;  %v359_v58 = vsub.f32 %v7394_v1, %v231_v17 }
 0x14a   :  { %v193_v13 = vpop.xlane.xlu1 %192  ;;  %v187_v16 = vpop.xlane.xlu0 %186 }
 0x14b   :  { %v232_v20 = vmul.f32 0.03125, %v187_v16  ;;  %v7612_v22 = vmul.f32 0.03125, %v193_v13 }
 0x14d   :  { %v328_v26 = vmul.f32 %v232_v20, %v232_v20  ;;  %v330_v34 = vmul.f32 %v7612_v22, %v7612_v22  ;;  %v360_v59 = vsub.f32 %v7402_v5, %v232_v20 }
 0x14e   :  { %v268_v23 = vpop.xlane.xlu1 %267  ;;  %v265_v24 = vpop.xlane.xlu0 %264 }
 0x14f   :  { %v312_v27 = vmul.f32 0.03125, %v268_v23  ;;  %v311_v28 = vmul.f32 0.03125, %v265_v24 }
 0x151   :  { %v344_v29 = vsub.f32 %v312_v27, %v328_v26  ;;  %v343_v30 = vsub.f32 %v311_v28, %v327_v25  ;;  %v361_v25 = vsub.f32 %v7392_v0, %v7610_v21  ;;  %v362_v26 = vsub.f32 %v7396_v2, %v7612_v22  ;;  %v7638_v27 = vld [vmem:[#allocation10] ss:$0 sm:$0xff] }
 0x152   :  { %v274_v35 = vpop.xlane.xlu1 %273  ;;  %v271_v38 = vpop.xlane.xlu0 %270 }
 0x153   :  { %v376_v39 = vadd.f32 1e-05, %v344_v29  ;;  %v375_v40 = vadd.f32 1e-05, %v343_v30  ;;  %v314_v41 = vmul.f32 0.03125, %v274_v35  ;;  %v313_v42 = vmul.f32 0.03125, %v271_v38 }
 0x155   :  { %6604 = vrsqrt.f32 %v376_v39  ;;  %v346_v43 = vsub.f32 %v314_v41, %v330_v34  ;;  %v345_v44 = vsub.f32 %v313_v42, %v329_v31 }
 0x156   :  { %6606 = vrsqrt.f32 %v375_v40  ;;  %v199_v45 = vpop.xlane.xlu1 %198  ;;  %v196_v46 = vpop.xlane.xlu0 %195 }
 0x157   :  { %v378_v47 = vadd.f32 1e-05, %v346_v43  ;;  %v377_v50 = vadd.f32 1e-05, %v345_v44  ;;  %v7618_v56 = vmul.f32 0.03125, %v199_v45  ;;  %v7620_v57 = vmul.f32 0.03125, %v196_v46 }
 0x159   :  { %6608 = vrsqrt.f32 %v378_v47  ;;  %v332_v7 = vmul.f32 %v7618_v56, %v7618_v56  ;;  %v331_v8 = vmul.f32 %v7620_v57, %v7620_v57 }
 0x15a   :  { %6610 = vrsqrt.f32 %v377_v50  ;;  %v205_v51 = vpop.xlane.xlu1 %204  ;;  %v202_v55 = vpop.xlane.xlu0 %201 }
 0x15b   :  { %v7624_v61 = vmul.f32 0.03125, %v205_v51  ;;  %v7632_v17 = vmul.f32 0.03125, %v202_v55 }
 0x15d   :  { %v334_v29 = vmul.f32 %v7624_v61, %v7624_v61  ;;  %v333_v22 = vmul.f32 %v7632_v17, %v7632_v17 }
 0x15e   :  { %v280_v62 = vpop.xlane.xlu1 %279  ;;  %v277_v63 = vpop.xlane.xlu0 %276 }
 0x15f   :  { %v6605_v3 = vpop.eup %6604  ;;  %v316_v11 = vmul.f32 0.03125, %v280_v62  ;;  %v315_v12 = vmul.f32 0.03125, %v277_v63 }
 0x160   :  { %v6607_v13 = vpop.eup %6606  ;;  %v408_v16 = vmul.f32 %v6605_v3, %v360_v59 }
 0x161   :  { %v407_v20 = vmul.f32 %v6607_v13, %v359_v58  ;;  %v348_v23 = vsub.f32 %v316_v11, %v332_v7  ;;  %v347_v24 = vsub.f32 %v315_v12, %v331_v8 }
 0x162   :  { %v431_v28 = vmul.f32 %v7626_v4, %v408_v16  ;;  %v286_v30 = vpop.xlane.xlu1 %285  ;;  %v283_v31 = vpop.xlane.xlu0 %282 }
 0x163   :  { %v6609_v34 = vpop.eup %6608  ;;  %v430_v35 = vmul.f32 %v7626_v4, %v407_v20  ;;  %v380_v38 = vadd.f32 1e-05, %v348_v23  ;;  %v379_v39 = vadd.f32 1e-05, %v347_v24  ;;  %v318_v40 = vmul.f32 0.03125, %v286_v30 }
 0x164   :  { %v6611_v41 = vpop.eup %6610  ;;  %v447_v21 = vadd.f32 %v431_v28, %v7402_v5  ;;  %v410_v42 = vmul.f32 %v6609_v34, %v362_v26  ;;  %v317_v43 = vmul.f32 0.03125, %v283_v31 }
 0x165   :  { %v446_v44 = vadd.f32 %v430_v35, %v7394_v1  ;;  %v409_v45 = vmul.f32 %v6611_v41, %v361_v25  ;;  %6612 = vrsqrt.f32 %v380_v38  ;;  %v350_v46 = vsub.f32 %v318_v40, %v334_v29  ;;  %v581_v25 = vld [vmem:[#allocation2 + $0x1] sm:$0xff] }
 0x166   :  { %v470_v47 = vadd.f32 %v7638_v27, %v447_v21  ;;  %v433_v50 = vmul.f32 %v7626_v4, %v410_v42  ;;  %6614 = vrsqrt.f32 %v379_v39  ;;  %v349_v51 = vsub.f32 %v317_v43, %v333_v22  ;;  %v211_v55 = vpop.xlane.xlu1 %210  ;;  %v208_v58 = vpop.xlane.xlu0 %207 }
 0x167   :  { %v469_v5 = vadd.f32 %v7638_v27, %v446_v44  ;;  %v432_v59 = vmul.f32 %v7626_v4, %v409_v45  ;;  %v382_v62 = vadd.f32 1e-05, %v350_v46  ;;  %v7658_v13 = vmul.f32 0.03125, %v211_v55 }
 0x168   :  { %538 = vst.msk [vmem:[#allocation2 + $0x21] sm:$0xff] %vm181_vm0, %v470_v47  ;;  %v449_v1 = vadd.f32 %v433_v50, %v7396_v2  ;;  %v381_v63 = vadd.f32 1e-05, %v349_v51  ;;  %v7660_v16 = vmul.f32 0.03125, %v208_v58  ;;  %v364_v2 = vsub.f32 %v7418_v14, %v7618_v56 }
 0x169   :  { %537 = vst.msk [vmem:[#allocation2 + $0x11] sm:$0xff] %vm181_vm0, %v469_v5  ;;  %v448_v3 = vadd.f32 %v432_v59, %v7392_v0  ;;  %6616 = vrsqrt.f32 %v382_v62  ;;  %v363_v0 = vsub.f32 %v7420_v15, %v7620_v57  ;;  %v336_v28 = vmul.f32 %v7658_v13, %v7658_v13 }
 0x16a   :  { %v472_v7 = vadd.f32 %v7638_v27, %v449_v1  ;;  %6618 = vrsqrt.f32 %v381_v63  ;;  %v217_v8 = vpop.xlane.xlu1 %216  ;;  %v214_v11 = vpop.xlane.xlu0 %213  ;;  %v335_v29 = vmul.f32 %v7660_v16, %v7660_v16  ;;  %v366_v57 = vsub.f32 %v7424_v18, %v7624_v61 }
 0x16b   :  { %v471_v12 = vadd.f32 %v7638_v27, %v448_v3  ;;  %v7668_v20 = vmul.f32 0.03125, %v217_v8  ;;  %v7678_v38 = vmul.f32 0.03125, %v214_v11  ;;  %v365_v43 = vsub.f32 %v7426_v19, %v7632_v17 }
 0x16c   :  { %540 = vst.msk [vmem:[#allocation2 + $0x41] sm:$0xff] %vm181_vm0, %v472_v7 }
 0x16d   :  { %539 = vst.msk [vmem:[#allocation2 + $0x31] sm:$0xff] %vm181_vm0, %v471_v12  ;;  %v338_v61 = vmul.f32 %v7668_v20, %v7668_v20  ;;  %v337_v1 = vmul.f32 %v7678_v38, %v7678_v38 }
 0x16e   :  { %v292_v23 = vpop.xlane.xlu1 %291  ;;  %v289_v24 = vpop.xlane.xlu0 %288 }
 0x16f   :  { %v6613_v26 = vpop.eup %6612  ;;  %v320_v30 = vmul.f32 0.03125, %v292_v23  ;;  %v319_v31 = vmul.f32 0.03125, %v289_v24  ;;  %v7674_v34 = vld [vmem:[#allocation2 + $0x20] sm:$0xff] }
 0x170   :  { %v6615_v56 = vpop.eup %6614  ;;  %v412_v35 = vmul.f32 %v6613_v26, %v364_v2  ;;  %v7680_v39 = vld [vmem:[#allocation2 + $0x11] sm:$0xff] }
 0x171   :  { %v7682_v40 = vld [vmem:[#allocation2 + $0x10] sm:$0xff]  ;;  %v411_v41 = vmul.f32 %v6615_v56, %v363_v0  ;;  %v352_v21 = vsub.f32 %v320_v30, %v336_v28  ;;  %v351_v42 = vsub.f32 %v319_v31, %v335_v29  ;;  %v597_v22 = vpack.c.bf16 %v7680_v39, %v581_v25  ;;  %v7709_v29 = vld [vmem:[#allocation2 + $0x21] sm:$0xff] }
 0x172   :  { %v435_v44 = vmul.f32 %v7626_v4, %v412_v35  ;;  %v298_v45 = vpop.xlane.xlu1 %297  ;;  %v1070_v46 = vpack.c.bf16 %v7674_v34, %v7682_v40  ;;  %v295_v47 = vpop.xlane.xlu0 %294  ;;  %v6587_v35 = vld [vmem:[#allocation12 + $0x48] sm:$0xff]  }
 0x173   :  { %v6617_v50 = vpop.eup %6616  ;;  %v434_v51 = vmul.f32 %v7626_v4, %v411_v41  ;;  %v384_v55 = vadd.f32 1e-05, %v352_v21  ;;  %v383_v58 = vadd.f32 1e-05, %v351_v42  ;;  %v322_v5 = vmul.f32 0.03125, %v298_v45  ;;  %6217 = vmatprep.mubr.msk.bf16.mxu1 %vm181_vm0, %v597_v22  ;;  %v7703_v2 = vld [vmem:[#allocation2 + $0x40] sm:$0xff] }
 0x174   :  { %v6619_v59 = vpop.eup %6618  ;;  %v451_v17 = vadd.f32 %v435_v44, %v7418_v14  ;;  %v414_v62 = vmul.f32 %v6617_v50, %v366_v57  ;;  %6277 = vmatprep.mubr.msk.bf16.mxu0 %vm181_vm0, %v1070_v46  ;;  %v321_v63 = vmul.f32 0.03125, %v295_v47  ;;  %v7699_v11 = vld [vmem:[#allocation2 + $0x31] sm:$0xff]  ;;  %v7735_v45 = vld [vmem:[#allocation12 + $0x20] sm:$0xff]   ;;  %v368_v46 = vsub.f32 %v7448_v32, %v7658_v13 }
 0x175   :  { %v450_v3 = vadd.f32 %v434_v51, %v7420_v15  ;;  %v413_v7 = vmul.f32 %v6619_v59, %v365_v43  ;;  %6620 = vrsqrt.f32 %v384_v55  ;;  %v354_v8 = vsub.f32 %v322_v5, %v338_v61  ;;  %v7701_v12 = vld [vmem:[#allocation2 + $0x30] sm:$0xff] }
 0x176   :  { %v474_v14 = vadd.f32 %v7638_v27, %v451_v17  ;;  %v437_v0 = vmul.f32 %v7626_v4, %v414_v62  ;;  %6622 = vrsqrt.f32 %v383_v58  ;;  %v353_v23 = vsub.f32 %v321_v63, %v337_v1  ;;  %v223_v24 = vpop.xlane.xlu1 %222  ;;  %v220_v25 = vpop.xlane.xlu0 %219  ;;  %v6591_v41 = vld [vmem:[#allocation12 + $0x8] sm:$0xff]   ;;  %v7754_v63 = vld [vmem:[#allocation2 + $0x41] sm:$0xff] }
 0x177   :  { %v473_v26 = vadd.f32 %v7638_v27, %v450_v3  ;;  %v436_v15 = vmul.f32 %v7626_v4, %v413_v7  ;;  %v386_v28 = vadd.f32 1e-05, %v354_v8  ;;  %v7715_v56 = vpack.c.bf16 %v7699_v11, %v7709_v29 }
 0x178   :  { %542 = vst.msk [vmem:[#allocation2 + $0x61] sm:$0xff] %vm181_vm0, %v474_v14  ;;  %v453_v30 = vadd.f32 %v437_v0, %v7424_v18  ;;  %v385_v31 = vadd.f32 1e-05, %v353_v23  ;;  %v1071_v57 = vpack.c.bf16 %v7703_v2, %v7701_v12  ;;  %v7726_v44 = vmul.f32 0.03125, %v223_v24 }
 0x179   :  { %541 = vst.msk [vmem:[#allocation2 + $0x51] sm:$0xff] %vm181_vm0, %v473_v26  ;;  %v452_v21 = vadd.f32 %v436_v15, %v7426_v19  ;;  %6624 = vrsqrt.f32 %v386_v28  ;;  %6218 = vmatmul.mubr.msk.bf16.vlgmr.msra.gmra.mrb[0].mxu1 %vm181_vm0, %v7715_v56  ;;  %v7728_v61 = vmul.f32 0.03125, %v220_v25  ;;  %v7733_v19 = vld [vmem:[#allocation12 + $0x50] sm:$0xff]   ;;  %v367_v47 = vsub.f32 %v7450_v33, %v7660_v16 }
 0x17a   :  { %v476_v42 = vadd.f32 %v7638_v27, %v453_v30  ;;  %6626 = vrsqrt.f32 %v385_v31  ;;  %6278 = vmatmul.mubr.msk.bf16.vlgmr.msra.gmra.mrb[0].mxu0 %vm181_vm0, %v1071_v57  ;;  %v229_v18 = vpop.xlane.xlu1 %228  ;;  %v226_v22 = vpop.xlane.xlu0 %225  ;;  %6234 = vmatpush3.bf16.msra.mxu1 %v7607_v10  ;;  %v340_v55 = vmul.f32 %v7726_v44, %v7726_v44  ;;  %v370_v16 = vsub.f32 %v7456_v36, %v7668_v20 }
 0x17b   :  { %v475_v43 = vadd.f32 %v7638_v27, %v452_v21  ;;  %6294 = vmatpush3.bf16.msra.mxu0 %v7604_v9  ;;  %6235 = vmatprep.subr.bf16.mxu1 %v6591_v41  ;;  %v7742_v50 = vmul.f32 0.03125, %v229_v18  ;;  %v339_v58 = vmul.f32 %v7728_v61, %v7728_v61  ;;  %v7752_v1 = vmul.f32 0.03125, %v226_v22 }
 0x17c   :  { %544 = vst.msk [vmem:[#allocation2 + $0x81] sm:$0xff] %vm181_vm0, %v476_v42  ;;  %6295 = vmatprep.subr.bf16.mxu0 %v6587_v35  ;;  %v369_v20 = vsub.f32 %v7458_v37, %v7678_v38 }
 0x17d   :  { %543 = vst.msk [vmem:[#allocation2 + $0x71] sm:$0xff] %vm181_vm0, %v475_v43  ;;  %v342_v25 = vmul.f32 %v7742_v50, %v7742_v50  ;;  %v341_v18 = vmul.f32 %v7752_v1, %v7752_v1 }
 0x17e   :  { %v304_v9 = vpop.xlane.xlu1 %303  ;;  %v301_v10 = vpop.xlane.xlu0 %300  ;;  %6236 = vmatpush3.bf16.msra.mxu1 %v6591_v41 }
 0x17f   :  { %v6621_v51 = vpop.eup %6620  ;;  %v324_v5 = vmul.f32 0.03125, %v304_v9  ;;  %v323_v59 = vmul.f32 0.03125, %v301_v10  ;;  %v7748_v17 = vld [vmem:[#allocation2 + $0x60] sm:$0xff]  ;;  %6296 = vmatpush3.bf16.msra.mxu0 %v6587_v35  ;;  %6253 = vmatprep.subr.bf16.mxu1 %v7735_v45 }
 0x180   :  { %v6623_v13 = vpop.eup %6622  ;;  %v416_v62 = vmul.f32 %v6621_v51, %v368_v46  ;;  %v7756_v3 = vld [vmem:[#allocation2 + $0x51] sm:$0xff]  ;;  %6313 = vmatprep.subr.bf16.mxu0 %v7733_v19 }
 0x181   :  { %v7758_v7 = vld [vmem:[#allocation2 + $0x50] sm:$0xff]  ;;  %v415_v8 = vmul.f32 %v6623_v13, %v367_v47  ;;  %v356_v14 = vsub.f32 %v324_v5, %v340_v55  ;;  %v355_v0 = vsub.f32 %v323_v59, %v339_v58  ;;  %v7764_v23 = vpack.c.bf16 %v7756_v3, %v7754_v63  ;;  %v587_v5 = vld [vmem:[#allocation2 + $0x61] sm:$0xff] }
 0x182   :  { %v439_v24 = vmul.f32 %v7626_v4, %v416_v62  ;;  %v310_v26 = vpop.xlane.xlu1 %309  ;;  %v1072_v15 = vpack.c.bf16 %v7748_v17, %v7758_v7  ;;  %v307_v28 = vpop.xlane.xlu0 %306 }
 0x183   :  { %v6625_v30 = vpop.eup %6624  ;;  %v438_v31 = vmul.f32 %v7626_v4, %v415_v8  ;;  %v388_v57 = vadd.f32 1e-05, %v356_v14  ;;  %v387_v35 = vadd.f32 1e-05, %v355_v0  ;;  %v326_v41 = vmul.f32 0.03125, %v310_v26  ;;  %6221 = vmatprep.mubr.msk.bf16.mxu1 %vm181_vm0, %v7764_v23  ;;  %v7785_v51 = vld [vmem:[#allocation2 + $0x80] sm:$0xff] }
 0x184   :  { %v6627_v38 = vpop.eup %6626  ;;  %v455_v21 = vadd.f32 %v439_v24, %v7448_v32  ;;  %v418_v42 = vmul.f32 %v6625_v30, %v370_v16  ;;  %6281 = vmatprep.mubr.msk.bf16.mxu0 %vm181_vm0, %v1072_v15  ;;  %v325_v22 = vmul.f32 0.03125, %v307_v28  ;;  %v7780_v43 = vld [vmem:[#allocation2 + $0x71] sm:$0xff]  ;;  %v1249_v28 = vpack.c.bf16 %v7754_v63, %v7699_v11 }
 0x185   :  { %v454_v46 = vadd.f32 %v438_v31, %v7450_v33  ;;  %v417_v47 = vmul.f32 %v6627_v38, %v369_v20  ;;  %6628 = vrsqrt.f32 %v388_v57  ;;  %v358_v9 = vsub.f32 %v326_v41, %v342_v25  ;;  %v7783_v10 = vld [vmem:[#allocation2 + $0x70] sm:$0xff]  ;;  %v589_v25 = vld [vmem:[#allocation2 + $0xa1] sm:$0xff] }
 0x186   :  { %v478_v32 = vadd.f32 %v7638_v27, %v455_v21  ;;  %v441_v55 = vmul.f32 %v7626_v4, %v418_v42  ;;  %6630 = vrsqrt.f32 %v387_v35  ;;  %v357_v58 = vsub.f32 %v325_v22, %v341_v18  ;;  %v6589_v31 = vld [vmem:[#allocation12 + $0x58] sm:$0xff]   ;;  %v6592_v22 = vld [vmem:[#allocation12 + $0x60] sm:$0xff]  }
 0x187   :  { %v477_v59 = vadd.f32 %v7638_v27, %v454_v46  ;;  %v440_v13 = vmul.f32 %v7626_v4, %v417_v47  ;;  %v390_v16 = vadd.f32 1e-05, %v358_v9  ;;  %v7792_v33 = vpack.c.bf16 %v7780_v43, %v587_v5  ;;  %v7831_v9 = vld [vmem:[#allocation2 + $0x81] sm:$0xff] }
 0x188   :  { %546 = vst.msk [vmem:[#allocation2 + $0xc1] sm:$0xff] %vm181_vm0, %v478_v32  ;;  %v457_v62 = vadd.f32 %v441_v55, %v7456_v36  ;;  %v389_v8 = vadd.f32 1e-05, %v357_v58  ;;  %v1073_v14 = vpack.c.bf16 %v7785_v51, %v7783_v10  ;;  %v1248_v20 = vpack.c.bf16 %v7709_v29, %v7680_v39 }
 0x189   :  { %545 = vst.msk [vmem:[#allocation2 + $0xb1] sm:$0xff] %vm181_vm0, %v477_v59  ;;  %v456_v0 = vadd.f32 %v440_v13, %v7458_v37  ;;  %6632 = vrsqrt.f32 %v390_v16  ;;  %6222 = vmatmul.mubr.msk.bf16.gmra.mrb[4].mxu1 %vm181_vm0, %v7792_v33  ;;  %v372_v37 = vsub.f32 %v7476_v48, %v7726_v44  ;;  %v371_v39 = vsub.f32 %v7478_v49, %v7728_v61 }
 0x18a   :  { %v480_v24 = vadd.f32 %v7638_v27, %v457_v62  ;;  %6634 = vrsqrt.f32 %v389_v8  ;;  %6282 = vmatmul.mubr.msk.bf16.gmra.mrb[4].mxu0 %vm181_vm0, %v1073_v14  ;;  %v1250_v35 = vpack.c.bf16 %v587_v5, %v7756_v3  ;;  %v374_v38 = vsub.f32 %v7484_v52, %v7742_v50  ;;  %v553_v14 = vld [vmem:[#allocation2] sm:$0xff] }
 0x18b   :  { %v479_v36 = vadd.f32 %v7638_v27, %v456_v0  ;;  %6297 = vmatprep.mubr.msk.bf16.mxu0 %vm181_vm0, %v1248_v20  ;;  %v373_v61 = vsub.f32 %v7486_v53, %v7752_v1  ;;  %v1251_v58 = vpack.c.bf16 %v7831_v9, %v7780_v43 }
 0x18c   :  { %548 = vst.msk [vmem:[#allocation2 + $0xe1] sm:$0xff] %vm181_vm0, %v480_v24 }
 0x18d   :  { %547 = vst.msk [vmem:[#allocation2 + $0xd1] sm:$0xff] %vm181_vm0, %v479_v36  ;;  %v569_v36 = vpack.c.bf16 %v7682_v40, %v553_v14  ;;  %v7878_v40 = vld [vmem:[#allocation2 + $0x32] sm:$0xff]  ;;  %v6598_v14 = vld [vmem:[#allocation12 + $0x80] sm:$0xff]  }
 0x18f   :  { %v6629_v26 = vpop.eup %6628  ;;  %v591_v50 = vld [vmem:[#allocation2 + $0xc1] sm:$0xff] }
 0x190   :  { %v6631_v29 = vpop.eup %6630  ;;  %v420_v15 = vmul.f32 %v6629_v26, %v372_v37  ;;  %v590_v30 = vld [vmem:[#allocation2 + $0xb1] sm:$0xff] }
 0x191   :  { %v419_v57 = vmul.f32 %v6631_v29, %v371_v39  ;;  %v601_v41 = vpack.c.bf16 %v590_v30, %v589_v25  ;;  %v1252_v59 = vpack.c.bf16 %v591_v50, %v590_v30  ;;  %v7863_v37 = vld [vmem:[#allocation2 + $0x12] sm:$0xff]  ;;  %v7865_v25 = vld [vmem:[#allocation2 + $0x22] sm:$0xff]  ;;  %v7876_v39 = vpack.c.bf16 %v7701_v12, %v7674_v34 }
 0x192   :  { %v443_v44 = vmul.f32 %v7626_v4, %v420_v15  ;;  %6298 = vmatmul.mubr.msk.bf16.vlgmr.msra.gmra.mrb[0].mxu0 %vm181_vm0, %v1249_v28  ;;  %v1426_v26 = vpack.c.bf16 %v7865_v25, %v7863_v37  ;;  %v7880_v29 = vld [vmem:[#allocation2 + $0x42] sm:$0xff]  ;;  %v6595_v15 = vld [vmem:[#allocation12 + $0x28] sm:$0xff]   ;;  %v7884_v28 = vpack.c.bf16 %v7758_v7, %v7703_v2 }
 0x193   :  { %v6633_v21 = vpop.eup %6632  ;;  %v442_v42 = vmul.f32 %v7626_v4, %v419_v57  ;;  %6314 = vmatpush3.bf16.msra.mxu0 %v7733_v19  ;;  %6301 = vmatprep.mubr.msk.bf16.mxu0 %vm181_vm0, %v1250_v35  ;;  %v1414_v30 = vld [vmem:[#allocation2 + $0x52] sm:$0xff]  ;;  %v1427_v57 = vpack.c.bf16 %v7880_v29, %v7878_v40  ;;  %v561_v2 = vld [vmem:[#allocation2 + $0xa0] sm:$0xff] }
 0x194   :  { %v6635_v11 = vpop.eup %6634  ;;  %v459_v63 = vadd.f32 %v443_v44, %v7476_v48  ;;  %v422_v3 = vmul.f32 %v6633_v21, %v374_v38  ;;  %6225 = vmatprep.mubr.msk.bf16.mxu1 %vm181_vm0, %v601_v41  ;;  %v592_v18 = vld [vmem:[#allocation2 + $0xd1] sm:$0xff]  ;;  %6315 = vmatprep.subr.bf16.mxu0 %v6589_v31  ;;  %v572_v41 = vpack.c.bf16 %v7783_v10, %v7748_v17  ;;  %v7902_v44 = vld [vmem:[#allocation2 + $0x82] sm:$0xff] }
 0x195   :  { %v458_v46 = vadd.f32 %v442_v42, %v7478_v49  ;;  %v421_v47 = vmul.f32 %v6635_v11, %v373_v61  ;;  %v7829_v1 = vpack.c.bf16 %v592_v18, %v591_v50  ;;  %v6593_v34 = vld [vmem:[#allocation12 + $0x68] sm:$0xff]   ;;  %v6596_v35 = vld [vmem:[#allocation12 + $0x70] sm:$0xff]   ;;  %v1419_v61 = vld [vmem:[#allocation2 + $0xc2] sm:$0xff] }
 0x196   :  { %v482_v19 = vadd.f32 %v7638_v27, %v459_v63  ;;  %v445_v32 = vmul.f32 %v7626_v4, %v422_v3  ;;  %v7898_v7 = vld [vmem:[#allocation2 + $0xb0] sm:$0xff]  ;;  %v7915_v63 = vld [vmem:[#allocation2 + $0xc0] sm:$0xff] }
 0x197   :  { %v481_v48 = vadd.f32 %v7638_v27, %v458_v46  ;;  %v444_v55 = vmul.f32 %v7626_v4, %v421_v47  ;;  %6226 = vmatmul.mubr.msk.bf16.gmra.mrb[8].mxu1 %vm181_vm0, %v7829_v1  ;;  %6316 = vmatpush3.bf16.msra.mxu0 %v6589_v31  ;;  %v7886_v31 = vld [vmem:[#allocation2 + $0x62] sm:$0xff]  ;;  %v1416_v38 = vld [vmem:[#allocation2 + $0x72] sm:$0xff] }
 0x198   :  { %550 = vst.msk [vmem:[#allocation2 + $0x101] sm:$0xff] %vm181_vm0, %v482_v19  ;;  %v461_v49 = vadd.f32 %v445_v32, %v7484_v52  ;;  %6333 = vmatprep.subr.bf16.mxu0 %v6592_v22  ;;  %v1243_v52 = vld [vmem:[#allocation2 + $0xe1] sm:$0xff]  ;;  %v1428_v12 = vpack.c.bf16 %v7886_v31, %v1414_v30  ;;  %v1418_v21 = vld [vmem:[#allocation2 + $0xb2] sm:$0xff]  ;;  %v1429_v42 = vpack.c.bf16 %v7902_v44, %v1416_v38 }
 0x199   :  { %549 = vst.msk [vmem:[#allocation2 + $0xf1] sm:$0xff] %vm181_vm0, %v481_v48  ;;  %v460_v5 = vadd.f32 %v444_v55, %v7486_v53  ;;  %v1253_v16 = vpack.c.bf16 %v1243_v52, %v592_v18  ;;  %v1430_v11 = vpack.c.bf16 %v1419_v61, %v1418_v21  ;;  %v7910_v17 = vld [vmem:[#allocation2 + $0xd0] sm:$0xff]  ;;  %v1421_v18 = vld [vmem:[#allocation2 + $0xe2] sm:$0xff] }
 0x19a   :  { %v484_v13 = vadd.f32 %v7638_v27, %v461_v49  ;;  %6302 = vmatmul.mubr.msk.bf16.gmra.mrb[4].mxu0 %vm181_vm0, %v1251_v58  ;;  %v574_v3 = vpack.c.bf16 %v7910_v17, %v7915_v63  ;;  %v1420_v50 = vld [vmem:[#allocation2 + $0xd2] sm:$0xff]  ;;  %v876_v49 = vld [vmem:[#allocation2 + $0x2] sm:$0xff] }
 0x19b   :  { %v483_v4 = vadd.f32 %v7638_v27, %v460_v5  ;;  %6305 = vmatprep.mubr.msk.bf16.mxu0 %vm181_vm0, %v1252_v59  ;;  %v1431_v32 = vpack.c.bf16 %v1421_v18, %v1420_v50 }
 0x19c   :  { %552 = vst.msk [vmem:[#allocation2 + $0x121] sm:$0xff] %vm181_vm0, %v484_v13 }
 0x19d   :  { %551 = vst.msk [vmem:[#allocation2 + $0x111] sm:$0xff] %vm181_vm0, %v483_v4  ;;  %v892_v4 = vpack.c.bf16 %v7863_v37, %v876_v49  ;;  %v897_v37 = vpack.c.bf16 %v1420_v50, %v1419_v61  ;;  %v6600_v50 = vld [vmem:[#allocation16] sm:$0xff]  }
 0x19f   :  { %v1245_v43 = vld [vmem:[#allocation2 + $0x101] sm:$0xff] }
 0x1a0   :  { %v594_v62 = vld [vmem:[#allocation2 + $0xf1] sm:$0xff]  ;;  %v1423_v19 = vld [vmem:[#allocation2 + $0x102] sm:$0xff] }
 0x1a1   :  { %v7851_v8 = vpack.c.bf16 %v594_v62, %v1243_v52  ;;  %v1254_v53 = vpack.c.bf16 %v1245_v43, %v594_v62  ;;  %v7913_v10 = vld [vmem:[#allocation2 + $0xf0] sm:$0xff]  ;;  %v567_v58 = vld [vmem:[#allocation2 + $0x100] sm:$0xff] }
 0x1a2   :  { %6306 = vmatmul.mubr.msk.bf16.gmra.mrb[8].mxu0 %vm181_vm0, %v1253_v16  ;;  %v1422_v47 = vld [vmem:[#allocation2 + $0xf2] sm:$0xff]  ;;  %v894_v16 = vpack.c.bf16 %v1414_v30, %v7880_v29  ;;  %v6597_v62 = vld [vmem:[#allocation12 + $0x78] sm:$0xff]  }
 0x1a3   :  { %6229 = vmatprep.mubr.msk.bf16.mxu1 %vm181_vm0, %v7851_v8  ;;  %6309 = vmatprep.mubr.msk.bf16.mxu0 %vm181_vm0, %v1254_v53  ;;  %v7857_v27 = vld [vmem:[#allocation2 + $0x121] sm:$0xff]  ;;  %v1432_v48 = vpack.c.bf16 %v1423_v19, %v1422_v47  ;;  %v1774_v30 = vld [vmem:[#allocation2 + $0x91] sm:$0xff] }
 0x1a4   :  { %v596_v0 = vld [vmem:[#allocation2 + $0x111] sm:$0xff]  ;;  %v7930_v13 = vld [vmem:[#allocation2 + $0x122] sm:$0xff] }
 0x1a5   :  { %v7859_v20 = vpack.c.bf16 %v596_v0, %v1245_v43  ;;  %v1255_v24 = vpack.c.bf16 %v7857_v27, %v596_v0  ;;  %v7926_v55 = vld [vmem:[#allocation2 + $0x110] sm:$0xff]  ;;  %v893_v43 = vpack.c.bf16 %v7878_v40, %v7865_v25  ;;  %v884_v53 = vld [vmem:[#allocation2 + $0xa2] sm:$0xff]  ;;  %v895_v0 = vpack.c.bf16 %v1416_v38, %v7886_v31 }
 0x1a6   :  { %v576_v5 = vpack.c.bf16 %v7926_v55, %v567_v58  ;;  %v1424_v59 = vld [vmem:[#allocation2 + $0x112] sm:$0xff]  ;;  %v898_v25 = vpack.c.bf16 %v1422_v47, %v1421_v18  ;;  %v1786_v31 = vpack.c.bf16 %v1774_v30, %v7831_v9  ;;  %v2919_v18 = vld [vmem:[#allocation7 + $0x60] sm:$0xff] }
 0x1a7   :  { %6230 = vmatmul.mubr.msk.bf16.gmra.mrb[12].mxu1 %vm181_vm0, %v7859_v20  ;;  %v1433_v52 = vpack.c.bf16 %v7930_v13, %v1424_v59  ;;  %v1952_v9 = vld [vmem:[#allocation2 + $0x92] sm:$0xff] }
 0x1a8   :  { %6237 = vmatprep.mubr.msk.bf16.mxu1 %vm181_vm0, %v569_v36  ;;  %v896_v36 = vpack.c.bf16 %v1418_v21, %v884_v53  ;;  %v2916_v21 = vld [vmem:[#allocation7 + $0x48] sm:$0xff] }
 0x1aa   :  { %6310 = vmatmul.mubr.msk.bf16.gmra.mrb[12].mxu0 %vm181_vm0, %v1255_v24  ;;  %v1596_v24 = vld [vmem:[#allocation2 + $0x90] sm:$0xff] }
 0x1ab   :  { %6317 = vmatprep.mubr.msk.bf16.mxu0 %vm181_vm0, %v1426_v26  ;;  %v1603_v26 = vld [vmem:[#allocation2 + $0x120] sm:$0xff] }
 0x1af   :  { %6238 = vmatmul.mubr.msk.bf16.vlgmr.msra.gmra.mrb[0].mxu1 %vm181_vm0, %v7876_v39 }
 0x1b0   :  { %6241 = vmatprep.mubr.msk.bf16.mxu1 %vm181_vm0, %v7884_v28  ;;  %6254 = vmatpush3.bf16.msra.mxu1 %v7735_v45  ;;  %v573_v45 = vpack.c.bf16 %v7898_v7, %v561_v2 }
 0x1b1   :  { %6255 = vmatprep.subr.bf16.mxu1 %v6595_v15 }
 0x1b2   :  { %6318 = vmatmul.mubr.msk.bf16.vlgmr.msra.gmra.mrb[0].mxu0 %vm181_vm0, %v1427_v57 }
 0x1b3   :  { %6334 = vmatpush3.bf16.msra.mxu0 %v6592_v22  ;;  %6321 = vmatprep.mubr.msk.bf16.mxu0 %vm181_vm0, %v1428_v12  ;;  %v7919_v22 = vld [vmem:[#allocation2 + $0xe0] sm:$0xff]  ;;  %v2908_v12 = vld [vmem:[#allocation7 + $0x8] sm:$0xff] }
 0x1b4   :  { %6335 = vmatprep.subr.bf16.mxu0 %v6593_v34  ;;  %6256 = vmatpush3.bf16.msra.mxu1 %v6595_v15  ;;  %v575_v46 = vpack.c.bf16 %v7913_v10, %v7919_v22  ;;  %v1075_v29 = vpack.c.bf16 %v7919_v22, %v7910_v17  ;;  %v1076_v15 = vpack.c.bf16 %v567_v58, %v7913_v10  ;;  %v2918_v17 = vld [vmem:[#allocation7 + $0x58] sm:$0xff]  ;;  %v3008_v22 = vsel %vm2923_vm3, %v2919_v18, 0.0 }
 0x1b5   :  { %6433 = vmatprep.subr.bf16.mxu1 %v7588_v60  ;;  %v2927_v47 = vsel %vm2923_vm3, %v2908_v12, -inf  ;;  %v2957_v58 = vsel %vm2923_vm3, %v2918_v17, -inf }
 0x1b7   :  { %6242 = vmatmul.mubr.msk.bf16.gmra.mrb[4].mxu1 %vm181_vm0, %v572_v41  ;;  %6336 = vmatpush3.bf16.msra.mxu0 %v6593_v34  ;;  %v2909_v34 = vld [vmem:[#allocation7 + $0x10] sm:$0xff] }
 0x1b8   :  { %6245 = vmatprep.mubr.msk.bf16.mxu1 %vm181_vm0, %v573_v45  ;;  %6353 = vmatprep.subr.bf16.mxu0 %v6596_v35  ;;  %v2978_v2 = vsel %vm2923_vm3, %v2909_v34, 0.0 }
 0x1ba   :  { %6322 = vmatmul.mubr.msk.bf16.gmra.mrb[4].mxu0 %vm181_vm0, %v1429_v42  ;;  %v2917_v42 = vld [vmem:[#allocation7 + $0x50] sm:$0xff] }
 0x1bb   :  { %6325 = vmatprep.mubr.msk.bf16.mxu0 %vm181_vm0, %v1430_v11  ;;  %v2999_v11 = vsel %vm2923_vm3, %v2916_v21, 0.0  ;;  %v3002_v10 = vsel %vm2923_vm3, %v2917_v42, 0.0 }
 0x1bf   :  { %6246 = vmatmul.mubr.msk.bf16.gmra.mrb[8].mxu1 %vm181_vm0, %v574_v3 }
 0x1c0   :  { %6249 = vmatprep.mubr.msk.bf16.mxu1 %vm181_vm0, %v575_v46 }
 0x1c2   :  { %6326 = vmatmul.mubr.msk.bf16.gmra.mrb[8].mxu0 %vm181_vm0, %v1431_v32  ;;  %v6601_v32 = vld [vmem:[#allocation16 + $0x8] sm:$0xff]  }
 0x1c3   :  { %6329 = vmatprep.mubr.msk.bf16.mxu0 %vm181_vm0, %v1432_v48 }
 0x1c7   :  { %6250 = vmatmul.mubr.msk.bf16.gmra.mrb[12].mxu1 %vm181_vm0, %v576_v5 }
 0x1c8   :  { %6257 = vmatprep.mubr.msk.bf16.mxu1 %vm181_vm0, %v892_v4  ;;  %v2913_v4 = vld [vmem:[#allocation7 + $0x30] sm:$0xff] }
 0x1ca   :  { %6330 = vmatmul.mubr.msk.bf16.gmra.mrb[12].mxu0 %vm181_vm0, %v1433_v52  ;;  %v2990_v52 = vsel %vm2923_vm3, %v2913_v4, 0.0 }
 0x1cb   :  { %6337 = vmatprep.mubr.msk.bf16.mxu0 %vm181_vm0, %v7876_v39  ;;  %v1074_v39 = vpack.c.bf16 %v7915_v63, %v7898_v7  ;;  %v2975_v7 = vsel %vm2923_vm3, %v2908_v12, 0.0  ;;  %v3005_v63 = vsel %vm2923_vm3, %v2918_v17, 0.0  ;;  %v3262_v12 = vld [vmem:[#allocation3 + $0x2] sm:$0xff] }
 0x1cc   :  { %2976 = vadd.xlane.f32.xlu1 %v2975_v7  ;;  %v8228_v7 = vld [vmem:[#allocation3 + $0x103] sm:$0xff] }
 0x1cf   :  { %6258 = vmatmul.mubr.msk.bf16.vlgmr.msra.gmra.mrb[0].mxu1 %vm181_vm0, %v893_v43 }
 0x1d0   :  { %6261 = vmatprep.mubr.msk.bf16.mxu1 %vm181_vm0, %v894_v16  ;;  %6435 = vmatpush3.bf16.msra.mxu1 %v7588_v60  ;;  %v1608_v60 = vpack.c.bf16 %v1596_v24, %v7785_v51  ;;  %v1604_v51 = vld [vmem:[#allocation2 + $0x130] sm:$0xff] }
 0x1d1   :  { %6434 = vmatprep.subr.bf16.mxu1 %v7598_v6  ;;  %v1612_v40 = vpack.c.bf16 %v1604_v51, %v1603_v26 }
 0x1d2   :  { %6338 = vmatmul.mubr.msk.bf16.vlgmr.msra.gmra.mrb[0].mxu0 %vm181_vm0, %v7884_v28  ;;  %v6599_v28 = vld [vmem:[#allocation12 + $0x88] sm:$0xff]  }
 0x1d3   :  { %6354 = vmatpush3.bf16.msra.mxu0 %v6596_v35  ;;  %6341 = vmatprep.mubr.msk.bf16.mxu0 %vm181_vm0, %v572_v41  ;;  %v2910_v35 = vld [vmem:[#allocation7 + $0x18] sm:$0xff]  ;;  %v2911_v41 = vld [vmem:[#allocation7 + $0x20] sm:$0xff] }
 0x1d4   :  { %6355 = vmatprep.subr.bf16.mxu0 %v6597_v62  ;;  %6436 = vmatpush3.bf16.msra.mxu1 %v7598_v6  ;;  %v899_v6 = vpack.c.bf16 %v1424_v59, %v1423_v19  ;;  %v2981_v38 = vsel %vm2923_vm3, %v2910_v35, 0.0  ;;  %v2984_v45 = vsel %vm2923_vm3, %v2911_v41, 0.0  ;;  %v2936_v19 = vsel %vm2923_vm3, %v2911_v41, -inf }
 0x1d5   :  { %2982 = vadd.xlane.f32.xlu1 %v2981_v38  ;;  %6393 = vmatprep.subr.bf16.mxu1 %v6600_v50  ;;  %v2933_v48 = vsel %vm2923_vm3, %v2910_v35, -inf }
 0x1d7   :  { %6262 = vmatmul.mubr.msk.bf16.gmra.mrb[4].mxu1 %vm181_vm0, %v895_v0  ;;  %6356 = vmatpush3.bf16.msra.mxu0 %v6597_v62  ;;  %v8021_v62 = vld [vmem:[#allocation7 + $0x38] sm:$0xff] }
 0x1d8   :  { %6265 = vmatprep.mubr.msk.bf16.mxu1 %vm181_vm0, %v896_v36  ;;  %6373 = vmatprep.subr.bf16.mxu0 %v6598_v14  ;;  %v2993_v53 = vsel %vm2923_vm3, %v8021_v62, 0.0  ;;  %v2945_v24 = vsel %vm2923_vm3, %v8021_v62, -inf }
 0x1da   :  { %6342 = vmatmul.mubr.msk.bf16.gmra.mrb[4].mxu0 %vm181_vm0, %v1608_v60 }
 0x1db   :  { %6345 = vmatprep.mubr.msk.bf16.mxu0 %vm181_vm0, %v574_v3 }
 0x1df   :  { %6266 = vmatmul.mubr.msk.bf16.gmra.mrb[8].mxu1 %vm181_vm0, %v897_v37 }
 0x1e0   :  { %6269 = vmatprep.mubr.msk.bf16.mxu1 %vm181_vm0, %v898_v25 }
 0x1e2   :  { %6346 = vmatmul.mubr.msk.bf16.gmra.mrb[8].mxu0 %vm181_vm0, %v575_v46  ;;  %v2930_v46 = vsel %vm2923_vm3, %v2909_v34, -inf }
 0x1e3   :  { %6349 = vmatprep.mubr.msk.bf16.mxu0 %vm181_vm0, %v576_v5  ;;  %v2912_v5 = vld [vmem:[#allocation7 + $0x28] sm:$0xff] }
 0x1e4   :  { %v2987_v59 = vsel %vm2923_vm3, %v2912_v5, 0.0 }
 0x1e7   :  { %6270 = vmatmul.mubr.msk.bf16.gmra.mrb[12].mxu1 %vm181_vm0, %v899_v6 }
 0x1e8   :  { %6285 = vmatprep.mubr.msk.bf16.mxu1 %vm181_vm0, %v1074_v39 }
 0x1ea   :  { %6350 = vmatmul.mubr.msk.bf16.gmra.mrb[12].mxu0 %vm181_vm0, %v1612_v40 }
 0x1eb   :  { %6357 = vmatprep.mubr.msk.bf16.mxu0 %vm181_vm0, %v7715_v56  ;;  %v1077_v56 = vpack.c.bf16 %v1603_v26, %v7926_v55  ;;  %v2951_v55 = vsel %vm2923_vm3, %v2916_v21, -inf  ;;  %v2922_v26 = vld [vmem:[#allocation7 + $0x78] sm:$0xff]  ;;  %v8238_v21 = vld [vmem:[#allocation3 + $0x104] sm:$0xff] }
 0x1ec   :  { %v3017_v40 = vsel %vm2923_vm3, %v2922_v26, 0.0  ;;  %v2969_v30 = vsel %vm2923_vm3, %v2922_v26, -inf  ;;  %v3270_v26 = vld [vmem:[#allocation3 + $0xe2] sm:$0xff] }
 0x1ef   :  { %6286 = vmatmul.mubr.msk.bf16.vlgmr.msra.gmra.mrb[8].mxu1 %vm181_vm0, %v1075_v29 }
 0x1f0   :  { %6289 = vmatprep.mubr.msk.bf16.mxu1 %vm181_vm0, %v1076_v15  ;;  %6394 = vmatpush3.bf16.msra.mxu1 %v6600_v50  ;;  %v3156_v15 = vld [vmem:[#allocation3] sm:$0xff]  ;;  %v3157_v50 = vld [vmem:[#allocation3 + $0x10] sm:$0xff] }
 0x1f1   :  { %6395 = vmatprep.subr.bf16.mxu1 %v6601_v32 }
 0x1f2   :  { %6358 = vmatmul.mubr.msk.bf16.vlgmr.msra.gmra.mrb[0].mxu0 %vm181_vm0, %v7764_v23  ;;  %v1782_v23 = vld [vmem:[#allocation2 + $0x131] sm:$0xff] }
 0x1f3   :  { %6374 = vmatpush3.bf16.msra.mxu0 %v6598_v14  ;;  %6361 = vmatprep.mubr.msk.bf16.mxu0 %vm181_vm0, %v7792_v33  ;;  %v1790_v33 = vpack.c.bf16 %v1782_v23, %v7857_v27  ;;  %v2960_v14 = vsel %vm2923_vm3, %v2919_v18, -inf  ;;  %v8210_v23 = vld [vmem:[#allocation19 + $0x1] ss:$0 sm:$0xff]  ;;  %v3210_v18 = vld [vmem:[#allocation3 + $0x11] sm:$0xff] }
 0x1f4   :  { %6375 = vmatprep.subr.bf16.mxu0 %v6599_v28  ;;  %6396 = vmatpush3.bf16.msra.mxu1 %v6601_v32  ;;  %11573 = vst [vmem:[#allocation30_spill] sm:$0xff] %v8210_v23 }
 0x1f7   :  { %6290 = vmatmul.mubr.msk.bf16.gmra.mrb[12].mxu1 %vm181_vm0, %v1077_v56  ;;  %6376 = vmatpush3.bf16.msra.mxu0 %v6599_v28  ;;  %v3209_v28 = vld [vmem:[#allocation3 + $0x1] sm:$0xff] }
 0x1f8   :  { %v8205_v56 = vld [vmem:[#allocation3 + $0x101] sm:$0xff] }
 0x1fa   :  { %6362 = vmatmul.mubr.msk.bf16.gmra.mrb[4].mxu0 %vm181_vm0, %v1786_v31  ;;  %v8208_v31 = vld [vmem:[#allocation19] ss:$0 sm:$0xff] }
 0x1fb   :  { %6365 = vmatprep.mubr.msk.bf16.mxu0 %vm181_vm0, %v7829_v1  ;;  %v1964_v1 = vpack.c.bf16 %v1952_v9, %v7902_v44  ;;  %v2915_v44 = vld [vmem:[#allocation7 + $0x40] sm:$0xff]  ;;  %11572 = vst [vmem:[#allocation29_spill] sm:$0xff] %v8208_v31 }
 0x1fc   :  { %v2996_v61 = vsel %vm2923_vm3, %v2915_v44, 0.0  ;;  %v2948_v49 = vsel %vm2923_vm3, %v2915_v44, -inf  ;;  %v8214_v9 = vld [vmem:[#allocation3 + $0x102] sm:$0xff] }
 0x1fd   :  { %2997 = vadd.xlane.f32.xlu1 %v2996_v61 }
 0x201   :  { %3003 = vadd.xlane.f32.xlu1 %v3002_v10  ;;  %v3315_v10 = vld [vmem:[#allocation3 + $0x3] sm:$0xff] }
 0x202   :  { %6366 = vmatmul.mubr.msk.bf16.gmra.mrb[8].mxu0 %vm181_vm0, %v7851_v8  ;;  %v1960_v8 = vld [vmem:[#allocation2 + $0x132] sm:$0xff] }
 0x203   :  { %6369 = vmatprep.mubr.msk.bf16.mxu0 %vm181_vm0, %v7859_v20  ;;  %v1968_v27 = vpack.c.bf16 %v1960_v8, %v7930_v13  ;;  %v2907_v20 = vld [vmem:[#allocation7] sm:$0xff]  ;;  %v2939_v13 = vsel %vm2923_vm3, %v2912_v5, -inf  ;;  %v3177_v8 = vmul.f32 %v8208_v31, %v3156_v15  ;;  %v3231_v5 = vmul.f32 %v8210_v23, %v3210_v18 }
 0x204   :  { %v2972_v57 = vsel %vm2923_vm3, %v2907_v20, 0.0  ;;  %v2924_v3 = vsel %vm2923_vm3, %v2907_v20, -inf }
 0x205   :  { %2973 = vadd.xlane.f32.xlu0 %v2972_v57  ;;  %3009 = vadd.xlane.f32.xlu1 %v3008_v22  ;;  %v3240_v57 = vmul.f32 %v8210_v23, %v8205_v56 }
 0x209   :  { %2979 = vadd.xlane.f32.xlu0 %v2978_v2  ;;  %2928 = vmax.xlane.f32.xlu1 %v2927_v47  ;;  %v8226_v2 = vld [vmem:[#allocation19 + $0x2] ss:$0 sm:$0xff]  ;;  %v8249_v47 = vld [vmem:[#allocation19 + $0x5] ss:$0 sm:$0xff] }
 0x20a   :  { %6370 = vmatmul.mubr.msk.bf16.gmra.mrb[12].mxu0 %vm181_vm0, %v1790_v33  ;;  %v8212_v33 = vld [vmem:[#allocation3 + $0x100] sm:$0xff]  ;;  %11574 = vst [vmem:[#allocation31_spill] sm:$0xff] %v8226_v2  ;;  %v3293_v38 = vmul.f32 %v8226_v2, %v8214_v9  ;;  %11577 = vst [vmem:[#allocation34_spill] sm:$0xff] %v8249_v47 }
 0x20b   :  { %6377 = vmatprep.mubr.msk.bf16.mxu0 %vm181_vm0, %v893_v43  ;;  %v2942_v43 = vsel %vm2923_vm3, %v2913_v4, -inf  ;;  %v3187_v20 = vmul.f32 %v8208_v31, %v8212_v33  ;;  %v3263_v4 = vld [vmem:[#allocation3 + $0x12] sm:$0xff] }
 0x20d   :  { %2985 = vadd.xlane.f32.xlu0 %v2984_v45  ;;  %2934 = vmax.xlane.f32.xlu1 %v2933_v48  ;;  %v3256_v41 = vadd.f32 %v3240_v57, %v3187_v20  ;;  %v8236_v45 = vld [vmem:[#allocation19 + $0x3] ss:$0 sm:$0xff]  ;;  %v3291_v20 = vmul.f32 %v8226_v2, %v3270_v26 }
 0x20e   :  { %11575 = vst [vmem:[#allocation32_spill] sm:$0xff] %v8236_v45  ;;  %v3346_v17 = vmul.f32 %v8236_v45, %v8228_v7  ;;  %v3336_v48 = vmul.f32 %v8236_v45, %v3315_v10  ;;  %v8274_v57 = vld [vmem:[#allocation3 + $0x14] sm:$0xff] }
 0x20f   :  { %v8280_v10 = vld [vmem:[#allocation3 + $0x15] sm:$0xff] }
 0x211   :  { %3000 = vadd.xlane.f32.xlu0 %v2999_v11  ;;  %2949 = vmax.xlane.f32.xlu1 %v2948_v49  ;;  %v3309_v11 = vadd.f32 %v3293_v38, %v3256_v41 }
 0x212   :  { %6378 = vmatmul.mubr.msk.bf16.vlgmr.msra.gmra.mrb[0].mxu0 %vm181_vm0, %v894_v16  ;;  %v2954_v16 = vsel %vm2923_vm3, %v2917_v42, -inf  ;;  %v3283_v42 = vmul.f32 %v8226_v2, %v3262_v12  ;;  %v3323_v12 = vld [vmem:[#allocation3 + $0xe3] sm:$0xff] }
 0x213   :  { %6381 = vmatprep.mubr.msk.bf16.mxu0 %vm181_vm0, %v895_v0  ;;  %v8050_v0 = vld [vmem:[#allocation7 + $0x68] sm:$0xff]  ;;  %v3362_v22 = vadd.f32 %v3346_v17, %v3309_v11  ;;  %v3344_v17 = vmul.f32 %v8236_v45, %v3323_v12 }
 0x214   :  { %v3011_v36 = vsel %vm2923_vm3, %v8050_v0, 0.0  ;;  %v2963_v60 = vsel %vm2923_vm3, %v8050_v0, -inf }
 0x215   :  { %3006 = vadd.xlane.f32.xlu0 %v3005_v63  ;;  %2955 = vmax.xlane.f32.xlu1 %v2954_v16  ;;  %v8243_v63 = vld [vmem:[#allocation19 + $0x4] ss:$0 sm:$0xff] }
 0x216   :  { %11576 = vst [vmem:[#allocation33_spill] sm:$0xff] %v8243_v63 }
 0x219   :  { %2925 = vmax.xlane.f32.xlu0 %v2924_v3  ;;  %2961 = vmax.xlane.f32.xlu1 %v2960_v14  ;;  %v8245_v3 = vld [vmem:[#allocation3 + $0x105] sm:$0xff] }
 0x21a   :  { %6382 = vmatmul.mubr.msk.bf16.gmra.mrb[4].mxu0 %vm181_vm0, %v1964_v1  ;;  %v3452_v49 = vmul.f32 %v8249_v47, %v8245_v3 }
 0x21b   :  { %6385 = vmatprep.mubr.msk.bf16.mxu0 %vm181_vm0, %v897_v37  ;;  %v2921_v37 = vld [vmem:[#allocation7 + $0x70] sm:$0xff] }
 0x21d   :  { %2931 = vmax.xlane.f32.xlu0 %v2930_v46  ;;  %3012 = vadd.xlane.f32.xlu1 %v3011_v36  ;;  %v3399_v46 = vmul.f32 %v8243_v63, %v8238_v21  ;;  %v3284_v36 = vmul.f32 %v8226_v2, %v3263_v4 }
 0x221   :  { %2937 = vmax.xlane.f32.xlu0 %v2936_v19  ;;  %2964 = vmax.xlane.f32.xlu1 %v2963_v60  ;;  %v8251_v19 = vld [vmem:[#allocation3 + $0x106] sm:$0xff] }
 0x222   :  { %6386 = vmatmul.mubr.msk.bf16.gmra.mrb[8].mxu0 %vm181_vm0, %v898_v25  ;;  %v3014_v25 = vsel %vm2923_vm3, %v2921_v37, 0.0  ;;  %11578 = vst [vmem:[#allocation35_spill] sm:$0xff] %v8251_v19  ;;  %v3421_v60 = vld [vmem:[#allocation3 + $0x5] sm:$0xff] }
 0x223   :  { %6389 = vmatprep.mubr.msk.bf16.mxu0 %vm181_vm0, %v899_v6  ;;  %v2966_v6 = vsel %vm2923_vm3, %v2921_v37, -inf  ;;  %v3442_v15 = vmul.f32 %v8249_v47, %v3421_v60  ;;  %v3218_v60 = vld [vmem:[#allocation3 + $0xf1] sm:$0xff] }
 0x225   :  { %2952 = vmax.xlane.f32.xlu0 %v2951_v55  ;;  %3015 = vadd.xlane.f32.xlu1 %v3014_v25  ;;  %v3415_v55 = vadd.f32 %v3399_v46, %v3362_v22  ;;  %v3376_v22 = vld [vmem:[#allocation3 + $0xe4] sm:$0xff]  ;;  %v8282_v46 = vld [vmem:[#allocation19 + $0x7] ss:$0 sm:$0xff] }
 0x226   :  { %11581 = vst [vmem:[#allocation38_spill] sm:$0xff] %v8282_v46 }
 0x227   :  { %v3468_v16 = vadd.f32 %v3452_v49, %v3415_v55  ;;  %v3549_v55 = vmul.f32 %v8282_v46, %v3157_v50 }
 0x229   :  { %2958 = vmax.xlane.f32.xlu0 %v2957_v58  ;;  %2967 = vmax.xlane.f32.xlu1 %v2966_v6  ;;  %v3178_v58 = vmul.f32 %v8208_v31, %v3157_v50  ;;  %v8268_v6 = vld [vmem:[#allocation3 + $0x13] sm:$0xff] }
 0x22a   :  { %6390 = vmatmul.mubr.msk.bf16.gmra.mrb[12].mxu0 %vm181_vm0, %v1968_v27  ;;  %v3230_v27 = vmul.f32 %v8210_v23, %v3209_v28 }
 0x22c   :  { %v3246_v61 = vadd.f32 %v3230_v27, %v3177_v8  ;;  %v3474_v8 = vld [vmem:[#allocation3 + $0x6] sm:$0xff] }
 0x22d   :  { %2988 = vadd.xlane.f32.xlu0 %v2987_v59  ;;  %3018 = vadd.xlane.f32.xlu1 %v3017_v40  ;;  %v3368_v59 = vld [vmem:[#allocation3 + $0x4] sm:$0xff] }
 0x22e   :  { %v3299_v32 = vadd.f32 %v3283_v42, %v3246_v61  ;;  %v3389_v14 = vmul.f32 %v8243_v63, %v3368_v59  ;;  %v3390_v42 = vmul.f32 %v8243_v63, %v8274_v57 }
 0x231   :  { %2940 = vmax.xlane.f32.xlu0 %v2939_v13  ;;  %2970 = vmax.xlane.f32.xlu1 %v2969_v30  ;;  %v8258_v13 = vld [vmem:[#allocation19 + $0x6] ss:$0 sm:$0xff]  ;;  %v3337_v30 = vmul.f32 %v8236_v45, %v8268_v6 }
 0x232   :  { %11579 = vst [vmem:[#allocation36_spill] sm:$0xff] %v8258_v13  ;;  %v3505_v62 = vmul.f32 %v8258_v13, %v8251_v19  ;;  %v3495_v38 = vmul.f32 %v8258_v13, %v3474_v8  ;;  %v8308_v8 = vld [vmem:[#allocation19 + $0x9] ss:$0 sm:$0xff] }
 0x234   :  { %v8263_v0 = vadd.f32 %v3505_v62, %v3468_v16  ;;  %v8294_v16 = vld [vmem:[#allocation3 + $0x16] sm:$0xff]  ;;  %v3429_v62 = vld [vmem:[#allocation3 + $0xe5] sm:$0xff] }
 0x235   :  { %2991 = vadd.xlane.f32.xlu0 %v2990_v52  ;;  %v3164_v52 = vld [vmem:[#allocation3 + $0xe0] sm:$0xff] }
 0x236   :  { %11580 = vst [vmem:[#allocation37_spill] sm:$0xff] %v8263_v0  ;;  %v3185_v37 = vmul.f32 %v8208_v31, %v3164_v52  ;;  %v3397_v52 = vmul.f32 %v8243_v63, %v3376_v22 }
 0x239   :  { %2943 = vmax.xlane.f32.xlu0 %v2942_v43  ;;  %v3217_v43 = vld [vmem:[#allocation3 + $0xe1] sm:$0xff] }
 0x23a   :  { %v3238_v25 = vmul.f32 %v8210_v23, %v3217_v43 }
 0x23c   :  { %v3254_v27 = vadd.f32 %v3238_v25, %v3185_v37  ;;  %v3496_v25 = vmul.f32 %v8258_v13, %v8294_v16 }
 0x23d   :  { %2994 = vadd.xlane.f32.xlu0 %v2993_v53  ;;  %v3352_v53 = vadd.f32 %v3336_v48, %v3299_v32 }
 0x23e   :  { %v3307_v11 = vadd.f32 %v3291_v20, %v3254_v27 }
 0x23f   :  { %v3405_v40 = vadd.f32 %v3389_v14, %v3352_v53  ;;  %v8298_v14 = vld [vmem:[#allocation19 + $0x8] ss:$0 sm:$0xff] }
 0x240   :  { %v3360_v59 = vadd.f32 %v3344_v17, %v3307_v11  ;;  %11582 = vst [vmem:[#allocation39_spill] sm:$0xff] %v8298_v14  ;;  %v3602_v50 = vmul.f32 %v8298_v14, %v3210_v18  ;;  %v3239_v18 = vmul.f32 %v8210_v23, %v3218_v60 }
 0x241   :  { %2946 = vmax.xlane.f32.xlu0 %v2945_v24  ;;  %v3247_v24 = vadd.f32 %v3231_v5, %v3178_v58  ;;  %v3458_v41 = vadd.f32 %v3442_v15, %v3405_v40  ;;  %v3443_v5 = vmul.f32 %v8249_v47, %v8280_v10  ;;  %v3450_v40 = vmul.f32 %v8249_v47, %v3429_v62  ;;  %v8304_v15 = vld [vmem:[#allocation3 + $0x20] sm:$0xff] }
 0x242   :  { %v3413_v26 = vadd.f32 %v3397_v52, %v3360_v59  ;;  %v3550_v11 = vmul.f32 %v8282_v46, %v8304_v15  ;;  %v8330_v59 = vld [vmem:[#allocation19 + $0xa] ss:$0 sm:$0xff] }
 0x243   :  { %v3300_v28 = vadd.f32 %v3284_v36, %v3247_v24  ;;  %v3511_v48 = vadd.f32 %v3495_v38, %v3458_v41  ;;  %v3165_v36 = vld [vmem:[#allocation3 + $0xf0] sm:$0xff]  ;;  %v3655_v41 = vmul.f32 %v8308_v8, %v3263_v4  ;;  %v8328_v4 = vld [vmem:[#allocation3 + $0x22] sm:$0xff] }
 0x244   :  { %v3186_v27 = vmul.f32 %v8208_v31, %v3165_v36  ;;  %v3271_v38 = vld [vmem:[#allocation3 + $0xf2] sm:$0xff]  ;;  %v3466_v17 = vadd.f32 %v3450_v40, %v3413_v26  ;;  %v3285_v19 = vmul.f32 %v8226_v2, %v8328_v4 }
 0x245   :  { %v3353_v61 = vadd.f32 %v3337_v30, %v3300_v28  ;;  %v3565_v24 = vadd.f32 %v3549_v55, %v3511_v48  ;;  %v3482_v28 = vld [vmem:[#allocation3 + $0xe6] sm:$0xff]  ;;  %v3179_v55 = vmul.f32 %v8208_v31, %v8304_v15  ;;  %v3292_v62 = vmul.f32 %v8226_v2, %v3271_v38 }
 0x246   :  { %v8306_v30 = vld [vmem:[#allocation3 + $0x21] sm:$0xff]  ;;  %v3503_v22 = vmul.f32 %v8258_v13, %v3482_v28  ;;  %v3255_v52 = vadd.f32 %v3239_v18, %v3186_v27  ;;  %v3557_v28 = vmul.f32 %v8282_v46, %v3165_v36  ;;  %v3656_v36 = vmul.f32 %v8308_v8, %v8328_v4 }
 0x247   :  { %v3406_v58 = vadd.f32 %v3390_v42, %v3353_v61  ;;  %v3618_v12 = vadd.f32 %v3602_v50, %v3565_v24  ;;  %v3708_v50 = vmul.f32 %v8330_v59, %v8268_v6  ;;  %v3603_v26 = vmul.f32 %v8298_v14, %v8306_v30  ;;  %v8342_v27 = vld [vmem:[#allocation19 + $0xb] ss:$0 sm:$0xff] }
 0x248   :  { %v3519_v40 = vadd.f32 %v3503_v22, %v3466_v17  ;;  %v3308_v18 = vadd.f32 %v3292_v62, %v3255_v52  ;;  %v3610_v22 = vmul.f32 %v8298_v14, %v3218_v60  ;;  %v8352_v52 = vld [vmem:[#allocation19 + $0xc] ss:$0 sm:$0xff] }
 0x249   :  { %v3459_v37 = vadd.f32 %v3443_v5, %v3406_v58  ;;  %v3232_v58 = vmul.f32 %v8210_v23, %v8306_v30  ;;  %v3671_v24 = vadd.f32 %v3655_v41, %v3618_v12  ;;  %v3761_v41 = vmul.f32 %v8342_v27, %v8274_v57  ;;  %11587 = vst [vmem:[#allocation44_spill] sm:$0xff] %v8352_v52 }
 0x24a   :  { %v3573_v17 = vadd.f32 %v3557_v28, %v3519_v40  ;;  %v3814_v57 = vmul.f32 %v8352_v52, %v8280_v10 }
 0x24b   :  { %v3512_v42 = vadd.f32 %v3496_v25, %v3459_v37  ;;  %v3324_v37 = vld [vmem:[#allocation3 + $0xf3] sm:$0xff]  ;;  %v3248_v0 = vadd.f32 %v3232_v58, %v3179_v55  ;;  %v3724_v6 = vadd.f32 %v3708_v50, %v3671_v24 }
 0x24c   :  { %v3345_v12 = vmul.f32 %v8236_v45, %v3324_v37  ;;  %v3626_v60 = vadd.f32 %v3610_v22, %v3573_v17  ;;  %v3716_v22 = vmul.f32 %v8330_v59, %v3324_v37 }
 0x24d   :  { %v3566_v25 = vadd.f32 %v3550_v11, %v3512_v42  ;;  %v3377_v42 = vld [vmem:[#allocation3 + $0xf4] sm:$0xff]  ;;  %v3301_v55 = vadd.f32 %v3285_v19, %v3248_v0  ;;  %v3777_v50 = vadd.f32 %v3761_v41, %v3724_v6  ;;  %v3663_v19 = vmul.f32 %v8308_v8, %v3271_v38 }
 0x24e   :  { %v3361_v62 = vadd.f32 %v3345_v12, %v3308_v18  ;;  %v3398_v24 = vmul.f32 %v8243_v63, %v3377_v42  ;;  %v3769_v37 = vmul.f32 %v8342_v27, %v3377_v42 }
 0x24f   :  { %v3619_v11 = vadd.f32 %v3603_v26, %v3566_v25  ;;  %v3430_v25 = vld [vmem:[#allocation3 + $0xf5] sm:$0xff]  ;;  %v3830_v10 = vadd.f32 %v3814_v57, %v3777_v50  ;;  %v3679_v38 = vadd.f32 %v3663_v19, %v3626_v60 }
 0x250   :  { %v3414_v18 = vadd.f32 %v3398_v24, %v3361_v62  ;;  %v3451_v12 = vmul.f32 %v8249_v47, %v3430_v25  ;;  %v8371_v62 = vld [vmem:[#allocation19 + $0xe] ss:$0 sm:$0xff] }
 0x251   :  { %v3672_v26 = vadd.f32 %v3656_v36, %v3619_v11  ;;  %v3483_v11 = vld [vmem:[#allocation3 + $0xf6] sm:$0xff]  ;;  %v3732_v60 = vadd.f32 %v3716_v22, %v3679_v38  ;;  %v3822_v22 = vmul.f32 %v8352_v52, %v3430_v25  ;;  %v8410_v25 = vld [vmem:[#allocation19 + $0x13] ss:$0 sm:$0xff] }
 0x252   :  { %v3467_v24 = vadd.f32 %v3451_v12, %v3414_v18  ;;  %v3558_v12 = vmul.f32 %v8282_v46, %v8212_v33  ;;  %11590 = vst [vmem:[#allocation47_spill] sm:$0xff] %v8410_v25 }
 0x253   :  { %v3785_v38 = vadd.f32 %v3769_v37, %v3732_v60 }
 0x292   :  { %v8364_v6 = vpop.xlane.xlu0 %2973 }
 0x296   :  { %v8374_v50 = vpop.xlane.xlu0 %2979 }
 0x2a2   :  { %v8196_v54 = vpop.f32.mrb[0].mxu1 }
 0x2a3   :  { %v8198_v51 = vpop.f32.mrb[1].mxu1 }
 0x2a4   :  { %v8200_v39 = vpop.f32.mrb[2].mxu1 }
 0x2a5   :  { %v8203_v29 = vpop.f32.mrb[3].mxu1 }
 0x2aa   :  { %v8216_v1 = vpop.f32.mrb[4].mxu1 }
 0x2ab   :  { %v8224_v34 = vpop.f32.mrb[5].mxu1 }
 0x2ac   :  { %v8230_v35 = vpop.f32.mrb[6].mxu1 }
 0x2ad   :  { %v8234_v44 = vpop.f32.mrb[7].mxu1 }
 0x2c2   :  { %v8284_v32 = vpop.f32.mrb[8].mxu1 }
 0x2c3   :  { %v8287_v49 = vpop.f32.mrb[9].mxu1 }
 0x2c4   :  { %v8292_v43 = vpop.f32.mrb[10].mxu1 }
 0x2c5   :  { %v8296_v53 = vpop.f32.mrb[11].mxu1 }
 0x2ca   :  { %v8312_v20 = vpop.f32.mrb[12].mxu1 }
 0x2cb   :  { %11583 = vst [vmem:[#allocation40_spill] sm:$0xff] %v8312_v20  ;;  %v8315_v61 = vpop.f32.mrb[13].mxu1  ;;  %v8361_v20 = vld [vmem:[#allocation19 + $0xd] ss:$0 sm:$0xff] }
 0x2cc   :  { %11584 = vst [vmem:[#allocation41_spill] sm:$0xff] %v8315_v61  ;;  %v8320_v48 = vpop.f32.mrb[14].mxu1  ;;  %v3423_v61 = vld [vmem:[#allocation3 + $0x25] sm:$0xff]  ;;  %11588 = vst [vmem:[#allocation45_spill] sm:$0xff] %v8361_v20  ;;  %v3867_v41 = vmul.f32 %v8361_v20, %v8294_v16  ;;  %v3921_v16 = vmul.f32 %v8371_v62, %v8304_v15 }
 0x2cd   :  { %11585 = vst [vmem:[#allocation42_spill] sm:$0xff] %v8320_v48  ;;  %v8326_v5 = vpop.f32.mrb[15].mxu1  ;;  %v3370_v48 = vld [vmem:[#allocation3 + $0x24] sm:$0xff]  ;;  %v8420_v46 = vmul.f32 %v8410_v25, %v3423_v61 }
 0x2ce   :  { %11586 = vst [vmem:[#allocation43_spill] sm:$0xff] %v8326_v5  ;;  %v8340_v5 = vld [vmem:[#allocation3 + $0x23] sm:$0xff]  ;;  %v3391_v28 = vmul.f32 %v8243_v63, %v3370_v48  ;;  %v3762_v17 = vmul.f32 %v8342_v27, %v3370_v48  ;;  %v3883_v57 = vadd.f32 %v3867_v41, %v3830_v10  ;;  %v8389_v41 = vld [vmem:[#allocation13] ss:$0 sm:$0xff] }
 0x2cf   :  { %v3338_v58 = vmul.f32 %v8236_v45, %v8340_v5  ;;  %v3709_v40 = vmul.f32 %v8330_v59, %v8340_v5  ;;  %v3476_v63 = vld [vmem:[#allocation3 + $0x26] sm:$0xff]  ;;  %v3504_v45 = vmul.f32 %v8258_v13, %v3483_v11 }
 0x2d0   :  { %v3937_v10 = vadd.f32 %v3921_v16, %v3883_v57  ;;  %v3868_v42 = vmul.f32 %v8361_v20, %v3476_v63  ;;  %v8403_v57 = vpop.xlane.xlu1 %2976 }
 0x2d1   :  { %v3354_v0 = vadd.f32 %v3338_v58, %v3301_v55  ;;  %v3725_v36 = vadd.f32 %v3709_v40, %v3672_v26  ;;  %v3444_v58 = vmul.f32 %v8249_v47, %v3423_v61  ;;  %v3815_v40 = vmul.f32 %v8352_v52, %v3423_v61  ;;  %v8385_v47 = vpop.xlane.xlu0 %2985 }
 0x2d2   :  { %v3520_v18 = vadd.f32 %v3504_v45, %v3467_v24  ;;  %v8401_v24 = vld [vmem:[#allocation19 + $0x12] ss:$0 sm:$0xff]  ;;  %v3664_v61 = vmul.f32 %v8308_v8, %v8214_v9 }
 0x2d3   :  { %v3407_v55 = vadd.f32 %v3391_v28, %v3354_v0  ;;  %v3778_v26 = vadd.f32 %v3762_v17, %v3725_v36  ;;  %v3497_v0 = vmul.f32 %v8258_v13, %v3476_v63  ;;  %v8381_v28 = vld [vmem:[#allocation19 + $0xf] ss:$0 sm:$0xff]  ;;  %v8392_v17 = vld [vmem:[#allocation19 + $0x10] ss:$0 sm:$0xff] }
 0x2d4   :  { %v3974_v15 = vmul.f32 %v8381_v28, %v8306_v30  ;;  %v3574_v60 = vadd.f32 %v3558_v12, %v3520_v18 }
 0x2d5   :  { %v3460_v19 = vadd.f32 %v3444_v58, %v3407_v55  ;;  %v3831_v36 = vadd.f32 %v3815_v40, %v3778_v26  ;;  %v4027_v55 = vmul.f32 %v8392_v17, %v8328_v4  ;;  %v8399_v58 = vld [vmem:[#allocation19 + $0x11] ss:$0 sm:$0xff]  ;;  %v8408_v26 = vmul.f32 %v8401_v24, %v3370_v48  ;;  %v8412_v40 = vld [vmem:[#allocation19 + $0x14] ss:$0 sm:$0xff] }
 0x2d6   :  { %v4080_v16 = vmul.f32 %v8399_v58, %v8340_v5  ;;  %11591 = vst [vmem:[#allocation48_spill] sm:$0xff] %v8412_v40  ;;  %v3611_v4 = vmul.f32 %v8298_v14, %v8205_v56  ;;  %v8423_v48 = vmul.f32 %v8412_v40, %v3476_v63  ;;  %v8425_v5 = vld [vmem:[#allocation15] ss:$0 sm:$0xff]  ;;  %v3838_v14 = vadd.f32 %v3822_v22, %v3785_v38 }
 0x2d7   :  { %v8395_v45 = vadd.f32 %v3497_v0, %v3460_v19  ;;  %v8417_v0 = vpop.xlane.xlu0 %3000  ;;  %v8428_v12 = vadd.f32 %v3868_v42, %v3831_v36  ;;  %v3717_v63 = vmul.f32 %v8330_v59, %v8228_v7  ;;  %v8441_v42 = vmul.f32 %v8342_v27, %v8238_v21 }
 0x2d8   :  { %v3627_v36 = vadd.f32 %v3611_v4, %v3574_v60  ;;  %v3929_v4 = vmul.f32 %v8371_v62, %v8212_v33 }
 0x2d9   :  { %11589 = vst [vmem:[#allocation46_spill] sm:$0xff] %v8395_v45  ;;  %v3990_v45 = vadd.f32 %v3974_v15, %v3937_v10 }
 0x2db   :  { %v8445_v38 = vpop.xlane.xlu0 %3006  ;;  %v4043_v22 = vadd.f32 %v4027_v55, %v3990_v45  ;;  %v3982_v45 = vmul.f32 %v8381_v28, %v8205_v56 }
 0x2e5   :  { %v6379_v30 = vpop.f32.mrb[0].mxu0 }
 0x2e6   :  { %v6437_v37 = vadd.f32 %v6379_v30, %v8196_v54  ;;  %v2044_v19 = vpop.f32.mrb[1].mxu0  ;;  %v3875_v54 = vmul.f32 %v8361_v20, %v3483_v11 }
 0x2e7   :  { %v6438_v13 = vadd.f32 %v2044_v19, %v8198_v51  ;;  %v6380_v18 = vpop.f32.mrb[2].mxu0 }
 0x2e8   :  { %v2132_v30 = vmul.f32 %v6437_v37, %v8389_v41  ;;  %v6439_v10 = vadd.f32 %v6380_v18, %v8200_v39  ;;  %v2047_v15 = vpop.f32.mrb[3].mxu0  ;;  %v8449_v37 = vmul.f32 %v8352_v52, %v8245_v3  ;;  %v3891_v60 = vadd.f32 %v3875_v54, %v3838_v14 }
 0x2e9   :  { %v2130_v40 = vmul.f32 %v6438_v13, %v8389_v41  ;;  %v6440_v51 = vadd.f32 %v2047_v15, %v8203_v29  ;;  %v3680_v52 = vadd.f32 %v3664_v61, %v3627_v36  ;;  %v4035_v14 = vmul.f32 %v8392_v17, %v8214_v9 }
 0x2ea   :  { %v2155_v11 = vadd.f32 %v8425_v5, %v2132_v30  ;;  %v2133_v39 = vmul.f32 %v6439_v10, %v8389_v41  ;;  %v3021_v30 = vmul.f32 0.25, %v8364_v6  ;;  %v8457_v10 = vpop.xlane.xlu1 %2982  ;;  %v8467_v6 = vmul.f32 %v8399_v58, %v8228_v7 }
 0x2eb   :  { %v2153_v13 = vadd.f32 %v8425_v5, %v2130_v40  ;;  %v2131_v29 = vmul.f32 %v6440_v51, %v8389_v41  ;;  %v3945_v61 = vadd.f32 %v3929_v4, %v3891_v60  ;;  %v8473_v9 = vmul.f32 %v8401_v24, %v8238_v21 }
 0x2ec   :  { %v2171_v19 = vmax.f32 %v2155_v11, 0.0  ;;  %v2156_v18 = vadd.f32 %v8425_v5, %v2133_v39  ;;  %v4096_v11 = vadd.f32 %v4080_v16, %v4043_v22  ;;  %v2926_v39 = vpop.xlane.xlu0 %2925 }
 0x2ed   :  { %v2169_v55 = vmax.f32 %v2153_v13, 0.0  ;;  %v2154_v15 = vadd.f32 %v8425_v5, %v2131_v29  ;;  %v6383_v40 = vpop.f32.mrb[4].mxu0  ;;  %3123 = vst.msk [vmem:[#allocation3 + $0x33] sm:$0xff] %vm3122_vm7, %v2926_v39 }
 0x2ee   :  { %v2172_v54 = vmax.f32 %v2156_v18, 0.0  ;;  %v6441_v33 = vadd.f32 %v6383_v40, %v8216_v1  ;;  %v2060_v51 = vpop.f32.mrb[5].mxu0  ;;  %v2187_v36 = vmin.f32 %v2171_v19, 6.0  ;;  %3140 = vst.msk [vmem:[#allocation3 + $0x33] sm:$0xff] %vm3139_vm8, %v3021_v30  ;;  %v8482_v19 = vpop.xlane.xlu1 %2997  ;;  %v8486_v40 = vmul.f32 %v8410_v25, %v8245_v3 }
 0x2ef   :  { %v2170_v20 = vmax.f32 %v2154_v15, 0.0  ;;  %v6442_v56 = vadd.f32 %v2060_v51, %v8224_v34  ;;  %v6384_v13 = vpop.f32.mrb[6].mxu0  ;;  %v2185_v7 = vmin.f32 %v2169_v55, 6.0  ;;  %v3998_v55 = vadd.f32 %v3982_v45, %v3945_v61 }
 0x2f0   :  { %v2188_v1 = vmin.f32 %v2172_v54, 6.0  ;;  %v2136_v16 = vmul.f32 %v6441_v33, %v8389_v41  ;;  %v6443_v22 = vadd.f32 %v6384_v13, %v8230_v35  ;;  %v2063_v29 = vpop.f32.mrb[7].mxu0  ;;  %v8492_v33 = vadd.f32 %v8408_v26, %v4096_v11 }
 0x2f1   :  { %v2186_v18 = vmin.f32 %v2170_v20, 6.0  ;;  %v2134_v34 = vmul.f32 %v6442_v56, %v8389_v41  ;;  %v6444_v15 = vadd.f32 %v2063_v29, %v8234_v44  ;;  %v8494_v51 = vadd.f32 %v3717_v63, %v3680_v52 }
 0x2f2   :  { %v2202_v60 = vpack.c.bf16 %v2188_v1, %v2187_v36  ;;  %v2159_v4 = vadd.f32 %v8425_v5, %v2136_v16  ;;  %v2137_v21 = vmul.f32 %v6443_v22, %v8389_v41  ;;  %v8499_v3 = vmul.f32 0.25, %v8374_v50 }
 0x2f3   :  { %v2157_v35 = vadd.f32 %v8425_v5, %v2134_v34  ;;  %v2135_v30 = vmul.f32 %v6444_v15, %v8389_v41  ;;  %v2201_v20 = vpack.c.bf16 %v2186_v18, %v2185_v7  ;;  %v8502_v36 = vmul.f32 0.25, %v8403_v57  ;;  %v8520_v15 = vpop.xlane.xlu1 %3003 }
 0x2f4   :  { %v2175_v54 = vmax.f32 %v2159_v4, 0.0  ;;  %v2160_v44 = vadd.f32 %v8425_v5, %v2137_v21  ;;  %v8507_v52 = vmul.f32 0.25, %v8385_v47  ;;  %v8516_v7 = vadd.f32 %v4035_v14, %v3998_v55 }
 0x2f5   :  { %v2173_v39 = vmax.f32 %v2157_v35, 0.0  ;;  %v2158_v56 = vadd.f32 %v8425_v5, %v2135_v30  ;;  %v6387_v13 = vpop.f32.mrb[8].mxu0  ;;  %6397 = vmatprep.mubr.msk.bf16.mxu1 %vm181_vm0, %v2201_v20  ;;  %v8510_v50 = vld [vmem:[#allocation3 + $0x30] sm:$0xff] }
 0x2f6   :  { %v2191_v45 = vmin.f32 %v2175_v54, 6.0  ;;  %v2176_v61 = vmax.f32 %v2160_v44, 0.0  ;;  %v6445_v1 = vadd.f32 %v6387_v13, %v8284_v32  ;;  %v2076_v26 = vpop.f32.mrb[9].mxu0  ;;  %6398 = vmatmul.mubr.msk.bf16.vlgmr.msra.gmra.mrb[16].mxu1 %vm181_vm0, %v2202_v60  ;;  %v8512_v29 = vld [vmem:[#allocation3 + $0x31] sm:$0xff] }
 0x2f7   :  { %v2189_v63 = vmin.f32 %v2173_v39, 6.0  ;;  %v2174_v11 = vmax.f32 %v2158_v56, 0.0  ;;  %v6446_v16 = vadd.f32 %v2076_v26, %v8287_v49  ;;  %v6388_v22 = vpop.f32.mrb[10].mxu0  ;;  %v8514_v57 = vld [vmem:[#allocation3 + $0x32] sm:$0xff]  ;;  %v3180_v49 = vmul.f32 %v8208_v31, %v8510_v50  ;;  %v2932_v31 = vpop.xlane.xlu0 %2931 }
 0x2f8   :  { %v2192_v32 = vmin.f32 %v2176_v61, 6.0  ;;  %v2140_v18 = vmul.f32 %v6445_v1, %v8389_v41  ;;  %v6447_v34 = vadd.f32 %v6388_v22, %v8292_v43  ;;  %v2079_v47 = vpop.f32.mrb[11].mxu0  ;;  %v3233_v14 = vmul.f32 %v8210_v23, %v8512_v29  ;;  %v8528_v35 = vld [vmem:[#allocation3 + $0x33] sm:$0xff]  ;;  %3125 = vst.msk [vmem:[#allocation3 + $0x53] sm:$0xff] %vm3122_vm7, %v2932_v31 }
 0x2f9   :  { %v2190_v60 = vmin.f32 %v2174_v11, 6.0  ;;  %v2138_v4 = vmul.f32 %v6446_v16, %v8389_v41  ;;  %v6448_v21 = vadd.f32 %v2079_v47, %v8296_v53  ;;  %v8530_v30 = vld [vmem:[#allocation3 + $0x34] sm:$0xff]  ;;  %v3286_v54 = vmul.f32 %v8226_v2, %v8514_v57  ;;  %v11593_v11 = vld [vmem:[#allocation32_spill] sm:$0xff]  ;;  %3142 = vst.msk [vmem:[#allocation3 + $0x53] sm:$0xff] %vm3139_vm8, %v8499_v3 }
 0x2fa   :  { %v2163_v43 = vadd.f32 %v8425_v5, %v2140_v18  ;;  %v2141_v20 = vmul.f32 %v6447_v34, %v8389_v41  ;;  %v2204_v55 = vpack.c.bf16 %v2192_v32, %v2191_v45  ;;  %v8536_v44 = vld [vmem:[#allocation3 + $0x35] sm:$0xff]  ;;  %v3249_v13 = vadd.f32 %v3233_v14, %v3180_v49 }
 0x2fb   :  { %v2161_v39 = vadd.f32 %v8425_v5, %v2138_v4  ;;  %v2139_v53 = vmul.f32 %v6448_v21, %v8389_v41  ;;  %v2203_v56 = vpack.c.bf16 %v2190_v60, %v2189_v63  ;;  %v8540_v61 = vld [vmem:[#allocation3 + $0x36] sm:$0xff]  ;;  %v3339_v16 = vmul.f32 %v11593_v11, %v8528_v35  ;;  %v11596_v21 = vld [vmem:[#allocation40_spill] sm:$0xff]  ;;  %v2938_v3 = vpop.xlane.xlu0 %2937 }
 0x2fc   :  { %11592 = vst [vmem:[#allocation49_spill] sm:$0xff] %v8540_v61  ;;  %v2179_v1 = vmax.f32 %v2163_v43, 0.0  ;;  %v2164_v26 = vadd.f32 %v8425_v5, %v2141_v20  ;;  %v11594_v45 = vld [vmem:[#allocation33_spill] sm:$0xff]  ;;  %v3302_v47 = vadd.f32 %v3286_v54, %v3249_v13  ;;  %v11595_v63 = vld [vmem:[#allocation34_spill] sm:$0xff]  ;;  %v11597_v20 = vld [vmem:[#allocation36_spill] sm:$0xff] }
 0x2fd   :  { %v3392_v22 = vmul.f32 %v11594_v45, %v8530_v30  ;;  %v2177_v32 = vmax.f32 %v2161_v39, 0.0  ;;  %v2162_v18 = vadd.f32 %v8425_v5, %v2139_v53  ;;  %v6391_v34 = vpop.f32.mrb[12].mxu0  ;;  %6401 = vmatprep.mubr.msk.bf16.mxu1 %vm181_vm0, %v2203_v56  ;;  %v3445_v49 = vmul.f32 %v11595_v63, %v8536_v44  ;;  %v8555_v39 = vpop.xlane.xlu1 %3009  ;;  %v11599_v2 = vld [vmem:[#allocation41_spill] sm:$0xff]  ;;  %3127 = vst.msk [vmem:[#allocation3 + $0x73] sm:$0xff] %vm3122_vm7, %v2938_v3 }
 0x2fe   :  { %v2195_v60 = vmin.f32 %v2179_v1, 6.0  ;;  %v2180_v4 = vmax.f32 %v2164_v26, 0.0  ;;  %v6449_v14 = vadd.f32 %v6391_v34, %v11596_v21  ;;  %v2092_v43 = vpop.f32.mrb[13].mxu0  ;;  %6402 = vmatmul.mubr.msk.bf16.gmra.mrb[20].mxu1 %vm181_vm0, %v2204_v55  ;;  %v3498_v45 = vmul.f32 %v11597_v20, %v8540_v61  ;;  %11598 = vst [vmem:[#allocation40_spill] sm:$0xff] %v8555_v39  ;;  %v11600_v26 = vld [vmem:[#allocation42_spill] sm:$0xff]  ;;  %v11602_v39 = vld [vmem:[#allocation43_spill] sm:$0xff] }
 0x2ff   :  { %v2193_v53 = vmin.f32 %v2177_v32, 6.0  ;;  %v2178_v11 = vmax.f32 %v2162_v18, 0.0  ;;  %v6450_v56 = vadd.f32 %v2092_v43, %v11599_v2  ;;  %v6392_v54 = vpop.f32.mrb[14].mxu0  ;;  %v3355_v13 = vadd.f32 %v3339_v16, %v3302_v47  ;;  %v11601_v21 = vld [vmem:[#allocation38_spill] sm:$0xff]  ;;  %3144 = vst.msk [vmem:[#allocation3 + $0x73] sm:$0xff] %vm3139_vm8, %v8507_v52 }
 0x300   :  { %v2196_v23 = vmin.f32 %v2180_v4, 6.0  ;;  %v2144_v1 = vmul.f32 %v6449_v14, %v8389_v41  ;;  %v6451_v63 = vadd.f32 %v6392_v54, %v11600_v26  ;;  %v2095_v34 = vpop.f32.mrb[15].mxu0  ;;  %v3551_v55 = vmul.f32 %v11601_v21, %v8510_v50  ;;  %v11603_v4 = vld [vmem:[#allocation46_spill] sm:$0xff] }
 0x301   :  { %v2194_v25 = vmin.f32 %v2178_v11, 6.0  ;;  %v2142_v20 = vmul.f32 %v6450_v56, %v8389_v41  ;;  %v6452_v32 = vadd.f32 %v2095_v34, %v11602_v39  ;;  %v3408_v18 = vadd.f32 %v3392_v22, %v3355_v13  ;;  %v2929_v43 = vpop.xlane.xlu1 %2928 }
 0x302   :  { %v2167_v2 = vadd.f32 %v8425_v5, %v2144_v1  ;;  %v2145_v16 = vmul.f32 %v6451_v63, %v8389_v41  ;;  %v2206_v47 = vpack.c.bf16 %v2196_v23, %v2195_v60  ;;  %v3567_v14 = vadd.f32 %v3551_v55, %v11603_v4  ;;  %3124 = vst.msk [vmem:[#allocation3 + $0x43] sm:$0xff] %vm3122_vm7, %v2929_v43  ;;  %v11604_v23 = vld [vmem:[#allocation39_spill] sm:$0xff] }
 0x303   :  { %v2165_v11 = vadd.f32 %v8425_v5, %v2142_v20  ;;  %v2143_v56 = vmul.f32 %v6452_v32, %v8389_v41  ;;  %v2205_v54 = vpack.c.bf16 %v2194_v25, %v2193_v53  ;;  %v3461_v39 = vadd.f32 %v3445_v49, %v3408_v18  ;;  %3141 = vst.msk [vmem:[#allocation3 + $0x43] sm:$0xff] %vm3139_vm8, %v8502_v36 }
 0x304   :  { %v2183_v31 = vmax.f32 %v2167_v2, 0.0  ;;  %v2168_v22 = vadd.f32 %v8425_v5, %v2145_v16  ;;  %v3024_v63 = vmul.f32 0.25, %v8457_v10  ;;  %v3604_v60 = vmul.f32 %v11604_v23, %v8512_v29 }
 0x305   :  { %v2181_v13 = vmax.f32 %v2165_v11, 0.0  ;;  %v2166_v20 = vadd.f32 %v8425_v5, %v2143_v56  ;;  %6405 = vmatprep.mubr.msk.bf16.mxu1 %vm181_vm0, %v2205_v54  ;;  %v8581_v41 = vadd.f32 %v3498_v45, %v3461_v39  ;;  %v3657_v25 = vmul.f32 %v8308_v8, %v8514_v57  ;;  %v2935_v36 = vpop.xlane.xlu1 %2934  ;;  %v11606_v39 = vld [vmem:[#allocation35_spill] sm:$0xff] }
 0x306   :  { %v2184_v10 = vmax.f32 %v2168_v22, 0.0  ;;  %6406 = vmatmul.mubr.msk.bf16.gmra.mrb[24].mxu1 %vm181_vm0, %v2206_v47  ;;  %v3030_v49 = vmul.f32 0.25, %v8417_v0  ;;  %v3620_v53 = vadd.f32 %v3604_v60, %v3567_v14  ;;  %v4104_v5 = vadd.f32 %v8467_v6, %v8516_v7  ;;  %3126 = vst.msk [vmem:[#allocation3 + $0x63] sm:$0xff] %vm3122_vm7, %v2935_v36  ;;  %v2953_v6 = vpop.xlane.xlu0 %2952  ;;  %v8613_v14 = vld [vmem:[#allocation19 + $0x15] ss:$0 sm:$0xff] }
 0x307   :  { %v2182_v45 = vmax.f32 %v2166_v20, 0.0  ;;  %v3029_v1 = vmul.f32 0.25, %v8482_v19  ;;  %v4202_v26 = vadd.f32 %v8420_v46, %v8492_v33  ;;  %v3786_v34 = vadd.f32 %v8441_v42, %v8494_v51  ;;  %3143 = vst.msk [vmem:[#allocation3 + $0x63] sm:$0xff] %vm3139_vm8, %v3024_v63  ;;  %11605 = vst [vmem:[#allocation41_spill] sm:$0xff] %v8613_v14  ;;  %v8635_v20 = vld [vmem:[#allocation19 + $0x16] ss:$0 sm:$0xff] }
 0x308   :  { %v2199_v0 = vmin.f32 %v2183_v31, 6.0  ;;  %v2200_v55 = vmin.f32 %v2184_v10, 6.0  ;;  %v3922_v52 = vmul.f32 %v8371_v62, %v8510_v50  ;;  %v3975_v32 = vmul.f32 %v8381_v28, %v8512_v29  ;;  %3132 = vst.msk [vmem:[#allocation3 + $0x123] sm:$0xff] %vm3122_vm7, %v2953_v6  ;;  %v11607_v31 = vld [vmem:[#allocation45_spill] sm:$0xff]  ;;  %11609 = vst [vmem:[#allocation42_spill] sm:$0xff] %v8635_v20  ;;  %v11610_v10 = vld [vmem:[#allocation44_spill] sm:$0xff] }
 0x309   :  { %v2197_v19 = vmin.f32 %v2181_v13, 6.0  ;;  %v2198_v7 = vmin.f32 %v2182_v45, 6.0  ;;  %v3673_v18 = vadd.f32 %v3657_v25, %v3620_v53  ;;  %v3710_v46 = vmul.f32 %v8330_v59, %v8528_v35  ;;  %3149 = vst.msk [vmem:[#allocation3 + $0x123] sm:$0xff] %vm3139_vm8, %v3030_v49  ;;  %v2950_v16 = vpop.xlane.xlu1 %2949  ;;  %v8664_v6 = vld [vmem:[#allocation3 + $0x50] sm:$0xff] }
 0x30a   :  { %v2208_v42 = vpack.c.bf16 %v2200_v55, %v2199_v0  ;;  %v3032_v33 = vmul.f32 0.25, %v8445_v38  ;;  %v3938_v51 = vadd.f32 %v3922_v52, %v8428_v12  ;;  %v4157_v2 = vadd.f32 %v8473_v9, %v4104_v5  ;;  %3131 = vst.msk [vmem:[#allocation3 + $0x113] sm:$0xff] %vm3122_vm7, %v2950_v16  ;;  %v2959_v11 = vpop.xlane.xlu0 %2958  ;;  %v8633_v13 = vld [vmem:[#allocation3 + $0x40] sm:$0xff]  ;;  %v8645_v5 = vld [vmem:[#allocation19 + $0x17] ss:$0 sm:$0xff]  ;;  %11614 = vst [vmem:[#allocation39_spill] sm:$0xff] %v8664_v6 }
 0x30b   :  { %v2207_v47 = vpack.c.bf16 %v2198_v7, %v2197_v19  ;;  %v4028_v4 = vmul.f32 %v8392_v17, %v8514_v57  ;;  %3148 = vst.msk [vmem:[#allocation3 + $0x113] sm:$0xff] %vm3139_vm8, %v3029_v1  ;;  %v4255_v12 = vadd.f32 %v8423_v48, %v4202_v26  ;;  %v3726_v38 = vadd.f32 %v3710_v46, %v3673_v18  ;;  %v11608_v48 = vld [vmem:[#allocation48_spill] sm:$0xff]  ;;  %v8656_v0 = vld [vmem:[#allocation19 + $0x18] ss:$0 sm:$0xff]  ;;  %v8658_v55 = vld [vmem:[#allocation19 + $0x19] ss:$0 sm:$0xff] }
 0x30c   :  { %v3991_v43 = vadd.f32 %v3975_v32, %v3938_v51  ;;  %v3763_v9 = vmul.f32 %v8342_v27, %v8530_v30  ;;  %v4292_v56 = vmul.f32 %v8613_v14, %v8510_v50  ;;  %3134 = vst.msk [vmem:[#allocation3 + $0x143] sm:$0xff] %vm3122_vm7, %v2959_v11  ;;  %v3839_v54 = vadd.f32 %v8449_v37, %v3786_v34  ;;  %v8643_v36 = vld [vmem:[#allocation3 + $0x41] sm:$0xff]  ;;  %v8666_v19 = vld [vmem:[#allocation19 + $0x1a] ss:$0 sm:$0xff] }
 0x30d   :  { %6409 = vmatprep.mubr.msk.bf16.mxu1 %vm181_vm0, %v2207_v47  ;;  %v3876_v22 = vmul.f32 %v11607_v31, %v11606_v39  ;;  %v4210_v63 = vadd.f32 %v8486_v40, %v4157_v2  ;;  %v4247_v60 = vmul.f32 %v11608_v48, %v11606_v39  ;;  %3151 = vst.msk [vmem:[#allocation3 + $0x143] sm:$0xff] %vm3139_vm8, %v3032_v33  ;;  %11611 = vst [vmem:[#allocation38_spill] sm:$0xff] %v8645_v5  ;;  %v11616_v7 = vld [vmem:[#allocation47_spill] sm:$0xff]  ;;  %v8688_v11 = vld [vmem:[#allocation3 + $0x51] sm:$0xff] }
 0x30e   :  { %6410 = vmatmul.mubr.msk.bf16.gmra.mrb[28].mxu1 %vm181_vm0, %v2208_v42  ;;  %v4044_v3 = vadd.f32 %v4028_v4, %v3991_v43  ;;  %v4081_v50 = vmul.f32 %v8399_v58, %v8528_v35  ;;  %v8637_v25 = vpop.xlane.xlu0 %2988  ;;  %v3779_v37 = vadd.f32 %v3763_v9, %v3726_v38  ;;  %v3816_v49 = vmul.f32 %v11610_v10, %v8536_v44  ;;  %v11622_v9 = vld [vmem:[#allocation40_spill] sm:$0xff] }
 0x30f   :  { %v4308_v40 = vadd.f32 %v4292_v56, %v4255_v12  ;;  %v4345_v53 = vmul.f32 %v8635_v20, %v8512_v29  ;;  %v3552_v45 = vmul.f32 %v11601_v21, %v8633_v13  ;;  %v8649_v1 = vadd.f32 %v3876_v22, %v3839_v54  ;;  %11612 = vst [vmem:[#allocation43_spill] sm:$0xff] %v8656_v0  ;;  %v8692_v12 = vld [vmem:[#allocation3 + $0x53] sm:$0xff] }
 0x310   :  { %v8651_v26 = vadd.f32 %v4247_v60, %v4210_v63  ;;  %v8654_v34 = vmul.f32 0.25, %v8520_v15  ;;  %11613 = vst [vmem:[#allocation46_spill] sm:$0xff] %v8658_v55  ;;  %v3869_v29 = vmul.f32 %v11607_v31, %v8540_v61  ;;  %v4097_v52 = vadd.f32 %v4081_v50, %v4044_v3  ;;  %11615 = vst [vmem:[#allocation35_spill] sm:$0xff] %v8666_v19  ;;  %v8711_v63 = vld [vmem:[#allocation3 + $0x42] sm:$0xff]  ;;  %v11625_v3 = vld [vmem:[#allocation29_spill] sm:$0xff] }
 0x311   :  { %v4134_v32 = vmul.f32 %v8401_v24, %v8530_v30  ;;  %v4187_v18 = vmul.f32 %v11616_v7, %v8536_v44  ;;  %v8672_v15 = vmul.f32 %v11608_v48, %v8540_v61  ;;  %v4398_v46 = vmul.f32 %v8645_v5, %v8514_v57  ;;  %11618 = vst [vmem:[#allocation48_spill] sm:$0xff] %v8688_v11  ;;  %v8690_v57 = vld [vmem:[#allocation3 + $0x52] sm:$0xff]  ;;  %v8713_v60 = vld [vmem:[#allocation3 + $0x43] sm:$0xff] }
 0x312   :  { %v3605_v42 = vmul.f32 %v11604_v23, %v8643_v36  ;;  %v8678_v33 = vld [vmem:[#allocation3 + $0x111] sm:$0xff]  ;;  %v2941_v2 = vpop.xlane.xlu0 %2940  ;;  %v3832_v16 = vadd.f32 %v3816_v49, %v3779_v37  ;;  %v4361_v47 = vadd.f32 %v4345_v53, %v4308_v40  ;;  %v4451_v4 = vmul.f32 %v8656_v0, %v8528_v35  ;;  %11619 = vst [vmem:[#allocation44_spill] sm:$0xff] %v8690_v57  ;;  %v11627_v40 = vld [vmem:[#allocation31_spill] sm:$0xff] }
 0x313   :  { %v8680_v51 = vld [vmem:[#allocation3 + $0x112] sm:$0xff]  ;;  %v8686_v43 = vmul.f32 %v8658_v55, %v8530_v30  ;;  %11620 = vst [vmem:[#allocation47_spill] sm:$0xff] %v8692_v12  ;;  %3128 = vst.msk [vmem:[#allocation3 + $0x83] sm:$0xff] %vm3122_vm7, %v2941_v2  ;;  %v8697_v38 = vmul.f32 %v8666_v19, %v8536_v44  ;;  %v8700_v56 = vmul.f32 0.25, %v11622_v9  ;;  %v8704_v35 = vmul.f32 %v8371_v62, %v8664_v6  ;;  %v8715_v44 = vld [vmem:[#allocation3 + $0x44] sm:$0xff] }
 0x314   :  { %v3568_v30 = vadd.f32 %v3552_v45, %v8581_v41  ;;  %v8707_v54 = vld [vmem:[#allocation3 + $0x110] sm:$0xff]  ;;  %v4150_v22 = vadd.f32 %v4134_v32, %v4097_v52  ;;  %11624 = vst [vmem:[#allocation51_spill] sm:$0xff] %v8715_v44  ;;  %v11626_v37 = vld [vmem:[#allocation30_spill] sm:$0xff]  ;;  %v3294_v41 = vmul.f32 %v11627_v40, %v8680_v51  ;;  %v8725_v53 = vmul.f32 %v8381_v28, %v8688_v11  ;;  %v8741_v40 = vld [vmem:[#allocation3 + $0x45] sm:$0xff] }
 0x315   :  { %11617 = vst [vmem:[#allocation45_spill] sm:$0xff] %v8686_v43  ;;  %11621 = vst [vmem:[#allocation50_spill] sm:$0xff] %v8697_v38  ;;  %v8709_v39 = vld [vmem:[#allocation3 + $0x113] sm:$0xff]  ;;  %v3188_v50 = vmul.f32 %v11625_v3, %v8707_v54  ;;  %v3241_v49 = vmul.f32 %v11626_v37, %v8678_v33  ;;  %v8729_v45 = vmul.f32 %v8392_v17, %v8690_v57  ;;  %v8743_v11 = vld [vmem:[#allocation3 + $0x46] sm:$0xff] }
 0x316   :  { %11623 = vst [vmem:[#allocation40_spill] sm:$0xff] %v8704_v35  ;;  %11628 = vst [vmem:[#allocation29_spill] sm:$0xff] %v8725_v53  ;;  %v8733_v52 = vmul.f32 %v8399_v58, %v8692_v12  ;;  %v8735_v32 = vadd.f32 %v3605_v42, %v3568_v30  ;;  %v8737_v2 = vld [vmem:[#allocation3 + $0x114] sm:$0xff]  ;;  %v8739_v9 = vpop.xlane.xlu0 %2991  ;;  %v3885_v3 = vadd.f32 %v3869_v29, %v3832_v16  ;;  %v11633_v57 = vld [vmem:[#allocation32_spill] sm:$0xff] }
 0x317   :  { %11629 = vst [vmem:[#allocation30_spill] sm:$0xff] %v8729_v45  ;;  %v4414_v37 = vadd.f32 %v4398_v46, %v4361_v47  ;;  %11631 = vst [vmem:[#allocation52_spill] sm:$0xff] %v8741_v40  ;;  %v3257_v6 = vadd.f32 %v3241_v49, %v3188_v50  ;;  %v3347_v61 = vmul.f32 %v11633_v57, %v8709_v39  ;;  %v8759_v46 = vld [vmem:[#allocation3 + $0x115] sm:$0xff] }
 0x318   :  { %11630 = vst [vmem:[#allocation31_spill] sm:$0xff] %v8733_v52  ;;  %11632 = vst [vmem:[#allocation53_spill] sm:$0xff] %v8743_v11  ;;  %v8749_v12 = vmul.f32 %v8308_v8, %v8711_v63  ;;  %v8753_v42 = vmul.f32 %v8330_v59, %v8713_v60  ;;  %v8757_v29 = vmul.f32 %v8342_v27, %v8715_v44  ;;  %v11634_v57 = vld [vmem:[#allocation33_spill] sm:$0xff]  ;;  %v11637_v35 = vld [vmem:[#allocation34_spill] sm:$0xff] }
 0x319   :  { %v3559_v16 = vmul.f32 %v11601_v21, %v8707_v54  ;;  %v4203_v47 = vadd.f32 %v4187_v18, %v4150_v22  ;;  %v3310_v30 = vadd.f32 %v3294_v41, %v3257_v6  ;;  %v3400_v50 = vmul.f32 %v11634_v57, %v8737_v2  ;;  %v8775_v19 = vld [vmem:[#allocation3 + $0x116] sm:$0xff]  ;;  %v2956_v22 = vpop.xlane.xlu1 %2955 }
 0x31a   :  { %v3612_v49 = vmul.f32 %v11604_v23, %v8678_v33  ;;  %v8769_v52 = vmul.f32 %v11610_v10, %v8741_v40  ;;  %v8773_v38 = vmul.f32 %v11607_v31, %v8743_v11  ;;  %v11635_v45 = vld [vmem:[#allocation37_spill] sm:$0xff]  ;;  %v3665_v6 = vmul.f32 %v8308_v8, %v8680_v51  ;;  %v2944_v18 = vpop.xlane.xlu0 %2943  ;;  %3133 = vst.msk [vmem:[#allocation3 + $0x133] sm:$0xff] %vm3122_vm7, %v2956_v22  ;;  %v11638_v22 = vld [vmem:[#allocation36_spill] sm:$0xff] }
 0x31b   :  { %v3575_v53 = vadd.f32 %v3559_v16, %v11635_v45  ;;  %v8780_v41 = vadd.f32 %v4451_v4, %v4414_v37  ;;  %v3923_v57 = vmul.f32 %v8371_v62, %v8633_v13  ;;  %v3363_v43 = vadd.f32 %v3347_v61, %v3310_v30  ;;  %3129 = vst.msk [vmem:[#allocation3 + $0x93] sm:$0xff] %vm3122_vm7, %v2944_v18  ;;  %v8794_v4 = vld [vmem:[#allocation3 + $0x120] sm:$0xff] }
 0x31c   :  { %v3453_v55 = vmul.f32 %v11637_v35, %v8759_v46  ;;  %v3976_v45 = vmul.f32 %v8381_v28, %v8643_v36  ;;  %v8792_v16 = vmul.f32 %v8392_v17, %v8711_v63  ;;  %v3718_v61 = vmul.f32 %v8330_v59, %v8709_v39  ;;  %3150 = vst.msk [vmem:[#allocation3 + $0x133] sm:$0xff] %vm3139_vm8, %v8654_v34 }
 0x31d   :  { %11636 = vst [vmem:[#allocation32_spill] sm:$0xff] %v8780_v41  ;;  %v3628_v37 = vadd.f32 %v3612_v49, %v3575_v53  ;;  %v4256_v35 = vadd.f32 %v8672_v15, %v4203_v47  ;;  %v4293_v30 = vmul.f32 %v8613_v14, %v8633_v13  ;;  %v3416_v18 = vadd.f32 %v3400_v50, %v3363_v43  ;;  %v8813_v49 = vld [vmem:[#allocation3 + $0x121] sm:$0xff]  ;;  %v2962_v13 = vpop.xlane.xlu1 %2961 }
 0x31e   :  { %v3506_v11 = vmul.f32 %v11638_v22, %v8775_v19  ;;  %v8807_v41 = vmul.f32 %v8399_v58, %v8713_v60  ;;  %v8811_v53 = vmul.f32 %v8401_v24, %v8715_v44  ;;  %v3771_v15 = vmul.f32 %v8342_v27, %v8737_v2  ;;  %v8817_v47 = vpop.xlane.xlu0 %2994  ;;  %3135 = vst.msk [vmem:[#allocation3 + $0x153] sm:$0xff] %vm3122_vm7, %v2962_v13  ;;  %v8834_v44 = vld [vmem:[#allocation3 + $0x122] sm:$0xff] }
 0x31f   :  { %v3681_v34 = vadd.f32 %v3665_v6, %v3628_v37  ;;  %v8821_v43 = vmul.f32 %v11616_v7, %v8741_v40  ;;  %v3469_v50 = vadd.f32 %v3453_v55, %v3416_v18  ;;  %v3560_v22 = vmul.f32 %v11601_v21, %v8794_v4  ;;  %11642 = vst [vmem:[#allocation36_spill] sm:$0xff] %v8834_v44 }
 0x320   :  { %11639 = vst [vmem:[#allocation33_spill] sm:$0xff] %v8807_v41  ;;  %11640 = vst [vmem:[#allocation37_spill] sm:$0xff] %v8811_v53  ;;  %v3930_v53 = vmul.f32 %v8371_v62, %v8707_v54  ;;  %v4346_v6 = vmul.f32 %v8635_v20, %v8643_v36  ;;  %v8832_v37 = vmul.f32 %v8645_v5, %v8711_v63  ;;  %v8846_v63 = vld [vmem:[#allocation3 + $0x123] sm:$0xff] }
 0x321   :  { %11641 = vst [vmem:[#allocation34_spill] sm:$0xff] %v8821_v43  ;;  %v3734_v40 = vadd.f32 %v3718_v61, %v3681_v34  ;;  %v3824_v55 = vmul.f32 %v11610_v10, %v8759_v46  ;;  %3152 = vst.msk [vmem:[#allocation3 + $0x153] sm:$0xff] %vm3139_vm8, %v8700_v56  ;;  %v3939_v21 = vadd.f32 %v3923_v57, %v3885_v3  ;;  %v8852_v3 = vpop.xlane.xlu1 %3012  ;;  %v8856_v57 = vld [vmem:[#allocation3 + $0x124] sm:$0xff] }
 0x322   :  { %v4309_v18 = vadd.f32 %v4293_v30, %v4256_v35  ;;  %v3522_v43 = vadd.f32 %v3506_v11, %v3469_v50  ;;  %v3613_v13 = vmul.f32 %v11604_v23, %v8813_v49  ;;  %v8844_v36 = vmul.f32 %v8656_v0, %v8713_v60  ;;  %11643 = vst [vmem:[#allocation54_spill] sm:$0xff] %v8846_v63  ;;  %v2947_v56 = vpop.xlane.xlu0 %2946  ;;  %v8858_v60 = vld [vmem:[#allocation3 + $0x125] sm:$0xff] }
 0x323   :  { %v3787_v41 = vadd.f32 %v3771_v15, %v3734_v40  ;;  %v3877_v61 = vmul.f32 %v11607_v31, %v8775_v19  ;;  %v4300_v34 = vmul.f32 %v8613_v14, %v8707_v54  ;;  %v3666_v23 = vmul.f32 %v8308_v8, %v8834_v44  ;;  %11644 = vst [vmem:[#allocation55_spill] sm:$0xff] %v8856_v57 }
 0x324   :  { %v3576_v11 = vadd.f32 %v3560_v22, %v3522_v43  ;;  %11645 = vst [vmem:[#allocation56_spill] sm:$0xff] %v8858_v60  ;;  %v3946_v35 = vadd.f32 %v3930_v53, %v8649_v1  ;;  %v3983_v40 = vmul.f32 %v8381_v28, %v8678_v33  ;;  %3130 = vst.msk [vmem:[#allocation3 + $0xa3] sm:$0xff] %vm3122_vm7, %v2947_v56 }
 0x325   :  { %v3840_v30 = vadd.f32 %v3824_v55, %v3787_v41  ;;  %v3931_v54 = vmul.f32 %v8371_v62, %v8794_v4  ;;  %v4316_v15 = vadd.f32 %v4300_v34, %v8651_v26  ;;  %v4353_v8 = vmul.f32 %v8635_v20, %v8678_v33  ;;  %v8875_v55 = vld [vmem:[#allocation3 + $0x126] sm:$0xff]  ;;  %v2965_v34 = vpop.xlane.xlu1 %2964 }
 0x326   :  { %v3992_v43 = vadd.f32 %v3976_v45, %v3939_v21  ;;  %v4362_v50 = vadd.f32 %v4346_v6, %v4309_v18  ;;  %v3629_v22 = vadd.f32 %v3613_v13, %v3576_v11  ;;  %v3719_v1 = vmul.f32 %v8330_v59, %v8846_v63  ;;  %11646 = vst [vmem:[#allocation57_spill] sm:$0xff] %v8875_v55 }
 0x327   :  { %v3772_v53 = vmul.f32 %v8342_v27, %v8856_v57  ;;  %v3825_v41 = vmul.f32 %v11610_v10, %v8858_v60  ;;  %v3893_v56 = vadd.f32 %v3877_v61, %v3840_v30  ;;  %v3984_v26 = vmul.f32 %v8381_v28, %v8813_v49  ;;  %3136 = vst.msk [vmem:[#allocation3 + $0x163] sm:$0xff] %vm3122_vm7, %v2965_v34  ;;  %v8898_v30 = vld [vmem:[#allocation3 + $0x130] sm:$0xff] }
 0x328   :  { %v3682_v33 = vadd.f32 %v3666_v23, %v3629_v22  ;;  %v3999_v45 = vadd.f32 %v3983_v40, %v3946_v35  ;;  %v4036_v6 = vmul.f32 %v8392_v17, %v8680_v51  ;;  %v3674_v59 = vadd.f32 %v8749_v12, %v8735_v32  ;;  %v8905_v22 = vld [vmem:[#allocation3 + $0x131] sm:$0xff] }
 0x329   :  { %v3947_v27 = vadd.f32 %v3931_v54, %v3893_v56  ;;  %v4037_v10 = vmul.f32 %v8392_v17, %v8834_v44  ;;  %v4369_v21 = vadd.f32 %v4353_v8, %v4316_v15  ;;  %v4406_v18 = vmul.f32 %v8645_v5, %v8680_v51 }
 0x32a   :  { %v3735_v13 = vadd.f32 %v3719_v1, %v3682_v33  ;;  %v3878_v61 = vmul.f32 %v11607_v31, %v8875_v55  ;;  %v3727_v11 = vadd.f32 %v8753_v42, %v3674_v59  ;;  %v3026_v23 = vmul.f32 0.25, %v8637_v25 }
 0x32b   :  { %v4000_v35 = vadd.f32 %v3984_v26, %v3947_v27  ;;  %v4089_v12 = vmul.f32 %v8399_v58, %v8709_v39  ;;  %v4090_v32 = vmul.f32 %v8399_v58, %v8846_v63  ;;  %v4143_v40 = vmul.f32 %v8401_v24, %v8856_v57  ;;  %v4643_v63 = vld [vmem:[#allocation3 + $0x40] sm:$0xff] }
 0x32c   :  { %v3788_v51 = vadd.f32 %v3772_v53, %v3735_v13  ;;  %v4052_v54 = vadd.f32 %v4036_v6, %v3999_v45  ;;  %v3780_v31 = vadd.f32 %v8757_v29, %v3727_v11  ;;  %3145 = vst.msk [vmem:[#allocation3 + $0x83] sm:$0xff] %vm3139_vm8, %v3026_v23  ;;  %v3027_v25 = vmul.f32 0.25, %v8739_v9  ;;  %v8925_v45 = vld [vmem:[#allocation3 + $0x60] sm:$0xff]  ;;  %v11652_v23 = vld [vmem:[#allocation33_spill] sm:$0xff] }
 0x32d   :  { %v4053_v42 = vadd.f32 %v4037_v10, %v4000_v35  ;;  %v4422_v15 = vadd.f32 %v4406_v18, %v4369_v21  ;;  %v4459_v8 = vmul.f32 %v8656_v0, %v8709_v39  ;;  %v3028_v1 = vmul.f32 0.25, %v8817_v47  ;;  %11647 = vst [vmem:[#allocation58_spill] sm:$0xff] %v8925_v45  ;;  %v8927_v6 = vld [vmem:[#allocation3 + $0x61] sm:$0xff]  ;;  %v11649_v10 = vld [vmem:[#allocation46_spill] sm:$0xff] }
 0x32e   :  { %v3841_v56 = vadd.f32 %v3825_v41, %v3788_v51  ;;  %v4142_v53 = vmul.f32 %v8401_v24, %v8737_v2  ;;  %v3833_v26 = vadd.f32 %v8769_v52, %v3780_v31  ;;  %3146 = vst.msk [vmem:[#allocation3 + $0x93] sm:$0xff] %vm3139_vm8, %v3027_v25  ;;  %v3932_v9 = vmul.f32 %v8371_v62, %v8898_v30  ;;  %v8919_v41 = vld [vmem:[#allocation3 + $0x132] sm:$0xff]  ;;  %v11650_v21 = vld [vmem:[#allocation40_spill] sm:$0xff] }
 0x32f   :  { %v4106_v29 = vadd.f32 %v4090_v32, %v4053_v42  ;;  %v4196_v34 = vmul.f32 %v11616_v7, %v8858_v60  ;;  %v4249_v39 = vmul.f32 %v11608_v48, %v8875_v55  ;;  %v4045_v47 = vadd.f32 %v8792_v16, %v3992_v43  ;;  %3147 = vst.msk [vmem:[#allocation3 + $0xa3] sm:$0xff] %vm3139_vm8, %v3028_v1  ;;  %v8943_v32 = vld [vmem:[#allocation19 + $0x1] ss:$0 sm:$0xff]  ;;  %v11655_v51 = vld [vmem:[#allocation29_spill] sm:$0xff]  ;;  %v8952_v25 = vld [vmem:[#allocation3 + $0x63] sm:$0xff] }
 0x330   :  { %v3894_v24 = vadd.f32 %v3878_v61, %v3841_v56  ;;  %v4105_v52 = vadd.f32 %v4089_v12, %v4052_v54  ;;  %v3886_v33 = vadd.f32 %v8773_v38, %v3833_v26  ;;  %v3985_v62 = vmul.f32 %v8381_v28, %v8905_v22  ;;  %11648 = vst [vmem:[#allocation59_spill] sm:$0xff] %v8927_v6  ;;  %v8936_v28 = vld [vmem:[#allocation3 + $0x62] sm:$0xff]  ;;  %v8939_v12 = vld [vmem:[#allocation19] ss:$0 sm:$0xff]  ;;  %v8957_v1 = vld [vmem:[#allocation19 + $0x2] ss:$0 sm:$0xff] }
 0x331   :  { %v4159_v59 = vadd.f32 %v4143_v40, %v4106_v29  ;;  %v4475_v27 = vadd.f32 %v4459_v8, %v4422_v15  ;;  %v4512_v16 = vmul.f32 %v11649_v10, %v8737_v2  ;;  %v4415_v43 = vadd.f32 %v8832_v37, %v4362_v50  ;;  %11651 = vst [vmem:[#allocation40_spill] sm:$0xff] %v8936_v28  ;;  %v11653_v50 = vld [vmem:[#allocation32_spill] sm:$0xff] }
 0x332   :  { %v3940_v18 = vadd.f32 %v11650_v21, %v3886_v33  ;;  %v4038_v13 = vmul.f32 %v8392_v17, %v8919_v41  ;;  %v3948_v38 = vadd.f32 %v3932_v9, %v3894_v24  ;;  %v3034_v61 = vmul.f32 0.25, %v8852_v3  ;;  %v11654_v17 = vld [vmem:[#allocation45_spill] sm:$0xff]  ;;  %11656 = vst [vmem:[#allocation33_spill] sm:$0xff] %v8952_v25  ;;  %v11658_v9 = vld [vmem:[#allocation30_spill] sm:$0xff] }
 0x333   :  { %v4212_v11 = vadd.f32 %v4196_v34, %v4159_v59  ;;  %v4098_v35 = vadd.f32 %v11652_v23, %v4045_v47  ;;  %v3183_v2 = vmul.f32 %v8939_v12, %v8925_v45  ;;  %v3236_v37 = vmul.f32 %v8943_v32, %v8927_v6  ;;  %v8965_v34 = vld [vmem:[#allocation3 + $0x64] sm:$0xff]  ;;  %v8974_v21 = vld [vmem:[#allocation19 + $0x3] ss:$0 sm:$0xff]  ;;  %v8989_v23 = vld [vmem:[#allocation19 + $0x1c] ss:$0 sm:$0xff] }
 0x334   :  { %v4520_v40 = vadd.f32 %v11654_v17, %v11653_v50  ;;  %v4195_v3 = vmul.f32 %v11616_v7, %v8759_v46  ;;  %v3993_v54 = vadd.f32 %v11655_v51, %v3940_v18  ;;  %v4001_v31 = vadd.f32 %v3985_v62, %v3948_v38  ;;  %3153 = vst.msk [vmem:[#allocation3 + $0x163] sm:$0xff] %vm3139_vm8, %v3034_v61  ;;  %v11660_v47 = vld [vmem:[#allocation51_spill] sm:$0xff]  ;;  %v11663_v62 = vld [vmem:[#allocation37_spill] sm:$0xff]  ;;  %v8994_v50 = vld [vmem:[#allocation19 + $0x4] ss:$0 sm:$0xff] }
 0x335   :  { %v4158_v42 = vadd.f32 %v4142_v53, %v4105_v52  ;;  %v8955_v15 = vadd.f32 %v4249_v39, %v4212_v11  ;;  %v3252_v8 = vadd.f32 %v3236_v37, %v3183_v2  ;;  %v3289_v56 = vmul.f32 %v8957_v1, %v8936_v28  ;;  %11659 = vst [vmem:[#allocation45_spill] sm:$0xff] %v8965_v34  ;;  %v8969_v53 = vld [vmem:[#allocation19 + $0x1b] ss:$0 sm:$0xff]  ;;  %v11662_v52 = vld [vmem:[#allocation35_spill] sm:$0xff] }
 0x336   :  { %v4468_v26 = vadd.f32 %v8844_v36, %v4415_v43  ;;  %v4046_v7 = vadd.f32 %v11658_v9, %v3993_v54  ;;  %v8963_v29 = vadd.f32 %v4038_v13, %v4001_v31  ;;  %v4505_v24 = vmul.f32 %v11649_v10, %v11660_v47  ;;  %11661 = vst [vmem:[#allocation29_spill] sm:$0xff] %v8969_v53  ;;  %v11664_v43 = vld [vmem:[#allocation50_spill] sm:$0xff]  ;;  %v11665_v13 = vld [vmem:[#allocation49_spill] sm:$0xff]  ;;  %v8998_v51 = vld [vmem:[#allocation3 + $0x66] sm:$0xff] }
 0x337   :  { %11657 = vst [vmem:[#allocation32_spill] sm:$0xff] %v8955_v15  ;;  %v4528_v39 = vadd.f32 %v4512_v16, %v4475_v27  ;;  %v4565_v33 = vmul.f32 %v11662_v52, %v8759_v46  ;;  %v4151_v59 = vadd.f32 %v11663_v62, %v4098_v35  ;;  %v3342_v36 = vmul.f32 %v8974_v21, %v8952_v25  ;;  %v11666_v61 = vld [vmem:[#allocation53_spill] sm:$0xff]  ;;  %v8985_v16 = vld [vmem:[#allocation3 + $0x65] sm:$0xff]  ;;  %v11673_v47 = vld [vmem:[#allocation34_spill] sm:$0xff] }
 0x338   :  { %v4573_v18 = vadd.f32 %v11664_v43, %v4520_v40  ;;  %v4610_v38 = vmul.f32 %v8969_v53, %v11665_v13  ;;  %v4241_v11 = vmul.f32 %v11608_v48, %v11666_v61  ;;  %v4248_v27 = vmul.f32 %v11608_v48, %v8775_v19  ;;  %11667 = vst [vmem:[#allocation30_spill] sm:$0xff] %v8985_v16  ;;  %v11669_v35 = vld [vmem:[#allocation31_spill] sm:$0xff]  ;;  %v11672_v54 = vld [vmem:[#allocation52_spill] sm:$0xff]  ;;  %v9005_v62 = vld [vmem:[#allocation19 + $0x1d] ss:$0 sm:$0xff] }
 0x339   :  { %v4618_v46 = vmul.f32 %v8969_v53, %v8775_v19  ;;  %11668 = vst [vmem:[#allocation51_spill] sm:$0xff] %v8989_v23  ;;  %v8992_v2 = vadd.f32 %v11669_v35, %v4046_v7  ;;  %v3305_v37 = vadd.f32 %v3289_v56, %v3252_v8  ;;  %v3395_v17 = vmul.f32 %v8994_v50, %v8965_v34  ;;  %v9007_v8 = vld [vmem:[#allocation19 + $0x1e] ss:$0 sm:$0xff]  ;;  %v9009_v43 = vld [vmem:[#allocation19 + $0x5] ss:$0 sm:$0xff]  ;;  %v11697_v10 = vld [vmem:[#allocation47_spill] sm:$0xff] }
 0x33a   :  { %v4211_v40 = vadd.f32 %v4195_v3, %v4158_v42  ;;  %11671 = vst [vmem:[#allocation50_spill] sm:$0xff] %v8998_v51  ;;  %v4521_v48 = vadd.f32 %v4505_v24, %v4468_v26  ;;  %v4558_v31 = vmul.f32 %v11662_v52, %v11672_v54  ;;  %v4611_v19 = vmul.f32 %v8969_v53, %v11666_v61  ;;  %v9013_v42 = vld [vmem:[#allocation3 + $0x133] sm:$0xff]  ;;  %v11677_v24 = vld [vmem:[#allocation39_spill] sm:$0xff]  ;;  %v9027_v35 = vld [vmem:[#allocation19 + $0x6] ss:$0 sm:$0xff] }
 0x33b   :  { %11670 = vst [vmem:[#allocation37_spill] sm:$0xff] %v8992_v2  ;;  %v4581_v9 = vadd.f32 %v4565_v33, %v4528_v39  ;;  %v4204_v7 = vadd.f32 %v11673_v47, %v4151_v59  ;;  %11674 = vst [vmem:[#allocation49_spill] sm:$0xff] %v9005_v62  ;;  %v3358_v56 = vadd.f32 %v3342_v36, %v3305_v37  ;;  %v9017_v61 = vld [vmem:[#allocation19 + $0x1f] ss:$0 sm:$0xff]  ;;  %v9019_v39 = vld [vmem:[#allocation19 + $0x20] ss:$0 sm:$0xff] }
 0x33c   :  { %11675 = vst [vmem:[#allocation53_spill] sm:$0xff] %v9007_v8  ;;  %11676 = vst [vmem:[#allocation31_spill] sm:$0xff] %v9009_v43  ;;  %v3448_v3 = vmul.f32 %v9009_v43, %v8985_v16  ;;  %v4574_v26 = vadd.f32 %v4558_v31, %v4521_v48  ;;  %v4665_v13 = vmul.f32 %v8989_v23, %v11677_v24  ;;  %v9031_v48 = vld [vmem:[#allocation3 + $0x54] sm:$0xff] }
 0x33d   :  { %11678 = vst [vmem:[#allocation52_spill] sm:$0xff] %v9017_v61  ;;  %11679 = vst [vmem:[#allocation34_spill] sm:$0xff] %v9019_v39  ;;  %v9021_v33 = vadd.f32 %v4610_v38, %v4573_v18  ;;  %v9025_v59 = vmul.f32 %v8613_v14, %v8794_v4  ;;  %v3411_v36 = vadd.f32 %v3395_v17, %v3358_v56  ;;  %v9033_v54 = vld [vmem:[#allocation19 + $0x21] ss:$0 sm:$0xff]  ;;  %v9035_v31 = vld [vmem:[#allocation19 + $0x22] ss:$0 sm:$0xff] }
 0x33e   :  { %11681 = vst [vmem:[#allocation60_spill] sm:$0xff] %v9027_v35  ;;  %v3501_v37 = vmul.f32 %v9027_v35, %v8998_v51  ;;  %11682 = vst [vmem:[#allocation61_spill] sm:$0xff] %v9031_v48  ;;  %v9037_v47 = vadd.f32 %v4248_v27, %v4211_v40  ;;  %v9041_v18 = vmul.f32 %v8635_v20, %v8813_v49  ;;  %v11687_v38 = vld [vmem:[#allocation48_spill] sm:$0xff]  ;;  %v9045_v56 = vld [vmem:[#allocation3 + $0x55] sm:$0xff] }
 0x33f   :  { %11680 = vst [vmem:[#allocation39_spill] sm:$0xff] %v9025_v59  ;;  %11683 = vst [vmem:[#allocation62_spill] sm:$0xff] %v9033_v54  ;;  %v4627_v4 = vadd.f32 %v4611_v19, %v4574_v26  ;;  %v4718_v17 = vmul.f32 %v9005_v62, %v11687_v38  ;;  %v9047_v24 = vld [vmem:[#allocation3 + $0x56] sm:$0xff]  ;;  %v9051_v2 = vadd.f32 %v4618_v46, %v4581_v9  ;;  %v9111_v20 = vld [vmem:[#allocation19 + $0x7] ss:$0 sm:$0xff] }
 0x340   :  { %11684 = vst [vmem:[#allocation63_spill] sm:$0xff] %v9035_v31  ;;  %11685 = vst [vmem:[#allocation64_spill] sm:$0xff] %v9037_v47  ;;  %v9049_v15 = vld [vmem:[#allocation3 + $0x70] sm:$0xff]  ;;  %v9053_v53 = vadd.f32 %v4241_v11, %v4204_v7  ;;  %v4091_v27 = vmul.f32 %v8399_v58, %v9013_v42  ;;  %v3464_v40 = vadd.f32 %v3448_v3, %v3411_v36  ;;  %v9057_v49 = vld [vmem:[#allocation19 + $0x23] ss:$0 sm:$0xff] }
 0x341   :  { %11686 = vst [vmem:[#allocation65_spill] sm:$0xff] %v9041_v18  ;;  %11688 = vst [vmem:[#allocation48_spill] sm:$0xff] %v9045_v56  ;;  %v9059_v19 = vld [vmem:[#allocation3 + $0x71] sm:$0xff]  ;;  %v4681_v38 = vadd.f32 %v4665_v13, %v4627_v4  ;;  %v11696_v18 = vld [vmem:[#allocation44_spill] sm:$0xff]  ;;  %v4824_v46 = vmul.f32 %v9017_v61, %v11697_v10  ;;  %v4877_v11 = vmul.f32 %v9019_v39, %v9031_v48 }
 0x342   :  { %11689 = vst [vmem:[#allocation66_spill] sm:$0xff] %v9047_v24  ;;  %11690 = vst [vmem:[#allocation67_spill] sm:$0xff] %v9049_v15  ;;  %v9061_v26 = vld [vmem:[#allocation3 + $0x72] sm:$0xff]  ;;  %v4771_v52 = vmul.f32 %v9007_v8, %v11696_v18  ;;  %v9069_v9 = vld [vmem:[#allocation19 + $0x24] ss:$0 sm:$0xff]  ;;  %v3517_v3 = vadd.f32 %v3501_v37, %v3464_v40  ;;  %v4930_v36 = vmul.f32 %v9033_v54, %v9045_v56 }
 0x343   :  { %11691 = vst [vmem:[#allocation68_spill] sm:$0xff] %v9051_v2  ;;  %11692 = vst [vmem:[#allocation69_spill] sm:$0xff] %v9053_v53  ;;  %v9071_v58 = vld [vmem:[#allocation19 + $0x25] ss:$0 sm:$0xff]  ;;  %v9073_v7 = vld [vmem:[#allocation19 + $0x26] ss:$0 sm:$0xff]  ;;  %v9079_v13 = vmul.f32 %v9035_v31, %v9047_v24  ;;  %v3184_v10 = vmul.f32 %v8939_v12, %v9049_v15  ;;  %v4734_v4 = vadd.f32 %v4718_v17, %v4681_v38 }
 0x344   :  { %11693 = vst [vmem:[#allocation70_spill] sm:$0xff] %v9057_v49  ;;  %11694 = vst [vmem:[#allocation71_spill] sm:$0xff] %v9059_v19  ;;  %v9081_v18 = vld [vmem:[#allocation3 + $0x73] sm:$0xff]  ;;  %v9087_v59 = vmul.f32 %v9057_v49, %v8925_v45  ;;  %v9089_v47 = vld [vmem:[#allocation19 + $0x27] ss:$0 sm:$0xff]  ;;  %v3237_v40 = vmul.f32 %v8943_v32, %v9059_v19  ;;  %v3290_v0 = vmul.f32 %v8957_v1, %v9061_v26 }
 0x345   :  { %11695 = vst [vmem:[#allocation72_spill] sm:$0xff] %v9061_v26  ;;  %11698 = vst [vmem:[#allocation44_spill] sm:$0xff] %v9069_v9  ;;  %v9091_v37 = vld [vmem:[#allocation19 + $0x28] ss:$0 sm:$0xff]  ;;  %v9099_v5 = vmul.f32 %v9069_v9, %v8927_v6  ;;  %v9103_v17 = vmul.f32 %v9071_v58, %v8936_v28  ;;  %v9107_v38 = vmul.f32 %v9073_v7, %v8952_v25  ;;  %v9109_v53 = vld [vmem:[#allocation3 + $0x74] sm:$0xff] }
 0x346   :  { %11699 = vst [vmem:[#allocation47_spill] sm:$0xff] %v9071_v58  ;;  %11700 = vst [vmem:[#allocation73_spill] sm:$0xff] %v9073_v7  ;;  %v3555_v14 = vmul.f32 %v9111_v20, %v9049_v15  ;;  %v4787_v55 = vadd.f32 %v4771_v52, %v4734_v4  ;;  %v3253_v60 = vadd.f32 %v3237_v40, %v3184_v10  ;;  %v9117_v6 = vld [vmem:[#allocation19 + $0x8] ss:$0 sm:$0xff]  ;;  %v4696_v25 = vld [vmem:[#allocation3 + $0x41] sm:$0xff] }
 0x347   :  { %11701 = vst [vmem:[#allocation74_spill] sm:$0xff] %v9081_v18  ;;  %11702 = vst [vmem:[#allocation75_spill] sm:$0xff] %v9089_v47  ;;  %v3343_v57 = vmul.f32 %v8974_v21, %v9081_v18  ;;  %v3608_v28 = vmul.f32 %v9117_v6, %v9059_v19  ;;  %v9123_v45 = vmul.f32 %v9089_v47, %v8965_v34  ;;  %v9129_v52 = vld [vmem:[#allocation19 + $0x29] ss:$0 sm:$0xff]  ;;  %v9131_v10 = vld [vmem:[#allocation3 + $0x75] sm:$0xff] }
 0x348   :  { %11703 = vst [vmem:[#allocation76_spill] sm:$0xff] %v9091_v37  ;;  %11704 = vst [vmem:[#allocation77_spill] sm:$0xff] %v9109_v53  ;;  %v9127_v24 = vmul.f32 %v9091_v37, %v8985_v16  ;;  %v3571_v4 = vadd.f32 %v3555_v14, %v3517_v3  ;;  %v9133_v40 = vld [vmem:[#allocation19 + $0x9] ss:$0 sm:$0xff]  ;;  %v3306_v44 = vadd.f32 %v3290_v0, %v3253_v60  ;;  %v4749_v16 = vld [vmem:[#allocation3 + $0x42] sm:$0xff] }
 0x349   :  { %11705 = vst [vmem:[#allocation78_spill] sm:$0xff] %v9111_v20  ;;  %11706 = vst [vmem:[#allocation79_spill] sm:$0xff] %v9117_v6  ;;  %v3661_v6 = vmul.f32 %v9133_v40, %v9061_v26  ;;  %v4840_v20 = vadd.f32 %v4824_v46, %v4787_v55  ;;  %v3396_v34 = vmul.f32 %v8994_v50, %v9109_v53  ;;  %v9144_v2 = vld [vmem:[#allocation3 + $0x76] sm:$0xff]  ;;  %v9146_v14 = vld [vmem:[#allocation19 + $0xa] ss:$0 sm:$0xff] }
 0x34a   :  { %11707 = vst [vmem:[#allocation80_spill] sm:$0xff] %v9123_v45  ;;  %11708 = vst [vmem:[#allocation81_spill] sm:$0xff] %v9127_v24  ;;  %v9140_v45 = vadd.f32 %v4091_v27, %v8963_v29  ;;  %v9142_v24 = vld [vmem:[#allocation19 + $0x2a] ss:$0 sm:$0xff]  ;;  %v3624_v37 = vadd.f32 %v3608_v28, %v3571_v4  ;;  %v3714_v3 = vmul.f32 %v9146_v14, %v9081_v18  ;;  %v9158_v28 = vld [vmem:[#allocation19 + $0x2b] ss:$0 sm:$0xff] }
 0x34b   :  { %11709 = vst [vmem:[#allocation82_spill] sm:$0xff] %v9131_v10  ;;  %11710 = vst [vmem:[#allocation83_spill] sm:$0xff] %v9133_v40  ;;  %v4664_v55 = vmul.f32 %v8989_v23, %v4643_v63  ;;  %v4717_v0 = vmul.f32 %v9005_v62, %v4696_v25  ;;  %v4893_v60 = vadd.f32 %v4877_v11, %v4840_v20  ;;  %v9160_v4 = vld [vmem:[#allocation19 + $0x2c] ss:$0 sm:$0xff] }
 0x34c   :  { %11711 = vst [vmem:[#allocation84_spill] sm:$0xff] %v9140_v45  ;;  %11712 = vst [vmem:[#allocation85_spill] sm:$0xff] %v9142_v24  ;;  %v9154_v29 = vmul.f32 %v9129_v52, %v8998_v51  ;;  %v3359_v27 = vadd.f32 %v3343_v57, %v3306_v44  ;;  %v3449_v46 = vmul.f32 %v9009_v43, %v9131_v10  ;;  %v4802_v45 = vld [vmem:[#allocation3 + $0x43] sm:$0xff] }
 0x34d   :  { %11713 = vst [vmem:[#allocation86_spill] sm:$0xff] %v9144_v2  ;;  %11714 = vst [vmem:[#allocation87_spill] sm:$0xff] %v9146_v14  ;;  %v3677_v40 = vadd.f32 %v3661_v6, %v3624_v37  ;;  %v9162_v14 = vld [vmem:[#allocation19 + $0xb] ss:$0 sm:$0xff]  ;;  %v4680_v20 = vadd.f32 %v4664_v55, %v9021_v33  ;;  %v4770_v25 = vmul.f32 %v9007_v8, %v4749_v16  ;;  %v9172_v57 = vld [vmem:[#allocation19 + $0x2d] ss:$0 sm:$0xff] }
 0x34e   :  { %11715 = vst [vmem:[#allocation88_spill] sm:$0xff] %v9154_v29  ;;  %11716 = vst [vmem:[#allocation89_spill] sm:$0xff] %v9160_v4  ;;  %v3767_v63 = vmul.f32 %v9162_v14, %v9109_v53  ;;  %v4946_v11 = vadd.f32 %v4930_v36, %v4893_v60  ;;  %v9170_v44 = vmul.f32 %v9142_v24, %v9049_v15  ;;  %v4855_v37 = vld [vmem:[#allocation3 + $0x44] sm:$0xff] }
 0x34f   :  { %11717 = vst [vmem:[#allocation90_spill] sm:$0xff] %v9162_v14  ;;  %v3412_v51 = vadd.f32 %v3396_v34, %v3359_v27  ;;  %v3502_v6 = vmul.f32 %v9027_v35, %v9144_v2  ;;  %v9176_v29 = vld [vmem:[#allocation19 + $0x2e] ss:$0 sm:$0xff]  ;;  %v9178_v43 = vld [vmem:[#allocation19 + $0x2f] ss:$0 sm:$0xff]  ;;  %v3730_v14 = vadd.f32 %v3714_v3, %v3677_v40  ;;  %v4733_v36 = vadd.f32 %v4717_v0, %v4680_v20 }
 0x350   :  { %11718 = vst [vmem:[#allocation91_spill] sm:$0xff] %v9176_v29  ;;  %11719 = vst [vmem:[#allocation92_spill] sm:$0xff] %v9178_v43  ;;  %v9180_v33 = vld [vmem:[#allocation19 + $0xc] ss:$0 sm:$0xff]  ;;  %v4823_v55 = vmul.f32 %v9017_v61, %v4802_v45  ;;  %v4999_v60 = vadd.f32 %v9079_v13, %v4946_v11  ;;  %v9188_v34 = vmul.f32 %v9158_v28, %v9059_v19  ;;  %v9194_v15 = vld [vmem:[#allocation19 + $0x30] ss:$0 sm:$0xff] }
 0x351   :  { %11720 = vst [vmem:[#allocation93_spill] sm:$0xff] %v9180_v33  ;;  %v3820_v16 = vmul.f32 %v9180_v33, %v9131_v10  ;;  %v9192_v27 = vmul.f32 %v9160_v4, %v9061_v26  ;;  %11721 = vst [vmem:[#allocation94_spill] sm:$0xff] %v9194_v15  ;;  %v3465_v40 = vadd.f32 %v3449_v46, %v3412_v51  ;;  %v4908_v3 = vld [vmem:[#allocation3 + $0x45] sm:$0xff] }
 0x352   :  { %v9198_v33 = vmul.f32 %v9172_v57, %v9081_v18  ;;  %v3783_v0 = vadd.f32 %v3767_v63, %v3730_v14  ;;  %v4786_v45 = vadd.f32 %v4770_v25, %v4733_v36  ;;  %v4876_v13 = vmul.f32 %v9019_v39, %v4855_v37  ;;  %v4961_v20 = vld [vmem:[#allocation3 + $0x46] sm:$0xff]  ;;  %v9221_v37 = vld [vmem:[#allocation3 + $0x51] sm:$0xff] }
 0x353   :  { %v5053_v11 = vadd.f32 %v9087_v59, %v4999_v60  ;;  %v9204_v19 = vmul.f32 %v9176_v29, %v9109_v53  ;;  %v9208_v26 = vmul.f32 %v9178_v43, %v9131_v10  ;;  %v9210_v51 = vadd.f32 %v3502_v6, %v3465_v40  ;;  %v9219_v59 = vld [vmem:[#allocation3 + $0x50] sm:$0xff]  ;;  %11728 = vst [vmem:[#allocation101_spill] sm:$0xff] %v9221_v37 }
 0x354   :  { %v9214_v46 = vmul.f32 %v9194_v15, %v9144_v2  ;;  %v9216_v14 = vadd.f32 %v3820_v16, %v3783_v0  ;;  %v4839_v63 = vadd.f32 %v4823_v55, %v4786_v45  ;;  %v4929_v25 = vmul.f32 %v9033_v54, %v4908_v3  ;;  %11727 = vst [vmem:[#allocation100_spill] sm:$0xff] %v9219_v59  ;;  %v9229_v2 = vld [vmem:[#allocation3 + $0x52] sm:$0xff]  ;;  %v4651_v16 = vld [vmem:[#allocation3 + $0x120] sm:$0xff] }
 0x355   :  { %11722 = vst [vmem:[#allocation95_spill] sm:$0xff] %v9204_v19  ;;  %11723 = vst [vmem:[#allocation96_spill] sm:$0xff] %v9208_v26  ;;  %v5106_v36 = vadd.f32 %v9099_v5, %v5053_v11  ;;  %v4982_v60 = vmul.f32 %v9035_v31, %v4961_v20  ;;  %v5036_v6 = vmul.f32 %v9057_v49, %v9219_v59  ;;  %v9231_v0 = vld [vmem:[#allocation3 + $0x53] sm:$0xff]  ;;  %v4704_v11 = vld [vmem:[#allocation3 + $0x121] sm:$0xff] }
 0x356   :  { %11724 = vst [vmem:[#allocation97_spill] sm:$0xff] %v9210_v51  ;;  %11725 = vst [vmem:[#allocation98_spill] sm:$0xff] %v9214_v46  ;;  %v5089_v40 = vmul.f32 %v9069_v9, %v9221_v37  ;;  %v4892_v55 = vadd.f32 %v4876_v13, %v4839_v63  ;;  %v3190_v3 = vmul.f32 %v8939_v12, %v8898_v30  ;;  %v9239_v20 = vld [vmem:[#allocation3 + $0x134] sm:$0xff]  ;;  %v11735_v59 = vld [vmem:[#allocation36_spill] sm:$0xff] }
 0x357   :  { %11726 = vst [vmem:[#allocation99_spill] sm:$0xff] %v9216_v14  ;;  %11729 = vst [vmem:[#allocation102_spill] sm:$0xff] %v9229_v2  ;;  %v3243_v5 = vmul.f32 %v8943_v32, %v8905_v22  ;;  %v3296_v45 = vmul.f32 %v8957_v1, %v8919_v41  ;;  %v5159_v14 = vadd.f32 %v9103_v17, %v5106_v36  ;;  %v9250_v15 = vld [vmem:[#allocation3 + $0x135] sm:$0xff]  ;;  %v11733_v36 = vld [vmem:[#allocation76_spill] sm:$0xff] }
 0x358   :  { %11730 = vst [vmem:[#allocation103_spill] sm:$0xff] %v9231_v0  ;;  %11731 = vst [vmem:[#allocation104_spill] sm:$0xff] %v9239_v20  ;;  %v5142_v10 = vmul.f32 %v9071_v58, %v9229_v2  ;;  %v5195_v13 = vmul.f32 %v9073_v7, %v9231_v0  ;;  %v5248_v63 = vmul.f32 %v9089_v47, %v9031_v48 }
 0x359   :  { %v4945_v53 = vadd.f32 %v4929_v25, %v4892_v55  ;;  %v3259_v18 = vadd.f32 %v3243_v5, %v3190_v3  ;;  %v3349_v51 = vmul.f32 %v8974_v21, %v9013_v42  ;;  %11732 = vst [vmem:[#allocation105_spill] sm:$0xff] %v9250_v15  ;;  %v4672_v46 = vmul.f32 %v8989_v23, %v4651_v16  ;;  %v9259_v55 = vld [vmem:[#allocation3 + $0x136] sm:$0xff]  ;;  %v11734_v3 = vld [vmem:[#allocation68_spill] sm:$0xff] }
 0x35a   :  { %v5212_v17 = vadd.f32 %v9107_v38, %v5159_v14  ;;  %v5301_v2 = vmul.f32 %v11733_v36, %v9045_v56  ;;  %v3402_v0 = vmul.f32 %v8994_v50, %v9239_v20  ;;  %v4725_v37 = vmul.f32 %v9005_v62, %v4704_v11  ;;  %v11736_v16 = vld [vmem:[#allocation80_spill] sm:$0xff]  ;;  %v11737_v38 = vld [vmem:[#allocation66_spill] sm:$0xff]  ;;  %v11739_v11 = vld [vmem:[#allocation31_spill] sm:$0xff] }
 0x35b   :  { %v4998_v48 = vadd.f32 %v4982_v60, %v4945_v53  ;;  %v3312_v25 = vadd.f32 %v3296_v45, %v3259_v18  ;;  %v4688_v5 = vadd.f32 %v4672_v46, %v11734_v3  ;;  %v4778_v26 = vmul.f32 %v9007_v8, %v11735_v59  ;;  %v11738_v56 = vld [vmem:[#allocation58_spill] sm:$0xff]  ;;  %v11741_v3 = vld [vmem:[#allocation81_spill] sm:$0xff]  ;;  %v11742_v59 = vld [vmem:[#allocation59_spill] sm:$0xff] }
 0x35c   :  { %v5265_v23 = vadd.f32 %v11736_v16, %v5212_v17  ;;  %v5354_v14 = vmul.f32 %v9129_v52, %v11737_v38  ;;  %v9269_v19 = vmul.f32 %v9142_v24, %v11738_v56  ;;  %v3455_v53 = vmul.f32 %v11739_v11, %v9250_v15  ;;  %v11740_v62 = vld [vmem:[#allocation54_spill] sm:$0xff]  ;;  %v11743_v16 = vld [vmem:[#allocation40_spill] sm:$0xff] }
 0x35d   :  { %v5052_v18 = vadd.f32 %v5036_v6, %v4998_v48  ;;  %v3365_v60 = vadd.f32 %v3349_v51, %v3312_v25  ;;  %v4741_v45 = vadd.f32 %v4725_v37, %v4688_v5  ;;  %v4831_v46 = vmul.f32 %v9017_v61, %v11740_v62  ;;  %v11744_v37 = vld [vmem:[#allocation55_spill] sm:$0xff]  ;;  %v3016_v25 = vpop.xlane.xlu1 %3015  ;;  %v11745_v5 = vld [vmem:[#allocation88_spill] sm:$0xff]  ;;  %v11748_v62 = vld [vmem:[#allocation30_spill] sm:$0xff] }
 0x35e   :  { %v5318_v8 = vadd.f32 %v11741_v3, %v5265_v23  ;;  %v9278_v17 = vmul.f32 %v9158_v28, %v11742_v59  ;;  %v9282_v38 = vmul.f32 %v9160_v4, %v11743_v16  ;;  %v3508_v56 = vmul.f32 %v9027_v35, %v9259_v55  ;;  %v11746_v3 = vld [vmem:[#allocation33_spill] sm:$0xff] }
 0x35f   :  { %v5105_v24 = vadd.f32 %v5089_v40, %v5052_v18  ;;  %v3418_v48 = vadd.f32 %v3402_v0, %v3365_v60  ;;  %v4794_v51 = vadd.f32 %v4778_v26, %v4741_v45  ;;  %v4884_v6 = vmul.f32 %v9019_v39, %v11744_v37  ;;  %v11747_v59 = vld [vmem:[#allocation45_spill] sm:$0xff]  ;;  %v11749_v18 = vld [vmem:[#allocation56_spill] sm:$0xff] }
 0x360   :  { %v5371_v23 = vadd.f32 %v11745_v5, %v5318_v8  ;;  %v9291_v61 = vmul.f32 %v9172_v57, %v11746_v3  ;;  %v9295_v16 = vmul.f32 %v9176_v29, %v11747_v59  ;;  %v9299_v4 = vmul.f32 %v9178_v43, %v11748_v62  ;;  %v9303_v45 = vld [vmem:[#allocation3 + $0x141] sm:$0xff]  ;;  %v11751_v5 = vld [vmem:[#allocation57_spill] sm:$0xff] }
 0x361   :  { %v5158_v40 = vadd.f32 %v5142_v10, %v5105_v24  ;;  %v3471_v26 = vadd.f32 %v3455_v53, %v3418_v48  ;;  %v4847_v0 = vadd.f32 %v4831_v46, %v4794_v51  ;;  %v4937_v60 = vmul.f32 %v9033_v54, %v11749_v18  ;;  %v9305_v8 = vld [vmem:[#allocation3 + $0x142] sm:$0xff]  ;;  %v11766_v54 = vld [vmem:[#allocation90_spill] sm:$0xff] }
 0x362   :  { %11750 = vst [vmem:[#allocation68_spill] sm:$0xff] %v9305_v8  ;;  %v5425_v37 = vadd.f32 %v9170_v44, %v5371_v23  ;;  %v4990_v39 = vmul.f32 %v9035_v31, %v11751_v5  ;;  %v5044_v59 = vmul.f32 %v9057_v49, %v8898_v30  ;;  %v5097_v24 = vmul.f32 %v9069_v9, %v8905_v22  ;;  %v9316_v51 = vld [vmem:[#allocation3 + $0x140] sm:$0xff]  ;;  %v2968_v44 = vpop.xlane.xlu1 %2967  ;;  %v11764_v31 = vld [vmem:[#allocation101_spill] sm:$0xff] }
 0x363   :  { %v5211_v10 = vadd.f32 %v5195_v13, %v5158_v40  ;;  %v3524_v53 = vadd.f32 %v3508_v56, %v3471_v26  ;;  %v4900_v46 = vadd.f32 %v4884_v6, %v4847_v0  ;;  %v5150_v48 = vmul.f32 %v9071_v58, %v8919_v41  ;;  %v9318_v18 = vld [vmem:[#allocation3 + $0x143] sm:$0xff]  ;;  %3137 = vst.msk [vmem:[#allocation3 + $0x173] sm:$0xff] %vm3122_vm7, %v2968_v44 }
 0x364   :  { %11752 = vst [vmem:[#allocation80_spill] sm:$0xff] %v9318_v18  ;;  %v5478_v23 = vadd.f32 %v9188_v34, %v5425_v37  ;;  %v3191_v5 = vmul.f32 %v8939_v12, %v9316_v51  ;;  %v3244_v30 = vmul.f32 %v8943_v32, %v9303_v45  ;;  %v3297_v22 = vmul.f32 %v8957_v1, %v9305_v8  ;;  %v9332_v34 = vld [vmem:[#allocation3 + $0x144] sm:$0xff] }
 0x365   :  { %v5264_v56 = vadd.f32 %v5248_v63, %v5211_v10  ;;  %v4953_v41 = vadd.f32 %v4937_v60, %v4900_v46  ;;  %v5203_v13 = vmul.f32 %v9073_v7, %v9013_v42  ;;  %v5256_v6 = vmul.f32 %v9089_v47, %v9239_v20  ;;  %11753 = vst [vmem:[#allocation81_spill] sm:$0xff] %v9332_v34  ;;  %v9334_v40 = vld [vmem:[#allocation3 + $0x145] sm:$0xff]  ;;  %v11756_v42 = vld [vmem:[#allocation78_spill] sm:$0xff] }
 0x366   :  { %11754 = vst [vmem:[#allocation55_spill] sm:$0xff] %v9334_v40  ;;  %v5531_v26 = vadd.f32 %v9192_v27, %v5478_v23  ;;  %v5309_v0 = vmul.f32 %v11733_v36, %v9250_v15  ;;  %v3260_v37 = vadd.f32 %v3244_v30, %v3191_v5  ;;  %v3350_v63 = vmul.f32 %v8974_v21, %v9318_v18  ;;  %v9341_v46 = vld [vmem:[#allocation3 + $0x146] sm:$0xff] }
 0x367   :  { %v5317_v60 = vadd.f32 %v5301_v2, %v5264_v56  ;;  %v5006_v10 = vadd.f32 %v4990_v39, %v4953_v41  ;;  %11755 = vst [vmem:[#allocation88_spill] sm:$0xff] %v9341_v46  ;;  %v3562_v44 = vmul.f32 %v11756_v42, %v9316_v51  ;;  %v11757_v20 = vld [vmem:[#allocation79_spill] sm:$0xff]  ;;  %v3403_v23 = vmul.f32 %v8994_v50, %v9332_v34 }
 0x368   :  { %v3615_v47 = vmul.f32 %v11757_v20, %v9303_v45  ;;  %v5584_v7 = vadd.f32 %v9198_v33, %v5531_v26  ;;  %v3313_v27 = vadd.f32 %v3297_v22, %v3260_v37  ;;  %v3456_v5 = vmul.f32 %v11739_v11, %v9334_v40  ;;  %v11758_v56 = vld [vmem:[#allocation83_spill] sm:$0xff] }
 0x369   :  { %v5370_v30 = vadd.f32 %v5354_v14, %v5317_v60  ;;  %v5060_v2 = vadd.f32 %v5044_v59, %v5006_v10  ;;  %v3578_v39 = vadd.f32 %v3562_v44, %v3524_v53  ;;  %v3668_v41 = vmul.f32 %v11758_v56, %v9305_v8  ;;  %v11759_v15 = vld [vmem:[#allocation95_spill] sm:$0xff]  ;;  %v11761_v14 = vld [vmem:[#allocation96_spill] sm:$0xff]  ;;  %v11763_v10 = vld [vmem:[#allocation41_spill] sm:$0xff] }
 0x36a   :  { %v5637_v36 = vadd.f32 %v11759_v15, %v5584_v7  ;;  %v3366_v58 = vadd.f32 %v3350_v63, %v3313_v27  ;;  %v3509_v9 = vmul.f32 %v9027_v35, %v9341_v46  ;;  %v11760_v33 = vld [vmem:[#allocation87_spill] sm:$0xff]  ;;  %v3035_v11 = vmul.f32 0.25, %v3016_v25  ;;  %v11762_v60 = vld [vmem:[#allocation100_spill] sm:$0xff]  ;;  %v11765_v15 = vld [vmem:[#allocation42_spill] sm:$0xff] }
 0x36b   :  { %v3721_v22 = vmul.f32 %v11760_v33, %v9318_v18  ;;  %v5424_v26 = vadd.f32 %v9269_v19, %v5370_v30  ;;  %v5113_v37 = vadd.f32 %v5097_v24, %v5060_v2  ;;  %v3631_v49 = vadd.f32 %v3615_v47, %v3578_v39  ;;  %v11767_v47 = vld [vmem:[#allocation98_spill] sm:$0xff] }
 0x36c   :  { %v5690_v59 = vadd.f32 %v11761_v14, %v5637_v36  ;;  %v3419_v53 = vadd.f32 %v3403_v23, %v3366_v58  ;;  %v4294_v44 = vmul.f32 %v11763_v10, %v11762_v60  ;;  %v4347_v7 = vmul.f32 %v11765_v15, %v11764_v31  ;;  %3154 = vst.msk [vmem:[#allocation3 + $0x173] sm:$0xff] %vm3139_vm8, %v3035_v11  ;;  %v11768_v36 = vld [vmem:[#allocation69_spill] sm:$0xff]  ;;  %v11769_v24 = vld [vmem:[#allocation102_spill] sm:$0xff] }
 0x36d   :  { %v5477_v63 = vadd.f32 %v9278_v17, %v5424_v26  ;;  %v5166_v27 = vadd.f32 %v5150_v48, %v5113_v37  ;;  %v3684_v35 = vadd.f32 %v3668_v41, %v3631_v49  ;;  %v3774_v62 = vmul.f32 %v11766_v54, %v9332_v34  ;;  %v11770_v23 = vld [vmem:[#allocation38_spill] sm:$0xff]  ;;  %v11771_v17 = vld [vmem:[#allocation93_spill] sm:$0xff]  ;;  %v11772_v26 = vld [vmem:[#allocation103_spill] sm:$0xff] }
 0x36e   :  { %v5743_v19 = vadd.f32 %v11767_v47, %v5690_v59  ;;  %v3472_v25 = vadd.f32 %v3456_v5, %v3419_v53  ;;  %v4310_v58 = vadd.f32 %v4294_v44, %v11768_v36  ;;  %v4400_v30 = vmul.f32 %v11770_v23, %v11769_v24  ;;  %v11773_v37 = vld [vmem:[#allocation43_spill] sm:$0xff]  ;;  %v11776_v60 = vld [vmem:[#allocation50_spill] sm:$0xff]  ;;  %v11778_v15 = vld [vmem:[#allocation61_spill] sm:$0xff] }
 0x36f   :  { %v5530_v2 = vadd.f32 %v9282_v38, %v5477_v63  ;;  %v5219_v31 = vadd.f32 %v5203_v13, %v5166_v27  ;;  %v3737_v39 = vadd.f32 %v3721_v22, %v3684_v35  ;;  %v3827_v49 = vmul.f32 %v11771_v17, %v9334_v40  ;;  %v11774_v35 = vld [vmem:[#allocation64_spill] sm:$0xff]  ;;  %v11775_v22 = vld [vmem:[#allocation39_spill] sm:$0xff]  ;;  %v11777_v10 = vld [vmem:[#allocation94_spill] sm:$0xff] }
 0x370   :  { %v5761_v48 = vsel %vm3037_vm4, %v5743_v19, 0.0  ;;  %v9377_v41 = vadd.f32 %v3509_v9, %v3472_v25  ;;  %v4363_v11 = vadd.f32 %v4347_v7, %v4310_v58  ;;  %v4453_v5 = vmul.f32 %v11773_v37, %v11772_v26  ;;  %v11779_v7 = vld [vmem:[#allocation46_spill] sm:$0xff]  ;;  %v11783_v36 = vld [vmem:[#allocation35_spill] sm:$0xff]  ;;  %v11787_v26 = vld [vmem:[#allocation29_spill] sm:$0xff] }
 0x371   :  { %5762 = vadd.xlane.f32.xlu1 %v5761_v48  ;;  %v5583_v14 = vadd.f32 %v9291_v61, %v5530_v2  ;;  %v5272_v59 = vadd.f32 %v5256_v6, %v5219_v31  ;;  %v5362_v38 = vmul.f32 %v9129_v52, %v9259_v55  ;;  %v3790_v13 = vadd.f32 %v3774_v62, %v3737_v39  ;;  %v11780_v61 = vld [vmem:[#allocation85_spill] sm:$0xff]  ;;  %v11782_v62 = vld [vmem:[#allocation48_spill] sm:$0xff] }
 0x372   :  { %v4317_v53 = vadd.f32 %v11775_v22, %v11774_v35  ;;  %v5726_v44 = vmul.f32 %v11777_v10, %v11776_v60  ;;  %v4416_v9 = vadd.f32 %v4400_v30, %v4363_v11  ;;  %v4506_v63 = vmul.f32 %v11779_v7, %v11778_v15  ;;  %v11784_v31 = vld [vmem:[#allocation65_spill] sm:$0xff]  ;;  %v11785_v48 = vld [vmem:[#allocation36_spill] sm:$0xff]  ;;  %v11786_v11 = vld [vmem:[#allocation66_spill] sm:$0xff] }
 0x373   :  { %v5636_v27 = vadd.f32 %v9295_v16, %v5583_v14  ;;  %v5325_v47 = vadd.f32 %v5309_v0, %v5272_v59  ;;  %v5416_v6 = vmul.f32 %v11780_v61, %v9316_v51  ;;  %v9393_v19 = vadd.f32 %v3827_v49, %v3790_v13  ;;  %v11788_v59 = vld [vmem:[#allocation89_spill] sm:$0xff]  ;;  %v9407_v35 = vld [vmem:[#allocation3 + $0x80] sm:$0xff] }
 0x374   :  { %v4469_v25 = vadd.f32 %v4453_v5, %v4416_v9  ;;  %v4559_v58 = vmul.f32 %v11783_v36, %v11782_v62  ;;  %v5469_v30 = vmul.f32 %v9158_v28, %v9303_v45  ;;  %v4370_v39 = vadd.f32 %v11784_v31, %v4317_v53  ;;  %v11790_v22 = vld [vmem:[#allocation51_spill] sm:$0xff]  ;;  %v11791_v53 = vld [vmem:[#allocation54_spill] sm:$0xff]  ;;  %v11793_v62 = vld [vmem:[#allocation49_spill] sm:$0xff] }
 0x375   :  { %11781 = vst [vmem:[#allocation33_spill] sm:$0xff] %v9393_v19  ;;  %v5689_v24 = vadd.f32 %v9299_v4, %v5636_v27  ;;  %v5378_v2 = vadd.f32 %v5362_v38, %v5325_v47  ;;  %v4407_v16 = vmul.f32 %v11770_v23, %v11785_v48  ;;  %v4612_v49 = vmul.f32 %v11787_v26, %v11786_v11  ;;  %v11789_v38 = vld [vmem:[#allocation58_spill] sm:$0xff]  ;;  %v9411_v15 = vld [vmem:[#allocation3 + $0x81] sm:$0xff]  ;;  %v11797_v11 = vld [vmem:[#allocation53_spill] sm:$0xff] }
 0x376   :  { %v4522_v0 = vadd.f32 %v4506_v63, %v4469_v25  ;;  %v5522_v13 = vmul.f32 %v11788_v59, %v9305_v8  ;;  %v4666_v9 = vmul.f32 %v11790_v22, %v11789_v38  ;;  %v4460_v23 = vmul.f32 %v11773_v37, %v11791_v53  ;;  %v9418_v27 = vld [vmem:[#allocation3 + $0x82] sm:$0xff]  ;;  %v9434_v48 = vld [vmem:[#allocation3 + $0x152] sm:$0xff] }
 0x377   :  { %v5742_v14 = vadd.f32 %v5726_v44, %v5689_v24  ;;  %v5432_v5 = vadd.f32 %v5416_v6, %v5378_v2  ;;  %v5575_v44 = vmul.f32 %v9172_v57, %v9318_v18  ;;  %v4423_v47 = vadd.f32 %v4407_v16, %v4370_v39  ;;  %v11792_v25 = vld [vmem:[#allocation59_spill] sm:$0xff]  ;;  %v9424_v24 = vld [vmem:[#allocation3 + $0x151] sm:$0xff]  ;;  %11795 = vst [vmem:[#allocation57_spill] sm:$0xff] %v9434_v48 }
 0x378   :  { %v4575_v4 = vadd.f32 %v4559_v58, %v4522_v0  ;;  %v4719_v36 = vmul.f32 %v11793_v62, %v11792_v25  ;;  %v3556_v58 = vmul.f32 %v11756_v42, %v9407_v35  ;;  %v5628_v2 = vmul.f32 %v9176_v29, %v9332_v34  ;;  %v9430_v31 = vld [vmem:[#allocation3 + $0x83] sm:$0xff]  ;;  %v9443_v38 = vld [vmem:[#allocation3 + $0x153] sm:$0xff] }
 0x379   :  { %v5758_v7 = vsel %vm3037_vm4, %v5742_v14, 0.0  ;;  %v5485_v63 = vadd.f32 %v5469_v30, %v5432_v5  ;;  %v5681_v30 = vmul.f32 %v9178_v43, %v9334_v40  ;;  %11794 = vst [vmem:[#allocation56_spill] sm:$0xff] %v9430_v31  ;;  %v3609_v39 = vmul.f32 %v11757_v20, %v9411_v15  ;;  %v11796_v0 = vld [vmem:[#allocation40_spill] sm:$0xff]  ;;  %v11798_v14 = vld [vmem:[#allocation97_spill] sm:$0xff]  ;;  %11799 = vst [vmem:[#allocation78_spill] sm:$0xff] %v9443_v38 }
 0x37a   :  { %5759 = vadd.xlane.f32.xlu0 %v5758_v7  ;;  %v4628_v6 = vadd.f32 %v4612_v49, %v4575_v4  ;;  %v4772_v49 = vmul.f32 %v11797_v11, %v11796_v0  ;;  %v3572_v5 = vadd.f32 %v3556_v58, %v11798_v14  ;;  %v9441_v4 = vld [vmem:[#allocation3 + $0x150] sm:$0xff]  ;;  %v11800_v7 = vld [vmem:[#allocation52_spill] sm:$0xff]  ;;  %v3715_v14 = vmul.f32 %v11760_v33, %v9430_v31 }
 0x37b   :  { %v5538_v37 = vadd.f32 %v5522_v13, %v5485_v63  ;;  %v3662_v13 = vmul.f32 %v11758_v56, %v9418_v27  ;;  %v4825_v63 = vmul.f32 %v11800_v7, %v11746_v3  ;;  %v9447_v25 = vld [vmem:[#allocation3 + $0x84] sm:$0xff]  ;;  %v3298_v19 = vmul.f32 %v8957_v1, %v9434_v48  ;;  %v9469_v18 = vld [vmem:[#allocation3 + $0x155] sm:$0xff] }
 0x37c   :  { %v4682_v16 = vadd.f32 %v4666_v9, %v4628_v6  ;;  %11801 = vst [vmem:[#allocation79_spill] sm:$0xff] %v9447_v25  ;;  %v3192_v9 = vmul.f32 %v8939_v12, %v9441_v4  ;;  %v3245_v6 = vmul.f32 %v8943_v32, %v9424_v24  ;;  %v3625_v0 = vadd.f32 %v3609_v39, %v3572_v5  ;;  %v9461_v40 = vld [vmem:[#allocation3 + $0x85] sm:$0xff]  ;;  %v11803_v39 = vld [vmem:[#allocation45_spill] sm:$0xff] }
 0x37d   :  { %v5591_v53 = vadd.f32 %v5575_v44, %v5538_v37  ;;  %v9457_v44 = vld [vmem:[#allocation3 + $0x154] sm:$0xff]  ;;  %v5734_v3 = vmul.f32 %v11777_v10, %v9341_v46  ;;  %11802 = vst [vmem:[#allocation83_spill] sm:$0xff] %v9461_v40  ;;  %v3351_v32 = vmul.f32 %v8974_v21, %v9443_v38  ;;  %v3768_v1 = vmul.f32 %v11766_v54, %v9447_v25 }
 0x37e   :  { %v4735_v58 = vadd.f32 %v4719_v36, %v4682_v16  ;;  %v3261_v12 = vadd.f32 %v3245_v6, %v3192_v9  ;;  %v11804_v16 = vld [vmem:[#allocation34_spill] sm:$0xff]  ;;  %v3678_v34 = vadd.f32 %v3662_v13, %v3625_v0  ;;  %v3404_v46 = vmul.f32 %v8994_v50, %v9457_v44  ;;  %v4492_v9 = vld [vmem:[#allocation3 + $0x124] sm:$0xff]  ;;  %v9494_v29 = vld [vmem:[#allocation3 + $0x130] sm:$0xff] }
 0x37f   :  { %v5644_v37 = vadd.f32 %v5628_v2, %v5591_v53  ;;  %v4878_v5 = vmul.f32 %v11804_v16, %v11803_v39  ;;  %v4476_v2 = vadd.f32 %v4460_v23, %v4423_v47  ;;  %v4545_v6 = vld [vmem:[#allocation3 + $0x125] sm:$0xff]  ;;  %v11805_v21 = vld [vmem:[#allocation30_spill] sm:$0xff]  ;;  %v3821_v13 = vmul.f32 %v11771_v17, %v9461_v40 }
 0x380   :  { %v4788_v36 = vadd.f32 %v4772_v49, %v4735_v58  ;;  %v3314_v8 = vadd.f32 %v3298_v19, %v3261_v12  ;;  %v11806_v49 = vld [vmem:[#allocation62_spill] sm:$0xff]  ;;  %v3731_v43 = vadd.f32 %v3715_v14, %v3678_v34  ;;  %v11808_v23 = vld [vmem:[#allocation63_spill] sm:$0xff]  ;;  %v9486_v14 = vld [vmem:[#allocation19 + $0x1a] ss:$0 sm:$0xff] }
 0x381   :  { %v5697_v53 = vadd.f32 %v5681_v30, %v5644_v37  ;;  %v4931_v58 = vmul.f32 %v11806_v49, %v11805_v21  ;;  %v9477_v0 = vld [vmem:[#allocation3 + $0x156] sm:$0xff]  ;;  %v4984_v47 = vmul.f32 %v11808_v23, %v11776_v60  ;;  %v11809_v30 = vld [vmem:[#allocation31_spill] sm:$0xff]  ;;  %11811 = vst [vmem:[#allocation96_spill] sm:$0xff] %v9486_v14  ;;  %v4566_v21 = vmul.f32 %v9486_v14, %v4545_v6 }
 0x382   :  { %v4841_v10 = vadd.f32 %v4825_v63, %v4788_v36  ;;  %11807 = vst [vmem:[#allocation95_spill] sm:$0xff] %v9477_v0  ;;  %v3367_v19 = vadd.f32 %v3351_v32, %v3314_v8  ;;  %v3457_v50 = vmul.f32 %v11809_v30, %v9469_v18  ;;  %v4598_v37 = vld [vmem:[#allocation3 + $0x126] sm:$0xff]  ;;  %v3784_v63 = vadd.f32 %v3768_v1, %v3731_v43  ;;  %v9483_v36 = vld [vmem:[#allocation19 + $0x19] ss:$0 sm:$0xff]  ;;  %v11813_v40 = vld [vmem:[#allocation70_spill] sm:$0xff] }
 0x383   :  { %v5750_v39 = vadd.f32 %v5734_v3, %v5697_v53  ;;  %11810 = vst [vmem:[#allocation87_spill] sm:$0xff] %v9483_v36  ;;  %v4513_v34 = vmul.f32 %v9483_v36, %v4492_v9  ;;  %v11812_v53 = vld [vmem:[#allocation67_spill] sm:$0xff]  ;;  %v11814_v32 = vld [vmem:[#allocation60_spill] sm:$0xff]  ;;  %v4619_v1 = vmul.f32 %v11787_v26, %v4598_v37  ;;  %v9499_v6 = vld [vmem:[#allocation3 + $0x131] sm:$0xff] }
 0x384   :  { %v4894_v12 = vadd.f32 %v4878_v5, %v4841_v10  ;;  %v5038_v60 = vmul.f32 %v11813_v40, %v11812_v53  ;;  %v3420_v8 = vadd.f32 %v3404_v46, %v3367_v19  ;;  %v3510_v30 = vmul.f32 %v11814_v32, %v9477_v0  ;;  %v11816_v14 = vld [vmem:[#allocation71_spill] sm:$0xff]  ;;  %v11817_v36 = vld [vmem:[#allocation44_spill] sm:$0xff] }
 0x385   :  { %v5782_v3 = vsel %vm3037_vm4, %v5750_v39, 0.0  ;;  %v9496_v10 = vadd.f32 %v3821_v13, %v3784_v63  ;;  %v4529_v5 = vadd.f32 %v4513_v34, %v4476_v2  ;;  %v5091_v53 = vmul.f32 %v11817_v36, %v11816_v14  ;;  %v9509_v13 = vld [vmem:[#allocation3 + $0x132] sm:$0xff]  ;;  %v11819_v37 = vld [vmem:[#allocation72_spill] sm:$0xff] }
 0x386   :  { %5783 = vadd.xlane.f32.xlu0 %v5782_v3  ;;  %v4947_v43 = vadd.f32 %v4931_v58, %v4894_v12  ;;  %v3473_v9 = vadd.f32 %v3457_v50, %v3420_v8  ;;  %v4673_v19 = vmul.f32 %v11790_v22, %v9494_v29  ;;  %v3563_v58 = vmul.f32 %v11756_v42, %v9441_v4  ;;  %v11820_v50 = vld [vmem:[#allocation47_spill] sm:$0xff]  ;;  %v9515_v34 = vld [vmem:[#allocation3 + $0x133] sm:$0xff] }
 0x387   :  { %11815 = vst [vmem:[#allocation100_spill] sm:$0xff] %v9496_v10  ;;  %v4582_v46 = vadd.f32 %v4566_v21, %v4529_v5  ;;  %11818 = vst [vmem:[#allocation41_spill] sm:$0xff] %v9509_v13  ;;  %v5144_v12 = vmul.f32 %v11820_v50, %v11819_v37  ;;  %v3616_v14 = vmul.f32 %v11757_v20, %v9424_v24  ;;  %v11822_v3 = vld [vmem:[#allocation74_spill] sm:$0xff]  ;;  %v11823_v8 = vld [vmem:[#allocation73_spill] sm:$0xff] }
 0x388   :  { %v5000_v39 = vadd.f32 %v4984_v47, %v4947_v43  ;;  %v9505_v32 = vadd.f32 %v3510_v30, %v3473_v9  ;;  %v4726_v47 = vmul.f32 %v11793_v62, %v9499_v6  ;;  %11821 = vst [vmem:[#allocation101_spill] sm:$0xff] %v9515_v34  ;;  %v5197_v30 = vmul.f32 %v11823_v8, %v11822_v3  ;;  %v11824_v5 = vld [vmem:[#allocation77_spill] sm:$0xff]  ;;  %v11825_v9 = vld [vmem:[#allocation75_spill] sm:$0xff]  ;;  %v9551_v62 = vld [vmem:[#allocation19 + $0x14] ss:$0 sm:$0xff] }
 0x389   :  { %v4635_v63 = vadd.f32 %v4619_v1, %v4582_v46  ;;  %v3669_v1 = vmul.f32 %v11758_v56, %v9434_v48  ;;  %v4832_v46 = vmul.f32 %v11800_v7, %v9515_v34  ;;  %v3579_v37 = vadd.f32 %v3563_v58, %v9377_v41  ;;  %v9530_v10 = vld [vmem:[#allocation3 + $0x54] sm:$0xff]  ;;  %v11831_v7 = vld [vmem:[#allocation76_spill] sm:$0xff]  ;;  %11835 = vst [vmem:[#allocation38_spill] sm:$0xff] %v9551_v62 }
 0x38a   :  { %v5054_v2 = vadd.f32 %v5038_v60, %v5000_v39  ;;  %v4779_v60 = vmul.f32 %v11797_v11, %v9509_v13  ;;  %v5250_v39 = vmul.f32 %v11825_v9, %v11824_v5  ;;  %11826 = vst [vmem:[#allocation42_spill] sm:$0xff] %v9530_v10  ;;  %v9538_v5 = vld [vmem:[#allocation19 + $0x13] ss:$0 sm:$0xff]  ;;  %v11830_v48 = vld [vmem:[#allocation82_spill] sm:$0xff]  ;;  %v3722_v41 = vmul.f32 %v11760_v33, %v9443_v38  ;;  %v11837_v13 = vld [vmem:[#allocation105_spill] sm:$0xff] }
 0x38b   :  { %v4689_v43 = vadd.f32 %v4673_v19, %v4635_v63  ;;  %v9534_v63 = vld [vmem:[#allocation19 + $0x12] ss:$0 sm:$0xff]  ;;  %11829 = vst [vmem:[#allocation69_spill] sm:$0xff] %v9538_v5  ;;  %v5303_v11 = vmul.f32 %v11831_v7, %v11830_v48  ;;  %v3775_v38 = vmul.f32 %v11766_v54, %v9457_v44 }
 0x38c   :  { %v5107_v21 = vadd.f32 %v5091_v53, %v5054_v2  ;;  %v9532_v53 = vld [vmem:[#allocation3 + $0x55] sm:$0xff]  ;;  %11828 = vst [vmem:[#allocation98_spill] sm:$0xff] %v9534_v63  ;;  %v4136_v3 = vmul.f32 %v9534_v63, %v9530_v10  ;;  %v11832_v58 = vld [vmem:[#allocation104_spill] sm:$0xff] }
 0x38d   :  { %11827 = vst [vmem:[#allocation90_spill] sm:$0xff] %v9532_v53  ;;  %v4742_v19 = vadd.f32 %v4726_v47, %v4689_v43  ;;  %v4189_v0 = vmul.f32 %v9538_v5, %v9532_v53  ;;  %v3632_v47 = vadd.f32 %v3616_v14, %v3579_v37  ;;  %v11834_v63 = vld [vmem:[#allocation37_spill] sm:$0xff]  ;;  %v11836_v53 = vld [vmem:[#allocation86_spill] sm:$0xff]  ;;  %v4938_v14 = vmul.f32 %v11806_v49, %v11837_v13 }
 0x38e   :  { %v5160_v2 = vadd.f32 %v5144_v12, %v5107_v21  ;;  %v4885_v12 = vmul.f32 %v11804_v16, %v11832_v58  ;;  %v9548_v21 = vld [vmem:[#allocation3 + $0x56] sm:$0xff]  ;;  %v4152_v10 = vadd.f32 %v4136_v3, %v11834_v63  ;;  %v5356_v48 = vmul.f32 %v9129_v52, %v11836_v53  ;;  %v3019_v58 = vpop.xlane.xlu1 %3018  ;;  %v9563_v63 = vld [vmem:[#allocation19 + $0x15] ss:$0 sm:$0xff] }
 0x38f   :  { %11833 = vst [vmem:[#allocation102_spill] sm:$0xff] %v9548_v21  ;;  %v4795_v34 = vadd.f32 %v4779_v60, %v4742_v19  ;;  %v4242_v5 = vmul.f32 %v9551_v62, %v9548_v21  ;;  %v3685_v37 = vadd.f32 %v3669_v1, %v3632_v47  ;;  %11839 = vst [vmem:[#allocation103_spill] sm:$0xff] %v9563_v63  ;;  %v9573_v1 = vld [vmem:[#allocation3 + $0x61] sm:$0xff]  ;;  %v3036_v21 = vmul.f32 0.25, %v3019_v58 }
 0x390   :  { %v5213_v43 = vadd.f32 %v5197_v30, %v5160_v2  ;;  %v9561_v30 = vld [vmem:[#allocation3 + $0x60] sm:$0xff]  ;;  %v4205_v19 = vadd.f32 %v4189_v0, %v4152_v10  ;;  %v5410_v53 = vmul.f32 %v11780_v61, %v9407_v35  ;;  %v3828_v62 = vmul.f32 %v11771_v17, %v9469_v18  ;;  %11840 = vst [vmem:[#allocation43_spill] sm:$0xff] %v9573_v1  ;;  %v9575_v10 = vld [vmem:[#allocation19 + $0x16] ss:$0 sm:$0xff] }
 0x391   :  { %11838 = vst [vmem:[#allocation93_spill] sm:$0xff] %v9561_v30  ;;  %v4848_v2 = vadd.f32 %v4832_v46, %v4795_v34  ;;  %v4295_v3 = vmul.f32 %v9563_v63, %v9561_v30  ;;  %v4991_v49 = vmul.f32 %v11808_v23, %v9259_v55  ;;  %v3738_v13 = vadd.f32 %v3722_v41, %v3685_v37  ;;  %v9583_v55 = vld [vmem:[#allocation3 + $0x62] sm:$0xff] }
 0x392   :  { %v5266_v60 = vadd.f32 %v5250_v39, %v5213_v43  ;;  %v4258_v0 = vadd.f32 %v4242_v5, %v4205_v19  ;;  %11841 = vst [vmem:[#allocation64_spill] sm:$0xff] %v9575_v10  ;;  %v4348_v46 = vmul.f32 %v9575_v10, %v9573_v1  ;;  %v5463_v47 = vmul.f32 %v9158_v28, %v9411_v15  ;;  %v9599_v58 = vld [vmem:[#allocation3 + $0x86] sm:$0xff] }
 0x393   :  { %v4901_v34 = vadd.f32 %v4885_v12, %v4848_v2  ;;  %v5045_v43 = vmul.f32 %v11813_v40, %v9316_v51  ;;  %v3791_v30 = vadd.f32 %v3775_v38, %v3738_v13  ;;  %11842 = vst [vmem:[#allocation39_spill] sm:$0xff] %v9583_v55  ;;  %v9585_v12 = vld [vmem:[#allocation19 + $0x17] ss:$0 sm:$0xff]  ;;  %v5516_v37 = vmul.f32 %v11788_v59, %v9418_v27  ;;  %v9597_v38 = vld [vmem:[#allocation3 + $0x63] sm:$0xff] }
 0x394   :  { %v5319_v39 = vadd.f32 %v5303_v11, %v5266_v60  ;;  %v4311_v11 = vadd.f32 %v4295_v3, %v4258_v0  ;;  %11843 = vst [vmem:[#allocation50_spill] sm:$0xff] %v9585_v12  ;;  %v4401_v5 = vmul.f32 %v9585_v12, %v9583_v55  ;;  %v5569_v60 = vmul.f32 %v9172_v57, %v9430_v31  ;;  %v9601_v3 = vld [vmem:[#allocation19 + $0x18] ss:$0 sm:$0xff]  ;;  %v11852_v0 = vld [vmem:[#allocation68_spill] sm:$0xff] }
 0x395   :  { %v4954_v41 = vadd.f32 %v4938_v14, %v4901_v34  ;;  %v5098_v51 = vmul.f32 %v11817_v36, %v9303_v45  ;;  %v9595_v40 = vadd.f32 %v3828_v62, %v3791_v30  ;;  %11845 = vst [vmem:[#allocation46_spill] sm:$0xff] %v9597_v38  ;;  %11846 = vst [vmem:[#allocation85_spill] sm:$0xff] %v9599_v58  ;;  %v11849_v62 = vld [vmem:[#allocation83_spill] sm:$0xff]  ;;  %v11850_v36 = vld [vmem:[#allocation92_spill] sm:$0xff] }
 0x396   :  { %v5372_v23 = vadd.f32 %v5356_v48, %v5319_v39  ;;  %v2971_v48 = vpop.xlane.xlu1 %2970  ;;  %v4364_v19 = vadd.f32 %v4348_v46, %v4311_v11  ;;  %11847 = vst [vmem:[#allocation48_spill] sm:$0xff] %v9601_v3  ;;  %v4454_v13 = vmul.f32 %v9601_v3, %v9597_v38  ;;  %v11848_v39 = vld [vmem:[#allocation91_spill] sm:$0xff]  ;;  %v5675_v30 = vmul.f32 %v11850_v36, %v11849_v62  ;;  %v11851_v34 = vld [vmem:[#allocation94_spill] sm:$0xff]  ;;  %v11855_v1 = vld [vmem:[#allocation80_spill] sm:$0xff] }
 0x397   :  { %11844 = vst [vmem:[#allocation61_spill] sm:$0xff] %v9595_v40  ;;  %v5007_v2 = vadd.f32 %v4991_v49, %v4954_v41  ;;  %3138 = vst.msk [vmem:[#allocation3 + $0x183] sm:$0xff] %vm3122_vm7, %v2971_v48  ;;  %v5622_v45 = vmul.f32 %v11848_v39, %v9447_v25  ;;  %v5151_v49 = vmul.f32 %v11820_v50, %v11852_v0  ;;  %v9614_v46 = vld [vmem:[#allocation3 + $0x64] sm:$0xff]  ;;  %v11856_v25 = vld [vmem:[#allocation81_spill] sm:$0xff] }
 0x398   :  { %v5426_v14 = vadd.f32 %v5410_v53, %v5372_v23  ;;  %v5728_v53 = vmul.f32 %v11851_v34, %v9599_v58  ;;  %11853 = vst [vmem:[#allocation35_spill] sm:$0xff] %v9614_v46  ;;  %3155 = vst.msk [vmem:[#allocation3 + $0x183] sm:$0xff] %vm3139_vm8, %v3036_v21  ;;  %v4417_v11 = vadd.f32 %v4401_v5, %v4364_v19  ;;  %v11854_v48 = vld [vmem:[#allocation87_spill] sm:$0xff]  ;;  %v11858_v21 = vld [vmem:[#allocation88_spill] sm:$0xff] }
 0x399   :  { %v5061_v41 = vadd.f32 %v5045_v43, %v5007_v2  ;;  %v4507_v40 = vmul.f32 %v11854_v48, %v9614_v46  ;;  %v9619_v38 = vld [vmem:[#allocation3 + $0x160] sm:$0xff]  ;;  %v5204_v62 = vmul.f32 %v11823_v8, %v11855_v1  ;;  %v5257_v50 = vmul.f32 %v11825_v9, %v11856_v25  ;;  %v11859_v19 = vld [vmem:[#allocation96_spill] sm:$0xff] }
 0x39a   :  { %v5479_v23 = vadd.f32 %v5463_v47, %v5426_v14  ;;  %v9621_v55 = vld [vmem:[#allocation3 + $0x161] sm:$0xff]  ;;  %v5363_v47 = vmul.f32 %v9129_v52, %v11858_v21  ;;  %v4470_v2 = vadd.f32 %v4454_v13, %v4417_v11  ;;  %v5417_v8 = vmul.f32 %v11780_v61, %v9441_v4 }
 0x39b   :  { %v11857_v0 = vld [vmem:[#allocation55_spill] sm:$0xff]  ;;  %v5114_v14 = vadd.f32 %v5098_v51, %v5061_v41  ;;  %v9641_v25 = vmul.f32 %v9158_v28, %v9424_v24  ;;  %v3564_v52 = vmul.f32 %v11756_v42, %v9619_v38  ;;  %v3617_v9 = vmul.f32 %v11757_v20, %v9621_v55 }
 0x39c   :  { %v5310_v31 = vmul.f32 %v11831_v7, %v11857_v0  ;;  %v9631_v43 = vld [vmem:[#allocation3 + $0x65] sm:$0xff]  ;;  %v5532_v5 = vadd.f32 %v5516_v37, %v5479_v23  ;;  %v4523_v51 = vadd.f32 %v4507_v40, %v4470_v2  ;;  %v9651_v23 = vld [vmem:[#allocation3 + $0x70] sm:$0xff]  ;;  %v4302_v20 = vmul.f32 %v9563_v63, %v9494_v29 }
 0x39d   :  { %v4560_v46 = vmul.f32 %v11859_v19, %v9631_v43  ;;  %v9635_v58 = vld [vmem:[#allocation3 + $0x162] sm:$0xff]  ;;  %v5167_v37 = vadd.f32 %v5151_v49, %v5114_v14  ;;  %v4667_v28 = vmul.f32 %v11790_v22, %v9651_v23  ;;  %v3580_v41 = vadd.f32 %v3564_v52, %v9505_v32  ;;  %v9666_v0 = vld [vmem:[#allocation3 + $0x71] sm:$0xff] }
 0x39e   :  { %v9643_v7 = vld [vmem:[#allocation3 + $0x66] sm:$0xff]  ;;  %v5585_v1 = vadd.f32 %v5569_v60, %v5532_v5  ;;  %v3670_v42 = vmul.f32 %v11758_v56, %v9635_v58  ;;  %v11861_v56 = vld [vmem:[#allocation41_spill] sm:$0xff] }
 0x39f   :  { %v4613_v13 = vmul.f32 %v11787_v26, %v9643_v7  ;;  %v9653_v61 = vld [vmem:[#allocation3 + $0x163] sm:$0xff]  ;;  %v5220_v40 = vadd.f32 %v5204_v62, %v5167_v37  ;;  %v4576_v49 = vadd.f32 %v4560_v46, %v4523_v51  ;;  %v4355_v26 = vmul.f32 %v9575_v10, %v9499_v6  ;;  %v11862_v46 = vld [vmem:[#allocation49_spill] sm:$0xff] }
 0x3a0   :  { %v5638_v60 = vadd.f32 %v5622_v45, %v5585_v1  ;;  %v9662_v11 = vld [vmem:[#allocation3 + $0x164] sm:$0xff]  ;;  %v3633_v21 = vadd.f32 %v3617_v9, %v3580_v41  ;;  %v3723_v22 = vmul.f32 %v11760_v33, %v9653_v61  ;;  %v4408_v14 = vmul.f32 %v9585_v12, %v11861_v56  ;;  %v4493_v6 = vld [vmem:[#allocation3 + $0x134] sm:$0xff] }
 0x3a1   :  { %v11860_v32 = vld [vmem:[#allocation32_spill] sm:$0xff]  ;;  %v5273_v45 = vadd.f32 %v5257_v50, %v5220_v40  ;;  %v4629_v62 = vadd.f32 %v4613_v13, %v4576_v49  ;;  %v4720_v2 = vmul.f32 %v11862_v46, %v9666_v0  ;;  %v9677_v1 = vld [vmem:[#allocation3 + $0x72] sm:$0xff]  ;;  %v3776_v33 = vmul.f32 %v11766_v54, %v9662_v11 }
 0x3a2   :  { %v4318_v5 = vadd.f32 %v4302_v20, %v11860_v32  ;;  %v5691_v29 = vadd.f32 %v5675_v30, %v5638_v60  ;;  %v9675_v52 = vld [vmem:[#allocation3 + $0x165] sm:$0xff]  ;;  %11863 = vst [vmem:[#allocation65_spill] sm:$0xff] %v9677_v1  ;;  %v3686_v9 = vadd.f32 %v3670_v42, %v3633_v21  ;;  %v11864_v51 = vld [vmem:[#allocation101_spill] sm:$0xff]  ;;  %v4514_v54 = vmul.f32 %v11854_v48, %v4493_v6 }
 0x3a3   :  { %v4461_v41 = vmul.f32 %v9601_v3, %v11864_v51  ;;  %v4278_v20 = vld [vmem:[#allocation3 + $0xa0] sm:$0xff]  ;;  %v5326_v50 = vadd.f32 %v5310_v31, %v5273_v45  ;;  %v4683_v13 = vadd.f32 %v4667_v28, %v4629_v62  ;;  %v11865_v60 = vld [vmem:[#allocation53_spill] sm:$0xff]  ;;  %v3829_v42 = vmul.f32 %v11771_v17, %v9675_v52  ;;  %v11867_v28 = vld [vmem:[#allocation52_spill] sm:$0xff] }
 0x3a4   :  { %v4371_v37 = vadd.f32 %v4355_v26, %v4318_v5  ;;  %v5744_v30 = vadd.f32 %v5728_v53, %v5691_v29  ;;  %v4773_v40 = vmul.f32 %v11865_v60, %v9677_v1  ;;  %v4546_v49 = vld [vmem:[#allocation3 + $0x135] sm:$0xff]  ;;  %v3739_v56 = vadd.f32 %v3723_v22, %v3686_v9  ;;  %v4331_v26 = vld [vmem:[#allocation3 + $0xa1] sm:$0xff] }
 0x3a5   :  { %v9685_v32 = vld [vmem:[#allocation3 + $0x73] sm:$0xff]  ;;  %v5379_v46 = vadd.f32 %v5363_v47, %v5326_v50  ;;  %v6602_v53 = vld [vmem:[#allocation18] sm:$0xff]   ;;  %v4736_v31 = vadd.f32 %v4720_v2, %v4683_v13  ;;  %v9694_v62 = vmul.f32 %v9563_v63, %v4278_v20  ;;  %v4567_v6 = vmul.f32 %v11859_v19, %v4546_v49  ;;  %v4653_v20 = vld [vmem:[#allocation3 + $0x140] sm:$0xff] }
 0x3a6   :  { %11866 = vst [vmem:[#allocation36_spill] sm:$0xff] %v9685_v32  ;;  %v4424_v21 = vadd.f32 %v4408_v14, %v4371_v37  ;;  %v5764_v5 = vsel %vm3037_vm4, %v5744_v30, 0.0  ;;  %v4826_v29 = vmul.f32 %v11867_v28, %v9685_v32  ;;  %v4599_v45 = vld [vmem:[#allocation3 + $0x136] sm:$0xff]  ;;  %v3792_v17 = vadd.f32 %v3776_v33, %v3739_v56  ;;  %v4384_v9 = vld [vmem:[#allocation3 + $0xa2] sm:$0xff]  ;;  %6413 = vmatprep.subr.bf16.mxu1 %v6602_v53  ;;  %v9710_v49 = vld [vmem:[#allocation19 + $0x1b] ss:$0 sm:$0xff] }
 0x3a7   :  { %11868 = vst [vmem:[#allocation66_spill] sm:$0xff] %v9694_v62  ;;  %5765 = vadd.xlane.f32.xlu0 %v5764_v5  ;;  %v9696_v22 = vld [vmem:[#allocation3 + $0x74] sm:$0xff]  ;;  %v4437_v37 = vld [vmem:[#allocation3 + $0xa3] sm:$0xff]  ;;  %v5433_v51 = vadd.f32 %v5417_v8, %v5379_v46  ;;  %v4789_v30 = vadd.f32 %v4773_v40, %v4736_v31  ;;  %v9704_v13 = vmul.f32 %v9575_v10, %v4331_v26  ;;  %11874 = vst [vmem:[#allocation54_spill] sm:$0xff] %v9710_v49 }
 0x3a8   :  { %11869 = vst [vmem:[#allocation29_spill] sm:$0xff] %v9696_v22  ;;  %v4477_v14 = vadd.f32 %v4461_v41, %v4424_v21  ;;  %v11870_v47 = vld [vmem:[#allocation57_spill] sm:$0xff]  ;;  %v4879_v50 = vmul.f32 %v11804_v16, %v9696_v22  ;;  %6414 = vmatpush3.bf16.msra.mxu1 %v6602_v53  ;;  %v9708_v41 = vadd.f32 %v3829_v42, %v3792_v17  ;;  %v4543_v56 = vld [vmem:[#allocation3 + $0xa5] sm:$0xff]  ;;  %v11875_v21 = vld [vmem:[#allocation78_spill] sm:$0xff] }
 0x3a9   :  { %v5523_v2 = vmul.f32 %v11788_v59, %v11870_v47  ;;  %11871 = vst [vmem:[#allocation89_spill] sm:$0xff] %v9704_v13  ;;  %v9706_v33 = vld [vmem:[#allocation3 + $0x75] sm:$0xff]  ;;  %v4620_v8 = vmul.f32 %v9710_v49, %v4599_v45  ;;  %v4490_v59 = vld [vmem:[#allocation3 + $0xa4] sm:$0xff]  ;;  %v5486_v40 = vadd.f32 %v9641_v25, %v5433_v51  ;;  %v5576_v16 = vmul.f32 %v9172_v57, %v11875_v21  ;;  %v9728_v25 = vld [vmem:[#allocation19 + $0x1c] ss:$0 sm:$0xff] }
 0x3aa   :  { %11872 = vst [vmem:[#allocation58_spill] sm:$0xff] %v9706_v33  ;;  %11873 = vst [vmem:[#allocation51_spill] sm:$0xff] %v9708_v41  ;;  %v4530_v60 = vadd.f32 %v4514_v54, %v4477_v14  ;;  %v4842_v5 = vadd.f32 %v4826_v29, %v4789_v30  ;;  %v9716_v26 = vld [vmem:[#allocation19 + $0x21] ss:$0 sm:$0xff]  ;;  %v4706_v42 = vld [vmem:[#allocation3 + $0x141] sm:$0xff]  ;;  %v9721_v54 = vmul.f32 %v9585_v12, %v4384_v9 }
 0x3ab   :  { %11876 = vst [vmem:[#allocation59_spill] sm:$0xff] %v9716_v26  ;;  %v4932_v46 = vmul.f32 %v9716_v26, %v9706_v33  ;;  %v9724_v53 = vmul.f32 %v9601_v3, %v4437_v37  ;;  %v9726_v31 = vld [vmem:[#allocation3 + $0x76] sm:$0xff]  ;;  %11880 = vst [vmem:[#allocation34_spill] sm:$0xff] %v9728_v25  ;;  %v4674_v57 = vmul.f32 %v9728_v25, %v4653_v20  ;;  %v4596_v29 = vld [vmem:[#allocation3 + $0xa6] sm:$0xff] }
 0x3ac   :  { %11877 = vst [vmem:[#allocation40_spill] sm:$0xff] %v9721_v54  ;;  %11879 = vst [vmem:[#allocation45_spill] sm:$0xff] %v9726_v31  ;;  %v4583_v28 = vadd.f32 %v4567_v6, %v4530_v60  ;;  %v5539_v45 = vadd.f32 %v5523_v2, %v5486_v40  ;;  %v5629_v17 = vmul.f32 %v11848_v39, %v9457_v44  ;;  %v9733_v51 = vld [vmem:[#allocation19 + $0x22] ss:$0 sm:$0xff]  ;;  %v4759_v37 = vld [vmem:[#allocation3 + $0x142] sm:$0xff] }
 0x3ad   :  { %11878 = vst [vmem:[#allocation97_spill] sm:$0xff] %v9724_v53  ;;  %v4895_v14 = vadd.f32 %v4879_v50, %v4842_v5  ;;  %11881 = vst [vmem:[#allocation30_spill] sm:$0xff] %v9733_v51  ;;  %v4985_v9 = vmul.f32 %v9733_v51, %v9726_v31  ;;  %v9738_v30 = vmul.f32 %v11854_v48, %v4490_v59  ;;  %v9743_v20 = vld [vmem:[#allocation19 + $0x1d] ss:$0 sm:$0xff]  ;;  %v9748_v5 = vld [vmem:[#allocation19 + $0x23] ss:$0 sm:$0xff] }
 0x3ae   :  { %v9741_v6 = vmul.f32 %v11859_v19, %v4543_v56  ;;  %v4636_v60 = vadd.f32 %v4620_v8, %v4583_v28  ;;  %11884 = vst [vmem:[#allocation31_spill] sm:$0xff] %v9743_v20  ;;  %v4727_v2 = vmul.f32 %v9743_v20, %v4706_v42  ;;  %v5592_v40 = vadd.f32 %v5576_v16, %v5539_v45  ;;  %v4812_v59 = vld [vmem:[#allocation3 + $0x143] sm:$0xff]  ;;  %v3214_v53 = vld [vmem:[#allocation3 + $0x51] sm:$0xff]  ;;  %v6804_v25 = vld [vmem:[#allocation19 + $0x27] ss:$0 sm:$0xff] }
 0x3af   :  { %11882 = vst [vmem:[#allocation62_spill] sm:$0xff] %v9738_v30  ;;  %v5682_v39 = vmul.f32 %v11850_v36, %v9469_v18  ;;  %v4948_v50 = vadd.f32 %v4932_v46, %v4895_v14  ;;  %11885 = vst [vmem:[#allocation67_spill] sm:$0xff] %v9748_v5  ;;  %v5039_v41 = vmul.f32 %v9748_v5, %v9407_v35  ;;  %v3161_v30 = vld [vmem:[#allocation3 + $0x50] sm:$0xff]  ;;  %v11888_v36 = vld [vmem:[#allocation95_spill] sm:$0xff] }
 0x3b0   :  { %11883 = vst [vmem:[#allocation63_spill] sm:$0xff] %v9741_v6  ;;  %v9753_v56 = vmul.f32 %v9710_v49, %v4596_v29  ;;  %v4690_v8 = vadd.f32 %v4674_v57, %v4636_v60  ;;  %v9755_v28 = vld [vmem:[#allocation19 + $0x1e] ss:$0 sm:$0xff]  ;;  %v5645_v45 = vadd.f32 %v5629_v17, %v5592_v40  ;;  %v5735_v46 = vmul.f32 %v11851_v34, %v11888_v36  ;;  %v9760_v6 = vld [vmem:[#allocation19 + $0x24] ss:$0 sm:$0xff]  ;;  %v4865_v54 = vld [vmem:[#allocation3 + $0x144] sm:$0xff] }
 0x3b1   :  { %11887 = vst [vmem:[#allocation60_spill] sm:$0xff] %v9755_v28  ;;  %v4780_v16 = vmul.f32 %v9755_v28, %v4759_v37  ;;  %v3267_v42 = vld [vmem:[#allocation3 + $0x52] sm:$0xff]  ;;  %v5001_v14 = vadd.f32 %v4985_v9, %v4948_v50  ;;  %11889 = vst [vmem:[#allocation71_spill] sm:$0xff] %v9760_v6  ;;  %v5092_v35 = vmul.f32 %v9760_v6, %v9411_v15  ;;  %v9773_v50 = vld [vmem:[#allocation19 + $0x25] ss:$0 sm:$0xff] }
 0x3b2   :  { %11886 = vst [vmem:[#allocation70_spill] sm:$0xff] %v9753_v56  ;;  %v3320_v13 = vld [vmem:[#allocation3 + $0x53] sm:$0xff]  ;;  %v4743_v29 = vadd.f32 %v4727_v2, %v4690_v8  ;;  %v5698_v9 = vadd.f32 %v5682_v39, %v5645_v45  ;;  %v5145_v15 = vmul.f32 %v9773_v50, %v9418_v27  ;;  %v4918_v2 = vld [vmem:[#allocation3 + $0x145] sm:$0xff]  ;;  %v9783_v28 = vld [vmem:[#allocation19 + $0x3] ss:$0 sm:$0xff]  ;;  %v5152_v22 = vmul.f32 %v9773_v50, %v11870_v47 }
 0x3b3   :  { %v9764_v56 = vld [vmem:[#allocation19 + $0x1f] ss:$0 sm:$0xff]  ;;  %v9767_v60 = vld [vmem:[#allocation19] ss:$0 sm:$0xff]  ;;  %v9770_v37 = vld [vmem:[#allocation19 + $0x1] ss:$0 sm:$0xff]  ;;  %v5055_v40 = vadd.f32 %v5039_v41, %v5001_v14  ;;  %v3341_v41 = vmul.f32 %v9783_v28, %v3320_v13 }
 0x3b4   :  { %11890 = vst [vmem:[#allocation44_spill] sm:$0xff] %v9764_v56  ;;  %v4833_v57 = vmul.f32 %v9764_v56, %v4812_v59  ;;  %11891 = vst [vmem:[#allocation72_spill] sm:$0xff] %v9767_v60  ;;  %v3182_v17 = vmul.f32 %v9767_v60, %v3161_v30  ;;  %v3235_v34 = vmul.f32 %v9770_v37, %v3214_v53  ;;  %v9777_v8 = vld [vmem:[#allocation19 + $0x2] ss:$0 sm:$0xff]  ;;  %v9780_v56 = vld [vmem:[#allocation19 + $0x20] ss:$0 sm:$0xff] }
 0x3b5   :  { %11892 = vst [vmem:[#allocation47_spill] sm:$0xff] %v9770_v37  ;;  %11893 = vst [vmem:[#allocation74_spill] sm:$0xff] %v9777_v8  ;;  %v3288_v59 = vmul.f32 %v9777_v8, %v3267_v42  ;;  %v4796_v62 = vadd.f32 %v4780_v16, %v4743_v29  ;;  %v4886_v30 = vmul.f32 %v9780_v56, %v4865_v54  ;;  %v9786_v53 = vld [vmem:[#allocation19 + $0xd] ss:$0 sm:$0xff]  ;;  %v11896_v39 = vld [vmem:[#allocation85_spill] sm:$0xff] }
 0x3b6   :  { %11894 = vst [vmem:[#allocation73_spill] sm:$0xff] %v9780_v56  ;;  %v3251_v60 = vadd.f32 %v3235_v34, %v3182_v17  ;;  %11895 = vst [vmem:[#allocation77_spill] sm:$0xff] %v9783_v28  ;;  %v9790_v27 = vmul.f32 %v9786_v53, %v11896_v39  ;;  %v5751_v45 = vadd.f32 %v5735_v46, %v5698_v9  ;;  %v6802_v37 = vld [vmem:[#allocation19 + $0x26] ss:$0 sm:$0xff]  ;;  %v11897_v42 = vld [vmem:[#allocation56_spill] sm:$0xff] }
 0x3b7   :  { %v5108_v14 = vadd.f32 %v5092_v35, %v5055_v40  ;;  %v5198_v16 = vmul.f32 %v6802_v37, %v11897_v42  ;;  %v4971_v29 = vld [vmem:[#allocation3 + $0x146] sm:$0xff]  ;;  %v4849_v8 = vadd.f32 %v4833_v57, %v4796_v62  ;;  %v4939_v54 = vmul.f32 %v9716_v26, %v4918_v2  ;;  %v6803_v34 = vld [vmem:[#allocation19 + $0x4] ss:$0 sm:$0xff]  ;;  %v6805_v48 = vld [vmem:[#allocation19 + $0x28] ss:$0 sm:$0xff] }
 0x3b8   :  { %v3304_v17 = vadd.f32 %v3288_v59, %v3251_v60  ;;  %v11898_v56 = vld [vmem:[#allocation42_spill] sm:$0xff]  ;;  %v5785_v13 = vsel %vm3037_vm4, %v5751_v45, 0.0  ;;  %v11899_v49 = vld [vmem:[#allocation79_spill] sm:$0xff]  ;;  %v9798_v9 = vld [vmem:[#allocation3 + $0x90] sm:$0xff]  ;;  %v4992_v57 = vmul.f32 %v9733_v51, %v4971_v29 }
 0x3b9   :  { %v3394_v20 = vmul.f32 %v6803_v34, %v11898_v56  ;;  %v5161_v28 = vadd.f32 %v5145_v15, %v5108_v14  ;;  %v5251_v19 = vmul.f32 %v6804_v25, %v11899_v49  ;;  %v11900_v46 = vld [vmem:[#allocation83_spill] sm:$0xff]  ;;  %5786 = vadd.xlane.f32.xlu1 %v5785_v13  ;;  %v9800_v40 = vld [vmem:[#allocation3 + $0x91] sm:$0xff]  ;;  %v4902_v62 = vadd.f32 %v4886_v30, %v4849_v8  ;;  %v6806_v2 = vld [vmem:[#allocation19 + $0x5] ss:$0 sm:$0xff] }
 0x3ba   :  { %v5304_v35 = vmul.f32 %v6805_v48, %v11900_v46  ;;  %v3357_v60 = vadd.f32 %v3341_v41, %v3304_v17  ;;  %v11901_v56 = vld [vmem:[#allocation90_spill] sm:$0xff]  ;;  %v6807_v15 = vld [vmem:[#allocation19 + $0x29] ss:$0 sm:$0xff]  ;;  %v6808_v49 = vld [vmem:[#allocation19 + $0x2a] ss:$0 sm:$0xff]  ;;  %v5046_v41 = vmul.f32 %v9748_v5, %v9441_v4 }
 0x3bb   :  { %v3447_v59 = vmul.f32 %v6806_v2, %v11901_v56  ;;  %v5214_v45 = vadd.f32 %v5198_v16, %v5161_v28  ;;  %v5357_v14 = vmul.f32 %v6807_v15, %v11896_v39  ;;  %v5411_v42 = vmul.f32 %v6808_v49, %v9798_v9  ;;  %v6809_v34 = vld [vmem:[#allocation19 + $0x2b] ss:$0 sm:$0xff]  ;;  %v9807_v46 = vld [vmem:[#allocation3 + $0x92] sm:$0xff]  ;;  %v6810_v16 = vld [vmem:[#allocation19 + $0x6] ss:$0 sm:$0xff] }
 0x3bc   :  { %v5464_v13 = vmul.f32 %v6809_v34, %v9800_v40  ;;  %v9809_v26 = vld [vmem:[#allocation3 + $0x93] sm:$0xff]  ;;  %v4955_v30 = vadd.f32 %v4939_v54, %v4902_v62  ;;  %v3410_v28 = vadd.f32 %v3394_v20, %v3357_v60  ;;  %v6811_v2 = vld [vmem:[#allocation19 + $0x2c] ss:$0 sm:$0xff]  ;;  %v6812_v51 = vld [vmem:[#allocation19 + $0x2d] ss:$0 sm:$0xff]  ;;  %v5099_v20 = vmul.f32 %v9760_v6, %v9424_v24 }
 0x3bd   :  { %v9811_v8 = vld [vmem:[#allocation3 + $0x94] sm:$0xff]  ;;  %v5267_v17 = vadd.f32 %v5251_v19, %v5214_v45  ;;  %v5517_v56 = vmul.f32 %v6811_v2, %v9807_v46  ;;  %v5570_v3 = vmul.f32 %v6812_v51, %v9809_v26  ;;  %v6813_v12 = vld [vmem:[#allocation19 + $0x2e] ss:$0 sm:$0xff]  ;;  %v6814_v19 = vld [vmem:[#allocation19 + $0x7] ss:$0 sm:$0xff] }
 0x3be   :  { %v11902_v29 = vld [vmem:[#allocation102_spill] sm:$0xff]  ;;  %v9819_v10 = vmul.f32 %v6813_v12, %v9811_v8  ;;  %v5008_v4 = vadd.f32 %v4992_v57, %v4955_v30  ;;  %v3463_v62 = vadd.f32 %v3447_v59, %v3410_v28  ;;  %v11904_v60 = vld [vmem:[#allocation93_spill] sm:$0xff]  ;;  %v6816_v31 = vld [vmem:[#allocation19 + $0x30] ss:$0 sm:$0xff]  ;;  %v5205_v30 = vmul.f32 %v6802_v37, %v11875_v21 }
 0x3bf   :  { %v3500_v39 = vmul.f32 %v6810_v16, %v11902_v29  ;;  %v9821_v63 = vld [vmem:[#allocation3 + $0x95] sm:$0xff]  ;;  %v3554_v45 = vmul.f32 %v6814_v19, %v11904_v60  ;;  %v5320_v16 = vadd.f32 %v5304_v35, %v5267_v17  ;;  %v6815_v29 = vld [vmem:[#allocation19 + $0x2f] ss:$0 sm:$0xff]  ;;  %v6817_v59 = vld [vmem:[#allocation19 + $0x8] ss:$0 sm:$0xff]  ;;  %v5258_v35 = vmul.f32 %v6804_v25, %v9457_v44 }
 0x3c0   :  { %v9823_v54 = vld [vmem:[#allocation3 + $0x96] sm:$0xff]  ;;  %v9829_v5 = vmul.f32 %v6815_v29, %v9821_v63  ;;  %v5062_v57 = vadd.f32 %v5046_v41, %v5008_v4  ;;  %v11907_v28 = vld [vmem:[#allocation43_spill] sm:$0xff]  ;;  %v5311_v17 = vmul.f32 %v6805_v48, %v9469_v18 }
 0x3c1   :  { %11903 = vst [vmem:[#allocation75_spill] sm:$0xff] %v9823_v54  ;;  %v9832_v33 = vmul.f32 %v6816_v31, %v9823_v54  ;;  %v3516_v24 = vadd.f32 %v3500_v39, %v3463_v62  ;;  %v3607_v6 = vmul.f32 %v6817_v59, %v11907_v28  ;;  %v5373_v19 = vadd.f32 %v5357_v14, %v5320_v16  ;;  %v6818_v60 = vld [vmem:[#allocation19 + $0x9] ss:$0 sm:$0xff]  ;;  %v11909_v54 = vld [vmem:[#allocation100_spill] sm:$0xff]  ;;  %v6819_v41 = vld [vmem:[#allocation19 + $0xe] ss:$0 sm:$0xff] }
 0x3c2   :  { %11905 = vst [vmem:[#allocation82_spill] sm:$0xff] %v9829_v5  ;;  %v11908_v32 = vld [vmem:[#allocation39_spill] sm:$0xff]  ;;  %v5115_v5 = vadd.f32 %v5099_v20, %v5062_v57  ;;  %v3890_v47 = vadd.f32 %v9790_v27, %v11909_v54  ;;  %v3928_v21 = vmul.f32 %v6819_v41, %v9798_v9  ;;  %v5364_v39 = vmul.f32 %v6807_v15, %v11888_v36  ;;  %v11910_v14 = vld [vmem:[#allocation46_spill] sm:$0xff]  ;;  %v6822_v20 = vld [vmem:[#allocation19 + $0x10] ss:$0 sm:$0xff] }
 0x3c3   :  { %11906 = vst [vmem:[#allocation76_spill] sm:$0xff] %v9832_v33  ;;  %v3660_v1 = vmul.f32 %v6818_v60, %v11908_v32  ;;  %v3570_v33 = vadd.f32 %v3554_v45, %v3516_v24  ;;  %v5427_v37 = vadd.f32 %v5411_v42, %v5373_v19  ;;  %v6820_v4 = vld [vmem:[#allocation19 + $0xa] ss:$0 sm:$0xff]  ;;  %v6821_v44 = vld [vmem:[#allocation19 + $0xf] ss:$0 sm:$0xff]  ;;  %v4034_v45 = vmul.f32 %v6822_v20, %v9807_v46 }
 0x3c4   :  { %v3713_v62 = vmul.f32 %v6820_v4, %v11910_v14  ;;  %v3981_v18 = vmul.f32 %v6821_v44, %v9800_v40  ;;  %v5168_v48 = vadd.f32 %v5152_v22, %v5115_v5  ;;  %v3944_v32 = vadd.f32 %v3928_v21, %v3890_v47  ;;  %v6823_v36 = vld [vmem:[#allocation19 + $0xb] ss:$0 sm:$0xff]  ;;  %v6824_v28 = vld [vmem:[#allocation19 + $0x11] ss:$0 sm:$0xff] }
 0x3c5   :  { %v3623_v25 = vadd.f32 %v3607_v6, %v3570_v33  ;;  %v5480_v16 = vadd.f32 %v5464_v13, %v5427_v37  ;;  %v9849_v27 = vmul.f32 %v6808_v49, %v9619_v38  ;;  %v9852_v42 = vmul.f32 %v6809_v34, %v9621_v55  ;;  %v11911_v15 = vld [vmem:[#allocation35_spill] sm:$0xff] }
 0x3c6   :  { %v3766_v54 = vmul.f32 %v6823_v36, %v11911_v15  ;;  %v5221_v57 = vadd.f32 %v5205_v30, %v5168_v48  ;;  %v3997_v59 = vadd.f32 %v3981_v18, %v3944_v32  ;;  %v4087_v22 = vmul.f32 %v6824_v28, %v9809_v26  ;;  %v6825_v38 = vld [vmem:[#allocation19 + $0xc] ss:$0 sm:$0xff]  ;;  %v3861_v49 = vld [vmem:[#allocation3 + $0x166] sm:$0xff]  ;;  %v11925_v36 = vld [vmem:[#allocation45_spill] sm:$0xff] }
 0x3c7   :  { %v3676_v24 = vadd.f32 %v3660_v1, %v3623_v25  ;;  %v5533_v33 = vadd.f32 %v5517_v56, %v5480_v16  ;;  %v9857_v6 = vmul.f32 %v6811_v2, %v9635_v58  ;;  %v9860_v5 = vmul.f32 %v6812_v51, %v9653_v61  ;;  %v11912_v1 = vld [vmem:[#allocation98_spill] sm:$0xff]  ;;  %v11913_v56 = vld [vmem:[#allocation69_spill] sm:$0xff]  ;;  %v4329_v4 = vld [vmem:[#allocation3 + $0x81] sm:$0xff] }
 0x3c8   :  { %v3819_v55 = vmul.f32 %v6825_v38, %v9631_v43  ;;  %v5274_v34 = vadd.f32 %v5258_v35, %v5221_v57  ;;  %v4050_v19 = vadd.f32 %v4034_v45, %v3997_v59  ;;  %v4140_v30 = vmul.f32 %v11912_v1, %v9811_v8  ;;  %v4382_v14 = vld [vmem:[#allocation3 + $0x82] sm:$0xff]  ;;  %v11917_v25 = vld [vmem:[#allocation65_spill] sm:$0xff]  ;;  %v11923_v45 = vld [vmem:[#allocation58_spill] sm:$0xff] }
 0x3c9   :  { %v3729_v13 = vadd.f32 %v3713_v62, %v3676_v24  ;;  %v5586_v60 = vadd.f32 %v5570_v3, %v5533_v33  ;;  %v9866_v47 = vmul.f32 %v6813_v12, %v9662_v11  ;;  %v9869_v58 = vmul.f32 %v6815_v29, %v9675_v52  ;;  %v4276_v29 = vld [vmem:[#allocation3 + $0x80] sm:$0xff]  ;;  %v11916_v18 = vld [vmem:[#allocation82_spill] sm:$0xff]  ;;  %v11930_v33 = vld [vmem:[#allocation64_spill] sm:$0xff] }
 0x3ca   :  { %v3872_v61 = vmul.f32 %v9786_v53, %v9643_v7  ;;  %v5327_v51 = vadd.f32 %v5311_v17, %v5274_v34  ;;  %v4103_v43 = vadd.f32 %v4087_v22, %v4050_v19  ;;  %v4193_v35 = vmul.f32 %v11913_v56, %v9821_v63  ;;  %v11914_v53 = vld [vmem:[#allocation75_spill] sm:$0xff]  ;;  %v11915_v17 = vld [vmem:[#allocation38_spill] sm:$0xff]  ;;  %v11927_v24 = vld [vmem:[#allocation76_spill] sm:$0xff] }
 0x3cb   :  { %v3782_v2 = vadd.f32 %v3766_v54, %v3729_v13  ;;  %v5639_v21 = vadd.f32 %v9819_v10, %v5586_v60  ;;  %v9876_v37 = vmul.f32 %v6816_v31, %v3861_v49  ;;  %v3926_v3 = vmul.f32 %v6819_v41, %v9651_v23  ;;  %v11919_v10 = vld [vmem:[#allocation36_spill] sm:$0xff]  ;;  %v11921_v23 = vld [vmem:[#allocation29_spill] sm:$0xff] }
 0x3cc   :  { %v3979_v12 = vmul.f32 %v6821_v44, %v9666_v0  ;;  %v5380_v11 = vadd.f32 %v5364_v39, %v5327_v51  ;;  %v4156_v7 = vadd.f32 %v4140_v30, %v4103_v43  ;;  %v4246_v62 = vmul.f32 %v11915_v17, %v11914_v53  ;;  %v4435_v41 = vld [vmem:[#allocation3 + $0x83] sm:$0xff] }
 0x3cd   :  { %v3835_v52 = vadd.f32 %v3819_v55, %v3782_v2  ;;  %v5692_v48 = vadd.f32 %v11916_v18, %v5639_v21  ;;  %v9884_v32 = vmul.f32 %v6822_v20, %v11917_v25  ;;  %v9887_v31 = vmul.f32 %v6824_v28, %v11919_v10  ;;  %v4488_v39 = vld [vmem:[#allocation3 + $0x84] sm:$0xff]  ;;  %v11932_v55 = vld [vmem:[#allocation50_spill] sm:$0xff]  ;;  %v5392_v18 = vld [vmem:[#allocation3 + $0xb0] sm:$0xff] }
 0x3ce   :  { %v9891_v0 = vmul.f32 %v11912_v1, %v11921_v23  ;;  %v9895_v16 = vmul.f32 %v11913_v56, %v11923_v45  ;;  %v9899_v15 = vmul.f32 %v11915_v17, %v11925_v36  ;;  %v4541_v20 = vld [vmem:[#allocation3 + $0x85] sm:$0xff]  ;;  %v4209_v57 = vadd.f32 %v4193_v35, %v4156_v7  ;;  %v11940_v56 = vld [vmem:[#allocation54_spill] sm:$0xff] }
 0x3cf   :  { %11918 = vst [vmem:[#allocation104_spill] sm:$0xff] %v9884_v32  ;;  %11920 = vst [vmem:[#allocation37_spill] sm:$0xff] %v9887_v31  ;;  %v3888_v44 = vadd.f32 %v3872_v61, %v3835_v52  ;;  %v4594_v54 = vld [vmem:[#allocation3 + $0x86] sm:$0xff]  ;;  %v5745_v59 = vadd.f32 %v11927_v24, %v5692_v48  ;;  %v9906_v38 = vmul.f32 %v11930_v33, %v4329_v4  ;;  %v9919_v61 = vpop.f32.mrb[16].mxu1  ;;  %v11942_v21 = vld [vmem:[#allocation34_spill] sm:$0xff] }
 0x3d0   :  { %11922 = vst [vmem:[#allocation86_spill] sm:$0xff] %v9891_v0  ;;  %11924 = vst [vmem:[#allocation105_spill] sm:$0xff] %v9895_v16  ;;  %v11928_v28 = vld [vmem:[#allocation103_spill] sm:$0xff]  ;;  %v9909_v49 = vmul.f32 %v11932_v55, %v4382_v14  ;;  %v11934_v13 = vld [vmem:[#allocation48_spill] sm:$0xff]  ;;  %v9917_v60 = vadd.f32 %v4246_v62, %v4209_v57  ;;  %v9926_v35 = vmul.f32 %v11940_v56, %v4594_v54  ;;  %v9933_v52 = vmul.f32 0.70710677, %v9919_v61 }
 0x3d1   :  { %11926 = vst [vmem:[#allocation91_spill] sm:$0xff] %v9899_v15  ;;  %v9903_v22 = vmul.f32 %v11928_v28, %v4276_v29  ;;  %11931 = vst [vmem:[#allocation94_spill] sm:$0xff] %v9906_v38  ;;  %v3942_v34 = vadd.f32 %v3926_v3, %v3888_v44  ;;  %v9912_v19 = vmul.f32 %v11934_v13, %v4435_v41  ;;  %v11936_v1 = vld [vmem:[#allocation87_spill] sm:$0xff]  ;;  %v5767_v51 = vsel %vm3037_vm4, %v5745_v59, 0.0  ;;  %v11938_v2 = vld [vmem:[#allocation96_spill] sm:$0xff]  ;;  %v9935_v29 = vpop.f32.mrb[17].mxu1 }
 0x3d2   :  { %11933 = vst [vmem:[#allocation68_spill] sm:$0xff] %v9909_v49  ;;  %v9915_v30 = vmul.f32 %v11936_v1, %v4488_v39  ;;  %v9923_v43 = vmul.f32 %v11938_v2, %v4541_v20  ;;  %11941 = vst [vmem:[#allocation88_spill] sm:$0xff] %v9926_v35  ;;  %v9930_v3 = vmul.f32 %v11942_v21, %v9798_v9  ;;  %5768 = vadd.xlane.f32.xlu1 %v5767_v51  ;;  %v11945_v14 = vld [vmem:[#allocation31_spill] sm:$0xff]  ;;  %v11947_v17 = vld [vmem:[#allocation60_spill] sm:$0xff]  ;;  %v9950_v10 = vpop.f32.mrb[18].mxu1 }
 0x3d3   :  { %11929 = vst [vmem:[#allocation92_spill] sm:$0xff] %v9903_v22  ;;  %11935 = vst [vmem:[#allocation80_spill] sm:$0xff] %v9912_v19  ;;  %v9937_v4 = vadd.f32 %v3979_v12, %v3942_v34  ;;  %v9941_v7 = vmul.f32 %v11945_v14, %v9800_v40  ;;  %v9945_v62 = vmul.f32 %v11947_v17, %v9807_v46  ;;  %v5445_v48 = vld [vmem:[#allocation3 + $0xb1] sm:$0xff]  ;;  %v9948_v25 = vmul.f32 0.70710677, %v9935_v29  ;;  %v11949_v23 = vld [vmem:[#allocation44_spill] sm:$0xff] }
 0x3d4   :  { %11937 = vst [vmem:[#allocation81_spill] sm:$0xff] %v9915_v30  ;;  %11939 = vst [vmem:[#allocation55_spill] sm:$0xff] %v9923_v43  ;;  %v5498_v9 = vld [vmem:[#allocation3 + $0xb2] sm:$0xff]  ;;  %v9954_v12 = vmul.f32 %v11949_v23, %v9809_v26  ;;  %v11953_v39 = vld [vmem:[#allocation59_spill] sm:$0xff]  ;;  %v2412_v20 = vand.u32 2147483647, %v9933_v52  ;;  %v5434_v57 = vadd.f32 %v9849_v27, %v5380_v11  ;;  %v9977_v55 = vmul.f32 %v11942_v21, %v5392_v18 }
 0x3d5   :  { %11943 = vst [vmem:[#allocation32_spill] sm:$0xff] %v9930_v3  ;;  %11944 = vst [vmem:[#allocation41_spill] sm:$0xff] %v9937_v4  ;;  %v11951_v41 = vld [vmem:[#allocation73_spill] sm:$0xff]  ;;  %v9962_v46 = vmul.f32 %v11953_v39, %v9821_v63  ;;  %v5020_v44 = vld [vmem:[#allocation3 + $0xa0] sm:$0xff]  ;;  %v9966_v54 = vmul.f32 0.70710677, %v9950_v10  ;;  %v9980_v34 = vmul.f32 %v11945_v14, %v5445_v48  ;;  %v9983_v13 = vmul.f32 %v11947_v17, %v5498_v9 }
 0x3d6   :  { %11946 = vst [vmem:[#allocation49_spill] sm:$0xff] %v9941_v7  ;;  %11948 = vst [vmem:[#allocation101_spill] sm:$0xff] %v9945_v62  ;;  %v9958_v40 = vmul.f32 %v11951_v41, %v9811_v8  ;;  %v5551_v45 = vld [vmem:[#allocation3 + $0xb3] sm:$0xff]  ;;  %v3160_v8 = vld [vmem:[#allocation3 + $0x40] sm:$0xff]  ;;  %v2410_v28 = vand.u32 2147483647, %v9948_v25 }
 0x3d7   :  { %11950 = vst [vmem:[#allocation53_spill] sm:$0xff] %v9954_v12  ;;  %11954 = vst [vmem:[#allocation57_spill] sm:$0xff] %v9962_v46  ;;  %v5604_v36 = vld [vmem:[#allocation3 + $0xb4] sm:$0xff]  ;;  %v3213_v59 = vld [vmem:[#allocation3 + $0x41] sm:$0xff]  ;;  %v9974_v63 = vpop.f32.mrb[19].mxu1  ;;  %v9989_v2 = vmul.f32 %v11949_v23, %v5551_v45  ;;  %vm2380_vm9 = vcmp.ge.f32.partialorder %v9933_v52, 0.0 }
 0x3d8   :  { %11952 = vst [vmem:[#allocation52_spill] sm:$0xff] %v9958_v40  ;;  %v11955_v26 = vld [vmem:[#allocation30_spill] sm:$0xff]  ;;  %11957 = vst [vmem:[#allocation95_spill] sm:$0xff] %v9977_v55  ;;  %v2428_v27 = vmul.f32 0.3275911, %v2412_v20  ;;  %v11960_v11 = vld [vmem:[#allocation67_spill] sm:$0xff]  ;;  %v9992_v56 = vmul.f32 %v11951_v41, %v5604_v36 }
 0x3d9   :  { %v9971_v24 = vmul.f32 %v11955_v26, %v11914_v53  ;;  %v5657_v33 = vld [vmem:[#allocation3 + $0xb5] sm:$0xff]  ;;  %11958 = vst [vmem:[#allocation85_spill] sm:$0xff] %v9980_v34  ;;  %11959 = vst [vmem:[#allocation56_spill] sm:$0xff] %v9983_v13  ;;  %v9986_v53 = vmul.f32 %v11960_v11, %v5020_v44  ;;  %v5073_v1 = vld [vmem:[#allocation3 + $0xa1] sm:$0xff]  ;;  %v2426_v21 = vmul.f32 0.3275911, %v2410_v28  ;;  %v5487_v11 = vadd.f32 %v9852_v42, %v5434_v57 }
 0x3da   :  { %v5710_v51 = vld [vmem:[#allocation3 + $0xb6] sm:$0xff]  ;;  %11962 = vst [vmem:[#allocation79_spill] sm:$0xff] %v9989_v2  ;;  %11963 = vst [vmem:[#allocation83_spill] sm:$0xff] %v9992_v56  ;;  %v2413_v18 = vand.u32 2147483647, %v9966_v54  ;;  %v5126_v14 = vld [vmem:[#allocation3 + $0xa2] sm:$0xff]  ;;  %v10002_v23 = vmul.f32 %v11953_v39, %v5657_v33 }
 0x3db   :  { %11956 = vst [vmem:[#allocation78_spill] sm:$0xff] %v9971_v24  ;;  %11961 = vst [vmem:[#allocation42_spill] sm:$0xff] %v9986_v53  ;;  %v11964_v48 = vld [vmem:[#allocation72_spill] sm:$0xff]  ;;  %v11965_v17 = vld [vmem:[#allocation47_spill] sm:$0xff]  ;;  %v2444_v46 = vadd.f32 1.0, %v2428_v27  ;;  %v2442_v45 = vadd.f32 1.0, %v2426_v21  ;;  %v10016_v42 = vmul.f32 %v9773_v50, %v5126_v14 }
 0x3dc   :  { %v3181_v24 = vmul.f32 %v11964_v48, %v3160_v8  ;;  %v3234_v9 = vmul.f32 %v11965_v17, %v3213_v59  ;;  %v9998_v44 = vmul.f32 0.70710677, %v9974_v63  ;;  %11966 = vst [vmem:[#allocation90_spill] sm:$0xff] %v10002_v23  ;;  %v2429_v41 = vmul.f32 0.3275911, %v2413_v18  ;;  %v10004_v36 = vpop.f32.mrb[20].mxu1 }
 0x3dd   :  { %v11967_v53 = vld [vmem:[#allocation71_spill] sm:$0xff]  ;;  %v10010_v8 = vmul.f32 %v11955_v26, %v5710_v51  ;;  %6636 = vrcp.f32 %v2444_v46  ;;  %v2620_v59 = vsub.f32 0.0, %v2412_v20  ;;  %v10013_v48 = vpop.f32.mrb[21].mxu1  ;;  %11970 = vst [vmem:[#allocation43_spill] sm:$0xff] %v10016_v42  ;;  %v2618_v39 = vsub.f32 0.0, %v2410_v28 }
 0x3de   :  { %v10007_v56 = vmul.f32 %v11967_v53, %v5073_v1  ;;  %v2411_v27 = vand.u32 2147483647, %v9998_v44  ;;  %6638 = vrcp.f32 %v2442_v45  ;;  %v2445_v57 = vadd.f32 1.0, %v2429_v41  ;;  %v10018_v33 = vpop.f32.mrb[22].mxu1 }
 0x3df   :  { %11969 = vst [vmem:[#allocation93_spill] sm:$0xff] %v10010_v8  ;;  %v10020_v21 = vadd.f32 %v3234_v9, %v3181_v24  ;;  %v10023_v53 = vmul.f32 0.5, %v9919_v61  ;;  %v2621_v26 = vsub.f32 0.0, %v2413_v18  ;;  %v10025_v1 = vpop.f32.mrb[23].mxu1  ;;  %v5540_v51 = vadd.f32 %v9857_v6, %v5487_v11 }
 0x3e0   :  { %11968 = vst [vmem:[#allocation102_spill] sm:$0xff] %v10007_v56  ;;  %v2427_v46 = vmul.f32 0.3275911, %v2411_v27  ;;  %v10030_v50 = vmul.f32 0.5, %v9935_v29  ;;  %vm2378_vm10 = vcmp.ge.f32.partialorder %v9948_v25, 0.0  ;;  %v2636_v24 = vmul.f32 %v2620_v59, %v2412_v20  ;;  %v3266_v29 = vld [vmem:[#allocation3 + $0x42] sm:$0xff] }
 0x3e1   :  { %v10034_v14 = vmul.f32 0.70710677, %v10004_v36  ;;  %vm2381_vm11 = vcmp.ge.f32.partialorder %v9966_v54, 0.0  ;;  %6640 = vrcp.f32 %v2445_v57  ;;  %v2634_v17 = vmul.f32 %v2618_v39, %v2410_v28  ;;  %v10059_v42 = vpop.f32.mrb[24].mxu1 }
 0x3e2   :  { %v2443_v61 = vadd.f32 1.0, %v2427_v46  ;;  %v10038_v9 = vmul.f32 0.5, %v9950_v10  ;;  %v10042_v52 = vmul.f32 0.70710677, %v10013_v48  ;;  %v11448_v11 = vmov -1.0   ;;  %v10064_v56 = vpop.f32.mrb[25].mxu1 }
 0x3e3   :  { %v2416_v6 = vand.u32 2147483647, %v10034_v14  ;;  %v10045_v45 = vsel %vm2380_vm9, 1.0, %v11448_v11  ;;  %v2637_v41 = vmul.f32 %v2621_v26, %v2413_v18  ;;  %v2619_v20 = vsub.f32 0.0, %v2411_v27  ;;  %v11971_v18 = vld [vmem:[#allocation74_spill] sm:$0xff] }
 0x3e4   :  { %6642 = vrcp.f32 %v2443_v61  ;;  %v10050_v54 = vsel %vm2378_vm10, 1.0, %v11448_v11  ;;  %v10053_v10 = vsel %vm2381_vm11, 1.0, %v11448_v11  ;;  %v2414_v59 = vand.u32 2147483647, %v10042_v52 }
 0x3e5   :  { %v2432_v28 = vmul.f32 0.3275911, %v2416_v6  ;;  %v2654_v39 = vmul.f32 1.442695, %v2636_v24  ;;  %v2624_v57 = vsub.f32 0.0, %v2416_v6  ;;  %v10062_v26 = vmul.f32 %v11971_v18, %v3266_v29  ;;  %v10078_v18 = vpop.f32.mrb[26].mxu1 }
 0x3e6   :  { %v10057_v46 = vmul.f32 0.70710677, %v10018_v33  ;;  %v2650_v61 = vmul.f32 1.442695, %v2634_v17  ;;  %v2430_v8 = vmul.f32 0.3275911, %v2414_v59  ;;  %v10067_v11 = vadd.f32 %v9860_v5, %v5540_v51 }
 0x3e7   :  { %v2448_v25 = vadd.f32 1.0, %v2432_v28  ;;  %v10069_v23 = vpop.eup %6636  ;;  %v2656_v24 = vmul.f32 1.442695, %v2637_v41  ;;  %v2635_v2 = vmul.f32 %v2619_v20, %v2411_v27  ;;  %v2622_v13 = vsub.f32 0.0, %v2414_v59  ;;  %v10081_v27 = vpop.f32.mrb[27].mxu1 }
 0x3e8   :  { %v2417_v40 = vand.u32 2147483647, %v10057_v46  ;;  %v10072_v34 = vpop.eup %6638  ;;  %v2476_v29 = vmul.f32 1.0614054, %v10069_v23  ;;  %v2446_v17 = vadd.f32 1.0, %v2430_v8  ;;  %v2640_v51 = vmul.f32 %v2624_v57, %v2416_v6  ;;  %v10091_v7 = vpop.f32.mrb[28].mxu1 }
 0x3e9   :  { %6644 = vrcp.f32 %v2448_v25  ;;  %v10076_v28 = vmul.f32 0.70710677, %v10025_v1  ;;  %v2474_v5 = vmul.f32 1.0614054, %v10072_v34  ;;  %v10084_v12 = vmul.f32 0.5, %v9974_v63 }
 0x3ea   :  { %6646 = vpow2.f32 %v2654_v39  ;;  %v2433_v41 = vmul.f32 0.3275911, %v2417_v40  ;;  %v2492_v20 = vadd.f32 -1.4531521, %v2476_v29  ;;  %vm2379_vm12 = vcmp.ge.f32.partialorder %v9998_v44, 0.0 }
 0x3eb   :  { %6648 = vpow2.f32 %v2650_v61  ;;  %v10087_v8 = vpop.eup %6640  ;;  %v2490_v25 = vadd.f32 -1.4531521, %v2474_v5  ;;  %v2652_v55 = vmul.f32 1.442695, %v2635_v2  ;;  %v2638_v57 = vmul.f32 %v2622_v13, %v2414_v59  ;;  %v10097_v5 = vpop.f32.mrb[29].mxu1 }
 0x3ec   :  { %6650 = vrcp.f32 %v2446_v17  ;;  %v2449_v62 = vadd.f32 1.0, %v2433_v41  ;;  %v2508_v39 = vmul.f32 %v10069_v23, %v2492_v20  ;;  %v2477_v6 = vmul.f32 1.0614054, %v10087_v8  ;;  %11972 = vst [vmem:[#allocation39_spill] sm:$0xff] %v10097_v5  ;;  %v10107_v19 = vpop.f32.mrb[30].mxu1 }
 0x3ed   :  { %6652 = vpow2.f32 %v2656_v24  ;;  %v2506_v63 = vmul.f32 %v10072_v34, %v2490_v25  ;;  %v2662_v29 = vmul.f32 1.442695, %v2640_v51  ;;  %v2625_v3 = vsub.f32 0.0, %v2417_v40  ;;  %11974 = vst [vmem:[#allocation100_spill] sm:$0xff] %v10107_v19  ;;  %v10113_v44 = vpop.f32.mrb[31].mxu1 }
 0x3ee   :  { %v10093_v61 = vpop.eup %6642  ;;  %v2415_v35 = vand.u32 2147483647, %v10076_v28  ;;  %v2524_v2 = vadd.f32 1.4214138, %v2508_v39  ;;  %v2493_v17 = vadd.f32 -1.4531521, %v2477_v6  ;;  %6654 = vrcp.f32 %v2449_v62 }
 0x3ef   :  { %v2475_v41 = vmul.f32 1.0614054, %v10093_v61  ;;  %v2522_v20 = vadd.f32 1.4214138, %v2506_v63  ;;  %v11973_v24 = vmov -1.0   ;;  %6656 = vpow2.f32 %v2652_v55  ;;  %11975 = vst [vmem:[#allocation46_spill] sm:$0xff] %v10113_v44 }
 0x3f0   :  { %v10103_v13 = vsel %vm2379_vm12, 1.0, %v11973_v24  ;;  %v2431_v59 = vmul.f32 0.3275911, %v2415_v35  ;;  %v2540_v51 = vmul.f32 %v10069_v23, %v2524_v2  ;;  %v2509_v25 = vmul.f32 %v10087_v8, %v2493_v17 }
 0x3f1   :  { %v2491_v43 = vadd.f32 -1.4531521, %v2475_v41  ;;  %v2658_v30 = vmul.f32 1.442695, %v2638_v57  ;;  %v2538_v39 = vmul.f32 %v10072_v34, %v2522_v20  ;;  %v2641_v6 = vmul.f32 %v2625_v3, %v2417_v40 }
 0x3f2   :  { %v2447_v62 = vadd.f32 1.0, %v2431_v59  ;;  %v10111_v63 = vmul.f32 0.70710677, %v10059_v42  ;;  %v2556_v55 = vadd.f32 -0.28449672, %v2540_v51  ;;  %6658 = vpow2.f32 %v2662_v29 }
 0x3f3   :  { %v10115_v49 = vpop.eup %6644  ;;  %v2525_v38 = vadd.f32 1.4214138, %v2509_v25  ;;  %v2507_v2 = vmul.f32 %v10093_v61, %v2491_v43  ;;  %v2554_v57 = vadd.f32 -0.28449672, %v2538_v39  ;;  %v2623_v20 = vsub.f32 0.0, %v2415_v35 }
 0x3f4   :  { %v6647_v17 = vpop.eup %6646  ;;  %v2480_v41 = vmul.f32 1.0614054, %v10115_v49  ;;  %6660 = vrcp.f32 %v2447_v62  ;;  %v2572_v40 = vmul.f32 %v10069_v23, %v2556_v55  ;;  %v2664_v43 = vmul.f32 1.442695, %v2641_v6 }
 0x3f5   :  { %v6649_v3 = vpop.eup %6648  ;;  %v2541_v59 = vmul.f32 %v10087_v8, %v2525_v38  ;;  %v2523_v22 = vadd.f32 1.4214138, %v2507_v2  ;;  %6662 = vpow2.f32 %v2658_v30  ;;  %v2570_v51 = vmul.f32 %v10072_v34, %v2554_v57 }
 0x3f6   :  { %v10121_v15 = vpop.eup %6650  ;;  %v2496_v25 = vadd.f32 -1.4531521, %v2480_v41  ;;  %v10125_v29 = vand.u32 2147483647, %v10111_v63  ;;  %v2588_v16 = vadd.f32 0.2548296, %v2572_v40  ;;  %v2639_v30 = vmul.f32 %v2623_v20, %v2415_v35 }
 0x3f7   :  { %v6653_v39 = vpop.eup %6652  ;;  %v2557_v62 = vadd.f32 -0.28449672, %v2541_v59  ;;  %v2539_v0 = vmul.f32 %v10093_v61, %v2523_v22  ;;  %v2478_v55 = vmul.f32 1.0614054, %v10121_v15  ;;  %v2586_v31 = vadd.f32 0.2548296, %v2570_v51 }
 0x3f8   :  { %v2512_v38 = vmul.f32 %v10115_v49, %v2496_v25  ;;  %v2436_v2 = vmul.f32 0.3275911, %v10125_v29  ;;  %v10131_v32 = vpop.eup %6654  ;;  %v2604_v6 = vmul.f32 %v10069_v23, %v2588_v16  ;;  %vm2384_vm13 = vcmp.ge.f32.partialorder %v10034_v14, 0.0 }
 0x3f9   :  { %v2573_v57 = vmul.f32 %v10087_v8, %v2557_v62  ;;  %v2555_v41 = vadd.f32 -0.28449672, %v2539_v0  ;;  %v2494_v4 = vadd.f32 -1.4531521, %v2478_v55  ;;  %v6657_v40 = vpop.eup %6656  ;;  %v2602_v59 = vmul.f32 %v10072_v34, %v2586_v31 }
 0x3fa   :  { %v2528_v22 = vadd.f32 1.4214138, %v2512_v38  ;;  %v2481_v44 = vmul.f32 1.0614054, %v10131_v32  ;;  %v2452_v51 = vadd.f32 1.0, %v2436_v2  ;;  %v2684_v19 = vmul.f32 %v6647_v17, %v2604_v6 }
 0x3fb   :  { %v2589_v25 = vadd.f32 0.2548296, %v2573_v57  ;;  %v2571_v35 = vmul.f32 %v10093_v61, %v2555_v41  ;;  %v2510_v20 = vmul.f32 %v10121_v15, %v2494_v4  ;;  %v2682_v5 = vmul.f32 %v6649_v3, %v2602_v59 }
 0x3fc   :  { %v2544_v16 = vmul.f32 %v10115_v49, %v2528_v22  ;;  %v2497_v23 = vadd.f32 -1.4531521, %v2481_v44  ;;  %6664 = vrcp.f32 %v2452_v51  ;;  %v6659_v0 = vpop.eup %6658  ;;  %v2700_v62 = vsub.f32 1.0, %v2684_v19 }
 0x3fd   :  { %v2605_v55 = vmul.f32 %v10087_v8, %v2589_v25  ;;  %v2587_v31 = vadd.f32 0.2548296, %v2571_v35  ;;  %v2526_v34 = vadd.f32 1.4214138, %v2510_v20  ;;  %v2698_v2 = vsub.f32 1.0, %v2682_v5 }
 0x3fe   :  { %v10141_v38 = vpop.eup %6660  ;;  %v2560_v17 = vadd.f32 -0.28449672, %v2544_v16  ;;  %v2513_v6 = vmul.f32 %v10131_v32, %v2497_v23  ;;  %v2660_v57 = vmul.f32 1.442695, %v2639_v30  ;;  %v2716_v4 = vmul.f32 %v2700_v62, %v10045_v45 }
 0x3ff   :  { %v6663_v41 = vpop.eup %6662  ;;  %v2685_v3 = vmul.f32 %v6653_v39, %v2605_v55  ;;  %v2603_v44 = vmul.f32 %v10093_v61, %v2587_v31  ;;  %v2542_v59 = vmul.f32 %v10121_v15, %v2526_v34  ;;  %v2714_v19 = vmul.f32 %v2698_v2, %v10050_v54 }
 0x400   :  { %v2576_v8 = vmul.f32 %v10115_v49, %v2560_v17  ;;  %v2529_v22 = vadd.f32 1.4214138, %v2513_v6  ;;  %v2479_v5 = vmul.f32 1.0614054, %v10141_v38  ;;  %6666 = vpow2.f32 %v2664_v43 }
 0x401   :  { %v2701_v51 = vsub.f32 1.0, %v2685_v3  ;;  %v2683_v25 = vmul.f32 %v6657_v40, %v2603_v44  ;;  %v2558_v30 = vadd.f32 -0.28449672, %v2542_v59  ;;  %v2732_v35 = vadd.f32 1.0, %v2716_v4 }
 0x402   :  { %v2592_v45 = vadd.f32 0.2548296, %v2576_v8  ;;  %v2545_v39 = vmul.f32 %v10131_v32, %v2529_v22  ;;  %v2495_v61 = vadd.f32 -1.4531521, %v2479_v5  ;;  %6668 = vpow2.f32 %v2660_v57 }
 0x403   :  { %v2717_v20 = vmul.f32 %v2701_v51, %v10053_v10  ;;  %v2699_v16 = vsub.f32 1.0, %v2683_v25  ;;  %v2574_v54 = vmul.f32 %v10121_v15, %v2558_v30  ;;  %v2730_v23 = vadd.f32 1.0, %v2714_v19 }
 0x404   :  { %v2608_v62 = vmul.f32 %v10115_v49, %v2592_v45  ;;  %v2561_v55 = vadd.f32 -0.28449672, %v2545_v39  ;;  %v2511_v31 = vmul.f32 %v10141_v38, %v2495_v61  ;;  %v2628_v2 = vsub.f32 0.0, %v10125_v29 }
 0x405   :  { %v2733_v40 = vadd.f32 1.0, %v2717_v20  ;;  %v2715_v43 = vmul.f32 %v2699_v16, %v10103_v13  ;;  %v2590_v34 = vadd.f32 0.2548296, %v2574_v54  ;;  %v10161_v10 = vmul.f32 %v2732_v35, %v10023_v53 }
 0x406   :  { %v10158_v17 = vpop.eup %6664  ;;  %v2688_v6 = vmul.f32 %v6659_v0, %v2608_v62  ;;  %v2577_v57 = vmul.f32 %v10131_v32, %v2561_v55  ;;  %v2527_v4 = vadd.f32 1.4214138, %v2511_v31  ;;  %v2746_v59 = vmul.f32 %v2730_v23, %v10030_v50 }
 0x407   :  { %v10165_v49 = vmul.f32 %v2733_v40, %v10038_v9  ;;  %v2731_v3 = vadd.f32 1.0, %v2715_v43  ;;  %v2606_v44 = vmul.f32 %v10121_v15, %v2590_v34  ;;  %v2484_v13 = vmul.f32 1.0614054, %v10158_v17 }
 0x408   :  { %v2704_v19 = vsub.f32 1.0, %v2688_v6  ;;  %v2593_v8 = vadd.f32 0.2548296, %v2577_v57  ;;  %v2543_v22 = vmul.f32 %v10141_v38, %v2527_v4  ;;  %v10175_v9 = vmul.f32 0.70710677, %v10064_v56 }
 0x409   :  { %v2763_v53 = vpack.c.bf16 %v10165_v49, %v10161_v10  ;;  %v2747_v0 = vmul.f32 %v2731_v3, %v10084_v12  ;;  %v2500_v5 = vadd.f32 -1.4531521, %v2484_v13  ;;  %v2352_v51 = vmul.f32 0.5, %v10004_v36 }
 0x40a   :  { %v2686_v15 = vmul.f32 %v6663_v41, %v2606_v44  ;;  %v2609_v25 = vmul.f32 %v10131_v32, %v2593_v8  ;;  %v2559_v30 = vadd.f32 -0.28449672, %v2543_v22  ;;  %v6667_v50 = vpop.eup %6666  ;;  %v2400_v45 = vsel %vm2384_vm13, 1.0, %v11973_v24 }
 0x40b   :  { %v2762_v35 = vpack.c.bf16 %v2747_v0, %v2746_v59  ;;  %v2353_v39 = vmul.f32 0.5, %v10018_v33  ;;  %v2516_v12 = vmul.f32 %v10158_v17, %v2500_v5  ;;  %v2720_v61 = vmul.f32 %v2704_v19, %v2400_v45  ;;  %v3319_v5 = vld [vmem:[#allocation3 + $0x43] sm:$0xff] }
 0x40c   :  { %vm2385_vm14 = vcmp.ge.f32.partialorder %v10057_v46, 0.0  ;;  %v2689_v20 = vmul.f32 %v6667_v50, %v2609_v25  ;;  %v2575_v36 = vmul.f32 %v10141_v38, %v2559_v30  ;;  %v6669_v41 = vpop.eup %6668  ;;  %vm2382_vm15 = vcmp.ge.f32.partialorder %v10042_v52, 0.0 }
 0x40d   :  { %v2532_v32 = vadd.f32 1.4214138, %v2516_v12  ;;  %v2644_v16 = vmul.f32 %v2628_v2, %v10125_v29  ;;  %v2418_v54 = vand.u32 2147483647, %v10175_v9  ;;  %6417 = vmatprep.mubr.msk.bf16.mxu1 %vm181_vm0, %v2762_v35  ;;  %v2702_v14 = vsub.f32 1.0, %v2686_v15  ;;  %v11976_v35 = vld [vmem:[#allocation77_spill] sm:$0xff] }
 0x40e   :  { %v2705_v33 = vsub.f32 1.0, %v2689_v20  ;;  %v2591_v23 = vadd.f32 0.2548296, %v2575_v36  ;;  %v10191_v62 = vmul.f32 0.70710677, %v10078_v18  ;;  %v2401_v46 = vsel %vm2385_vm14, 1.0, %v11973_v24 }
 0x40f   :  { %vm2383_vm1 = vcmp.ge.f32.partialorder %v10076_v28, 0.0  ;;  %v2548_v55 = vmul.f32 %v10158_v17, %v2532_v32  ;;  %v2434_v31 = vmul.f32 0.3275911, %v2418_v54  ;;  %v2736_v40 = vadd.f32 1.0, %v2720_v61 }
 0x410   :  { %v2721_v43 = vmul.f32 %v2705_v33, %v2401_v46  ;;  %v2607_v29 = vmul.f32 %v10141_v38, %v2591_v23  ;;  %v2421_v34 = vand.u32 2147483647, %v10191_v62  ;;  %v2398_v2 = vsel %vm2382_vm15, 1.0, %v11973_v24 }
 0x411   :  { %v2564_v6 = vadd.f32 -0.28449672, %v2548_v55  ;;  %v2670_v57 = vmul.f32 1.442695, %v2644_v16  ;;  %v2450_v4 = vadd.f32 1.0, %v2434_v31  ;;  %v2718_v3 = vmul.f32 %v2702_v14, %v2398_v2 }
 0x412   :  { %v2737_v44 = vadd.f32 1.0, %v2721_v43  ;;  %v2687_v13 = vmul.f32 %v6669_v41, %v2607_v29  ;;  %v2437_v28 = vmul.f32 0.3275911, %v2421_v34  ;;  %v2399_v59 = vsel %vm2383_vm1, 1.0, %v11973_v24 }
 0x413   :  { %6670 = vrcp.f32 %v2450_v4  ;;  %v5646_v19 = vadd.f32 %v9866_v47, %v10067_v11  ;;  %v10206_v38 = vadd.f32 %v10062_v26, %v10020_v21  ;;  %v10208_v8 = vmul.f32 %v2736_v40, %v2352_v51 }
 0x414   :  { %v10210_v52 = vmul.f32 %v2737_v44, %v2353_v39  ;;  %v2703_v22 = vsub.f32 1.0, %v2687_v13  ;;  %v2453_v0 = vadd.f32 1.0, %v2437_v28  ;;  %v2580_v15 = vmul.f32 %v10158_v17, %v2564_v6 }
 0x415   :  { %6672 = vpow2.f32 %v2670_v57  ;;  %v2626_v25 = vsub.f32 0.0, %v2418_v54  ;;  %v10214_v30 = vmul.f32 0.70710677, %v10081_v27  ;;  %v2734_v50 = vadd.f32 1.0, %v2718_v3  ;;  %v11979_v3 = vld [vmem:[#allocation100_spill] sm:$0xff] }
 0x416   :  { %v2765_v47 = vpack.c.bf16 %v10210_v52, %v10208_v8  ;;  %v2719_v21 = vmul.f32 %v2703_v22, %v2399_v59  ;;  %6674 = vrcp.f32 %v2453_v0  ;;  %v2350_v11 = vmul.f32 0.5, %v10013_v48 }
 0x417   :  { %v2351_v26 = vmul.f32 0.5, %v10025_v1  ;;  %v2419_v51 = vand.u32 2147483647, %v10214_v30  ;;  %v10222_v45 = vmul.f32 %v11976_v35, %v3319_v5  ;;  %v2629_v12 = vsub.f32 0.0, %v2421_v34 }
 0x418   :  { %v2735_v39 = vadd.f32 1.0, %v2719_v21  ;;  %v10225_v61 = vmul.f32 0.70710677, %v10091_v7  ;;  %v5699_v20 = vadd.f32 %v9869_v58, %v5646_v19  ;;  %vm2388_vm2 = vcmp.ge.f32.partialorder %v10111_v63, 0.0  ;;  %v11977_v58 = vld [vmem:[#allocation66_spill] sm:$0xff] }
 0x419   :  { %v2596_v36 = vadd.f32 0.2548296, %v2580_v15  ;;  %v2642_v41 = vmul.f32 %v2626_v25, %v2418_v54  ;;  %v2435_v32 = vmul.f32 0.3275911, %v2419_v51  ;;  %v10229_v48 = vmul.f32 %v2734_v50, %v2350_v11 }
 0x41a   :  { %v10231_v1 = vmul.f32 %v2735_v39, %v2351_v26  ;;  %v2424_v16 = vand.u32 2147483647, %v10225_v61  ;;  %v5752_v14 = vadd.f32 %v9876_v37, %v5699_v20  ;;  %v10236_v33 = vmul.f32 0.5, %v10059_v42  ;;  %v11980_v20 = vld [vmem:[#allocation46_spill] sm:$0xff] }
 0x41b   :  { %vm2386_vm3 = vcmp.ge.f32.partialorder %v10175_v9, 0.0  ;;  %v2451_v23 = vadd.f32 1.0, %v2435_v32  ;;  %v10241_v46 = vadd.f32 %v11977_v58, %v9917_v60  ;;  %v2645_v55 = vmul.f32 %v2629_v12, %v2421_v34  ;;  %v11978_v34 = vld [vmem:[#allocation39_spill] sm:$0xff] }
 0x41c   :  { %v2764_v54 = vpack.c.bf16 %v10231_v1, %v10229_v48  ;;  %v2440_v31 = vmul.f32 0.3275911, %v2424_v16  ;;  %v5788_v40 = vsel %vm3037_vm4, %v5752_v14, 0.0  ;;  %v2404_v37 = vsel %vm2388_vm2, 1.0, %v11973_v24  ;;  %v11981_v14 = vld [vmem:[#allocation41_spill] sm:$0xff] }
 0x41d   :  { %v10246_v43 = vpop.eup %6670  ;;  %v2612_v42 = vmul.f32 %v10158_v17, %v2596_v36  ;;  %v2666_v29 = vmul.f32 1.442695, %v2642_v41  ;;  %6676 = vrcp.f32 %v2451_v23  ;;  %5789 = vadd.xlane.f32.xlu0 %v5788_v40  ;;  %vm2389_vm5 = vcmp.ge.f32.partialorder %v10191_v62, 0.0  ;;  %v11982_v23 = vld [vmem:[#allocation104_spill] sm:$0xff] }
 0x41e   :  { %v2482_v60 = vmul.f32 1.0614054, %v10246_v43  ;;  %v2456_v2 = vadd.f32 1.0, %v2440_v31  ;;  %v10255_v6 = vmul.f32 0.70710677, %v11978_v34  ;;  %v10258_v4 = vmul.f32 0.5, %v10064_v56 }
 0x41f   :  { %v6673_v57 = vpop.eup %6672  ;;  %v10263_v63 = vsel %vm2386_vm3, 1.0, %v11973_v24  ;;  %v2627_v17 = vsub.f32 0.0, %v2419_v51  ;;  %v10266_v44 = vmul.f32 0.70710677, %v11979_v3  ;;  %v10271_v28 = vmul.f32 0.5, %v10078_v18 }
 0x420   :  { %v10268_v13 = vpop.eup %6674  ;;  %v2498_v62 = vadd.f32 -1.4531521, %v2482_v60  ;;  %v2672_v59 = vmul.f32 1.442695, %v2645_v55  ;;  %6678 = vrcp.f32 %v2456_v2  ;;  %v2692_v19 = vmul.f32 %v6673_v57, %v2612_v42  ;;  %v6603_v42 = vld [vmem:[#allocation18 + $0x8] sm:$0xff]  }
 0x421   :  { %v10274_v56 = vsel %vm2389_vm5, 1.0, %v11973_v24  ;;  %v2485_v9 = vmul.f32 1.0614054, %v10268_v13  ;;  %v2422_v22 = vand.u32 2147483647, %v10255_v6  ;;  %6680 = vpow2.f32 %v2666_v29  ;;  %6415 = vmatprep.subr.bf16.mxu1 %v6603_v42 }
 0x422   :  { %v2514_v0 = vmul.f32 %v10246_v43, %v2498_v62  ;;  %v10280_v5 = vmul.f32 0.5, %v10081_v27  ;;  %v2425_v15 = vand.u32 2147483647, %v10266_v44  ;;  %vm2387_vm6 = vcmp.ge.f32.partialorder %v10214_v30, 0.0  ;;  %6416 = vmatpush3.bf16.msra.mxu1 %v6603_v42 }
 0x423   :  { %v2501_v18 = vadd.f32 -1.4531521, %v2485_v9  ;;  %v2643_v25 = vmul.f32 %v2627_v17, %v2419_v51  ;;  %v2438_v50 = vmul.f32 0.3275911, %v2422_v22  ;;  %6682 = vpow2.f32 %v2672_v59 }
 0x424   :  { %v2530_v21 = vadd.f32 1.4214138, %v2514_v0  ;;  %v2632_v11 = vsub.f32 0.0, %v2424_v16  ;;  %v2441_v26 = vmul.f32 0.3275911, %v2425_v15  ;;  %v2708_v35 = vsub.f32 1.0, %v2692_v19 }
 0x425   :  { %v2517_v39 = vmul.f32 %v10268_v13, %v2501_v18  ;;  %v2454_v12 = vadd.f32 1.0, %v2438_v50  ;;  %v10286_v36 = vmul.f32 0.70710677, %v11980_v20  ;;  %v2630_v41 = vsub.f32 0.0, %v2422_v22  ;;  %v11983_v18 = vld [vmem:[#allocation37_spill] sm:$0xff]  ;;  %6418 = vmatmul.mubr.msk.bf16.vlgmr.msra.gmra.mrb[32].mxu1 %vm181_vm0, %v2763_v53 }
 0x426   :  { %v2546_v27 = vmul.f32 %v10246_v43, %v2530_v21  ;;  %v2457_v32 = vadd.f32 1.0, %v2441_v26  ;;  %v4048_v58 = vadd.f32 %v11982_v23, %v11981_v14  ;;  %v10296_v31 = vsel %vm2387_vm6, 1.0, %v11973_v24  ;;  %6421 = vmatprep.mubr.msk.bf16.mxu1 %vm181_vm0, %v2764_v54 }
 0x427   :  { %v10291_v51 = vpop.eup %6676  ;;  %v2533_v55 = vadd.f32 1.4214138, %v2517_v39  ;;  %v2668_v40 = vmul.f32 1.442695, %v2643_v25  ;;  %6684 = vrcp.f32 %v2454_v12  ;;  %v2648_v2 = vmul.f32 %v2632_v11, %v2424_v16  ;;  %v11984_v39 = vld [vmem:[#allocation86_spill] sm:$0xff] }
 0x428   :  { %v2562_v29 = vadd.f32 -0.28449672, %v2546_v27  ;;  %v2483_v60 = vmul.f32 1.0614054, %v10291_v51  ;;  %6686 = vrcp.f32 %v2457_v32  ;;  %v2724_v57 = vmul.f32 %v2708_v35, %v2404_v37 }
 0x429   :  { %v2549_v17 = vmul.f32 %v10268_v13, %v2533_v55  ;;  %v2633_v62 = vsub.f32 0.0, %v2425_v15  ;;  %v2423_v59 = vand.u32 2147483647, %v10286_v36  ;;  %v2646_v0 = vmul.f32 %v2630_v41, %v2422_v22 }
 0x42a   :  { %v10301_v19 = vpop.eup %6678  ;;  %v2578_v30 = vmul.f32 %v10246_v43, %v2562_v29  ;;  %v2499_v9 = vadd.f32 -1.4531521, %v2483_v60  ;;  %v4101_v25 = vadd.f32 %v11983_v18, %v4048_v58  ;;  %6688 = vpow2.f32 %v2668_v40  ;;  %v11985_v40 = vld [vmem:[#allocation105_spill] sm:$0xff] }
 0x42b   :  { %v2565_v50 = vadd.f32 -0.28449672, %v2549_v17  ;;  %v2488_v16 = vmul.f32 1.0614054, %v10301_v19  ;;  %v2439_v37 = vmul.f32 0.3275911, %v2423_v59  ;;  %v6681_v21 = vpop.eup %6680  ;;  %v2649_v14 = vmul.f32 %v2633_v62, %v2425_v15 }
 0x42c   :  { %v2594_v11 = vadd.f32 0.2548296, %v2578_v30  ;;  %v2515_v26 = vmul.f32 %v10291_v51, %v2499_v9  ;;  %v2678_v35 = vmul.f32 1.442695, %v2648_v2  ;;  %v4154_v12 = vadd.f32 %v11984_v39, %v4101_v25  ;;  %v11986_v2 = vld [vmem:[#allocation91_spill] sm:$0xff] }
 0x42d   :  { %v2581_v27 = vmul.f32 %v10268_v13, %v2565_v50  ;;  %v2504_v32 = vadd.f32 -1.4531521, %v2488_v16  ;;  %v2455_v22 = vadd.f32 1.0, %v2439_v37  ;;  %v6683_v41 = vpop.eup %6682  ;;  %v2674_v55 = vmul.f32 1.442695, %v2646_v0  ;;  %v11987_v50 = vld [vmem:[#allocation92_spill] sm:$0xff]  ;;  %6422 = vmatmul.mubr.msk.bf16.gmra.mrb[36].mxu1 %vm181_vm0, %v2765_v47 }
 0x42e   :  { %v2610_v23 = vmul.f32 %v10246_v43, %v2594_v11  ;;  %v2531_v58 = vadd.f32 1.4214138, %v2515_v26  ;;  %v4207_v42 = vadd.f32 %v11985_v40, %v4154_v12  ;;  %v2740_v29 = vadd.f32 1.0, %v2724_v57 }
 0x42f   :  { %v2597_v15 = vadd.f32 0.2548296, %v2581_v27  ;;  %v2520_v60 = vmul.f32 %v10301_v19, %v2504_v32  ;;  %6690 = vrcp.f32 %v2455_v22  ;;  %v2631_v53 = vsub.f32 0.0, %v2423_v59  ;;  %v11988_v27 = vld [vmem:[#allocation94_spill] sm:$0xff] }
 0x430   :  { %v2690_v10 = vmul.f32 %v6681_v21, %v2610_v23  ;;  %v2547_v49 = vmul.f32 %v10291_v51, %v2531_v58  ;;  %v4260_v43 = vadd.f32 %v11986_v2, %v4207_v42  ;;  %6692 = vpow2.f32 %v2678_v35  ;;  %v11989_v58 = vld [vmem:[#allocation68_spill] sm:$0xff]  ;;  %v11991_v2 = vld [vmem:[#allocation89_spill] sm:$0xff] }
 0x431   :  { %v10322_v17 = vpop.eup %6684  ;;  %v2613_v62 = vmul.f32 %v10268_v13, %v2597_v15  ;;  %v2536_v30 = vadd.f32 1.4214138, %v2520_v60  ;;  %v2680_v48 = vmul.f32 1.442695, %v2649_v14  ;;  %6694 = vpow2.f32 %v2674_v55  ;;  %v11990_v60 = vld [vmem:[#allocation80_spill] sm:$0xff] }
 0x432   :  { %v10325_v1 = vpop.eup %6686  ;;  %v2706_v54 = vsub.f32 1.0, %v2690_v10  ;;  %v2563_v57 = vadd.f32 -0.28449672, %v2547_v49  ;;  %v2486_v9 = vmul.f32 1.0614054, %v10322_v17  ;;  %v4313_v16 = vadd.f32 %v11987_v50, %v4260_v43  ;;  %v11993_v50 = vld [vmem:[#allocation40_spill] sm:$0xff] }
 0x433   :  { %v2693_v0 = vmul.f32 %v6683_v41, %v2613_v62  ;;  %v2552_v18 = vmul.f32 %v10301_v19, %v2536_v30  ;;  %v2489_v25 = vmul.f32 1.0614054, %v10325_v1  ;;  %v2647_v11 = vmul.f32 %v2631_v53, %v2423_v59 }
 0x434   :  { %v2722_v37 = vmul.f32 %v2706_v54, %v10263_v63  ;;  %v2579_v13 = vmul.f32 %v10291_v51, %v2563_v57  ;;  %v2502_v21 = vadd.f32 -1.4531521, %v2486_v9  ;;  %v6689_v26 = vpop.eup %6688  ;;  %v4366_v32 = vadd.f32 %v11988_v27, %v4313_v16  ;;  %v11992_v54 = vld [vmem:[#allocation81_spill] sm:$0xff]  ;;  %v11996_v27 = vld [vmem:[#allocation88_spill] sm:$0xff] }
 0x435   :  { %v2709_v35 = vsub.f32 1.0, %v2693_v0  ;;  %v2568_v39 = vadd.f32 -0.28449672, %v2552_v18  ;;  %v2505_v12 = vadd.f32 -1.4531521, %v2489_v25  ;;  %v10339_v14 = vmul.f32 %v2740_v29, %v10236_v33 }
 0x436   :  { %v2595_v22 = vadd.f32 0.2548296, %v2579_v13  ;;  %v2518_v63 = vmul.f32 %v10322_v17, %v2502_v21  ;;  %6696 = vpow2.f32 %v2680_v48  ;;  %v4419_v55 = vadd.f32 %v11989_v58, %v4366_v32 }
 0x437   :  { %v2725_v59 = vmul.f32 %v2709_v35, %v10274_v56  ;;  %v2584_v41 = vmul.f32 %v10301_v19, %v2568_v39  ;;  %v2521_v23 = vmul.f32 %v10325_v1, %v2505_v12  ;;  %v2738_v40 = vadd.f32 1.0, %v2722_v37  ;;  %v11995_v35 = vld [vmem:[#allocation97_spill] sm:$0xff] }
 0x438   :  { %v2611_v8 = vmul.f32 %v10291_v51, %v2595_v22  ;;  %v2534_v52 = vadd.f32 1.4214138, %v2518_v63  ;;  %v2676_v47 = vmul.f32 1.442695, %v2647_v11  ;;  %v4472_v10 = vadd.f32 %v11990_v60, %v4419_v55  ;;  %v12000_v60 = vld [vmem:[#allocation63_spill] sm:$0xff] }
 0x439   :  { %v10347_v42 = vpop.eup %6690  ;;  %v2741_v33 = vadd.f32 1.0, %v2725_v59  ;;  %v2600_v29 = vadd.f32 0.2548296, %v2584_v41  ;;  %v2537_v15 = vadd.f32 1.4214138, %v2521_v23  ;;  %v4368_v43 = vadd.f32 %v11991_v2, %v10241_v46  ;;  %v11994_v46 = vld [vmem:[#allocation55_spill] sm:$0xff] }
 0x43a   :  { %v2691_v49 = vmul.f32 %v6689_v26, %v2611_v8  ;;  %v2550_v56 = vmul.f32 %v10322_v17, %v2534_v52  ;;  %v2487_v53 = vmul.f32 1.0614054, %v10347_v42  ;;  %v6693_v62 = vpop.eup %6692  ;;  %v4525_v57 = vadd.f32 %v11992_v54, %v4472_v10  ;;  %v11997_v41 = vld [vmem:[#allocation62_spill] sm:$0xff]  ;;  %v11999_v52 = vld [vmem:[#allocation32_spill] sm:$0xff]  ;;  %v12003_v54 = vld [vmem:[#allocation101_spill] sm:$0xff] }
 0x43b   :  { %v2757_v51 = vmul.f32 %v2741_v33, %v10271_v28  ;;  %v2616_v30 = vmul.f32 %v10301_v19, %v2600_v29  ;;  %v2553_v48 = vmul.f32 %v10325_v1, %v2537_v15  ;;  %v6695_v9 = vpop.eup %6694  ;;  %v4421_v16 = vadd.f32 %v11993_v50, %v4368_v43 }
 0x43c   :  { %v2707_v0 = vsub.f32 1.0, %v2691_v49  ;;  %v2566_v18 = vadd.f32 -0.28449672, %v2550_v56  ;;  %v2503_v25 = vadd.f32 -1.4531521, %v2487_v53  ;;  %v4578_v11 = vadd.f32 %v11994_v46, %v4525_v57  ;;  %v12001_v53 = vld [vmem:[#allocation49_spill] sm:$0xff] }
 0x43d   :  { %v2767_v37 = vpack.c.bf16 %v2757_v51, %v10339_v14  ;;  %v2696_v13 = vmul.f32 %v6693_v62, %v2616_v30  ;;  %v2569_v21 = vadd.f32 -0.28449672, %v2553_v48  ;;  %v4474_v39 = vadd.f32 %v11995_v35, %v4421_v16  ;;  %v12002_v51 = vld [vmem:[#allocation70_spill] sm:$0xff]  ;;  %v10391_v57 = vld [vmem:[#allocation3 + $0xa3] sm:$0xff] }
 0x43e   :  { %v2723_v28 = vmul.f32 %v2707_v0, %v10296_v31  ;;  %v2582_v19 = vmul.f32 %v10322_v17, %v2566_v18  ;;  %v2519_v26 = vmul.f32 %v10347_v42, %v2503_v25  ;;  %vm2392_vm7 = vcmp.ge.f32.partialorder %v10225_v61, 0.0  ;;  %v10369_v31 = vld [vmem:[#allocation3 + $0xc0] sm:$0xff]  ;;  %v10397_v16 = vld [vmem:[#allocation19 + $0x4] ss:$0 sm:$0xff] }
 0x43f   :  { %v2585_v12 = vmul.f32 %v10325_v1, %v2569_v21  ;;  %6698 = vpow2.f32 %v2676_v47  ;;  %v4631_v32 = vadd.f32 %v11996_v27, %v4578_v11  ;;  %v4527_v23 = vadd.f32 %v11997_v41, %v4474_v39  ;;  %11998 = vst [vmem:[#allocation35_spill] sm:$0xff] %v10369_v31  ;;  %v12004_v18 = vld [vmem:[#allocation95_spill] sm:$0xff]  ;;  %v12005_v21 = vld [vmem:[#allocation53_spill] sm:$0xff]  ;;  %v12008_v41 = vld [vmem:[#allocation56_spill] sm:$0xff] }
 0x440   :  { %v6697_v14 = vpop.eup %6696  ;;  %v2739_v22 = vadd.f32 1.0, %v2723_v28  ;;  %v2598_v63 = vadd.f32 0.2548296, %v2582_v19  ;;  %v2535_v59 = vadd.f32 1.4214138, %v2519_v26  ;;  %v2754_v58 = vmul.f32 %v2738_v40, %v10258_v4 }
 0x441   :  { %v2712_v55 = vsub.f32 1.0, %v2696_v13  ;;  %v2601_v8 = vadd.f32 0.2548296, %v2585_v12  ;;  %v4685_v33 = vadd.f32 %v11999_v52, %v4631_v32  ;;  %v4580_v10 = vadd.f32 %v12000_v60, %v4527_v23  ;;  %v10382_v40 = vld [vmem:[#allocation19 + $0x23] ss:$0 sm:$0xff]  ;;  %v12007_v32 = vld [vmem:[#allocation52_spill] sm:$0xff] }
 0x442   :  { %v2755_v29 = vmul.f32 %v2739_v22, %v10280_v5  ;;  %v2614_v47 = vmul.f32 %v10322_v17, %v2598_v63  ;;  %v2551_v15 = vmul.f32 %v10347_v42, %v2535_v59  ;;  %v2408_v49 = vsel %vm2392_vm7, 1.0, %v11973_v24  ;;  %v3372_v5 = vld [vmem:[#allocation3 + $0x44] sm:$0xff]  ;;  %v10405_v19 = vld [vmem:[#allocation19 + $0x26] ss:$0 sm:$0xff]  ;;  %v12009_v52 = vld [vmem:[#allocation57_spill] sm:$0xff] }
 0x443   :  { %v2617_v56 = vmul.f32 %v10325_v1, %v2601_v8  ;;  %v4738_v4 = vadd.f32 %v12001_v53, %v4685_v33  ;;  %v10386_v2 = vmul.f32 %v10382_v40, %v10369_v31  ;;  %v4633_v30 = vadd.f32 %v12002_v51, %v4580_v10  ;;  %v3425_v22 = vld [vmem:[#allocation3 + $0x45] sm:$0xff]  ;;  %v10423_v60 = vld [vmem:[#allocation19 + $0x5] ss:$0 sm:$0xff]  ;;  %v10437_v51 = vld [vmem:[#allocation19 + $0x7] ss:$0 sm:$0xff] }
 0x444   :  { %v2766_v17 = vpack.c.bf16 %v2755_v29, %v2754_v58  ;;  %v2694_v43 = vmul.f32 %v6695_v9, %v2614_v47  ;;  %v2567_v62 = vadd.f32 -0.28449672, %v2551_v15  ;;  %v2728_v48 = vmul.f32 %v2712_v55, %v2408_v49  ;;  %v3478_v58 = vld [vmem:[#allocation3 + $0x46] sm:$0xff]  ;;  %v12011_v10 = vld [vmem:[#allocation78_spill] sm:$0xff] }
 0x445   :  { %vm2393_vm8 = vcmp.ge.f32.partialorder %v10266_v44, 0.0  ;;  %v2697_v61 = vmul.f32 %v6697_v14, %v2617_v56  ;;  %v4791_v1 = vadd.f32 %v12003_v54, %v4738_v4  ;;  %v4687_v25 = vadd.f32 %v12004_v18, %v4633_v30  ;;  %v12010_v47 = vld [vmem:[#allocation79_spill] sm:$0xff]  ;;  %v10431_v56 = vld [vmem:[#allocation19 + $0x6] ss:$0 sm:$0xff]  ;;  %v6832_v30 = vld [vmem:[#allocation3 + $0x50] sm:$0xff] }
 0x446   :  { %v2583_v0 = vmul.f32 %v10347_v42, %v2567_v62  ;;  %v3356_v50 = vadd.f32 %v10222_v45, %v10206_v38  ;;  %v3393_v9 = vmul.f32 %v10397_v16, %v3372_v5  ;;  %6425 = vmatprep.mubr.msk.bf16.mxu1 %vm181_vm0, %v2766_v17  ;;  %vm2390_vm9 = vcmp.ge.f32.partialorder %v10255_v6, 0.0  ;;  %v12006_v45 = vld [vmem:[#allocation85_spill] sm:$0xff]  ;;  %v12012_v5 = vld [vmem:[#allocation83_spill] sm:$0xff] }
 0x447   :  { %v2710_v44 = vsub.f32 1.0, %v2694_v43  ;;  %v2713_v13 = vsub.f32 1.0, %v2697_v61  ;;  %v4844_v46 = vadd.f32 %v12005_v21, %v4791_v1  ;;  %6426 = vmatmul.mubr.msk.bf16.gmra.mrb[40].mxu1 %vm181_vm0, %v2767_v37  ;;  %v2409_v11 = vsel %vm2393_vm8, 1.0, %v11973_v24  ;;  %v10435_v43 = vld [vmem:[#allocation3 + $0xc1] sm:$0xff] }
 0x448   :  { %v2599_v28 = vadd.f32 0.2548296, %v2583_v0  ;;  %v10409_v38 = vmul.f32 %v10405_v19, %v10391_v57  ;;  %v4740_v26 = vadd.f32 %v12006_v45, %v4687_v25  ;;  %v2360_v39 = vmul.f32 0.5, %v10091_v7  ;;  %12013 = vst [vmem:[#allocation98_spill] sm:$0xff] %v10435_v43  ;;  %v12014_v0 = vld [vmem:[#allocation42_spill] sm:$0xff] }
 0x449   :  { %v6699_v35 = vpop.eup %6698  ;;  %v2744_v12 = vadd.f32 1.0, %v2728_v48  ;;  %v2729_v27 = vmul.f32 %v2713_v13, %v2409_v11  ;;  %v4897_v14 = vadd.f32 %v12007_v32, %v4844_v46  ;;  %v2406_v37 = vsel %vm2390_vm9, 1.0, %v11973_v24  ;;  %v10449_v13 = vld [vmem:[#allocation3 + $0xc2] sm:$0xff]  ;;  %v10451_v46 = vld [vmem:[#allocation19 + $0x8] ss:$0 sm:$0xff]  ;;  %v6834_v11 = vld [vmem:[#allocation3 + $0x51] sm:$0xff] }
 0x44a   :  { %v2361_v63 = vmul.f32 0.5, %v11979_v3  ;;  %v2615_v59 = vmul.f32 %v10347_v42, %v2599_v28  ;;  %v4793_v23 = vadd.f32 %v12008_v41, %v4740_v26  ;;  %v2726_v55 = vmul.f32 %v2710_v44, %v2406_v37  ;;  %12016 = vst [vmem:[#allocation69_spill] sm:$0xff] %v10449_v13  ;;  %12017 = vst [vmem:[#allocation75_spill] sm:$0xff] %v10451_v46  ;;  %v12020_v32 = vld [vmem:[#allocation93_spill] sm:$0xff]  ;;  %v12023_v41 = vld [vmem:[#allocation43_spill] sm:$0xff] }
 0x44b   :  { %v2745_v8 = vadd.f32 1.0, %v2729_v27  ;;  %v4950_v7 = vadd.f32 %v12009_v52, %v4897_v14  ;;  %v3409_v33 = vadd.f32 %v3393_v9, %v3356_v50  ;;  %vm2391_vm10 = vcmp.ge.f32.partialorder %v10286_v36, 0.0  ;;  %v10446_v50 = vld [vmem:[#allocation3 + $0xa4] sm:$0xff]  ;;  %v12015_v9 = vld [vmem:[#allocation90_spill] sm:$0xff] }
 0x44c   :  { %v2695_v29 = vmul.f32 %v6699_v35, %v2615_v59  ;;  %v4846_v15 = vadd.f32 %v12010_v47, %v4793_v23  ;;  %v3446_v6 = vmul.f32 %v10423_v60, %v3425_v22  ;;  %v10426_v3 = vmul.f32 %v2744_v12, %v2360_v39  ;;  %v10457_v35 = vld [vmem:[#allocation19 + $0x24] ss:$0 sm:$0xff]  ;;  %v10461_v27 = vld [vmem:[#allocation3 + $0xa5] sm:$0xff] }
 0x44d   :  { %v10428_v42 = vmul.f32 %v2745_v8, %v2361_v63  ;;  %v5003_v49 = vadd.f32 %v12011_v10, %v4950_v7  ;;  %v3499_v53 = vmul.f32 %v10431_v56, %v3478_v58  ;;  %v3553_v48 = vmul.f32 %v6832_v30, %v10437_v51  ;;  %12019 = vst [vmem:[#allocation38_spill] sm:$0xff] %v10461_v27  ;;  %v10464_v22 = vld [vmem:[#allocation3 + $0xc3] sm:$0xff]  ;;  %v10466_v63 = vld [vmem:[#allocation19 + $0x9] ss:$0 sm:$0xff]  ;;  %v10470_v58 = vld [vmem:[#allocation19 + $0x27] ss:$0 sm:$0xff] }
 0x44e   :  { %v2711_v4 = vsub.f32 1.0, %v2695_v29  ;;  %v4899_v17 = vadd.f32 %v12012_v5, %v4846_v15  ;;  %v3462_v62 = vadd.f32 %v3446_v6, %v3409_v33  ;;  %v2742_v61 = vadd.f32 1.0, %v2726_v55  ;;  %12021 = vst [vmem:[#allocation82_spill] sm:$0xff] %v10464_v22  ;;  %12022 = vst [vmem:[#allocation65_spill] sm:$0xff] %v10466_v63  ;;  %v10474_v8 = vld [vmem:[#allocation19 + $0x25] ss:$0 sm:$0xff] }
 0x44f   :  { %v2769_v54 = vpack.c.bf16 %v10428_v42, %v10426_v3  ;;  %v2407_v1 = vsel %vm2391_vm10, 1.0, %v11973_v24  ;;  %v5057_v18 = vadd.f32 %v12014_v0, %v5003_v49  ;;  %v3606_v28 = vmul.f32 %v6834_v11, %v10451_v46  ;;  %v12018_v24 = vld [vmem:[#allocation102_spill] sm:$0xff]  ;;  %12024 = vst [vmem:[#allocation36_spill] sm:$0xff] %v10470_v58  ;;  %v10478_v29 = vld [vmem:[#allocation3 + $0xa6] sm:$0xff]  ;;  %v10481_v6 = vld [vmem:[#allocation19 + $0xa] ss:$0 sm:$0xff] }
 0x450   :  { %v2727_v25 = vmul.f32 %v2711_v4, %v2407_v1  ;;  %v4952_v44 = vadd.f32 %v12015_v9, %v4899_v17  ;;  %v3515_v21 = vadd.f32 %v3499_v53, %v3462_v62  ;;  %v2358_v45 = vmul.f32 0.5, %v11978_v34  ;;  %v6837_v34 = vld [vmem:[#allocation3 + $0x52] sm:$0xff]  ;;  %12025 = vst [vmem:[#allocation29_spill] sm:$0xff] %v10478_v29  ;;  %12026 = vst [vmem:[#allocation58_spill] sm:$0xff] %v10481_v6  ;;  %v10485_v4 = vld [vmem:[#allocation19 + $0x28] ss:$0 sm:$0xff] }
 0x451   :  { %v2359_v36 = vmul.f32 0.5, %v11980_v20  ;;  %v5110_v26 = vadd.f32 %v12018_v24, %v5057_v18  ;;  %v5096_v39 = vmul.f32 %v10457_v35, %v10435_v43  ;;  %v3659_v20 = vmul.f32 %v6837_v34, %v10466_v63  ;;  %v3744_v7 = vld [vmem:[#allocation3 + $0x54] sm:$0xff]  ;;  %v10491_v62 = vld [vmem:[#allocation3 + $0xc4] sm:$0xff]  ;;  %v10493_v1 = vld [vmem:[#allocation19 + $0xb] ss:$0 sm:$0xff] }
 0x452   :  { %v2743_v12 = vadd.f32 1.0, %v2727_v25  ;;  %v5005_v14 = vadd.f32 %v12020_v32, %v4952_v44  ;;  %v3569_v37 = vadd.f32 %v3553_v48, %v3515_v21  ;;  %v2758_v59 = vmul.f32 %v2742_v61, %v2358_v45  ;;  %v6841_v10 = vld [vmem:[#allocation3 + $0x53] sm:$0xff]  ;;  %12027 = vst [vmem:[#allocation45_spill] sm:$0xff] %v10491_v62  ;;  %12028 = vst [vmem:[#allocation76_spill] sm:$0xff] %v10493_v1  ;;  %v10500_v9 = vld [vmem:[#allocation3 + $0xc5] sm:$0xff] }
 0x453   :  { %v5163_v23 = vadd.f32 %v12023_v41, %v5110_v26  ;;  %v5253_v55 = vmul.f32 %v10470_v58, %v10446_v50  ;;  %v5149_v52 = vmul.f32 %v10474_v8, %v10449_v13  ;;  %v3712_v49 = vmul.f32 %v6841_v10, %v10481_v6  ;;  %v3797_v30 = vld [vmem:[#allocation3 + $0x55] sm:$0xff]  ;;  %12029 = vst [vmem:[#allocation103_spill] sm:$0xff] %v10500_v9  ;;  %v10504_v45 = vld [vmem:[#allocation19 + $0xc] ss:$0 sm:$0xff]  ;;  %v10508_v26 = vld [vmem:[#allocation19 + $0x2a] ss:$0 sm:$0xff] }
 0x454   :  { %v2759_v33 = vmul.f32 %v2743_v12, %v2359_v36  ;;  %v5059_v47 = vadd.f32 %v10386_v2, %v5005_v14  ;;  %v3622_v15 = vadd.f32 %v3606_v28, %v3569_v37  ;;  %v5306_v5 = vmul.f32 %v10485_v4, %v10461_v27  ;;  %v3850_v44 = vld [vmem:[#allocation3 + $0x56] sm:$0xff]  ;;  %12030 = vst [vmem:[#allocation64_spill] sm:$0xff] %v10504_v45  ;;  %v10514_v32 = vld [vmem:[#allocation3 + $0xc6] sm:$0xff] }
 0x455   :  { %v5216_v53 = vadd.f32 %v10409_v38, %v5163_v23  ;;  %v5202_v17 = vmul.f32 %v10405_v19, %v10464_v22  ;;  %v3765_v0 = vmul.f32 %v10493_v1, %v3744_v7  ;;  %v10496_v38 = vld [vmem:[#allocation19 + $0x29] ss:$0 sm:$0xff]  ;;  %v5255_v11 = vmul.f32 %v10470_v58, %v10491_v62  ;;  %12032 = vst [vmem:[#allocation48_spill] sm:$0xff] %v10514_v32  ;;  %v5394_v3 = vld [vmem:[#allocation3 + $0xd0] sm:$0xff]  ;;  %v10582_v13 = vld [vmem:[#allocation19 + $0x2f] ss:$0 sm:$0xff] }
 0x456   :  { %v2768_v2 = vpack.c.bf16 %v2759_v33, %v2758_v59  ;;  %v5112_v48 = vadd.f32 %v5096_v39, %v5059_v47  ;;  %v3675_v61 = vadd.f32 %v3659_v20, %v3622_v15  ;;  %v5359_v25 = vmul.f32 %v10496_v38, %v10478_v29  ;;  %v10510_v39 = vld [vmem:[#allocation3 + $0xb0] sm:$0xff]  ;;  %v3904_v14 = vld [vmem:[#allocation3 + $0x60] sm:$0xff]  ;;  %12050 = vst [vmem:[#allocation39_spill] sm:$0xff] %v10582_v13 }
 0x457   :  { %v5269_v18 = vadd.f32 %v5253_v55, %v5216_v53  ;;  %v3818_v36 = vmul.f32 %v10504_v45, %v3797_v30  ;;  %12031 = vst [vmem:[#allocation50_spill] sm:$0xff] %v10510_v39  ;;  %v5413_v12 = vmul.f32 %v10510_v39, %v10508_v26  ;;  %v5308_v34 = vmul.f32 %v10485_v4, %v10500_v9  ;;  %v10522_v59 = vld [vmem:[#allocation19 + $0xd] ss:$0 sm:$0xff]  ;;  %v10525_v55 = vld [vmem:[#allocation19 + $0x2b] ss:$0 sm:$0xff]  ;;  %v5447_v30 = vld [vmem:[#allocation3 + $0xd1] sm:$0xff] }
 0x458   :  { %v5165_v21 = vadd.f32 %v5149_v52, %v5112_v48  ;;  %v3728_v28 = vadd.f32 %v3712_v49, %v3675_v61  ;;  %6429 = vmatprep.mubr.msk.bf16.mxu1 %vm181_vm0, %v2768_v2  ;;  %12033 = vst [vmem:[#allocation87_spill] sm:$0xff] %v10522_v59  ;;  %v3871_v41 = vmul.f32 %v10522_v59, %v3850_v44  ;;  %12034 = vst [vmem:[#allocation96_spill] sm:$0xff] %v10525_v55  ;;  %v10527_v52 = vld [vmem:[#allocation3 + $0xb1] sm:$0xff]  ;;  %v3957_v42 = vld [vmem:[#allocation3 + $0x61] sm:$0xff] }
 0x459   :  { %v5322_v24 = vadd.f32 %v5306_v5, %v5269_v18  ;;  %6430 = vmatmul.mubr.msk.bf16.gmra.mrb[44].mxu1 %vm181_vm0, %v2769_v54  ;;  %12035 = vst [vmem:[#allocation54_spill] sm:$0xff] %v10527_v52  ;;  %v5466_v7 = vmul.f32 %v10527_v52, %v10525_v55  ;;  %v5361_v33 = vmul.f32 %v10496_v38, %v10514_v32  ;;  %v10533_v15 = vld [vmem:[#allocation19 + $0xe] ss:$0 sm:$0xff]  ;;  %v10536_v53 = vld [vmem:[#allocation19 + $0x2c] ss:$0 sm:$0xff]  ;;  %v10538_v5 = vld [vmem:[#allocation3 + $0xb2] sm:$0xff] }
 0x45a   :  { %v5218_v37 = vadd.f32 %v5202_v17, %v5165_v21  ;;  %v3781_v20 = vadd.f32 %v3765_v0, %v3728_v28  ;;  %12036 = vst [vmem:[#allocation34_spill] sm:$0xff] %v10533_v15  ;;  %v3925_v10 = vmul.f32 %v10533_v15, %v3904_v14  ;;  %12037 = vst [vmem:[#allocation31_spill] sm:$0xff] %v10538_v5  ;;  %v4010_v2 = vld [vmem:[#allocation3 + $0x62] sm:$0xff]  ;;  %v10546_v44 = vld [vmem:[#allocation3 + $0x134] sm:$0xff] }
 0x45b   :  { %v5375_v23 = vadd.f32 %v5359_v25, %v5322_v24  ;;  %v5519_v17 = vmul.f32 %v10538_v5, %v10536_v53  ;;  %v5415_v61 = vmul.f32 %v10508_v26, %v5394_v3  ;;  %v10543_v18 = vld [vmem:[#allocation19 + $0xf] ss:$0 sm:$0xff]  ;;  %12039 = vst [vmem:[#allocation44_spill] sm:$0xff] %v10546_v44  ;;  %v10548_v21 = vld [vmem:[#allocation3 + $0x135] sm:$0xff]  ;;  %v10550_v28 = vld [vmem:[#allocation19 + $0x2d] ss:$0 sm:$0xff] }
 0x45c   :  { %v5271_v54 = vadd.f32 %v5255_v11, %v5218_v37  ;;  %v3834_v47 = vadd.f32 %v3818_v36, %v3781_v20  ;;  %12038 = vst [vmem:[#allocation60_spill] sm:$0xff] %v10543_v18  ;;  %v3978_v25 = vmul.f32 %v10543_v18, %v3957_v42  ;;  %12040 = vst [vmem:[#allocation73_spill] sm:$0xff] %v10548_v21  ;;  %v10552_v36 = vld [vmem:[#allocation3 + $0xb3] sm:$0xff]  ;;  %v4063_v14 = vld [vmem:[#allocation3 + $0x63] sm:$0xff] }
 0x45d   :  { %v5429_v49 = vadd.f32 %v5413_v12, %v5375_v23  ;;  %12041 = vst [vmem:[#allocation59_spill] sm:$0xff] %v10552_v36  ;;  %v5572_v24 = vmul.f32 %v10552_v36, %v10550_v28  ;;  %v5500_v12 = vld [vmem:[#allocation3 + $0xd2] sm:$0xff]  ;;  %v10562_v42 = vld [vmem:[#allocation19 + $0x2e] ss:$0 sm:$0xff]  ;;  %v10597_v39 = vld [vmem:[#allocation19 + $0x30] ss:$0 sm:$0xff] }
 0x45e   :  { %v5324_v48 = vadd.f32 %v5308_v34, %v5271_v54  ;;  %v3887_v0 = vadd.f32 %v3871_v41, %v3834_v47  ;;  %v5468_v34 = vmul.f32 %v10525_v55, %v5447_v30  ;;  %v10557_v41 = vld [vmem:[#allocation19 + $0x10] ss:$0 sm:$0xff]  ;;  %v10560_v3 = vld [vmem:[#allocation3 + $0x136] sm:$0xff]  ;;  %12044 = vst [vmem:[#allocation72_spill] sm:$0xff] %v10562_v42  ;;  %v10572_v30 = vld [vmem:[#allocation19 + $0x13] ss:$0 sm:$0xff] }
 0x45f   :  { %v5482_v11 = vadd.f32 %v5466_v7, %v5429_v49  ;;  %12042 = vst [vmem:[#allocation30_spill] sm:$0xff] %v10557_v41  ;;  %v4031_v23 = vmul.f32 %v10557_v41, %v4010_v2  ;;  %12043 = vst [vmem:[#allocation67_spill] sm:$0xff] %v10560_v3  ;;  %v10564_v54 = vld [vmem:[#allocation3 + $0xb4] sm:$0xff]  ;;  %v4116_v32 = vld [vmem:[#allocation3 + $0x64] sm:$0xff]  ;;  %v4197_v2 = vmul.f32 %v10572_v30, %v10548_v21 }
 0x460   :  { %v5377_v37 = vadd.f32 %v5361_v33, %v5324_v48  ;;  %v3941_v20 = vadd.f32 %v3925_v10, %v3887_v0  ;;  %12045 = vst [vmem:[#allocation47_spill] sm:$0xff] %v10564_v54  ;;  %v5625_v47 = vmul.f32 %v10564_v54, %v10562_v42  ;;  %v5553_v49 = vld [vmem:[#allocation3 + $0xd3] sm:$0xff]  ;;  %v10568_v33 = vld [vmem:[#allocation19 + $0x12] ss:$0 sm:$0xff]  ;;  %12047 = vst [vmem:[#allocation74_spill] sm:$0xff] %v10572_v30 }
 0x461   :  { %v5535_v7 = vadd.f32 %v5519_v17, %v5482_v11  ;;  %12046 = vst [vmem:[#allocation71_spill] sm:$0xff] %v10568_v33  ;;  %v4144_v10 = vmul.f32 %v10568_v33, %v10546_v44  ;;  %v5521_v48 = vmul.f32 %v10536_v53, %v5500_v12  ;;  %v10577_v11 = vld [vmem:[#allocation19 + $0x11] ss:$0 sm:$0xff]  ;;  %v10580_v62 = vld [vmem:[#allocation3 + $0x140] sm:$0xff]  ;;  %v10584_v43 = vld [vmem:[#allocation3 + $0xb5] sm:$0xff] }
 0x462   :  { %v5431_v17 = vadd.f32 %v5415_v61, %v5377_v37  ;;  %v3994_v0 = vadd.f32 %v3978_v25, %v3941_v20  ;;  %12048 = vst [vmem:[#allocation77_spill] sm:$0xff] %v10577_v11  ;;  %v4084_v9 = vmul.f32 %v10577_v11, %v4063_v14  ;;  %12049 = vst [vmem:[#allocation66_spill] sm:$0xff] %v10580_v62  ;;  %v5606_v54 = vld [vmem:[#allocation3 + $0xd4] sm:$0xff]  ;;  %v4169_v36 = vld [vmem:[#allocation3 + $0x65] sm:$0xff] }
 0x463   :  { %v5588_v22 = vadd.f32 %v5572_v24, %v5535_v7  ;;  %12051 = vst [vmem:[#allocation100_spill] sm:$0xff] %v10584_v43  ;;  %v5678_v31 = vmul.f32 %v10584_v43, %v10582_v13  ;;  %v12052_v61 = vld [vmem:[#allocation84_spill] sm:$0xff]  ;;  %v5574_v20 = vmul.f32 %v10550_v28, %v5553_v49  ;;  %v4137_v7 = vmul.f32 %v10568_v33, %v4116_v32  ;;  %v10599_v43 = vld [vmem:[#allocation3 + $0xb6] sm:$0xff]  ;;  %v6882_v29 = vld [vmem:[#allocation3 + $0x80] sm:$0xff] }
 0x464   :  { %v4160_v37 = vadd.f32 %v4144_v10, %v12052_v61  ;;  %v10589_v12 = vld [vmem:[#allocation19 + $0x14] ss:$0 sm:$0xff]  ;;  %v5484_v14 = vadd.f32 %v5468_v34, %v5431_v17  ;;  %v4047_v24 = vadd.f32 %v4031_v23, %v3994_v0  ;;  %v10595_v5 = vld [vmem:[#allocation3 + $0x141] sm:$0xff]  ;;  %12055 = vst [vmem:[#allocation104_spill] sm:$0xff] %v10597_v39  ;;  %12056 = vst [vmem:[#allocation37_spill] sm:$0xff] %v10599_v43 }
 0x465   :  { %12053 = vst [vmem:[#allocation46_spill] sm:$0xff] %v10589_v12  ;;  %v4250_v25 = vmul.f32 %v10589_v12, %v10560_v3  ;;  %12054 = vst [vmem:[#allocation41_spill] sm:$0xff] %v10595_v5  ;;  %v5641_v52 = vadd.f32 %v5625_v47, %v5588_v22  ;;  %v5731_v10 = vmul.f32 %v10599_v43, %v10597_v39  ;;  %v5659_v61 = vld [vmem:[#allocation3 + $0xd5] sm:$0xff]  ;;  %v4222_v45 = vld [vmem:[#allocation3 + $0x66] sm:$0xff] }
 0x466   :  { %v4213_v21 = vadd.f32 %v4197_v2, %v4160_v37  ;;  %v10603_v3 = vld [vmem:[#allocation19 + $0x15] ss:$0 sm:$0xff]  ;;  %v5537_v23 = vadd.f32 %v5521_v48, %v5484_v14  ;;  %v5627_v32 = vmul.f32 %v10562_v42, %v5606_v54  ;;  %v4100_v49 = vadd.f32 %v4084_v9, %v4047_v24  ;;  %v10609_v47 = vld [vmem:[#allocation3 + $0x142] sm:$0xff]  ;;  %v5712_v0 = vld [vmem:[#allocation3 + $0xd6] sm:$0xff] }
 0x467   :  { %v4303_v34 = vmul.f32 %v10603_v3, %v10580_v62  ;;  %v4190_v22 = vmul.f32 %v10572_v30, %v4169_v36  ;;  %12057 = vst [vmem:[#allocation86_spill] sm:$0xff] %v10609_v47  ;;  %v5694_v17 = vadd.f32 %v5678_v31, %v5641_v52  ;;  %v4275_v1 = vld [vmem:[#allocation3 + $0x70] sm:$0xff]  ;;  %v10611_v44 = vld [vmem:[#allocation19 + $0x16] ss:$0 sm:$0xff]  ;;  %v5680_v62 = vmul.f32 %v10582_v13, %v5659_v61  ;;  %v10617_v9 = vld [vmem:[#allocation3 + $0x143] sm:$0xff] }
 0x468   :  { %v4266_v43 = vadd.f32 %v4250_v25, %v4213_v21  ;;  %v4356_v2 = vmul.f32 %v10611_v44, %v10595_v5  ;;  %v5590_v37 = vadd.f32 %v5574_v20, %v5537_v23  ;;  %v4153_v48 = vadd.f32 %v4137_v7, %v4100_v49  ;;  %12058 = vst [vmem:[#allocation105_spill] sm:$0xff] %v10617_v9  ;;  %v4328_v14 = vld [vmem:[#allocation3 + $0x71] sm:$0xff]  ;;  %v10619_v31 = vld [vmem:[#allocation19 + $0x17] ss:$0 sm:$0xff]  ;;  %v10625_v61 = vld [vmem:[#allocation3 + $0x144] sm:$0xff] }
 0x469   :  { %v4243_v54 = vmul.f32 %v10589_v12, %v4222_v45  ;;  %v5747_v36 = vadd.f32 %v5731_v10, %v5694_v17  ;;  %12059 = vst [vmem:[#allocation91_spill] sm:$0xff] %v10619_v31  ;;  %v4409_v52 = vmul.f32 %v10619_v31, %v10609_v47  ;;  %v5733_v25 = vmul.f32 %v10597_v39, %v5712_v0  ;;  %v6871_v7 = vld [vmem:[#allocation3 + $0x76] sm:$0xff]  ;;  %v6874_v17 = vld [vmem:[#allocation3 + $0xa0] sm:$0xff] }
 0x46a   :  { %v4319_v24 = vadd.f32 %v4303_v34, %v4266_v43  ;;  %v5643_v21 = vadd.f32 %v5627_v32, %v5590_v37  ;;  %v4206_v5 = vadd.f32 %v4190_v22, %v4153_v48  ;;  %v4296_v20 = vmul.f32 %v10603_v3, %v4275_v1  ;;  %12060 = vst [vmem:[#allocation92_spill] sm:$0xff] %v10625_v61  ;;  %v4381_v23 = vld [vmem:[#allocation3 + $0x72] sm:$0xff]  ;;  %v10629_v34 = vld [vmem:[#allocation19 + $0x18] ss:$0 sm:$0xff]  ;;  %v10639_v48 = vld [vmem:[#allocation3 + $0x145] sm:$0xff] }
 0x46b   :  { %v3873_v45 = vmul.f32 %v6871_v7, %v10522_v59  ;;  %v5773_v10 = vsel %vm3037_vm4, %v5747_v36, 0.0  ;;  %12061 = vst [vmem:[#allocation94_spill] sm:$0xff] %v10629_v34  ;;  %v4462_v49 = vmul.f32 %v10629_v34, %v10617_v9  ;;  %v10633_v32 = vld [vmem:[#allocation19 + $0x1c] ss:$0 sm:$0xff]  ;;  %v4349_v37 = vmul.f32 %v10611_v44, %v4328_v14  ;;  %12064 = vst [vmem:[#allocation89_spill] sm:$0xff] %v10639_v48  ;;  %v6878_v9 = vld [vmem:[#allocation3 + $0xa2] sm:$0xff] }
 0x46c   :  { %v4372_v43 = vadd.f32 %v4356_v2, %v4319_v24  ;;  %12062 = vst [vmem:[#allocation68_spill] sm:$0xff] %v10633_v32  ;;  %v10636_v22 = vmul.f32 %v6874_v17, %v10633_v32  ;;  %5774 = vadd.xlane.f32.xlu1 %v5773_v10  ;;  %v5696_v1 = vadd.f32 %v5680_v62, %v5643_v21  ;;  %v10641_v36 = vld [vmem:[#allocation19 + $0x1d] ss:$0 sm:$0xff]  ;;  %v6876_v2 = vld [vmem:[#allocation3 + $0xa1] sm:$0xff]  ;;  %v10646_v7 = vld [vmem:[#allocation19 + $0x1e] ss:$0 sm:$0xff] }
 0x46d   :  { %v4259_v0 = vadd.f32 %v4243_v54, %v4206_v5  ;;  %12065 = vst [vmem:[#allocation81_spill] sm:$0xff] %v10641_v36  ;;  %v10644_v24 = vmul.f32 %v6876_v2, %v10641_v36  ;;  %12067 = vst [vmem:[#allocation55_spill] sm:$0xff] %v10646_v7  ;;  %v10649_v47 = vmul.f32 %v6878_v9, %v10646_v7  ;;  %v4434_v17 = vld [vmem:[#allocation3 + $0x73] sm:$0xff]  ;;  %v10651_v62 = vld [vmem:[#allocation19 + $0x19] ss:$0 sm:$0xff] }
 0x46e   :  { %12063 = vst [vmem:[#allocation80_spill] sm:$0xff] %v10636_v22  ;;  %v4425_v10 = vadd.f32 %v4409_v52, %v4372_v43  ;;  %12069 = vst [vmem:[#allocation88_spill] sm:$0xff] %v10651_v62  ;;  %v4515_v5 = vmul.f32 %v10651_v62, %v10625_v61  ;;  %v6880_v54 = vld [vmem:[#allocation3 + $0x146] sm:$0xff]  ;;  %v5749_v21 = vadd.f32 %v5733_v25, %v5696_v1  ;;  %v4487_v22 = vld [vmem:[#allocation3 + $0x74] sm:$0xff] }
 0x46f   :  { %12066 = vst [vmem:[#allocation40_spill] sm:$0xff] %v10644_v24  ;;  %12068 = vst [vmem:[#allocation97_spill] sm:$0xff] %v10649_v47  ;;  %v10656_v14 = vmul.f32 %v6880_v54, %v10522_v59  ;;  %v4312_v2 = vadd.f32 %v4296_v20, %v4259_v0  ;;  %v4402_v24 = vmul.f32 %v10619_v31, %v4381_v23  ;;  %v10659_v6 = vld [vmem:[#allocation3 + $0x146] sm:$0xff]  ;;  %v4540_v9 = vld [vmem:[#allocation3 + $0x75] sm:$0xff] }
 0x470   :  { %12071 = vst [vmem:[#allocation32_spill] sm:$0xff] %v10659_v6  ;;  %v4593_v47 = vld [vmem:[#allocation3 + $0x76] sm:$0xff]  ;;  %v4478_v63 = vadd.f32 %v4462_v49, %v4425_v10  ;;  %v10661_v52 = vld [vmem:[#allocation19 + $0x1a] ss:$0 sm:$0xff]  ;;  %v12073_v61 = vld [vmem:[#allocation99_spill] sm:$0xff]  ;;  %v3927_v54 = vmul.f32 %v6882_v29, %v10533_v15  ;;  %v5779_v25 = vsel %vm3037_vm4, %v5749_v21, 0.0  ;;  %v4455_v23 = vmul.f32 %v10629_v34, %v4434_v17 }
 0x471   :  { %12070 = vst [vmem:[#allocation62_spill] sm:$0xff] %v10656_v14  ;;  %12072 = vst [vmem:[#allocation63_spill] sm:$0xff] %v10661_v52  ;;  %v4568_v43 = vmul.f32 %v10661_v52, %v10639_v48  ;;  %v3889_v39 = vadd.f32 %v3873_v45, %v12073_v61  ;;  %v4365_v20 = vadd.f32 %v4349_v37, %v4312_v2  ;;  %v10669_v1 = vld [vmem:[#allocation3 + $0x150] sm:$0xff]  ;;  %v6883_v0 = vld [vmem:[#allocation3 + $0x81] sm:$0xff]  ;;  %5780 = vadd.xlane.f32.xlu1 %v5779_v25 }
 0x472   :  { %12074 = vst [vmem:[#allocation49_spill] sm:$0xff] %v10669_v1  ;;  %v3980_v49 = vmul.f32 %v6883_v0, %v10543_v18  ;;  %v4531_v10 = vadd.f32 %v4515_v5, %v4478_v63  ;;  %v10672_v14 = vld [vmem:[#allocation19 + $0x1b] ss:$0 sm:$0xff]  ;;  %v6885_v48 = vld [vmem:[#allocation3 + $0x82] sm:$0xff]  ;;  %v4508_v37 = vmul.f32 %v10651_v62, %v4487_v22  ;;  %v4561_v17 = vmul.f32 %v10661_v52, %v4540_v9  ;;  %v6896_v42 = vld [vmem:[#allocation19 + $0x2] ss:$0 sm:$0xff] }
 0x473   :  { %12075 = vst [vmem:[#allocation70_spill] sm:$0xff] %v10672_v14  ;;  %v4621_v61 = vmul.f32 %v10672_v14, %v10659_v6  ;;  %v3943_v45 = vadd.f32 %v3927_v54, %v3889_v39  ;;  %v4033_v15 = vmul.f32 %v6885_v48, %v10557_v41  ;;  %v4418_v21 = vadd.f32 %v4402_v24, %v4365_v20  ;;  %v10680_v59 = vld [vmem:[#allocation3 + $0x151] sm:$0xff]  ;;  %v6886_v18 = vld [vmem:[#allocation3 + $0x83] sm:$0xff] }
 0x474   :  { %v4614_v2 = vmul.f32 %v10672_v14, %v4593_v47  ;;  %12076 = vst [vmem:[#allocation101_spill] sm:$0xff] %v10680_v59  ;;  %v4584_v25 = vadd.f32 %v4568_v43, %v4531_v10  ;;  %v4675_v63 = vmul.f32 %v10633_v32, %v10669_v1  ;;  %v4086_v39 = vmul.f32 %v6886_v18, %v10577_v11  ;;  %v10692_v47 = vld [vmem:[#allocation3 + $0x152] sm:$0xff]  ;;  %v6893_v11 = vld [vmem:[#allocation3 + $0x86] sm:$0xff] }
 0x475   :  { %v3996_v5 = vadd.f32 %v3980_v49, %v3943_v45  ;;  %v4471_v54 = vadd.f32 %v4455_v23, %v4418_v21  ;;  %v4668_v6 = vmul.f32 %v6882_v29, %v10633_v32  ;;  %v10687_v24 = vmul.f32 %v6883_v0, %v10641_v36  ;;  %12077 = vst [vmem:[#allocation95_spill] sm:$0xff] %v10692_v47  ;;  %v6887_v49 = vld [vmem:[#allocation3 + $0x84] sm:$0xff]  ;;  %v10697_v23 = vld [vmem:[#allocation19 + $0x1f] ss:$0 sm:$0xff]  ;;  %v10702_v0 = vld [vmem:[#allocation19 + $0x20] ss:$0 sm:$0xff] }
 0x476   :  { %v10690_v22 = vmul.f32 %v6885_v48, %v10646_v7  ;;  %v4637_v9 = vadd.f32 %v4621_v61, %v4584_v25  ;;  %v4728_v43 = vmul.f32 %v10641_v36, %v10680_v59  ;;  %v4139_v10 = vmul.f32 %v6887_v49, %v10568_v33  ;;  %12078 = vst [vmem:[#allocation53_spill] sm:$0xff] %v10697_v23  ;;  %v10707_v21 = vld [vmem:[#allocation19 + $0x21] ss:$0 sm:$0xff]  ;;  %v6891_v61 = vld [vmem:[#allocation3 + $0x85] sm:$0xff] }
 0x477   :  { %v4049_v20 = vadd.f32 %v4033_v15, %v3996_v5  ;;  %v4524_v45 = vadd.f32 %v4508_v37, %v4471_v54  ;;  %v10700_v29 = vmul.f32 %v10697_v23, %v6886_v18  ;;  %12079 = vst [vmem:[#allocation85_spill] sm:$0xff] %v10702_v0  ;;  %v10705_v48 = vmul.f32 %v10702_v0, %v6887_v49  ;;  %v10712_v15 = vld [vmem:[#allocation3 + $0x153] sm:$0xff]  ;;  %v3221_v46 = vld [vmem:[#allocation3 + $0x121] sm:$0xff] }
 0x478   :  { %12080 = vst [vmem:[#allocation52_spill] sm:$0xff] %v10707_v21  ;;  %v10710_v25 = vmul.f32 %v6891_v61, %v10707_v21  ;;  %12081 = vst [vmem:[#allocation56_spill] sm:$0xff] %v10712_v15  ;;  %v5019_v5 = vld [vmem:[#allocation3 + $0x90] sm:$0xff]  ;;  %v4691_v54 = vadd.f32 %v4675_v63, %v4637_v9  ;;  %v4781_v18 = vmul.f32 %v10646_v7, %v10692_v47  ;;  %v10717_v49 = vld [vmem:[#allocation19 + $0x22] ss:$0 sm:$0xff] }
 0x479   :  { %v5072_v37 = vld [vmem:[#allocation3 + $0x91] sm:$0xff]  ;;  %v4102_v36 = vadd.f32 %v4086_v39, %v4049_v20  ;;  %v4192_v32 = vmul.f32 %v6891_v61, %v10572_v30  ;;  %v4577_v33 = vadd.f32 %v4561_v17, %v4524_v45  ;;  %12082 = vst [vmem:[#allocation57_spill] sm:$0xff] %v10717_v49  ;;  %v10720_v41 = vmul.f32 %v6893_v11, %v10717_v49  ;;  %v3168_v7 = vld [vmem:[#allocation3 + $0x120] sm:$0xff] }
 0x47a   :  { %v10723_v59 = vmul.f32 %v10382_v40, %v5019_v5  ;;  %v10726_v1 = vmul.f32 %v10457_v35, %v5072_v37  ;;  %v5125_v63 = vld [vmem:[#allocation3 + $0x92] sm:$0xff]  ;;  %v4744_v61 = vadd.f32 %v4728_v43, %v4691_v54  ;;  %v4834_v17 = vmul.f32 %v10697_v23, %v10712_v15  ;;  %v3274_v43 = vld [vmem:[#allocation3 + $0x122] sm:$0xff] }
 0x47b   :  { %v10728_v9 = vld [vmem:[#allocation3 + $0x154] sm:$0xff]  ;;  %v4155_v30 = vadd.f32 %v4139_v10, %v4102_v36  ;;  %v4245_v47 = vmul.f32 %v6893_v11, %v10589_v12  ;;  %v4630_v13 = vadd.f32 %v4614_v2, %v4577_v33  ;;  %v10736_v27 = vmul.f32 %v10474_v8, %v5125_v63 }
 0x47c   :  { %12083 = vst [vmem:[#allocation79_spill] sm:$0xff] %v10723_v59  ;;  %12084 = vst [vmem:[#allocation78_spill] sm:$0xff] %v10726_v1  ;;  %v5178_v39 = vld [vmem:[#allocation3 + $0x93] sm:$0xff]  ;;  %v4797_v54 = vadd.f32 %v4781_v18, %v4744_v61  ;;  %v4887_v15 = vmul.f32 %v10702_v0, %v10728_v9  ;;  %v4298_v33 = vmul.f32 %v10603_v3, %v5019_v5  ;;  %v10752_v18 = vld [vmem:[#allocation3 + $0x160] sm:$0xff] }
 0x47d   :  { %12085 = vst [vmem:[#allocation83_spill] sm:$0xff] %v10728_v9  ;;  %v5231_v20 = vld [vmem:[#allocation3 + $0x94] sm:$0xff]  ;;  %12086 = vst [vmem:[#allocation42_spill] sm:$0xff] %v10736_v27  ;;  %v10739_v1 = vmul.f32 %v10405_v19, %v5178_v39  ;;  %v4208_v36 = vadd.f32 %v4192_v32, %v4155_v30  ;;  %v4684_v11 = vadd.f32 %v4668_v6, %v4630_v13 }
 0x47e   :  { %v10732_v45 = vld [vmem:[#allocation3 + $0x155] sm:$0xff]  ;;  %v10742_v59 = vmul.f32 %v10470_v58, %v5231_v20  ;;  %v4351_v10 = vmul.f32 %v10611_v44, %v5072_v37  ;;  %v4850_v58 = vadd.f32 %v4834_v17, %v4797_v54  ;;  %v3295_v30 = vmul.f32 %v6896_v42, %v3274_v43  ;;  %v10761_v17 = vld [vmem:[#allocation3 + $0x161] sm:$0xff] }
 0x47f   :  { %12087 = vst [vmem:[#allocation90_spill] sm:$0xff] %v10739_v1  ;;  %v10746_v23 = vld [vmem:[#allocation3 + $0x156] sm:$0xff]  ;;  %v4940_v2 = vmul.f32 %v10707_v21, %v10732_v45  ;;  %v4261_v61 = vadd.f32 %v4245_v47, %v4208_v36  ;;  %v4737_v32 = vadd.f32 %v10687_v24, %v4684_v11  ;;  %v5047_v43 = vmul.f32 %v10382_v40, %v10752_v18 }
 0x480   :  { %12088 = vst [vmem:[#allocation102_spill] sm:$0xff] %v10742_v59  ;;  %v6894_v12 = vld [vmem:[#allocation19] ss:$0 sm:$0xff]  ;;  %v3327_v59 = vld [vmem:[#allocation3 + $0x123] sm:$0xff]  ;;  %v6895_v9 = vld [vmem:[#allocation19 + $0x1] ss:$0 sm:$0xff]  ;;  %v4993_v6 = vmul.f32 %v10717_v49, %v10746_v23  ;;  %v4903_v37 = vadd.f32 %v4887_v15, %v4850_v58  ;;  %v4457_v36 = vmul.f32 %v10629_v34, %v5178_v39 }
 0x481   :  { %v3189_v1 = vmul.f32 %v6894_v12, %v3168_v7  ;;  %v5284_v27 = vld [vmem:[#allocation3 + $0x95] sm:$0xff]  ;;  %v3242_v0 = vmul.f32 %v6895_v9, %v3221_v46  ;;  %v4404_v12 = vmul.f32 %v10619_v31, %v5125_v63  ;;  %v3380_v7 = vld [vmem:[#allocation3 + $0x124] sm:$0xff]  ;;  %v4314_v47 = vadd.f32 %v4298_v33, %v4261_v61 }
 0x482   :  { %v10756_v13 = vmul.f32 %v10485_v4, %v5284_v27  ;;  %v5337_v5 = vld [vmem:[#allocation3 + $0x96] sm:$0xff]  ;;  %v4790_v42 = vadd.f32 %v10690_v22, %v4737_v32  ;;  %v3433_v63 = vld [vmem:[#allocation3 + $0x125] sm:$0xff]  ;;  %v4956_v11 = vadd.f32 %v4940_v2, %v4903_v37  ;;  %v5100_v33 = vmul.f32 %v10457_v35, %v10761_v17 }
 0x483   :  { %v3258_v54 = vadd.f32 %v3242_v0, %v3189_v1  ;;  %v6897_v46 = vld [vmem:[#allocation19 + $0x3] ss:$0 sm:$0xff]  ;;  %v10765_v24 = vmul.f32 %v10496_v38, %v5337_v5  ;;  %v10770_v31 = vld [vmem:[#allocation3 + $0x162] sm:$0xff]  ;;  %v4367_v58 = vadd.f32 %v4351_v10, %v4314_v47  ;;  %v3401_v1 = vmul.f32 %v10397_v16, %v3380_v7 }
 0x484   :  { %v3348_v9 = vmul.f32 %v6897_v46, %v3327_v59  ;;  %12089 = vst [vmem:[#allocation93_spill] sm:$0xff] %v10770_v31  ;;  %v4843_v59 = vadd.f32 %v10700_v29, %v4790_v42  ;;  %v6898_v0 = vld [vmem:[#allocation3 + $0xa0] sm:$0xff]  ;;  %v4510_v61 = vmul.f32 %v10651_v62, %v5231_v20  ;;  %v5009_v32 = vadd.f32 %v4993_v6, %v4956_v11  ;;  %v3540_v20 = vld [vmem:[#allocation3 + $0x130] sm:$0xff] }
 0x485   :  { %v3311_v15 = vadd.f32 %v3295_v30, %v3258_v54  ;;  %v10775_v22 = vmul.f32 %v6898_v0, %v10508_v26  ;;  %v3486_v39 = vld [vmem:[#allocation3 + $0x126] sm:$0xff]  ;;  %v4420_v37 = vadd.f32 %v4404_v12, %v4367_v58  ;;  %v3454_v30 = vmul.f32 %v10423_v60, %v3433_v63  ;;  %v10832_v62 = vld [vmem:[#allocation3 + $0x172] sm:$0xff] }
 0x486   :  { %v10780_v2 = vld [vmem:[#allocation3 + $0x163] sm:$0xff]  ;;  %v4896_v16 = vadd.f32 %v10705_v48, %v4843_v59  ;;  %v5153_v47 = vmul.f32 %v10474_v8, %v10770_v31  ;;  %v4563_v54 = vmul.f32 %v10661_v52, %v5284_v27  ;;  %v5063_v46 = vadd.f32 %v5047_v43, %v5009_v32  ;;  %v3593_v27 = vld [vmem:[#allocation3 + $0x131] sm:$0xff] }
 0x487   :  { %12090 = vst [vmem:[#allocation43_spill] sm:$0xff] %v10780_v2  ;;  %v3364_v10 = vadd.f32 %v3348_v9, %v3311_v15  ;;  %v6899_v29 = vld [vmem:[#allocation3 + $0xa1] sm:$0xff]  ;;  %v4473_v42 = vadd.f32 %v4457_v36, %v4420_v37  ;;  %v3507_v9 = vmul.f32 %v10431_v56, %v3486_v39  ;;  %v5206_v11 = vmul.f32 %v10405_v19, %v10780_v2  ;;  %v10846_v34 = vld [vmem:[#allocation3 + $0x175] sm:$0xff] }
 0x488   :  { %v10785_v7 = vmul.f32 %v6899_v29, %v10525_v55  ;;  %v10790_v6 = vld [vmem:[#allocation3 + $0x164] sm:$0xff]  ;;  %v4949_v60 = vadd.f32 %v10710_v25, %v4896_v16  ;;  %v4616_v58 = vmul.f32 %v10672_v14, %v5337_v5  ;;  %v5116_v15 = vadd.f32 %v5100_v33, %v5063_v46  ;;  %v3646_v33 = vld [vmem:[#allocation3 + $0x132] sm:$0xff] }
 0x489   :  { %12091 = vst [vmem:[#allocation84_spill] sm:$0xff] %v10790_v6  ;;  %v3417_v12 = vadd.f32 %v3401_v1, %v3364_v10  ;;  %v6900_v48 = vld [vmem:[#allocation3 + $0xa2] sm:$0xff]  ;;  %v4526_v59 = vadd.f32 %v4510_v61, %v4473_v42  ;;  %v3561_v1 = vmul.f32 %v10437_v51, %v3540_v20  ;;  %v10806_v25 = vmul.f32 %v10550_v28, %v10391_v57  ;;  %v10816_v61 = vld [vmem:[#allocation3 + $0x170] sm:$0xff]  ;;  %v12100_v46 = vld [vmem:[#allocation38_spill] sm:$0xff] }
 0x48a   :  { %v10795_v63 = vmul.f32 %v6900_v48, %v10536_v53  ;;  %v10800_v43 = vld [vmem:[#allocation3 + $0x165] sm:$0xff]  ;;  %v5002_v56 = vadd.f32 %v10720_v41, %v4949_v60  ;;  %v5169_v37 = vadd.f32 %v5153_v47, %v5116_v15  ;;  %12096 = vst [vmem:[#allocation106_spill] sm:$0xff] %v10816_v61  ;;  %v10818_v51 = vld [vmem:[#allocation3 + $0x171] sm:$0xff] }
 0x48b   :  { %12092 = vst [vmem:[#allocation99_spill] sm:$0xff] %v10800_v43  ;;  %v3470_v36 = vadd.f32 %v3454_v30, %v3417_v12  ;;  %v12093_v0 = vld [vmem:[#allocation72_spill] sm:$0xff]  ;;  %12097 = vst [vmem:[#allocation107_spill] sm:$0xff] %v10818_v51  ;;  %v4579_v41 = vadd.f32 %v4563_v54, %v4526_v59  ;;  %v12098_v16 = vld [vmem:[#allocation75_spill] sm:$0xff]  ;;  %v5312_v47 = vmul.f32 %v10485_v4, %v10800_v43 }
 0x48c   :  { %v10810_v39 = vmul.f32 %v12093_v0, %v10446_v50  ;;  %v12094_v5 = vld [vmem:[#allocation36_spill] sm:$0xff]  ;;  %v3614_v57 = vmul.f32 %v12098_v16, %v3593_v27  ;;  %v12099_v29 = vld [vmem:[#allocation79_spill] sm:$0xff]  ;;  %v12102_v60 = vld [vmem:[#allocation29_spill] sm:$0xff]  ;;  %v5222_v52 = vadd.f32 %v5206_v11, %v5169_v37  ;;  %12104 = vst [vmem:[#allocation75_spill] sm:$0xff] %v10832_v62  ;;  %v5472_v43 = vmul.f32 %v10525_v55, %v10818_v51 }
 0x48d   :  { %v5259_v32 = vmul.f32 %v12094_v5, %v10790_v6  ;;  %v10814_v10 = vld [vmem:[#allocation3 + $0x166] sm:$0xff]  ;;  %v3523_v30 = vadd.f32 %v3507_v9, %v3470_v36  ;;  %v5056_v20 = vadd.f32 %v12099_v29, %v5002_v56  ;;  %v3699_v15 = vld [vmem:[#allocation3 + $0x133] sm:$0xff]  ;;  %v4632_v9 = vadd.f32 %v4616_v58, %v4579_v41  ;;  %12109 = vst [vmem:[#allocation29_spill] sm:$0xff] %v10846_v34 }
 0x48e   :  { %12095 = vst [vmem:[#allocation36_spill] sm:$0xff] %v10814_v10  ;;  %v12101_v42 = vld [vmem:[#allocation39_spill] sm:$0xff]  ;;  %v12103_v48 = vld [vmem:[#allocation104_spill] sm:$0xff]  ;;  %v10834_v54 = vld [vmem:[#allocation3 + $0x173] sm:$0xff]  ;;  %v5365_v29 = vmul.f32 %v10496_v38, %v10814_v10  ;;  %v5419_v6 = vmul.f32 %v10508_v26, %v10816_v61 }
 0x48f   :  { %v10824_v12 = vmul.f32 %v12101_v42, %v12100_v46  ;;  %v10828_v14 = vmul.f32 %v12103_v48, %v12102_v60  ;;  %12105 = vst [vmem:[#allocation79_spill] sm:$0xff] %v10834_v54  ;;  %v3577_v27 = vadd.f32 %v3561_v1, %v3523_v30  ;;  %v12106_v59 = vld [vmem:[#allocation65_spill] sm:$0xff]  ;;  %v12107_v56 = vld [vmem:[#allocation78_spill] sm:$0xff]  ;;  %v5275_v11 = vadd.f32 %v5259_v32, %v5222_v52  ;;  %v12110_v58 = vld [vmem:[#allocation80_spill] sm:$0xff] }
 0x490   :  { %v3667_v36 = vmul.f32 %v12106_v59, %v3646_v33  ;;  %v5109_v16 = vadd.f32 %v12107_v56, %v5056_v20  ;;  %v10844_v37 = vld [vmem:[#allocation3 + $0x174] sm:$0xff]  ;;  %v4686_v1 = vadd.f32 %v12110_v58, %v4632_v9  ;;  %v5525_v56 = vmul.f32 %v10536_v53, %v10832_v62  ;;  %v6901_v10 = vld [vmem:[#allocation3 + $0xa3] sm:$0xff] }
 0x491   :  { %12108 = vst [vmem:[#allocation38_spill] sm:$0xff] %v10844_v37  ;;  %v3630_v41 = vadd.f32 %v3614_v57, %v3577_v27  ;;  %v12111_v33 = vld [vmem:[#allocation58_spill] sm:$0xff]  ;;  %v5578_v61 = vmul.f32 %v10550_v28, %v10834_v54  ;;  %v12113_v51 = vld [vmem:[#allocation53_spill] sm:$0xff]  ;;  %v5328_v32 = vadd.f32 %v5312_v47, %v5275_v11  ;;  %v12115_v55 = vld [vmem:[#allocation40_spill] sm:$0xff] }
 0x492   :  { %v3720_v30 = vmul.f32 %v12111_v33, %v3699_v15  ;;  %v12112_v20 = vld [vmem:[#allocation42_spill] sm:$0xff]  ;;  %v4829_v52 = vmul.f32 %v6901_v10, %v12113_v51  ;;  %v4739_v31 = vadd.f32 %v12115_v55, %v4686_v1  ;;  %v12116_v57 = vld [vmem:[#allocation44_spill] sm:$0xff]  ;;  %v5631_v33 = vmul.f32 %v12093_v0, %v10844_v37  ;;  %v12119_v54 = vld [vmem:[#allocation85_spill] sm:$0xff] }
 0x493   :  { %v5162_v59 = vadd.f32 %v12112_v20, %v5109_v16  ;;  %v10856_v2 = vld [vmem:[#allocation3 + $0x176] sm:$0xff]  ;;  %v3683_v9 = vadd.f32 %v3667_v36, %v3630_v41  ;;  %v12117_v27 = vld [vmem:[#allocation76_spill] sm:$0xff]  ;;  %v5684_v20 = vmul.f32 %v12101_v42, %v10846_v34  ;;  %v4882_v10 = vmul.f32 %v12119_v54, %v10446_v50 }
 0x494   :  { %12114 = vst [vmem:[#allocation65_spill] sm:$0xff] %v10856_v2  ;;  %v3773_v15 = vmul.f32 %v12117_v27, %v12116_v57  ;;  %v12118_v58 = vld [vmem:[#allocation90_spill] sm:$0xff]  ;;  %v5381_v47 = vadd.f32 %v5365_v29, %v5328_v32  ;;  %v12120_v11 = vld [vmem:[#allocation97_spill] sm:$0xff]  ;;  %v12122_v36 = vld [vmem:[#allocation64_spill] sm:$0xff]  ;;  %v4935_v27 = vmul.f32 %v10707_v21, %v12100_v46 }
 0x495   :  { %v5215_v16 = vadd.f32 %v12118_v58, %v5162_v59  ;;  %v4792_v51 = vadd.f32 %v12120_v11, %v4739_v31  ;;  %v3736_v62 = vadd.f32 %v3720_v30, %v3683_v9  ;;  %v12121_v55 = vld [vmem:[#allocation73_spill] sm:$0xff]  ;;  %v12123_v41 = vld [vmem:[#allocation102_spill] sm:$0xff]  ;;  %v5737_v59 = vmul.f32 %v12103_v48, %v10856_v2  ;;  %v12124_v32 = vld [vmem:[#allocation67_spill] sm:$0xff] }
 0x496   :  { %v3826_v1 = vmul.f32 %v12122_v36, %v12121_v55  ;;  %v4988_v58 = vmul.f32 %v10717_v49, %v12102_v60  ;;  %v5435_v34 = vadd.f32 %v5419_v6, %v5381_v47  ;;  %v12125_v31 = vld [vmem:[#allocation87_spill] sm:$0xff]  ;;  %v12126_v11 = vld [vmem:[#allocation50_spill] sm:$0xff]  ;;  %v12129_v2 = vld [vmem:[#allocation33_spill] sm:$0xff] }
 0x497   :  { %v5268_v57 = vadd.f32 %v12123_v41, %v5215_v16  ;;  %v4845_v50 = vadd.f32 %v4829_v52, %v4792_v51  ;;  %v3789_v29 = vadd.f32 %v3773_v15, %v3736_v62  ;;  %v3879_v30 = vmul.f32 %v12125_v31, %v12124_v32  ;;  %v12127_v55 = vld [vmem:[#allocation66_spill] sm:$0xff]  ;;  %v12131_v6 = vld [vmem:[#allocation49_spill] sm:$0xff]  ;;  %v12133_v15 = vld [vmem:[#allocation60_spill] sm:$0xff] }
 0x498   :  { %v5042_v16 = vmul.f32 %v12126_v11, %v10382_v40  ;;  %v12128_v36 = vld [vmem:[#allocation34_spill] sm:$0xff]  ;;  %v5488_v21 = vadd.f32 %v5472_v43, %v5435_v34  ;;  %v12132_v52 = vld [vmem:[#allocation41_spill] sm:$0xff] }
 0x499   :  { %v5321_v9 = vadd.f32 %v10756_v13, %v5268_v57  ;;  %v3933_v41 = vmul.f32 %v12128_v36, %v12127_v55  ;;  %v12130_v37 = vld [vmem:[#allocation62_spill] sm:$0xff]  ;;  %v4898_v54 = vadd.f32 %v4882_v10, %v4845_v50  ;;  %v3842_v60 = vadd.f32 %v3826_v1, %v3789_v29  ;;  %v12134_v47 = vld [vmem:[#allocation101_spill] sm:$0xff]  ;;  %v12135_v57 = vld [vmem:[#allocation95_spill] sm:$0xff] }
 0x49a   :  { %v3896_v46 = vadd.f32 %v12130_v37, %v12129_v2  ;;  %v3934_v62 = vmul.f32 %v12128_v36, %v12131_v6  ;;  %v3986_v13 = vmul.f32 %v12133_v15, %v12132_v52  ;;  %v3987_v40 = vmul.f32 %v12133_v15, %v12134_v47  ;;  %v12136_v32 = vld [vmem:[#allocation30_spill] sm:$0xff]  ;;  %v12139_v50 = vld [vmem:[#allocation56_spill] sm:$0xff]  ;;  %v12140_v29 = vld [vmem:[#allocation77_spill] sm:$0xff] }
 0x49b   :  { %v5374_v51 = vadd.f32 %v10765_v24, %v5321_v9  ;;  %v4040_v11 = vmul.f32 %v12136_v32, %v12135_v57  ;;  %v5541_v55 = vadd.f32 %v5525_v56, %v5488_v21  ;;  %v4951_v49 = vadd.f32 %v4935_v27, %v4898_v54  ;;  %v12137_v37 = vld [vmem:[#allocation54_spill] sm:$0xff]  ;;  %v12141_v54 = vld [vmem:[#allocation31_spill] sm:$0xff]  ;;  %v12142_v27 = vld [vmem:[#allocation105_spill] sm:$0xff] }
 0x49c   :  { %v3895_v2 = vadd.f32 %v3879_v30, %v3842_v60  ;;  %v3950_v34 = vadd.f32 %v3934_v62, %v3896_v46  ;;  %v5095_v10 = vmul.f32 %v12137_v37, %v10457_v35  ;;  %v12138_v1 = vld [vmem:[#allocation86_spill] sm:$0xff]  ;;  %v4093_v9 = vmul.f32 %v12140_v29, %v12139_v50  ;;  %v12143_v30 = vld [vmem:[#allocation83_spill] sm:$0xff] }
 0x49d   :  { %v5428_v43 = vadd.f32 %v10775_v22, %v5374_v51  ;;  %v4039_v24 = vmul.f32 %v12136_v32, %v12138_v1  ;;  %v5594_v52 = vadd.f32 %v5578_v61, %v5541_v55  ;;  %v5004_v48 = vadd.f32 %v4988_v58, %v4951_v49  ;;  %v12144_v46 = vld [vmem:[#allocation71_spill] sm:$0xff] }
 0x49e   :  { %v3949_v42 = vadd.f32 %v3933_v41, %v3895_v2  ;;  %v4003_v0 = vadd.f32 %v3987_v40, %v3950_v34  ;;  %v5148_v56 = vmul.f32 %v12141_v54, %v10474_v8  ;;  %v4092_v22 = vmul.f32 %v12140_v29, %v12142_v27  ;;  %v12145_v49 = vld [vmem:[#allocation59_spill] sm:$0xff]  ;;  %v12146_v41 = vld [vmem:[#allocation92_spill] sm:$0xff]  ;;  %v12147_v40 = vld [vmem:[#allocation74_spill] sm:$0xff] }
 0x49f   :  { %v5481_v21 = vadd.f32 %v10785_v7, %v5428_v43  ;;  %v4146_v60 = vmul.f32 %v12144_v46, %v12143_v30  ;;  %v5647_v62 = vadd.f32 %v5631_v33, %v5594_v52  ;;  %v5058_v51 = vadd.f32 %v5042_v16, %v5004_v48  ;;  %v12149_v48 = vld [vmem:[#allocation89_spill] sm:$0xff] }
 0x4a0   :  { %v4002_v37 = vadd.f32 %v3986_v13, %v3949_v42  ;;  %v4056_v1 = vadd.f32 %v4040_v11, %v4003_v0  ;;  %v5201_v58 = vmul.f32 %v12145_v49, %v10405_v19  ;;  %v4145_v7 = vmul.f32 %v12144_v46, %v12146_v41  ;;  %v12148_v42 = vld [vmem:[#allocation47_spill] sm:$0xff]  ;;  %v12150_v19 = vld [vmem:[#allocation46_spill] sm:$0xff] }
 0x4a1   :  { %v5534_v61 = vadd.f32 %v10795_v63, %v5481_v21  ;;  %v4199_v55 = vmul.f32 %v12147_v40, %v10732_v45  ;;  %v5700_v2 = vadd.f32 %v5684_v20, %v5647_v62  ;;  %v5111_v34 = vadd.f32 %v5095_v10, %v5058_v51  ;;  %v12151_v10 = vld [vmem:[#allocation100_spill] sm:$0xff]  ;;  %v6902_v49 = vld [vmem:[#allocation3 + $0x156] sm:$0xff] }
 0x4a2   :  { %v4055_v43 = vadd.f32 %v4039_v24, %v4002_v37  ;;  %v4109_v54 = vadd.f32 %v4093_v9, %v4056_v1  ;;  %v5254_v0 = vmul.f32 %v12148_v42, %v12094_v5  ;;  %v4198_v63 = vmul.f32 %v12147_v40, %v12149_v48  ;;  %v12152_v9 = vld [vmem:[#allocation32_spill] sm:$0xff]  ;;  %v12157_v42 = vld [vmem:[#allocation98_spill] sm:$0xff] }
 0x4a3   :  { %v5587_v33 = vadd.f32 %v10806_v25, %v5534_v61  ;;  %v4252_v16 = vmul.f32 %v12150_v19, %v10746_v23  ;;  %v5753_v13 = vadd.f32 %v5737_v59, %v5700_v2  ;;  %v5164_v11 = vadd.f32 %v5148_v56, %v5111_v34  ;;  %v12153_v56 = vld [vmem:[#allocation37_spill] sm:$0xff] }
 0x4a4   :  { %v4108_v52 = vadd.f32 %v4092_v22, %v4055_v43  ;;  %v4162_v21 = vadd.f32 %v4146_v60, %v4109_v54  ;;  %v5307_v24 = vmul.f32 %v12151_v10, %v10485_v4  ;;  %v4251_v25 = vmul.f32 %v12150_v19, %v12152_v9  ;;  %v12155_v34 = vld [vmem:[#allocation93_spill] sm:$0xff]  ;;  %v12156_v43 = vld [vmem:[#allocation91_spill] sm:$0xff]  ;;  %v12162_v10 = vld [vmem:[#allocation84_spill] sm:$0xff] }
 0x4a5   :  { %v5640_v20 = vadd.f32 %v10810_v39, %v5587_v33  ;;  %v4305_v5 = vmul.f32 %v10603_v3, %v10752_v18  ;;  %v5791_v27 = vsel %vm3037_vm4, %v5753_v13, 0.0  ;;  %v5217_v62 = vadd.f32 %v5201_v58, %v5164_v11  ;;  %v12159_v13 = vld [vmem:[#allocation43_spill] sm:$0xff] }
 0x4a6   :  { %v4161_v51 = vadd.f32 %v4145_v7, %v4108_v52  ;;  %v4215_v37 = vadd.f32 %v4199_v55, %v4162_v21  ;;  %5792 = vadd.xlane.f32.xlu1 %v5791_v27  ;;  %v5360_v39 = vmul.f32 %v12153_v56, %v10496_v38  ;;  %v4304_v4 = vmul.f32 %v10603_v3, %v12131_v6  ;;  %v12154_v7 = vld [vmem:[#allocation35_spill] sm:$0xff]  ;;  %v12161_v52 = vld [vmem:[#allocation69_spill] sm:$0xff] }
 0x4a7   :  { %v5693_v59 = vadd.f32 %v10824_v12, %v5640_v20  ;;  %v5270_v22 = vadd.f32 %v5254_v0, %v5217_v62  ;;  %v4358_v61 = vmul.f32 %v10611_v44, %v10761_v17  ;;  %v3881_v58 = vmul.f32 %v6902_v49, %v12125_v31  ;;  %v12158_v0 = vld [vmem:[#allocation96_spill] sm:$0xff] }
 0x4a8   :  { %v4214_v60 = vadd.f32 %v4198_v63, %v4161_v51  ;;  %v4268_v1 = vadd.f32 %v4252_v16, %v4215_v37  ;;  %v5414_v12 = vmul.f32 %v10508_v26, %v12154_v7  ;;  %v4357_v38 = vmul.f32 %v10611_v44, %v12134_v47  ;;  %v12160_v47 = vld [vmem:[#allocation94_spill] sm:$0xff]  ;;  %v12169_v49 = vld [vmem:[#allocation72_spill] sm:$0xff] }
 0x4a9   :  { %v5746_v41 = vadd.f32 %v10828_v14, %v5693_v59  ;;  %v5323_v55 = vadd.f32 %v5307_v24, %v5270_v22  ;;  %v4411_v54 = vmul.f32 %v12156_v43, %v12155_v34  ;;  %v5467_v48 = vmul.f32 %v12158_v0, %v12157_v42  ;;  %v12163_v24 = vld [vmem:[#allocation88_spill] sm:$0xff]  ;;  %v12165_v51 = vld [vmem:[#allocation82_spill] sm:$0xff]  ;;  %v12166_v22 = vld [vmem:[#allocation99_spill] sm:$0xff] }
 0x4aa   :  { %v4267_v2 = vadd.f32 %v4251_v25, %v4214_v60  ;;  %v4321_v6 = vadd.f32 %v4305_v5, %v4268_v1  ;;  %v4410_v14 = vmul.f32 %v12156_v43, %v12135_v57  ;;  %v4464_v11 = vmul.f32 %v12160_v47, %v12159_v13  ;;  %v12164_v57 = vld [vmem:[#allocation61_spill] sm:$0xff]  ;;  %v12167_v60 = vld [vmem:[#allocation63_spill] sm:$0xff] }
 0x4ab   :  { %v5770_v33 = vsel %vm3037_vm4, %v5746_v41, 0.0  ;;  %v5376_v63 = vadd.f32 %v5360_v39, %v5323_v55  ;;  %v5520_v21 = vmul.f32 %v10536_v53, %v12161_v52  ;;  %v4463_v20 = vmul.f32 %v12160_v47, %v12139_v50  ;;  %v12170_v55 = vld [vmem:[#allocation36_spill] sm:$0xff] }
 0x4ac   :  { %5771 = vadd.xlane.f32.xlu0 %v5770_v33  ;;  %v4320_v26 = vadd.f32 %v4304_v4, %v4267_v2  ;;  %v4374_v16 = vadd.f32 %v4358_v61, %v4321_v6  ;;  %v4517_v9 = vmul.f32 %v12163_v24, %v12162_v10  ;;  %v3897_v62 = vadd.f32 %v3881_v58, %v12164_v57  ;;  %v12168_v61 = vld [vmem:[#allocation45_spill] sm:$0xff]  ;;  %v12171_v2 = vld [vmem:[#allocation70_spill] sm:$0xff]  ;;  %v12173_v33 = vld [vmem:[#allocation39_spill] sm:$0xff] }
 0x4ad   :  { %v5430_v25 = vadd.f32 %v5414_v12, %v5376_v63  ;;  %v5573_v37 = vmul.f32 %v10550_v28, %v12165_v51  ;;  %v4516_v59 = vmul.f32 %v12163_v24, %v12143_v30  ;;  %v3935_v53 = vmul.f32 %v12128_v36, %v10752_v18  ;;  %v12178_v51 = vld [vmem:[#allocation107_spill] sm:$0xff] }
 0x4ae   :  { %v4373_v5 = vadd.f32 %v4357_v38, %v4320_v26  ;;  %v4427_v27 = vadd.f32 %v4411_v54, %v4374_v16  ;;  %v3988_v50 = vmul.f32 %v12133_v15, %v10761_v17  ;;  %v4570_v1 = vmul.f32 %v12167_v60, %v12166_v22  ;;  %v12172_v54 = vld [vmem:[#allocation103_spill] sm:$0xff]  ;;  %v12174_v16 = vld [vmem:[#allocation106_spill] sm:$0xff] }
 0x4af   :  { %v5483_v56 = vadd.f32 %v5467_v48, %v5430_v25  ;;  %v5626_v58 = vmul.f32 %v12169_v49, %v12168_v61  ;;  %v4569_v28 = vmul.f32 %v12167_v60, %v10732_v45  ;;  %v3951_v41 = vadd.f32 %v3935_v53, %v3897_v62  ;;  %v12181_v61 = vld [vmem:[#allocation55_spill] sm:$0xff] }
 0x4b0   :  { %v4426_v39 = vadd.f32 %v4410_v14, %v4373_v5  ;;  %v4480_v4 = vadd.f32 %v4464_v11, %v4427_v27  ;;  %v4041_v30 = vmul.f32 %v12136_v32, %v12155_v34  ;;  %v4623_v6 = vmul.f32 %v12171_v2, %v12170_v55  ;;  %v12175_v11 = vld [vmem:[#allocation68_spill] sm:$0xff] }
 0x4b1   :  { %v5536_v7 = vadd.f32 %v5520_v21, %v5483_v56  ;;  %v5679_v42 = vmul.f32 %v12173_v33, %v12172_v54  ;;  %v4622_v0 = vmul.f32 %v12171_v2, %v10746_v23  ;;  %v4004_v48 = vadd.f32 %v3988_v50, %v3951_v41  ;;  %v12176_v21 = vld [vmem:[#allocation48_spill] sm:$0xff]  ;;  %v12183_v54 = vld [vmem:[#allocation53_spill] sm:$0xff] }
 0x4b2   :  { %v4479_v12 = vadd.f32 %v4463_v20, %v4426_v39  ;;  %v4533_v38 = vadd.f32 %v4517_v9, %v4480_v4  ;;  %v4094_v45 = vmul.f32 %v12140_v29, %v12159_v13  ;;  %v4677_v52 = vmul.f32 %v12175_v11, %v12174_v16  ;;  %v12177_v20 = vld [vmem:[#allocation104_spill] sm:$0xff] }
 0x4b3   :  { %v5589_v14 = vadd.f32 %v5573_v37, %v5536_v7  ;;  %v5732_v9 = vmul.f32 %v12177_v20, %v12176_v21  ;;  %v4676_v25 = vmul.f32 %v12175_v11, %v10752_v18  ;;  %v4057_v5 = vadd.f32 %v4041_v30, %v4004_v48  ;;  %v12179_v37 = vld [vmem:[#allocation81_spill] sm:$0xff]  ;;  %v6903_v41 = vld [vmem:[#allocation3 + $0x166] sm:$0xff] }
 0x4b4   :  { %v4532_v63 = vadd.f32 %v4516_v59, %v4479_v12  ;;  %v4586_v26 = vadd.f32 %v4570_v1, %v4533_v38  ;;  %v4147_v23 = vmul.f32 %v12144_v46, %v12162_v10  ;;  %v4730_v59 = vmul.f32 %v12179_v37, %v12178_v51  ;;  %v12180_v1 = vld [vmem:[#allocation75_spill] sm:$0xff]  ;;  %v12186_v21 = vld [vmem:[#allocation52_spill] sm:$0xff] }
 0x4b5   :  { %v5642_v27 = vadd.f32 %v5626_v58, %v5589_v14  ;;  %v4729_v53 = vmul.f32 %v12179_v37, %v10761_v17  ;;  %v4110_v50 = vadd.f32 %v4094_v45, %v4057_v5  ;;  %v4200_v56 = vmul.f32 %v12147_v40, %v12166_v22 }
 0x4b6   :  { %v4585_v57 = vadd.f32 %v4569_v28, %v4532_v63  ;;  %v4639_v62 = vadd.f32 %v4623_v6, %v4586_v26  ;;  %v4783_v49 = vmul.f32 %v12181_v61, %v12180_v1  ;;  %v3882_v58 = vmul.f32 %v6903_v41, %v12125_v31  ;;  %v12182_v6 = vld [vmem:[#allocation79_spill] sm:$0xff]  ;;  %v12185_v26 = vld [vmem:[#allocation38_spill] sm:$0xff] }
 0x4b7   :  { %v5695_v39 = vadd.f32 %v5679_v42, %v5642_v27  ;;  %v4782_v28 = vmul.f32 %v12181_v61, %v12155_v34  ;;  %v4163_v30 = vadd.f32 %v4147_v23, %v4110_v50  ;;  %v4253_v17 = vmul.f32 %v12150_v19, %v12170_v55  ;;  %v11023_v23 = vld [vmem:[#allocation3 + $0x180] sm:$0xff]  ;;  %v12190_v50 = vld [vmem:[#allocation57_spill] sm:$0xff] }
 0x4b8   :  { %v4638_v4 = vadd.f32 %v4622_v0, %v4585_v57  ;;  %v4693_v18 = vadd.f32 %v4677_v52, %v4639_v62  ;;  %v4836_v33 = vmul.f32 %v12183_v54, %v12182_v6  ;;  %v4835_v42 = vmul.f32 %v12183_v54, %v12159_v13  ;;  %v12184_v0 = vld [vmem:[#allocation85_spill] sm:$0xff]  ;;  %v12188_v57 = vld [vmem:[#allocation51_spill] sm:$0xff] }
 0x4b9   :  { %v5748_v7 = vadd.f32 %v5732_v9, %v5695_v39  ;;  %v4888_v48 = vmul.f32 %v12184_v0, %v12162_v10  ;;  %v4216_v31 = vadd.f32 %v4200_v56, %v4163_v30  ;;  %v4306_v34 = vmul.f32 %v10603_v3, %v12174_v16  ;;  %v12187_v9 = vld [vmem:[#allocation29_spill] sm:$0xff]  ;;  %v11040_v30 = vld [vmem:[#allocation19 + $0x23] ss:$0 sm:$0xff] }
 0x4ba   :  { %v4692_v12 = vadd.f32 %v4676_v25, %v4638_v4  ;;  %v4746_v38 = vadd.f32 %v4730_v59, %v4693_v18  ;;  %v4889_v52 = vmul.f32 %v12184_v0, %v12185_v26  ;;  %v4941_v20 = vmul.f32 %v12186_v21, %v12166_v22 }
 0x4bb   :  { %v5776_v45 = vsel %vm3037_vm4, %v5748_v7, 0.0  ;;  %v4942_v13 = vmul.f32 %v12186_v21, %v12187_v9  ;;  %v4269_v25 = vadd.f32 %v4253_v17, %v4216_v31  ;;  %v4359_v10 = vmul.f32 %v10611_v44, %v12178_v51 }
 0x4bc   :  { %v4745_v14 = vadd.f32 %v4729_v53, %v4692_v12  ;;  %v4799_v63 = vadd.f32 %v4783_v49, %v4746_v38  ;;  %5777 = vadd.xlane.f32.xlu0 %v5776_v45  ;;  %v3898_v62 = vadd.f32 %v3882_v58, %v12188_v57  ;;  %v3936_v59 = vmul.f32 %v12128_v36, %v12174_v16  ;;  %v12189_v53 = vld [vmem:[#allocation65_spill] sm:$0xff]  ;;  %v11034_v49 = vld [vmem:[#allocation3 + $0x181] sm:$0xff] }
 0x4bd   :  { %v4995_v56 = vmul.f32 %v12190_v50, %v12189_v53  ;;  %v4322_v22 = vadd.f32 %v4306_v34, %v4269_v25  ;;  %v4412_v39 = vmul.f32 %v12156_v43, %v12180_v1  ;;  %v3989_v4 = vmul.f32 %v12133_v15, %v12178_v51  ;;  %v11046_v38 = vld [vmem:[#allocation3 + $0x182] sm:$0xff]  ;;  %v11060_v25 = vld [vmem:[#allocation19 + $0x24] ss:$0 sm:$0xff] }
 0x4be   :  { %v4798_v5 = vadd.f32 %v4782_v28, %v4745_v14  ;;  %v4852_v27 = vadd.f32 %v4836_v33, %v4799_v63  ;;  %v3952_v28 = vadd.f32 %v3936_v59, %v3898_v62  ;;  %v4042_v58 = vmul.f32 %v12136_v32, %v12180_v1  ;;  %v11056_v63 = vld [vmem:[#allocation3 + $0x183] sm:$0xff] }
 0x4bf   :  { %v4994_v36 = vmul.f32 %v12190_v50, %v12170_v55  ;;  %v5049_v17 = vmul.f32 %v11040_v30, %v11023_v23  ;;  %v4375_v7 = vadd.f32 %v4359_v10, %v4322_v22  ;;  %v4465_v15 = vmul.f32 %v12160_v47, %v12182_v6 }
 0x4c0   :  { %v4851_v18 = vadd.f32 %v4835_v42, %v4798_v5  ;;  %v4905_v41 = vadd.f32 %v4889_v52, %v4852_v27  ;;  %v4005_v42 = vadd.f32 %v3989_v4, %v3952_v28  ;;  %v4095_v32 = vmul.f32 %v12140_v29, %v12182_v6  ;;  %v4339_v4 = vld [vmem:[#allocation3 + $0x181] sm:$0xff] }
 0x4c1   :  { %v5048_v55 = vmul.f32 %v11040_v30, %v12174_v16  ;;  %v5102_v31 = vmul.f32 %v10457_v35, %v11034_v49  ;;  %v4428_v34 = vadd.f32 %v4412_v39, %v4375_v7  ;;  %v4518_v45 = vmul.f32 %v12163_v24, %v12185_v26 }
 0x4c2   :  { %v4904_v12 = vadd.f32 %v4888_v48, %v4851_v18  ;;  %v4958_v33 = vadd.f32 %v4942_v13, %v4905_v41  ;;  %v4058_v52 = vadd.f32 %v4042_v58, %v4005_v42  ;;  %v4148_v13 = vmul.f32 %v12144_v46, %v12185_v26  ;;  %v11070_v46 = vld [vmem:[#allocation19 + $0x25] ss:$0 sm:$0xff]  ;;  %v11090_v42 = vld [vmem:[#allocation19 + $0x27] ss:$0 sm:$0xff] }
 0x4c3   :  { %v5101_v29 = vmul.f32 %v11060_v25, %v12178_v51  ;;  %v5155_v35 = vmul.f32 %v10474_v8, %v11046_v38  ;;  %v4481_v16 = vadd.f32 %v4465_v15, %v4428_v34  ;;  %v4571_v10 = vmul.f32 %v12167_v60, %v12187_v9  ;;  %v11074_v51 = vld [vmem:[#allocation3 + $0x184] sm:$0xff] }
 0x4c4   :  { %v4957_v14 = vadd.f32 %v4941_v20, %v4904_v12  ;;  %v5011_v48 = vadd.f32 %v4995_v56, %v4958_v33  ;;  %v4286_v20 = vld [vmem:[#allocation3 + $0x180] sm:$0xff]  ;;  %v4111_v57 = vadd.f32 %v4095_v32, %v4058_v52  ;;  %v4201_v62 = vmul.f32 %v12147_v40, %v12187_v9  ;;  %v11076_v56 = vld [vmem:[#allocation19 + $0x26] ss:$0 sm:$0xff] }
 0x4c5   :  { %v5154_v59 = vmul.f32 %v11070_v46, %v12180_v1  ;;  %v5208_v8 = vmul.f32 %v11076_v56, %v11056_v63  ;;  %v4534_v22 = vadd.f32 %v4518_v45, %v4481_v16  ;;  %v4624_v39 = vmul.f32 %v12171_v2, %v12189_v53  ;;  %v4392_v15 = vld [vmem:[#allocation3 + $0x182] sm:$0xff]  ;;  %v11100_v52 = vld [vmem:[#allocation19 + $0x28] ss:$0 sm:$0xff] }
 0x4c6   :  { %v5010_v5 = vadd.f32 %v4994_v36, %v4957_v14  ;;  %v5065_v27 = vadd.f32 %v5049_v17, %v5011_v48  ;;  %v4164_v40 = vadd.f32 %v4148_v13, %v4111_v57  ;;  %v4254_v28 = vmul.f32 %v12150_v19, %v12189_v53  ;;  %v11088_v17 = vld [vmem:[#allocation3 + $0x185] sm:$0xff] }
 0x4c7   :  { %v4307_v1 = vmul.f32 %v10603_v3, %v4286_v20  ;;  %v4678_v58 = vmul.f32 %v12175_v11, %v4286_v20  ;;  %v5207_v36 = vmul.f32 %v11076_v56, %v12182_v6  ;;  %v4587_v7 = vadd.f32 %v4571_v10, %v4534_v22  ;;  %v11098_v6 = vld [vmem:[#allocation3 + $0x186] sm:$0xff] }
 0x4c8   :  { %v5064_v18 = vadd.f32 %v5048_v55, %v5010_v5  ;;  %v5118_v41 = vadd.f32 %v5102_v31, %v5065_v27  ;;  %v5261_v32 = vmul.f32 %v11090_v42, %v11074_v51  ;;  %v4217_v55 = vadd.f32 %v4201_v62, %v4164_v40  ;;  %v4445_v45 = vld [vmem:[#allocation3 + $0x183] sm:$0xff]  ;;  %v11108_v27 = vld [vmem:[#allocation19 + $0x29] ss:$0 sm:$0xff]  ;;  %v5453_v62 = vld [vmem:[#allocation3 + $0x191] sm:$0xff] }
 0x4c9   :  { %v4360_v19 = vmul.f32 %v10611_v44, %v4339_v4  ;;  %v4731_v3 = vmul.f32 %v12179_v37, %v4339_v4  ;;  %v5260_v31 = vmul.f32 %v11090_v42, %v12185_v26  ;;  %v4640_v34 = vadd.f32 %v4624_v39, %v4587_v7  ;;  %v5400_v26 = vld [vmem:[#allocation3 + $0x190] sm:$0xff] }
 0x4ca   :  { %v5117_v12 = vadd.f32 %v5101_v29, %v5064_v18  ;;  %v5171_v33 = vadd.f32 %v5155_v35, %v5118_v41  ;;  %v5314_v13 = vmul.f32 %v11100_v52, %v11088_v17  ;;  %v4270_v29 = vadd.f32 %v4254_v28, %v4217_v55  ;;  %v11116_v18 = vld [vmem:[#allocation19 + $0x2a] ss:$0 sm:$0xff]  ;;  %v5506_v40 = vld [vmem:[#allocation3 + $0x192] sm:$0xff] }
 0x4cb   :  { %v4413_v35 = vmul.f32 %v12156_v43, %v4392_v15  ;;  %v4784_v44 = vmul.f32 %v12181_v61, %v4392_v15  ;;  %v5313_v16 = vmul.f32 %v11100_v52, %v12187_v9  ;;  %v4694_v10 = vadd.f32 %v4678_v58, %v4640_v34 }
 0x4cc   :  { %v5170_v14 = vadd.f32 %v5154_v59, %v5117_v12  ;;  %v5224_v48 = vadd.f32 %v5208_v8, %v5171_v33  ;;  %v5367_v57 = vmul.f32 %v11108_v27, %v11098_v6  ;;  %v4323_v59 = vadd.f32 %v4307_v1, %v4270_v29  ;;  %v11121_v1 = vld [vmem:[#allocation19 + $0x2b] ss:$0 sm:$0xff]  ;;  %v5559_v12 = vld [vmem:[#allocation3 + $0x193] sm:$0xff]  ;;  %v11139_v29 = vld [vmem:[#allocation19 + $0x2d] ss:$0 sm:$0xff] }
 0x4cd   :  { %v4466_v8 = vmul.f32 %v12160_v47, %v4445_v45  ;;  %v5366_v43 = vmul.f32 %v11108_v27, %v12189_v53  ;;  %v4747_v22 = vadd.f32 %v4731_v3, %v4694_v10  ;;  %v4837_v39 = vmul.f32 %v12183_v54, %v4445_v45 }
 0x4ce   :  { %v5223_v20 = vadd.f32 %v5207_v36, %v5170_v14  ;;  %v5277_v5 = vadd.f32 %v5261_v32, %v5224_v48  ;;  %v5421_v41 = vmul.f32 %v11116_v18, %v5400_v26  ;;  %v4376_v28 = vadd.f32 %v4360_v19, %v4323_v59  ;;  %v11130_v19 = vld [vmem:[#allocation19 + $0x2c] ss:$0 sm:$0xff]  ;;  %v5612_v14 = vld [vmem:[#allocation3 + $0x194] sm:$0xff]  ;;  %v11148_v59 = vld [vmem:[#allocation19 + $0x2e] ss:$0 sm:$0xff] }
 0x4cf   :  { %v5420_v58 = vmul.f32 %v11116_v18, %v11023_v23  ;;  %v5474_v47 = vmul.f32 %v11121_v1, %v5453_v62  ;;  %v4800_v36 = vadd.f32 %v4784_v44, %v4747_v22  ;;  %v4890_v53 = vmul.f32 %v12184_v0, %v11074_v51 }
 0x4d0   :  { %v5276_v9 = vadd.f32 %v5260_v31, %v5223_v20  ;;  %v5330_v4 = vadd.f32 %v5314_v13, %v5277_v5  ;;  %v4429_v33 = vadd.f32 %v4413_v35, %v4376_v28  ;;  %v4519_v32 = vmul.f32 %v12163_v24, %v11074_v51  ;;  %v5665_v20 = vld [vmem:[#allocation3 + $0x195] sm:$0xff] }
 0x4d1   :  { %v5473_v55 = vmul.f32 %v11121_v1, %v11034_v49  ;;  %v5527_v23 = vmul.f32 %v11130_v19, %v5506_v40  ;;  %v4853_v3 = vadd.f32 %v4837_v39, %v4800_v36  ;;  %v4943_v31 = vmul.f32 %v12186_v21, %v11088_v17 }
 0x4d2   :  { %v5329_v7 = vadd.f32 %v5313_v16, %v5276_v9  ;;  %v5383_v15 = vadd.f32 %v5367_v57, %v5330_v4  ;;  %v4482_v48 = vadd.f32 %v4466_v8, %v4429_v33  ;;  %v4572_v13 = vmul.f32 %v12167_v60, %v11088_v17  ;;  %v5718_v9 = vld [vmem:[#allocation3 + $0x196] sm:$0xff] }
 0x4d3   :  { %v5526_v24 = vmul.f32 %v11130_v19, %v11046_v38  ;;  %v5580_v49 = vmul.f32 %v11139_v29, %v5559_v12  ;;  %v4906_v35 = vadd.f32 %v4890_v53, %v4853_v3  ;;  %v4996_v44 = vmul.f32 %v12190_v50, %v11098_v6 }
 0x4d4   :  { %v5382_v34 = vadd.f32 %v5366_v43, %v5329_v7  ;;  %v5437_v45 = vadd.f32 %v5421_v41, %v5383_v15  ;;  %v4535_v5 = vadd.f32 %v4519_v32, %v4482_v48  ;;  %v4625_v57 = vmul.f32 %v12171_v2, %v11098_v6  ;;  %v11155_v2 = vld [vmem:[#allocation19 + $0x2f] ss:$0 sm:$0xff]  ;;  %v11162_v32 = vld [vmem:[#allocation19 + $0x30] ss:$0 sm:$0xff] }
 0x4d5   :  { %v5579_v60 = vmul.f32 %v11139_v29, %v11056_v63  ;;  %v5633_v38 = vmul.f32 %v11148_v59, %v5612_v14  ;;  %v4959_v8 = vadd.f32 %v4943_v31, %v4906_v35  ;;  %v5050_v43 = vmul.f32 %v11040_v30, %v5400_v26 }
 0x4d6   :  { %v5436_v16 = vadd.f32 %v5420_v58, %v5382_v34  ;;  %v5490_v10 = vadd.f32 %v5474_v47, %v5437_v45  ;;  %v4588_v4 = vadd.f32 %v4572_v13, %v4535_v5  ;;  %v4679_v41 = vmul.f32 %v12175_v11, %v5400_v26 }
 0x4d7   :  { %v5632_v28 = vmul.f32 %v11148_v59, %v11074_v51  ;;  %v5686_v63 = vmul.f32 %v11155_v2, %v5665_v20  ;;  %v5012_v58 = vadd.f32 %v4996_v44, %v4959_v8  ;;  %v5103_v47 = vmul.f32 %v11060_v25, %v5453_v62 }
 0x4d8   :  { %v5489_v22 = vadd.f32 %v5473_v55, %v5436_v16  ;;  %v5543_v39 = vadd.f32 %v5527_v23, %v5490_v10  ;;  %v4641_v7 = vadd.f32 %v4625_v57, %v4588_v4  ;;  %v4732_v15 = vmul.f32 %v12179_v37, %v5453_v62  ;;  %v5401_v57 = vld [vmem:[#allocation3 + $0x1a0] sm:$0xff] }
 0x4d9   :  { %v5685_v33 = vmul.f32 %v11155_v2, %v11088_v17  ;;  %v5739_v11 = vmul.f32 %v11162_v32, %v5718_v9  ;;  %v5066_v51 = vadd.f32 %v5050_v43, %v5012_v58  ;;  %v5156_v26 = vmul.f32 %v11070_v46, %v5506_v40  ;;  %v5454_v43 = vld [vmem:[#allocation3 + $0x1a1] sm:$0xff] }
 0x4da   :  { %v5542_v36 = vadd.f32 %v5526_v24, %v5489_v22  ;;  %v5596_v53 = vadd.f32 %v5580_v49, %v5543_v39  ;;  %v4695_v3 = vadd.f32 %v4679_v41, %v4641_v7  ;;  %v4785_v31 = vmul.f32 %v12181_v61, %v5506_v40  ;;  %v5507_v4 = vld [vmem:[#allocation3 + $0x1a2] sm:$0xff] }
 0x4db   :  { %v5738_v34 = vmul.f32 %v11162_v32, %v11098_v6  ;;  %v5119_v45 = vadd.f32 %v5103_v47, %v5066_v51  ;;  %v5209_v37 = vmul.f32 %v11076_v56, %v5559_v12  ;;  %v4838_v13 = vmul.f32 %v12183_v54, %v5559_v12  ;;  %v5613_v7 = vld [vmem:[#allocation3 + $0x1a4] sm:$0xff] }
 0x4dc   :  { %v5595_v55 = vadd.f32 %v5579_v60, %v5542_v36  ;;  %v5649_v23 = vadd.f32 %v5633_v38, %v5596_v53  ;;  %v4748_v48 = vadd.f32 %v4732_v15, %v4695_v3  ;;  %v5262_v49 = vmul.f32 %v11090_v42, %v5612_v14 }
 0x4dd   :  { %v5172_v24 = vadd.f32 %v5156_v26, %v5119_v45  ;;  %v4891_v10 = vmul.f32 %v12184_v0, %v5612_v14  ;;  %v5315_v40 = vmul.f32 %v11100_v52, %v5665_v20  ;;  %v4944_v38 = vmul.f32 %v12186_v21, %v5665_v20  ;;  %v5560_v20 = vld [vmem:[#allocation3 + $0x1a3] sm:$0xff] }
 0x4de   :  { %v5648_v62 = vadd.f32 %v5632_v28, %v5595_v55  ;;  %v5702_v17 = vadd.f32 %v5686_v63, %v5649_v23  ;;  %v4801_v16 = vadd.f32 %v4785_v31, %v4748_v48  ;;  %v5368_v12 = vmul.f32 %v11108_v27, %v5718_v9  ;;  %v5719_v23 = vld [vmem:[#allocation3 + $0x1a6] sm:$0xff] }
 0x4df   :  { %v5225_v61 = vadd.f32 %v5209_v37, %v5172_v24  ;;  %v4997_v0 = vmul.f32 %v12190_v50, %v5718_v9  ;;  %v5422_v39 = vmul.f32 %v11116_v18, %v5401_v57  ;;  %v5051_v28 = vmul.f32 %v11040_v30, %v5401_v57  ;;  %v5455_v24 = vld [vmem:[#allocation3 + $0x1b1] sm:$0xff] }
 0x4e0   :  { %v5701_v35 = vadd.f32 %v5685_v33, %v5648_v62  ;;  %v5755_v44 = vadd.f32 %v5739_v11, %v5702_v17  ;;  %v4854_v60 = vadd.f32 %v4838_v13, %v4801_v16  ;;  %v5475_v21 = vmul.f32 %v11121_v1, %v5454_v43  ;;  %v5666_v11 = vld [vmem:[#allocation3 + $0x1a5] sm:$0xff]  ;;  %v5402_v17 = vld [vmem:[#allocation3 + $0x1b0] sm:$0xff] }
 0x4e1   :  { %v5278_v54 = vadd.f32 %v5262_v49, %v5225_v61  ;;  %v5104_v47 = vmul.f32 %v11060_v25, %v5454_v43  ;;  %v5528_v53 = vmul.f32 %v11130_v19, %v5507_v4  ;;  %v5157_v9 = vmul.f32 %v11070_v46, %v5507_v4  ;;  %v5763_v61 = vpop.xlane.xlu1 %5762 }
 0x4e2   :  { %v5754_v6 = vadd.f32 %v5738_v34, %v5701_v35  ;;  %v5797_v5 = vsel %vm3037_vm4, %v5755_v44, 0.0  ;;  %v4907_v22 = vadd.f32 %v4891_v10, %v4854_v60  ;;  %v5581_v33 = vmul.f32 %v11139_v29, %v5560_v20 }
 0x4e3   :  { %5798 = vadd.xlane.f32.xlu1 %v5797_v5  ;;  %v5331_v14 = vadd.f32 %v5315_v40, %v5278_v54  ;;  %v5210_v30 = vmul.f32 %v11076_v56, %v5560_v20  ;;  %v5634_v55 = vmul.f32 %v11148_v59, %v5613_v7  ;;  %v5263_v25 = vmul.f32 %v11090_v42, %v5613_v7  ;;  %v5508_v42 = vld [vmem:[#allocation3 + $0x1b2] sm:$0xff]  ;;  %v5760_v40 = vpop.xlane.xlu0 %5759 }
 0x4e4   :  { %v5794_v8 = vsel %vm3037_vm4, %v5754_v6, 0.0  ;;  %v4960_v41 = vadd.f32 %v4944_v38, %v4907_v22  ;;  %v5687_v34 = vmul.f32 %v11155_v2, %v5666_v11  ;;  %v5316_v46 = vmul.f32 %v11100_v52, %v5666_v11  ;;  %v5561_v6 = vld [vmem:[#allocation3 + $0x1b3] sm:$0xff] }
 0x4e5   :  { %5795 = vadd.xlane.f32.xlu0 %v5794_v8  ;;  %v5384_v63 = vadd.f32 %v5368_v12, %v5331_v14  ;;  %v5740_v62 = vmul.f32 %v11162_v32, %v5719_v23  ;;  %v5369_v56 = vmul.f32 %v11108_v27, %v5719_v23  ;;  %v5423_v35 = vmul.f32 %v11116_v18, %v5402_v17  ;;  %v5614_v27 = vld [vmem:[#allocation3 + $0x1b4] sm:$0xff]  ;;  %v5787_v54 = vpop.xlane.xlu1 %5786 }
 0x4e6   :  { %v5013_v58 = vadd.f32 %v4997_v0, %v4960_v41  ;;  %v5476_v10 = vmul.f32 %v11121_v1, %v5455_v24  ;;  %v5529_v57 = vmul.f32 %v11130_v19, %v5508_v42  ;;  %v5582_v38 = vmul.f32 %v11139_v29, %v5561_v6  ;;  %v5667_v18 = vld [vmem:[#allocation3 + $0x1b5] sm:$0xff] }
 0x4e7   :  { %v5438_v36 = vadd.f32 %v5422_v39, %v5384_v63  ;;  %v5635_v8 = vmul.f32 %v11148_v59, %v5614_v27  ;;  %v5784_v43 = vpop.xlane.xlu0 %5783  ;;  %v5720_v1 = vld [vmem:[#allocation3 + $0x1b6] sm:$0xff]  ;;  %v5688_v0 = vmul.f32 %v11155_v2, %v5667_v18  ;;  %v5806_v29 = vsub.f32 0.0, %v5760_v40 }
 0x4e8   :  { %v5067_v50 = vadd.f32 %v5051_v28, %v5013_v58  ;;  %v5741_v4 = vmul.f32 %v11162_v32, %v5720_v1 }
 0x4e9   :  { %v5491_v15 = vadd.f32 %v5475_v21, %v5438_v36  ;;  %v5769_v14 = vpop.xlane.xlu1 %5768  ;;  %v5822_v36 = vmul.f32 1.442695, %v5806_v29 }
 0x4ea   :  { %v5120_v51 = vadd.f32 %v5104_v47, %v5067_v50  ;;  %v5809_v20 = vsub.f32 0.0, %v5769_v14  ;;  %v5807_v47 = vsub.f32 0.0, %v5763_v61 }
 0x4eb   :  { %v5544_v26 = vadd.f32 %v5528_v53, %v5491_v15  ;;  %v5766_v41 = vpop.xlane.xlu0 %5765 }
 0x4ec   :  { %v5173_v3 = vadd.f32 %v5157_v9, %v5120_v51  ;;  %v5808_v63 = vsub.f32 0.0, %v5766_v41  ;;  %v5828_v2 = vmul.f32 1.442695, %v5809_v20  ;;  %v5824_v9 = vmul.f32 1.442695, %v5807_v47 }
 0x4ed   :  { %v5597_v31 = vadd.f32 %v5581_v33, %v5544_v26  ;;  %v5814_v33 = vsub.f32 0.0, %v5784_v43  ;;  %v5815_v51 = vsub.f32 0.0, %v5787_v54 }
 0x4ee   :  { %v5226_v45 = vadd.f32 %v5210_v30, %v5173_v3  ;;  %v5826_v59 = vmul.f32 1.442695, %v5808_v63 }
 0x4ef   :  { %v5650_v37 = vadd.f32 %v5634_v55, %v5597_v31  ;;  %v5790_v53 = vpop.xlane.xlu0 %5789  ;;  %v5838_v55 = vmul.f32 1.442695, %v5814_v33  ;;  %v5840_v23 = vmul.f32 1.442695, %v5815_v51 }
 0x4f0   :  { %v5279_v48 = vadd.f32 %v5263_v25, %v5226_v45  ;;  %6700 = vpow2.f32 %v5826_v59  ;;  %v5816_v32 = vsub.f32 0.0, %v5790_v53 }
 0x4f1   :  { %v5703_v13 = vadd.f32 %v5687_v34, %v5650_v37  ;;  %6702 = vpow2.f32 %v5822_v36 }
 0x4f2   :  { %v5332_v49 = vadd.f32 %v5316_v46, %v5279_v48  ;;  %6704 = vpow2.f32 %v5828_v2  ;;  %v5842_v26 = vmul.f32 1.442695, %v5816_v32 }
 0x4f3   :  { %v5756_v44 = vadd.f32 %v5740_v62, %v5703_v13  ;;  %6706 = vpow2.f32 %v5824_v9 }
 0x4f4   :  { %v5385_v16 = vadd.f32 %v5369_v56, %v5332_v49 }
 0x4f5   :  { %v5800_v52 = vsel %vm3037_vm4, %v5756_v44, 0.0 }
 0x4f6   :  { %5801 = vadd.xlane.f32.xlu0 %v5800_v52  ;;  %v5439_v5 = vadd.f32 %v5423_v35, %v5385_v16 }
 0x4f8   :  { %v5492_v60 = vadd.f32 %v5476_v10, %v5439_v5  ;;  %v6419_v61 = vpop.f32.mrb[32].mxu1 }
 0x4f9   :  { %v5775_v28 = vpop.xlane.xlu1 %5774  ;;  %v2844_v6 = vpop.f32.mrb[33].mxu1 }
 0x4fa   :  { %v5545_v12 = vadd.f32 %v5529_v57, %v5492_v60  ;;  %v5811_v15 = vsub.f32 0.0, %v5775_v28  ;;  %v6701_v3 = vpop.eup %6700  ;;  %v6420_v27 = vpop.f32.mrb[34].mxu1 }
 0x4fb   :  { %v6703_v25 = vpop.eup %6702  ;;  %v5856_v45 = vadd.f32 1.0, %v6701_v3  ;;  %v2847_v54 = vpop.f32.mrb[35].mxu1 }
 0x4fc   :  { %v5598_v22 = vadd.f32 %v5582_v38, %v5545_v12  ;;  %v5832_v30 = vmul.f32 1.442695, %v5811_v15  ;;  %v6705_v31 = vpop.eup %6704  ;;  %v5854_v46 = vadd.f32 1.0, %v6703_v25 }
 0x4fd   :  { %v6707_v34 = vpop.eup %6706  ;;  %v5857_v37 = vadd.f32 1.0, %v6705_v31 }
 0x4fe   :  { %v5651_v39 = vadd.f32 %v5635_v8, %v5598_v22  ;;  %v5781_v7 = vpop.xlane.xlu1 %5780  ;;  %v5855_v17 = vadd.f32 1.0, %v6707_v34 }
 0x4ff   :  { %v5813_v50 = vsub.f32 0.0, %v5781_v7 }
 0x500   :  { %v5704_v19 = vadd.f32 %v5688_v0, %v5651_v39  ;;  %v6423_v12 = vpop.f32.mrb[36].mxu1 }
 0x501   :  { %v5836_v11 = vmul.f32 1.442695, %v5813_v50  ;;  %v2860_v8 = vpop.f32.mrb[37].mxu1 }
 0x502   :  { %v5757_v21 = vadd.f32 %v5741_v4, %v5704_v19  ;;  %v6424_v1 = vpop.f32.mrb[38].mxu1 }
 0x503   :  { %6708 = vpow2.f32 %v5836_v11  ;;  %v2863_v14 = vpop.f32.mrb[39].mxu1 }
 0x504   :  { %v5803_v58 = vsel %vm3037_vm4, %v5757_v21, 0.0  ;;  %6710 = vpow2.f32 %v5832_v30 }
 0x505   :  { %5804 = vadd.xlane.f32.xlu1 %v5803_v58  ;;  %6712 = vpow2.f32 %v5842_v26 }
 0x506   :  { %6714 = vpow2.f32 %v5838_v55 }
 0x507   :  { %6716 = vpow2.f32 %v5840_v23 }
 0x508   :  { %6718 = vrcp.f32 %v5856_v45 }
 0x509   :  { %6720 = vrcp.f32 %v5854_v46 }
 0x50a   :  { %6722 = vrcp.f32 %v5857_v37 }
 0x50b   :  { %6724 = vrcp.f32 %v5855_v17 }
 0x50d   :  { %v6709_v62 = vpop.eup %6708 }
 0x50e   :  { %v6711_v48 = vpop.eup %6710  ;;  %v5861_v24 = vadd.f32 1.0, %v6709_v62 }
 0x50f   :  { %v6713_v56 = vpop.eup %6712  ;;  %v5859_v49 = vadd.f32 1.0, %v6711_v48 }
 0x510   :  { %v6715_v13 = vpop.eup %6714  ;;  %v5864_v44 = vadd.f32 1.0, %v6713_v56  ;;  %6726 = vrcp.f32 %v5861_v24 }
 0x511   :  { %v6717_v35 = vpop.eup %6716  ;;  %v5862_v42 = vadd.f32 1.0, %v6715_v13  ;;  %6728 = vrcp.f32 %v5859_v49 }
 0x512   :  { %v5863_v16 = vadd.f32 1.0, %v6717_v35  ;;  %6730 = vrcp.f32 %v5864_v44  ;;  %v6719_v10 = vpop.eup %6718 }
 0x513   :  { %6732 = vrcp.f32 %v5862_v42  ;;  %v6721_v40 = vpop.eup %6720  ;;  %v5888_v52 = vmul.f32 %v6719_v10, %v6419_v61 }
 0x514   :  { %6734 = vrcp.f32 %v5863_v16  ;;  %v6723_v5 = vpop.eup %6722  ;;  %v5886_v57 = vmul.f32 %v6721_v40, %v2844_v6 }
 0x515   :  { %v6725_v60 = vpop.eup %6724  ;;  %5904 = vst [vmem:[#allocation21 + $0x10] sm:$0xff] %v5888_v52  ;;  %v5889_v38 = vmul.f32 %v6723_v5, %v6420_v27 }
 0x516   :  { %5902 = vst [vmem:[#allocation21] sm:$0xff] %v5886_v57  ;;  %v5887_v18 = vmul.f32 %v6725_v60, %v2847_v54 }
 0x517   :  { %5905 = vst [vmem:[#allocation21 + $0x18] sm:$0xff] %v5889_v38 }
 0x518   :  { %5903 = vst [vmem:[#allocation21 + $0x8] sm:$0xff] %v5887_v18 }
 0x51a   :  { %v6727_v43 = vpop.eup %6726  ;;  %v6427_v41 = vpop.f32.mrb[40].mxu1 }
 0x51b   :  { %v6729_v22 = vpop.eup %6728  ;;  %v5893_v0 = vmul.f32 %v6727_v43, %v6424_v1  ;;  %v2876_v63 = vpop.f32.mrb[41].mxu1 }
 0x51c   :  { %v6731_v39 = vpop.eup %6730  ;;  %v5891_v4 = vmul.f32 %v6729_v22, %v2863_v14  ;;  %v6428_v29 = vpop.f32.mrb[42].mxu1 }
 0x51d   :  { %v6733_v19 = vpop.eup %6732  ;;  %5909 = vst [vmem:[#allocation21 + $0x38] sm:$0xff] %v5893_v0  ;;  %v5896_v28 = vmul.f32 %v6731_v39, %v6427_v41  ;;  %v2879_v58 = vpop.f32.mrb[43].mxu1 }
 0x51e   :  { %5907 = vst [vmem:[#allocation21 + $0x28] sm:$0xff] %v5891_v4  ;;  %v5894_v21 = vmul.f32 %v6733_v19, %v2876_v63  ;;  %v6735_v20 = vpop.eup %6734 }
 0x51f   :  { %5912 = vst [vmem:[#allocation21 + $0x50] sm:$0xff] %v5896_v28  ;;  %v5895_v47 = vmul.f32 %v6735_v20, %v2879_v58 }
 0x520   :  { %5910 = vst [vmem:[#allocation21 + $0x40] sm:$0xff] %v5894_v21 }
 0x521   :  { %5911 = vst [vmem:[#allocation21 + $0x48] sm:$0xff] %v5895_v47 }
 0x52c   :  { %v11202_v59 = vpop.f32.mrb[44].mxu1 }
 0x52d   :  { %v2892_v36 = vpop.f32.mrb[45].mxu1 }
 0x52e   :  { %v11204_v7 = vpop.f32.mrb[46].mxu1 }
 0x52f   :  { %v2895_v50 = vpop.f32.mrb[47].mxu1 }
 0x533   :  { %v5793_v53 = vpop.xlane.xlu1 %5792 }
 0x534   :  { %v5817_v2 = vsub.f32 0.0, %v5793_v53 }
 0x536   :  { %v5844_v9 = vmul.f32 1.442695, %v5817_v2 }
 0x538   :  { %6736 = vpow2.f32 %v5844_v9 }
 0x539   :  { %v5772_v15 = vpop.xlane.xlu0 %5771 }
 0x53a   :  { %v5810_v32 = vsub.f32 0.0, %v5772_v15 }
 0x53c   :  { %v5830_v33 = vmul.f32 1.442695, %v5810_v32 }
 0x53e   :  { %6738 = vpow2.f32 %v5830_v33 }
 0x542   :  { %v6737_v11 = vpop.eup %6736 }
 0x543   :  { %v5865_v51 = vadd.f32 1.0, %v6737_v11 }
 0x545   :  { %6740 = vrcp.f32 %v5865_v51 }
 0x548   :  { %v6739_v30 = vpop.eup %6738 }
 0x549   :  { %v5858_v26 = vadd.f32 1.0, %v6739_v30  ;;  %v5778_v55 = vpop.xlane.xlu0 %5777 }
 0x54a   :  { %v5812_v23 = vsub.f32 0.0, %v5778_v55 }
 0x54b   :  { %6742 = vrcp.f32 %v5858_v26 }
 0x54c   :  { %v5834_v3 = vmul.f32 1.442695, %v5812_v23 }
 0x54e   :  { %6744 = vpow2.f32 %v5834_v3 }
 0x54f   :  { %v6741_v25 = vpop.eup %6740 }
 0x550   :  { %v5897_v31 = vmul.f32 %v6741_v25, %v6428_v29 }
 0x552   :  { %5913 = vst [vmem:[#allocation21 + $0x58] sm:$0xff] %v5897_v31 }
 0x555   :  { %v6743_v34 = vpop.eup %6742 }
 0x556   :  { %v5890_v45 = vmul.f32 %v6743_v34, %v2860_v8 }
 0x558   :  { %5906 = vst [vmem:[#allocation21 + $0x20] sm:$0xff] %v5890_v45  ;;  %v6745_v46 = vpop.eup %6744 }
 0x559   :  { %v5860_v37 = vadd.f32 1.0, %v6745_v46 }
 0x55b   :  { %6746 = vrcp.f32 %v5860_v37 }
 0x565   :  { %v6747_v62 = vpop.eup %6746 }
 0x566   :  { %v5892_v17 = vmul.f32 %v6747_v62, %v6423_v12 }
 0x568   :  { %5908 = vst [vmem:[#allocation21 + $0x30] sm:$0xff] %v5892_v17 }
 0x570   :  { %v5799_v48 = vpop.xlane.xlu1 %5798 }
 0x571   :  { %v5819_v56 = vsub.f32 0.0, %v5799_v48 }
 0x572   :  { %v5796_v13 = vpop.xlane.xlu0 %5795 }
 0x573   :  { %v5818_v24 = vsub.f32 0.0, %v5796_v13  ;;  %v5848_v49 = vmul.f32 1.442695, %v5819_v56 }
 0x575   :  { %v5846_v35 = vmul.f32 1.442695, %v5818_v24  ;;  %6748 = vpow2.f32 %v5848_v49 }
 0x577   :  { %6750 = vpow2.f32 %v5846_v35 }
 0x57f   :  { %v6749_v44 = vpop.eup %6748 }
 0x580   :  { %v5867_v42 = vadd.f32 1.0, %v6749_v44 }
 0x581   :  { %v6751_v16 = vpop.eup %6750 }
 0x582   :  { %v5866_v10 = vadd.f32 1.0, %v6751_v16  ;;  %6752 = vrcp.f32 %v5867_v42 }
 0x583   :  { %v5802_v61 = vpop.xlane.xlu0 %5801 }
 0x584   :  { %6754 = vrcp.f32 %v5866_v10  ;;  %v5820_v40 = vsub.f32 0.0, %v5802_v61 }
 0x586   :  { %v5850_v52 = vmul.f32 1.442695, %v5820_v40 }
 0x588   :  { %6756 = vpow2.f32 %v5850_v52 }
 0x58c   :  { %v6753_v6 = vpop.eup %6752 }
 0x58d   :  { %v5899_v5 = vmul.f32 %v6753_v6, %v2895_v50 }
 0x58e   :  { %v6755_v57 = vpop.eup %6754 }
 0x58f   :  { %v5898_v27 = vmul.f32 %v6755_v57, %v2892_v36  ;;  %5915 = vst [vmem:[#allocation21 + $0x68] sm:$0xff] %v5899_v5 }
 0x591   :  { %5914 = vst [vmem:[#allocation21 + $0x60] sm:$0xff] %v5898_v27 }
 0x592   :  { %v6757_v60 = vpop.eup %6756  ;;  %v5805_v38 = vpop.xlane.xlu1 %5804 }
 0x593   :  { %v5868_v54 = vadd.f32 1.0, %v6757_v60  ;;  %v5821_v18 = vsub.f32 0.0, %v5805_v38 }
 0x595   :  { %6758 = vrcp.f32 %v5868_v54  ;;  %v5852_v12 = vmul.f32 1.442695, %v5821_v18 }
 0x597   :  { %6760 = vpow2.f32 %v5852_v12 }
 0x59f   :  { %v6759_v8 = vpop.eup %6758 }
 0x5a0   :  { %v5900_v43 = vmul.f32 %v6759_v8, %v11202_v59 }
 0x5a1   :  { %v6761_v1 = vpop.eup %6760 }
 0x5a2   :  { %v5869_v22 = vadd.f32 1.0, %v6761_v1  ;;  %5916 = vst [vmem:[#allocation21 + $0x70] sm:$0xff] %v5900_v43 }
 0x5a4   :  { %6762 = vrcp.f32 %v5869_v22 }
 0x5ae   :  { %v6763_v0 = vpop.eup %6762 }
 0x5af   :  { %v5901_v14 = vmul.f32 %v6763_v0, %v11204_v7 }
 0x5b1   :  { %5917 = vst [vmem:[#allocation21 + $0x78] sm:$0xff] %v5901_v14 }
 0x5b2   :  { %7149 = shalt.err (!%p7146_p0)
}
 0x5b3   :  { %s7150_s13 = scalar_lea.hbm %s11233_s10, 2048 }
 0x5b4   :  { %p7151_p1 = scmp.ne.s32.totalorder %s11233_s10, %s7150_s13  ;;  %p7154_p2 = scmp.lt.u32.totalorder %s7150_s13, %s11233_s10 }
 0x5b6   :  { %p7156_p3 = pnand %p7154_p2, %p7151_p1 }
 0x5b8   :  { %7159 = shalt.err (!%p7156_p3)
}
 0x5b9   :  { %5929 = dma.vmem_to_hbm [thread:$0]  %s5924_s27, 2048, %s11233_s10, [#allocation6], %s7176_s25, %s7176_s25, %s7177_s26  }
 0x5ba   :  { %7172 = dma.done.wait [#allocation6], 2048  }
 0x5bb   :  { %7173 = vsyncadd [#allocation6], 4294965248 }
 0x5bc   :  { %5933 = vsyncpa [#allocation5], 1 }
 0x5bd   :  { %5934 = vsyncpa [#allocation8], 1 }
 0x5be   :  { %5935 = vsyncpa [#allocation11], 1 }
 0x5bf   :  { %5936 = vsyncpa [#allocation14], 1 }
 0x5c0   :  { %5937 = vsyncpa [#allocation17], 1 }
 0x5c1   :  { %5938 = vsyncpa [#allocation20], 1 }
 0x5c2   :  { %5939 = vsyncpa [#allocation6], 1 }

</bundles_post_ra>
